<compile_context>
chip_gen: v5e
topology: v5e:2x2
jax: 0.10.0
libtpu: 0.0.40
codegen_flags: <defaults>
</compile_context>

<pallas_src>
import functools

import jax
import jax.numpy as jnp
from jax.experimental import pallas as pl
from jax.experimental.pallas import tpu as pltpu

# ----------------------------- configuration (small, deterministic) ----------
IMG_SIZE = 16
PATCH_SIZE = 4
IN_CHANS = 3
EMBED_DIM = 32
WINDOW_SIZE = 2
MLP_RATIO = 4
NUM_HEADS = (2, 4)          # heads per resolution stage
NUM_CLASSES = 4

HP = IMG_SIZE // PATCH_SIZE          # 4
WP = IMG_SIZE // PATCH_SIZE          # 4
L1 = HP * WP                         # 16 tokens / image at stage 1
H2, W2 = HP // 2, WP // 2            # 2, 2
L2 = H2 * W2                         # 4 tokens / image at stage 2


# ----------------------------- in-kernel helpers ------------------------------
def _mm(a, b):
    # MXU matmul: bf16 inputs (weights are pre-cast; astype on bf16 is a no-op),
    # f32 accumulation.
    return jnp.dot(a.astype(jnp.bfloat16), b.astype(jnp.bfloat16),
                   preferred_element_type=jnp.float32)


def _mm_t(a, b):
    # a @ b.T (contract last dims): attention scores.
    return jnp.einsum("qd,kd->qk",
                      a.astype(jnp.bfloat16), b.astype(jnp.bfloat16),
                      preferred_element_type=jnp.float32)


def _ln(x, g, b):
    mu = jnp.mean(x, axis=-1, keepdims=True)
    var = jnp.mean(jnp.square(x - mu), axis=-1, keepdims=True)
    return (x - mu) * jax.lax.rsqrt(var + 1e-5) * g + b


def _softmax(s):
    s = s - jnp.max(s, axis=-1, keepdims=True)
    p = jnp.exp(s)
    return p * pl.reciprocal(jnp.sum(p, axis=-1, keepdims=True), approx=True)


def _swin_block(x, p, heads):
    """One Swin transformer block on (L, C) tokens of a single image.

    p is a dict of Refs; p['attn_bias'] is (heads, L, L) with the relative
    position bias on same-window pairs and -1e9 on cross-window pairs.
    """
    L, C = x.shape
    dh = C // heads
    scale = 1.0 / float(dh) ** 0.5

    # --- windowed multi-head self-attention (mask-based, no partitioning)
    y = _ln(x, p["ln1_g"][...], p["ln1_b"][...])
    qkv = _mm(y, p["qkv_w"][...]) + p["qkv_b"][...]            # (L, 3C)
    pw = p["proj_w"][...]                                      # (C, C) bf16

    attn_out = None
    for h in range(heads):
        q = qkv[:, h * dh:(h + 1) * dh]
        k = qkv[:, C + h * dh:C + (h + 1) * dh]
        v = qkv[:, 2 * C + h * dh:2 * C + (h + 1) * dh]
        s = _mm_t(q, k) * scale + p["attn_bias"][h]            # (L, L)
        oh = _mm(_softmax(s), v)                               # (L, dh)
        # proj(concat_h(oh)) == sum_h oh @ proj_w[h*dh:(h+1)*dh, :]
        contrib = _mm(oh, pw[h * dh:(h + 1) * dh, :])
        attn_out = contrib if attn_out is None else attn_out + contrib
    x = x + attn_out + p["proj_b"][...]

    # --- MLP
    z = _ln(x, p["ln2_g"][...], p["ln2_b"][...])
    # TODO(synk): PyTorch nn.GELU default is exact erf; tanh approximation used
    # (erf has no guaranteed Mosaic lowering) -> tiny numerical deviation.
    z = jax.nn.gelu(_mm(z, p["fc1_w"][...]) + p["fc1_b"][...], approximate=True)
    z = _mm(z, p["fc2_w"][...]) + p["fc2_b"][...]
    return x + z


def _make_fused_kernel(treedef, n_leaves):
    C = EMBED_DIM

    def kernel(x_ref, *rest):
        p = jax.tree_util.tree_unflatten(treedef, rest[:n_leaves])
        o_ref = rest[n_leaves]

        # ---- patch embedding (conv k=4 s=4 as matmul) + LayerNorm
        tok = _mm(x_ref[...], p["pe_w"][...]) + p["pe_b"][...]          # (16, 32)
        tok = _ln(tok, p["pe_ln_g"][...], p["pe_ln_b"][...])

        # ---- encoder stage 1
        x1 = _swin_block(tok, p["enc1"], NUM_HEADS[0])                  # (16, 32)

        # ---- patch merging (token-selection matmuls + LN + linear, no bias)
        msel = p["merge_sel"]                                           # (4, 4, 16)
        xm = jnp.concatenate([_mm(msel[g], x1) for g in range(4)],
                             axis=-1)                                   # (4, 128)
        xm = _ln(xm, p["merge_ln_g"][...], p["merge_ln_b"][...])
        x2 = _mm(xm, p["merge_w"][...])                                 # (4, 64)

        # ---- bottleneck stage + encoder norm
        x2 = _swin_block(x2, p["enc2"], NUM_HEADS[1])
        x2 = _ln(x2, p["norm_g"][...], p["norm_b"][...])

        # ---- PatchExpand (2x upsample, channel halving) via scatter matmuls
        y = _mm(x2, p["exp_w"][...])                                    # (4, 128)
        esel = p["exp_sel"]                                             # (4, 16, 4)
        xup = _mm(esel[0], y[:, 0:C])
        for g in range(1, 4):
            xup = xup + _mm(esel[g], y[:, g * C:(g + 1) * C])           # (16, 32)
        xup = _ln(xup, p["exp_ln_g"][...], p["exp_ln_b"][...])

        # ---- skip connection: concat([up, skip]) @ cat_w done as two matmuls
        cw = p["cat_w"][...]                                            # (64, 32)
        yd = _mm(xup, cw[0:C, :]) + _mm(x1, cw[C:2 * C, :]) + p["cat_b"][...]
        yd = _swin_block(yd, p["dec1"], NUM_HEADS[0])                   # (16, 32)
        yd = _ln(yd, p["norm_up_g"][...], p["norm_up_b"][...])

        # ---- FinalPatchExpand_X4 (4x upsample) + LN + 1x1 conv (bias=False)
        yf = _mm(yd, p["final_exp_w"][...])                             # (16, 512)
        fsel = p["final_sel"]                                           # (16, 256, 16)
        yo = _mm(fsel[0], yf[:, 0:C])
        for g in range(1, 16):
            yo = yo + _mm(fsel[g], yf[:, g * C:(g + 1) * C])            # (256, 32)
        yo = _ln(yo, p["final_ln_g"][...], p["final_ln_b"][...])

        o_ref[...] = _mm(yo, p["out_w"][...])                           # (256, 4)

    return kernel


# ----------------------------- parameter construction ------------------------
def _w(key, shape):
    return 0.02 * jax.random.normal(key, shape, jnp.float32)


def _relative_position_index(ws):
    coords = jnp.stack(
        jnp.meshgrid(jnp.arange(ws), jnp.arange(ws), indexing="ij"))
    flat = coords.reshape(2, -1)
    rel = flat[:, :, None] - flat[:, None, :]
    rel = rel.transpose(1, 2, 0) + jnp.array([ws - 1, ws - 1])
    return rel[..., 0] * (2 * ws - 1) + rel[..., 1]          # (T, T) int32


def _full_attn_bias(key, Hs, Ws, ws, heads):
    """(heads, L, L) additive bias: rel-pos bias within windows, -1e9 across."""
    table = _w(key, ((2 * ws - 1) ** 2, heads))
    T = ws * ws
    idx = _relative_position_index(ws)
    rpb = table[idx.reshape(-1)].reshape(T, T, heads).transpose(2, 0, 1)
    ii, jj = jnp.meshgrid(jnp.arange(Hs), jnp.arange(Ws), indexing="ij")
    win_id = ((ii // ws) * (Ws // ws) + (jj // ws)).reshape(-1)   # (L,)
    in_idx = ((ii % ws) * ws + (jj % ws)).reshape(-1)             # (L,)
    same = win_id[:, None] == win_id[None, :]
    gathered = rpb[:, in_idx[:, None], in_idx[None, :]]           # (heads, L, L)
    return jnp.where(same[None], gathered, -1e9).astype(jnp.float32)


def _merge_selectors(Hs, Ws):
    """PatchMerging gather as 0/1 matmuls; group order (0,0),(1,0),(0,1),(1,1)."""
    Ho, Wo = Hs // 2, Ws // 2
    oi, oj = jnp.meshgrid(jnp.arange(Ho), jnp.arange(Wo), indexing="ij")
    dst = (oi * Wo + oj).reshape(-1)
    sels = []
    for di, dj in ((0, 0), (1, 0), (0, 1), (1, 1)):
        src = ((2 * oi + di) * Ws + (2 * oj + dj)).reshape(-1)
        sels.append(jnp.zeros((Ho * Wo, Hs * Ws), jnp.float32)
                    .at[dst, src].set(1.0))
    return jnp.stack(sels)                    # (4, Ho*Wo, Hs*Ws)


def _expand_selectors(Hs, Ws, r):
    """PatchExpand pixel shuffle: group g=p1*r+p2 -> pixel (r*i+p1, r*j+p2)."""
    ii, jj = jnp.meshgrid(jnp.arange(Hs), jnp.arange(Ws), indexing="ij")
    src = (ii * Ws + jj).reshape(-1)
    sels = []
    for p1 in range(r):
        for p2 in range(r):
            dst = ((ii * r + p1) * (Ws * r) + (jj * r + p2)).reshape(-1)
            sels.append(jnp.zeros((Hs * Ws * r * r, Hs * Ws), jnp.float32)
                        .at[dst, src].set(1.0))
    return jnp.stack(sels)                    # (r*r, Hs*Ws*r*r, Hs*Ws)


def _make_block_params(key, C, heads, Hs, Ws, ws):
    ks = jax.random.split(key, 6)
    hidden = MLP_RATIO * C
    return dict(
        ln1_g=jnp.ones((1, C), jnp.float32), ln1_b=jnp.zeros((1, C), jnp.float32),
        qkv_w=_w(ks[0], (C, 3 * C)), qkv_b=jnp.zeros((1, 3 * C), jnp.float32),
        proj_w=_w(ks[1], (C, C)), proj_b=jnp.zeros((1, C), jnp.float32),
        attn_bias=_full_attn_bias(ks[2], Hs, Ws, ws, heads),
        ln2_g=jnp.ones((1, C), jnp.float32), ln2_b=jnp.zeros((1, C), jnp.float32),
        fc1_w=_w(ks[3], (C, hidden)), fc1_b=jnp.zeros((1, hidden), jnp.float32),
        fc2_w=_w(ks[4], (hidden, C)), fc2_b=jnp.zeros((1, C), jnp.float32),
    )


def init_params(key):
    C = EMBED_DIM
    ks = jax.random.split(key, 10)
    return dict(
        pe_w=_w(ks[0], (PATCH_SIZE * PATCH_SIZE * IN_CHANS, C)),
        pe_b=jnp.zeros((1, C), jnp.float32),
        pe_ln_g=jnp.ones((1, C), jnp.float32),
        pe_ln_b=jnp.zeros((1, C), jnp.float32),
        # encoder
        enc1=_make_block_params(ks[1], C, NUM_HEADS[0], HP, WP, WINDOW_SIZE),
        merge_sel=_merge_selectors(HP, WP),
        merge_ln_g=jnp.ones((1, 4 * C), jnp.float32),
        merge_ln_b=jnp.zeros((1, 4 * C), jnp.float32),
        merge_w=_w(ks[2], (4 * C, 2 * C)),
        enc2=_make_block_params(ks[3], 2 * C, NUM_HEADS[1], H2, W2, WINDOW_SIZE),
        norm_g=jnp.ones((1, 2 * C), jnp.float32),
        norm_b=jnp.zeros((1, 2 * C), jnp.float32),
        # decoder
        exp_w=_w(ks[4], (2 * C, 4 * C)),
        exp_sel=_expand_selectors(H2, W2, 2),
        exp_ln_g=jnp.ones((1, C), jnp.float32),
        exp_ln_b=jnp.zeros((1, C), jnp.float32),
        cat_w=_w(ks[5], (2 * C, C)), cat_b=jnp.zeros((1, C), jnp.float32),
        dec1=_make_block_params(ks[6], C, NUM_HEADS[0], HP, WP, WINDOW_SIZE),
        norm_up_g=jnp.ones((1, C), jnp.float32),
        norm_up_b=jnp.zeros((1, C), jnp.float32),
        # FinalPatchExpand_X4 + 1x1 output conv (bias=False)
        final_exp_w=_w(ks[7], (C, 16 * C)),
        final_sel=_expand_selectors(HP, WP, 4),
        final_ln_g=jnp.ones((1, C), jnp.float32),
        final_ln_b=jnp.zeros((1, C), jnp.float32),
        out_w=_w(ks[8], (C, NUM_CLASSES)),
    )


# ----------------------------- host-side wrapper ------------------------------
# Matmul weights & 0/1 selectors pre-cast to bf16 (kernel accumulates in f32).
_BF16_KEYS = frozenset({
    "pe_w", "qkv_w", "proj_w", "fc1_w", "fc2_w", "merge_w", "exp_w", "cat_w",
    "final_exp_w", "out_w", "merge_sel", "exp_sel", "final_sel",
})


def _cast_matmul_weights(p):
    out = {}
    for k, v in p.items():
        if isinstance(v, dict):
            out[k] = _cast_matmul_weights(v)
        elif k in _BF16_KEYS:
            out[k] = v.astype(jnp.bfloat16)
        else:
            out[k] = v
    return out


def _full_spec(a):
    nd = a.ndim
    return pl.BlockSpec(a.shape, lambda b, nd=nd: (0,) * nd)


def swin_unet_forward(params, x_nhwc):
    B, H, W, _ = x_nhwc.shape
    ps = PATCH_SIZE
    Hp, Wp = H // ps, W // ps

    # im2col for the k=4, s=4 patch-embed conv (one tiny host-side op).
    patches = (
        x_nhwc.reshape(B, Hp, ps, Wp, ps, IN_CHANS)
        .transpose(0, 1, 3, 2, 4, 5)
        .reshape(B * Hp * Wp, ps * ps * IN_CHANS)
    )

    params = _cast_matmul_weights(params)
    leaves, treedef = jax.tree_util.tree_flatten(params)
    kernel = _make_fused_kernel(treedef, len(leaves))

    out = pl.pallas_call(
        kernel,
        out_shape=jax.ShapeDtypeStruct((B * H * W, NUM_CLASSES), jnp.float32),
        grid=(B,),  # one image per grid step; parallel -> v7x megacore
        in_specs=[pl.BlockSpec((Hp * Wp, ps * ps * IN_CHANS), lambda b: (b, 0))]
        + [_full_spec(leaf) for leaf in leaves],
        out_specs=pl.BlockSpec((H * W, NUM_CLASSES), lambda b: (b, 0)),
        compiler_params=pltpu.CompilerParams(
            dimension_semantics=("parallel",)),
    )(patches, *leaves)

    return out.reshape(B, H, W, NUM_CLASSES).transpose(0, 3, 1, 2)  # NCHW


def lcab_two_forward(params, x_nchw):
    # forward of lcab_two: repeat grayscale to 3 channels, then Swin-Unet.
    if x_nchw.shape[1] == 1:
        x_nchw = jnp.tile(x_nchw, (1, 3, 1, 1))
    return swin_unet_forward(params, jnp.transpose(x_nchw, (0, 2, 3, 1)))


# ----------------------------- main -------------------------------------------
if __name__ == "__main__":
    key = jax.random.PRNGKey(0)
    kx, kp = jax.random.split(key)
    x = jax.random.normal(kx, (2, 1, IMG_SIZE, IMG_SIZE), jnp.float32)
    params = init_params(kp)

    fwd = jax.jit(functools.partial(lcab_two_forward, params))
    logits = fwd(x)
    jax.block_until_ready(logits)
    assert logits.shape == (2, NUM_CLASSES, IMG_SIZE, IMG_SIZE), logits.shape
    assert bool(jnp.all(jnp.isfinite(logits)))
    print("KERNEL_OK")
</pallas_src>

<mosaic_0001>
module attributes {stable_mosaic.version = 11 : i64} {
  func.func @kernel(%arg0: i32, %arg1: memref<16x48xf32, #tpu.memory_space<vmem>>, %arg2: memref<1x32xf32, #tpu.memory_space<vmem>>, %arg3: memref<64x32xbf16, #tpu.memory_space<vmem>>, %arg4: memref<2x16x16xf32, #tpu.memory_space<vmem>>, %arg5: memref<1x128xf32, #tpu.memory_space<vmem>>, %arg6: memref<32x128xbf16, #tpu.memory_space<vmem>>, %arg7: memref<1x32xf32, #tpu.memory_space<vmem>>, %arg8: memref<128x32xbf16, #tpu.memory_space<vmem>>, %arg9: memref<1x32xf32, #tpu.memory_space<vmem>>, %arg10: memref<1x32xf32, #tpu.memory_space<vmem>>, %arg11: memref<1x32xf32, #tpu.memory_space<vmem>>, %arg12: memref<1x32xf32, #tpu.memory_space<vmem>>, %arg13: memref<1x32xf32, #tpu.memory_space<vmem>>, %arg14: memref<32x32xbf16, #tpu.memory_space<vmem>>, %arg15: memref<1x96xf32, #tpu.memory_space<vmem>>, %arg16: memref<32x96xbf16, #tpu.memory_space<vmem>>, %arg17: memref<2x16x16xf32, #tpu.memory_space<vmem>>, %arg18: memref<1x128xf32, #tpu.memory_space<vmem>>, %arg19: memref<32x128xbf16, #tpu.memory_space<vmem>>, %arg20: memref<1x32xf32, #tpu.memory_space<vmem>>, %arg21: memref<128x32xbf16, #tpu.memory_space<vmem>>, %arg22: memref<1x32xf32, #tpu.memory_space<vmem>>, %arg23: memref<1x32xf32, #tpu.memory_space<vmem>>, %arg24: memref<1x32xf32, #tpu.memory_space<vmem>>, %arg25: memref<1x32xf32, #tpu.memory_space<vmem>>, %arg26: memref<1x32xf32, #tpu.memory_space<vmem>>, %arg27: memref<32x32xbf16, #tpu.memory_space<vmem>>, %arg28: memref<1x96xf32, #tpu.memory_space<vmem>>, %arg29: memref<32x96xbf16, #tpu.memory_space<vmem>>, %arg30: memref<4x4x4xf32, #tpu.memory_space<vmem>>, %arg31: memref<1x256xf32, #tpu.memory_space<vmem>>, %arg32: memref<64x256xbf16, #tpu.memory_space<vmem>>, %arg33: memref<1x64xf32, #tpu.memory_space<vmem>>, %arg34: memref<256x64xbf16, #tpu.memory_space<vmem>>, %arg35: memref<1x64xf32, #tpu.memory_space<vmem>>, %arg36: memref<1x64xf32, #tpu.memory_space<vmem>>, %arg37: memref<1x64xf32, #tpu.memory_space<vmem>>, %arg38: memref<1x64xf32, #tpu.memory_space<vmem>>, %arg39: memref<1x64xf32, #tpu.memory_space<vmem>>, %arg40: memref<64x64xbf16, #tpu.memory_space<vmem>>, %arg41: memref<1x192xf32, #tpu.memory_space<vmem>>, %arg42: memref<64x192xbf16, #tpu.memory_space<vmem>>, %arg43: memref<1x32xf32, #tpu.memory_space<vmem>>, %arg44: memref<1x32xf32, #tpu.memory_space<vmem>>, %arg45: memref<4x16x4xbf16, #tpu.memory_space<vmem>>, %arg46: memref<64x128xbf16, #tpu.memory_space<vmem>>, %arg47: memref<32x512xbf16, #tpu.memory_space<vmem>>, %arg48: memref<1x32xf32, #tpu.memory_space<vmem>>, %arg49: memref<1x32xf32, #tpu.memory_space<vmem>>, %arg50: memref<16x256x16xbf16, #tpu.memory_space<vmem>>, %arg51: memref<1x128xf32, #tpu.memory_space<vmem>>, %arg52: memref<1x128xf32, #tpu.memory_space<vmem>>, %arg53: memref<4x4x16xbf16, #tpu.memory_space<vmem>>, %arg54: memref<128x64xbf16, #tpu.memory_space<vmem>>, %arg55: memref<1x64xf32, #tpu.memory_space<vmem>>, %arg56: memref<1x64xf32, #tpu.memory_space<vmem>>, %arg57: memref<1x32xf32, #tpu.memory_space<vmem>>, %arg58: memref<1x32xf32, #tpu.memory_space<vmem>>, %arg59: memref<32x4xbf16, #tpu.memory_space<vmem>>, %arg60: memref<1x32xf32, #tpu.memory_space<vmem>>, %arg61: memref<1x32xf32, #tpu.memory_space<vmem>>, %arg62: memref<1x32xf32, #tpu.memory_space<vmem>>, %arg63: memref<48x32xbf16, #tpu.memory_space<vmem>>, %arg64: memref<256x4xf32, #tpu.memory_space<vmem>>) attributes {dimension_semantics = [#tpu.dimension_semantics<parallel>], iteration_bounds = array<i64: 2>, scalar_prefetch = 0 : i64, scratch_operands = 0 : i64, tpu.core_type = #tpu.core_type<tc>, window_params = [{transform_indices = @transform_0, window_bounds = array<i64: 16, 48>}, {pipeline_mode = #tpu.pipeline_mode<synchronous>, transform_indices = @transform_1, window_bounds = array<i64: 1, 32>}, {pipeline_mode = #tpu.pipeline_mode<synchronous>, transform_indices = @transform_2, window_bounds = array<i64: 64, 32>}, {pipeline_mode = #tpu.pipeline_mode<synchronous>, transform_indices = @transform_3, window_bounds = array<i64: 2, 16, 16>}, {pipeline_mode = #tpu.pipeline_mode<synchronous>, transform_indices = @transform_4, window_bounds = array<i64: 1, 128>}, {pipeline_mode = #tpu.pipeline_mode<synchronous>, transform_indices = @transform_5, window_bounds = array<i64: 32, 128>}, {pipeline_mode = #tpu.pipeline_mode<synchronous>, transform_indices = @transform_6, window_bounds = array<i64: 1, 32>}, {pipeline_mode = #tpu.pipeline_mode<synchronous>, transform_indices = @transform_7, window_bounds = array<i64: 128, 32>}, {pipeline_mode = #tpu.pipeline_mode<synchronous>, transform_indices = @transform_8, window_bounds = array<i64: 1, 32>}, {pipeline_mode = #tpu.pipeline_mode<synchronous>, transform_indices = @transform_9, window_bounds = array<i64: 1, 32>}, {pipeline_mode = #tpu.pipeline_mode<synchronous>, transform_indices = @transform_10, window_bounds = array<i64: 1, 32>}, {pipeline_mode = #tpu.pipeline_mode<synchronous>, transform_indices = @transform_11, window_bounds = array<i64: 1, 32>}, {pipeline_mode = #tpu.pipeline_mode<synchronous>, transform_indices = @transform_12, window_bounds = array<i64: 1, 32>}, {pipeline_mode = #tpu.pipeline_mode<synchronous>, transform_indices = @transform_13, window_bounds = array<i64: 32, 32>}, {pipeline_mode = #tpu.pipeline_mode<synchronous>, transform_indices = @transform_14, window_bounds = array<i64: 1, 96>}, {pipeline_mode = #tpu.pipeline_mode<synchronous>, transform_indices = @transform_15, window_bounds = array<i64: 32, 96>}, {pipeline_mode = #tpu.pipeline_mode<synchronous>, transform_indices = @transform_16, window_bounds = array<i64: 2, 16, 16>}, {pipeline_mode = #tpu.pipeline_mode<synchronous>, transform_indices = @transform_17, window_bounds = array<i64: 1, 128>}, {pipeline_mode = #tpu.pipeline_mode<synchronous>, transform_indices = @transform_18, window_bounds = array<i64: 32, 128>}, {pipeline_mode = #tpu.pipeline_mode<synchronous>, transform_indices = @transform_19, window_bounds = array<i64: 1, 32>}, {pipeline_mode = #tpu.pipeline_mode<synchronous>, transform_indices = @transform_20, window_bounds = array<i64: 128, 32>}, {pipeline_mode = #tpu.pipeline_mode<synchronous>, transform_indices = @transform_21, window_bounds = array<i64: 1, 32>}, {pipeline_mode = #tpu.pipeline_mode<synchronous>, transform_indices = @transform_22, window_bounds = array<i64: 1, 32>}, {pipeline_mode = #tpu.pipeline_mode<synchronous>, transform_indices = @transform_23, window_bounds = array<i64: 1, 32>}, {pipeline_mode = #tpu.pipeline_mode<synchronous>, transform_indices = @transform_24, window_bounds = array<i64: 1, 32>}, {pipeline_mode = #tpu.pipeline_mode<synchronous>, transform_indices = @transform_25, window_bounds = array<i64: 1, 32>}, {pipeline_mode = #tpu.pipeline_mode<synchronous>, transform_indices = @transform_26, window_bounds = array<i64: 32, 32>}, {pipeline_mode = #tpu.pipeline_mode<synchronous>, transform_indices = @transform_27, window_bounds = array<i64: 1, 96>}, {pipeline_mode = #tpu.pipeline_mode<synchronous>, transform_indices = @transform_28, window_bounds = array<i64: 32, 96>}, {pipeline_mode = #tpu.pipeline_mode<synchronous>, transform_indices = @transform_29, window_bounds = array<i64: 4, 4, 4>}, {pipeline_mode = #tpu.pipeline_mode<synchronous>, transform_indices = @transform_30, window_bounds = array<i64: 1, 256>}, {pipeline_mode = #tpu.pipeline_mode<synchronous>, transform_indices = @transform_31, window_bounds = array<i64: 64, 256>}, {pipeline_mode = #tpu.pipeline_mode<synchronous>, transform_indices = @transform_32, window_bounds = array<i64: 1, 64>}, {pipeline_mode = #tpu.pipeline_mode<synchronous>, transform_indices = @transform_33, window_bounds = array<i64: 256, 64>}, {pipeline_mode = #tpu.pipeline_mode<synchronous>, transform_indices = @transform_34, window_bounds = array<i64: 1, 64>}, {pipeline_mode = #tpu.pipeline_mode<synchronous>, transform_indices = @transform_35, window_bounds = array<i64: 1, 64>}, {pipeline_mode = #tpu.pipeline_mode<synchronous>, transform_indices = @transform_36, window_bounds = array<i64: 1, 64>}, {pipeline_mode = #tpu.pipeline_mode<synchronous>, transform_indices = @transform_37, window_bounds = array<i64: 1, 64>}, {pipeline_mode = #tpu.pipeline_mode<synchronous>, transform_indices = @transform_38, window_bounds = array<i64: 1, 64>}, {pipeline_mode = #tpu.pipeline_mode<synchronous>, transform_indices = @transform_39, window_bounds = array<i64: 64, 64>}, {pipeline_mode = #tpu.pipeline_mode<synchronous>, transform_indices = @transform_40, window_bounds = array<i64: 1, 192>}, {pipeline_mode = #tpu.pipeline_mode<synchronous>, transform_indices = @transform_41, window_bounds = array<i64: 64, 192>}, {pipeline_mode = #tpu.pipeline_mode<synchronous>, transform_indices = @transform_42, window_bounds = array<i64: 1, 32>}, {pipeline_mode = #tpu.pipeline_mode<synchronous>, transform_indices = @transform_43, window_bounds = array<i64: 1, 32>}, {pipeline_mode = #tpu.pipeline_mode<synchronous>, transform_indices = @transform_44, window_bounds = array<i64: 4, 16, 4>}, {pipeline_mode = #tpu.pipeline_mode<synchronous>, transform_indices = @transform_45, window_bounds = array<i64: 64, 128>}, {pipeline_mode = #tpu.pipeline_mode<synchronous>, transform_indices = @transform_46, window_bounds = array<i64: 32, 512>}, {pipeline_mode = #tpu.pipeline_mode<synchronous>, transform_indices = @transform_47, window_bounds = array<i64: 1, 32>}, {pipeline_mode = #tpu.pipeline_mode<synchronous>, transform_indices = @transform_48, window_bounds = array<i64: 1, 32>}, {pipeline_mode = #tpu.pipeline_mode<synchronous>, transform_indices = @transform_49, window_bounds = array<i64: 16, 256, 16>}, {pipeline_mode = #tpu.pipeline_mode<synchronous>, transform_indices = @transform_50, window_bounds = array<i64: 1, 128>}, {pipeline_mode = #tpu.pipeline_mode<synchronous>, transform_indices = @transform_51, window_bounds = array<i64: 1, 128>}, {pipeline_mode = #tpu.pipeline_mode<synchronous>, transform_indices = @transform_52, window_bounds = array<i64: 4, 4, 16>}, {pipeline_mode = #tpu.pipeline_mode<synchronous>, transform_indices = @transform_53, window_bounds = array<i64: 128, 64>}, {pipeline_mode = #tpu.pipeline_mode<synchronous>, transform_indices = @transform_54, window_bounds = array<i64: 1, 64>}, {pipeline_mode = #tpu.pipeline_mode<synchronous>, transform_indices = @transform_55, window_bounds = array<i64: 1, 64>}, {pipeline_mode = #tpu.pipeline_mode<synchronous>, transform_indices = @transform_56, window_bounds = array<i64: 1, 32>}, {pipeline_mode = #tpu.pipeline_mode<synchronous>, transform_indices = @transform_57, window_bounds = array<i64: 1, 32>}, {pipeline_mode = #tpu.pipeline_mode<synchronous>, transform_indices = @transform_58, window_bounds = array<i64: 32, 4>}, {pipeline_mode = #tpu.pipeline_mode<synchronous>, transform_indices = @transform_59, window_bounds = array<i64: 1, 32>}, {pipeline_mode = #tpu.pipeline_mode<synchronous>, transform_indices = @transform_60, window_bounds = array<i64: 1, 32>}, {pipeline_mode = #tpu.pipeline_mode<synchronous>, transform_indices = @transform_61, window_bounds = array<i64: 1, 32>}, {pipeline_mode = #tpu.pipeline_mode<synchronous>, transform_indices = @transform_62, window_bounds = array<i64: 48, 32>}, {transform_indices = @transform_63, window_bounds = array<i64: 256, 4>}]} {
    %c0 = arith.constant 0 : index
    %c0_0 = arith.constant 0 : index
    %0 = vector.load %arg1[%c0, %c0_0] : memref<16x48xf32, #tpu.memory_space<vmem>>, vector<16x48xf32>
    %c0_1 = arith.constant 0 : index
    %c0_2 = arith.constant 0 : index
    %1 = vector.load %arg63[%c0_1, %c0_2] : memref<48x32xbf16, #tpu.memory_space<vmem>>, vector<48x32xbf16>
    %2 = arith.truncf %0 : vector<16x48xf32> to vector<16x48xbf16>
    %cst = arith.constant dense<0.000000e+00> : vector<16x32xf32>
    %3 = tpu.matmul %2, %1, %cst {dimension_numbers = #tpu.dot_dimension_numbers<[1], [0], [0], [1], [0, 0, 1, 1], [], []>} : vector<16x48xbf16>, vector<48x32xbf16>, vector<16x32xf32> -> vector<16x32xf32>
    %c0_3 = arith.constant 0 : index
    %c0_4 = arith.constant 0 : index
    %4 = vector.load %arg60[%c0_3, %c0_4] : memref<1x32xf32, #tpu.memory_space<vmem>>, vector<1x32xf32>
    %5 = vector.broadcast %4 : vector<1x32xf32> to vector<16x32xf32>
    %6 = arith.addf %3, %5 : vector<16x32xf32>
    %c0_5 = arith.constant 0 : index
    %c0_6 = arith.constant 0 : index
    %7 = vector.load %arg62[%c0_5, %c0_6] : memref<1x32xf32, #tpu.memory_space<vmem>>, vector<1x32xf32>
    %c0_7 = arith.constant 0 : index
    %c0_8 = arith.constant 0 : index
    %8 = vector.load %arg61[%c0_7, %c0_8] : memref<1x32xf32, #tpu.memory_space<vmem>>, vector<1x32xf32>
    %cst_9 = arith.constant dense<0.000000e+00> : vector<16xf32>
    %9 = vector.multi_reduction <add>, %6, %cst_9 [1] : vector<16x32xf32> to vector<16xf32>
    %10 = vector.shape_cast %9 : vector<16xf32> to vector<16x1xf32>
    %cst_10 = arith.constant 3.200000e+01 : f32
    %11 = vector.broadcast %cst_10 : f32 to vector<16x1xf32>
    %12 = arith.divf %10, %11 : vector<16x1xf32>
    %13 = vector.broadcast %12 : vector<16x1xf32> to vector<16x32xf32>
    %14 = arith.subf %6, %13 : vector<16x32xf32>
    %15 = arith.mulf %14, %14 : vector<16x32xf32>
    %cst_11 = arith.constant dense<0.000000e+00> : vector<16xf32>
    %16 = vector.multi_reduction <add>, %15, %cst_11 [1] : vector<16x32xf32> to vector<16xf32>
    %17 = vector.shape_cast %16 : vector<16xf32> to vector<16x1xf32>
    %cst_12 = arith.constant 3.200000e+01 : f32
    %18 = vector.broadcast %cst_12 : f32 to vector<16x1xf32>
    %19 = arith.divf %17, %18 : vector<16x1xf32>
    %20 = vector.broadcast %12 : vector<16x1xf32> to vector<16x32xf32>
    %21 = arith.subf %6, %20 : vector<16x32xf32>
    %cst_13 = arith.constant 9.99999974E-6 : f32
    %22 = vector.broadcast %cst_13 : f32 to vector<16x1xf32>
    %23 = arith.addf %19, %22 : vector<16x1xf32>
    %24 = math.rsqrt %23 : vector<16x1xf32>
    %25 = vector.broadcast %24 : vector<16x1xf32> to vector<16x32xf32>
    %26 = arith.mulf %21, %25 : vector<16x32xf32>
    %27 = vector.broadcast %7 : vector<1x32xf32> to vector<16x32xf32>
    %28 = arith.mulf %26, %27 : vector<16x32xf32>
    %29 = vector.broadcast %8 : vector<1x32xf32> to vector<16x32xf32>
    %30 = arith.addf %28, %29 : vector<16x32xf32>
    %c0_14 = arith.constant 0 : index
    %c0_15 = arith.constant 0 : index
    %31 = vector.load %arg23[%c0_14, %c0_15] : memref<1x32xf32, #tpu.memory_space<vmem>>, vector<1x32xf32>
    %c0_16 = arith.constant 0 : index
    %c0_17 = arith.constant 0 : index
    %32 = vector.load %arg22[%c0_16, %c0_17] : memref<1x32xf32, #tpu.memory_space<vmem>>, vector<1x32xf32>
    %cst_18 = arith.constant dense<0.000000e+00> : vector<16xf32>
    %33 = vector.multi_reduction <add>, %30, %cst_18 [1] : vector<16x32xf32> to vector<16xf32>
    %34 = vector.shape_cast %33 : vector<16xf32> to vector<16x1xf32>
    %cst_19 = arith.constant 3.200000e+01 : f32
    %35 = vector.broadcast %cst_19 : f32 to vector<16x1xf32>
    %36 = arith.divf %34, %35 : vector<16x1xf32>
    %37 = vector.broadcast %36 : vector<16x1xf32> to vector<16x32xf32>
    %38 = arith.subf %30, %37 : vector<16x32xf32>
    %39 = arith.mulf %38, %38 : vector<16x32xf32>
    %cst_20 = arith.constant dense<0.000000e+00> : vector<16xf32>
    %40 = vector.multi_reduction <add>, %39, %cst_20 [1] : vector<16x32xf32> to vector<16xf32>
    %41 = vector.shape_cast %40 : vector<16xf32> to vector<16x1xf32>
    %cst_21 = arith.constant 3.200000e+01 : f32
    %42 = vector.broadcast %cst_21 : f32 to vector<16x1xf32>
    %43 = arith.divf %41, %42 : vector<16x1xf32>
    %44 = vector.broadcast %36 : vector<16x1xf32> to vector<16x32xf32>
    %45 = arith.subf %30, %44 : vector<16x32xf32>
    %cst_22 = arith.constant 9.99999974E-6 : f32
    %46 = vector.broadcast %cst_22 : f32 to vector<16x1xf32>
    %47 = arith.addf %43, %46 : vector<16x1xf32>
    %48 = math.rsqrt %47 : vector<16x1xf32>
    %49 = vector.broadcast %48 : vector<16x1xf32> to vector<16x32xf32>
    %50 = arith.mulf %45, %49 : vector<16x32xf32>
    %51 = vector.broadcast %31 : vector<1x32xf32> to vector<16x32xf32>
    %52 = arith.mulf %50, %51 : vector<16x32xf32>
    %53 = vector.broadcast %32 : vector<1x32xf32> to vector<16x32xf32>
    %54 = arith.addf %52, %53 : vector<16x32xf32>
    %c0_23 = arith.constant 0 : index
    %c0_24 = arith.constant 0 : index
    %55 = vector.load %arg29[%c0_23, %c0_24] : memref<32x96xbf16, #tpu.memory_space<vmem>>, vector<32x96xbf16>
    %56 = arith.truncf %54 : vector<16x32xf32> to vector<16x32xbf16>
    %cst_25 = arith.constant dense<0.000000e+00> : vector<16x96xf32>
    %57 = tpu.matmul %56, %55, %cst_25 {dimension_numbers = #tpu.dot_dimension_numbers<[1], [0], [0], [1], [0, 0, 1, 1], [], []>} : vector<16x32xbf16>, vector<32x96xbf16>, vector<16x96xf32> -> vector<16x96xf32>
    %c0_26 = arith.constant 0 : index
    %c0_27 = arith.constant 0 : index
    %58 = vector.load %arg28[%c0_26, %c0_27] : memref<1x96xf32, #tpu.memory_space<vmem>>, vector<1x96xf32>
    %59 = vector.broadcast %58 : vector<1x96xf32> to vector<16x96xf32>
    %60 = arith.addf %57, %59 : vector<16x96xf32>
    %c0_28 = arith.constant 0 : index
    %c0_29 = arith.constant 0 : index
    %61 = vector.load %arg27[%c0_28, %c0_29] : memref<32x32xbf16, #tpu.memory_space<vmem>>, vector<32x32xbf16>
    %62 = vector.extract_strided_slice %60 {offsets = [0, 0], sizes = [16, 16], strides = [1, 1]} : vector<16x96xf32> to vector<16x16xf32>
    %63 = vector.extract_strided_slice %60 {offsets = [0, 32], sizes = [16, 16], strides = [1, 1]} : vector<16x96xf32> to vector<16x16xf32>
    %64 = vector.extract_strided_slice %60 {offsets = [0, 64], sizes = [16, 16], strides = [1, 1]} : vector<16x96xf32> to vector<16x16xf32>
    %65 = arith.truncf %62 : vector<16x16xf32> to vector<16x16xbf16>
    %66 = arith.truncf %63 : vector<16x16xf32> to vector<16x16xbf16>
    "tpu.trace_start"() <{level = 10 : i32, message = "qd,kd->qk"}> : () -> ()
    %cst_30 = arith.constant dense<0.000000e+00> : vector<16x16xf32>
    %67 = tpu.matmul %65, %66, %cst_30 {dimension_numbers = #tpu.dot_dimension_numbers<[1], [1], [0], [0], [0, 0, 1, 0], [], []>} : vector<16x16xbf16>, vector<16x16xbf16>, vector<16x16xf32> -> vector<16x16xf32>
    "tpu.trace_stop"() : () -> ()
    %cst_31 = arith.constant 2.500000e-01 : f32
    %68 = vector.broadcast %cst_31 : f32 to vector<16x16xf32>
    %69 = arith.mulf %67, %68 : vector<16x16xf32>
    %c0_32 = arith.constant 0 : index
    %c0_33 = arith.constant 0 : index
    %c0_34 = arith.constant 0 : index
    %70 = vector.load %arg17[%c0_32, %c0_33, %c0_34] : memref<2x16x16xf32, #tpu.memory_space<vmem>>, vector<1x16x16xf32>
    %71 = vector.shape_cast %70 : vector<1x16x16xf32> to vector<16x16xf32>
    %72 = arith.addf %69, %71 : vector<16x16xf32>
    %cst_35 = arith.constant dense<0xFF800000> : vector<16xf32>
    %73 = vector.multi_reduction <maximumf>, %72, %cst_35 [1] : vector<16x16xf32> to vector<16xf32>
    %74 = vector.shape_cast %73 : vector<16xf32> to vector<16x1xf32>
    %75 = vector.broadcast %74 : vector<16x1xf32> to vector<16x16xf32>
    %76 = arith.subf %72, %75 : vector<16x16xf32>
    %77 = math.exp %76 : vector<16x16xf32>
    %cst_36 = arith.constant dense<0.000000e+00> : vector<16xf32>
    %78 = vector.multi_reduction <add>, %77, %cst_36 [1] : vector<16x16xf32> to vector<16xf32>
    %79 = vector.shape_cast %78 : vector<16xf32> to vector<16x1xf32>
    %80 = tpu.reciprocal %79 {approx = true} : vector<16x1xf32> -> vector<16x1xf32>
    %81 = vector.broadcast %80 : vector<16x1xf32> to vector<16x16xf32>
    %82 = arith.mulf %77, %81 : vector<16x16xf32>
    %83 = arith.truncf %82 : vector<16x16xf32> to vector<16x16xbf16>
    %84 = arith.truncf %64 : vector<16x16xf32> to vector<16x16xbf16>
    %cst_37 = arith.constant dense<0.000000e+00> : vector<16x16xf32>
    %85 = tpu.matmul %83, %84, %cst_37 {dimension_numbers = #tpu.dot_dimension_numbers<[1], [0], [0], [1], [0, 0, 1, 1], [], []>} : vector<16x16xbf16>, vector<16x16xbf16>, vector<16x16xf32> -> vector<16x16xf32>
    %86 = vector.extract_strided_slice %61 {offsets = [0, 0], sizes = [16, 32], strides = [1, 1]} : vector<32x32xbf16> to vector<16x32xbf16>
    %87 = arith.truncf %85 : vector<16x16xf32> to vector<16x16xbf16>
    %cst_38 = arith.constant dense<0.000000e+00> : vector<16x32xf32>
    %88 = tpu.matmul %87, %86, %cst_38 {dimension_numbers = #tpu.dot_dimension_numbers<[1], [0], [0], [1], [0, 0, 1, 1], [], []>} : vector<16x16xbf16>, vector<16x32xbf16>, vector<16x32xf32> -> vector<16x32xf32>
    %89 = vector.extract_strided_slice %60 {offsets = [0, 16], sizes = [16, 16], strides = [1, 1]} : vector<16x96xf32> to vector<16x16xf32>
    %90 = vector.extract_strided_slice %60 {offsets = [0, 48], sizes = [16, 16], strides = [1, 1]} : vector<16x96xf32> to vector<16x16xf32>
    %91 = vector.extract_strided_slice %60 {offsets = [0, 80], sizes = [16, 16], strides = [1, 1]} : vector<16x96xf32> to vector<16x16xf32>
    %92 = arith.truncf %89 : vector<16x16xf32> to vector<16x16xbf16>
    %93 = arith.truncf %90 : vector<16x16xf32> to vector<16x16xbf16>
    "tpu.trace_start"() <{level = 10 : i32, message = "qd,kd->qk"}> : () -> ()
    %cst_39 = arith.constant dense<0.000000e+00> : vector<16x16xf32>
    %94 = tpu.matmul %92, %93, %cst_39 {dimension_numbers = #tpu.dot_dimension_numbers<[1], [1], [0], [0], [0, 0, 1, 0], [], []>} : vector<16x16xbf16>, vector<16x16xbf16>, vector<16x16xf32> -> vector<16x16xf32>
    "tpu.trace_stop"() : () -> ()
    %cst_40 = arith.constant 2.500000e-01 : f32
    %95 = vector.broadcast %cst_40 : f32 to vector<16x16xf32>
    %96 = arith.mulf %94, %95 : vector<16x16xf32>
    %c1 = arith.constant 1 : index
    %c0_41 = arith.constant 0 : index
    %c0_42 = arith.constant 0 : index
    %97 = vector.load %arg17[%c1, %c0_41, %c0_42] : memref<2x16x16xf32, #tpu.memory_space<vmem>>, vector<1x16x16xf32>
    %98 = vector.shape_cast %97 : vector<1x16x16xf32> to vector<16x16xf32>
    %99 = arith.addf %96, %98 : vector<16x16xf32>
    %cst_43 = arith.constant dense<0xFF800000> : vector<16xf32>
    %100 = vector.multi_reduction <maximumf>, %99, %cst_43 [1] : vector<16x16xf32> to vector<16xf32>
    %101 = vector.shape_cast %100 : vector<16xf32> to vector<16x1xf32>
    %102 = vector.broadcast %101 : vector<16x1xf32> to vector<16x16xf32>
    %103 = arith.subf %99, %102 : vector<16x16xf32>
    %104 = math.exp %103 : vector<16x16xf32>
    %cst_44 = arith.constant dense<0.000000e+00> : vector<16xf32>
    %105 = vector.multi_reduction <add>, %104, %cst_44 [1] : vector<16x16xf32> to vector<16xf32>
    %106 = vector.shape_cast %105 : vector<16xf32> to vector<16x1xf32>
    %107 = tpu.reciprocal %106 {approx = true} : vector<16x1xf32> -> vector<16x1xf32>
    %108 = vector.broadcast %107 : vector<16x1xf32> to vector<16x16xf32>
    %109 = arith.mulf %104, %108 : vector<16x16xf32>
    %110 = arith.truncf %109 : vector<16x16xf32> to vector<16x16xbf16>
    %111 = arith.truncf %91 : vector<16x16xf32> to vector<16x16xbf16>
    %cst_45 = arith.constant dense<0.000000e+00> : vector<16x16xf32>
    %112 = tpu.matmul %110, %111, %cst_45 {dimension_numbers = #tpu.dot_dimension_numbers<[1], [0], [0], [1], [0, 0, 1, 1], [], []>} : vector<16x16xbf16>, vector<16x16xbf16>, vector<16x16xf32> -> vector<16x16xf32>
    %113 = vector.extract_strided_slice %61 {offsets = [16, 0], sizes = [16, 32], strides = [1, 1]} : vector<32x32xbf16> to vector<16x32xbf16>
    %114 = arith.truncf %112 : vector<16x16xf32> to vector<16x16xbf16>
    %cst_46 = arith.constant dense<0.000000e+00> : vector<16x32xf32>
    %115 = tpu.matmul %114, %113, %cst_46 {dimension_numbers = #tpu.dot_dimension_numbers<[1], [0], [0], [1], [0, 0, 1, 1], [], []>} : vector<16x16xbf16>, vector<16x32xbf16>, vector<16x32xf32> -> vector<16x32xf32>
    %116 = arith.addf %88, %115 : vector<16x32xf32>
    %117 = arith.addf %30, %116 : vector<16x32xf32>
    %c0_47 = arith.constant 0 : index
    %c0_48 = arith.constant 0 : index
    %118 = vector.load %arg26[%c0_47, %c0_48] : memref<1x32xf32, #tpu.memory_space<vmem>>, vector<1x32xf32>
    %119 = vector.broadcast %118 : vector<1x32xf32> to vector<16x32xf32>
    %120 = arith.addf %117, %119 : vector<16x32xf32>
    %c0_49 = arith.constant 0 : index
    %c0_50 = arith.constant 0 : index
    %121 = vector.load %arg25[%c0_49, %c0_50] : memref<1x32xf32, #tpu.memory_space<vmem>>, vector<1x32xf32>
    %c0_51 = arith.constant 0 : index
    %c0_52 = arith.constant 0 : index
    %122 = vector.load %arg24[%c0_51, %c0_52] : memref<1x32xf32, #tpu.memory_space<vmem>>, vector<1x32xf32>
    %cst_53 = arith.constant dense<0.000000e+00> : vector<16xf32>
    %123 = vector.multi_reduction <add>, %120, %cst_53 [1] : vector<16x32xf32> to vector<16xf32>
    %124 = vector.shape_cast %123 : vector<16xf32> to vector<16x1xf32>
    %cst_54 = arith.constant 3.200000e+01 : f32
    %125 = vector.broadcast %cst_54 : f32 to vector<16x1xf32>
    %126 = arith.divf %124, %125 : vector<16x1xf32>
    %127 = vector.broadcast %126 : vector<16x1xf32> to vector<16x32xf32>
    %128 = arith.subf %120, %127 : vector<16x32xf32>
    %129 = arith.mulf %128, %128 : vector<16x32xf32>
    %cst_55 = arith.constant dense<0.000000e+00> : vector<16xf32>
    %130 = vector.multi_reduction <add>, %129, %cst_55 [1] : vector<16x32xf32> to vector<16xf32>
    %131 = vector.shape_cast %130 : vector<16xf32> to vector<16x1xf32>
    %cst_56 = arith.constant 3.200000e+01 : f32
    %132 = vector.broadcast %cst_56 : f32 to vector<16x1xf32>
    %133 = arith.divf %131, %132 : vector<16x1xf32>
    %134 = vector.broadcast %126 : vector<16x1xf32> to vector<16x32xf32>
    %135 = arith.subf %120, %134 : vector<16x32xf32>
    %cst_57 = arith.constant 9.99999974E-6 : f32
    %136 = vector.broadcast %cst_57 : f32 to vector<16x1xf32>
    %137 = arith.addf %133, %136 : vector<16x1xf32>
    %138 = math.rsqrt %137 : vector<16x1xf32>
    %139 = vector.broadcast %138 : vector<16x1xf32> to vector<16x32xf32>
    %140 = arith.mulf %135, %139 : vector<16x32xf32>
    %141 = vector.broadcast %121 : vector<1x32xf32> to vector<16x32xf32>
    %142 = arith.mulf %140, %141 : vector<16x32xf32>
    %143 = vector.broadcast %122 : vector<1x32xf32> to vector<16x32xf32>
    %144 = arith.addf %142, %143 : vector<16x32xf32>
    %c0_58 = arith.constant 0 : index
    %c0_59 = arith.constant 0 : index
    %145 = vector.load %arg19[%c0_58, %c0_59] : memref<32x128xbf16, #tpu.memory_space<vmem>>, vector<32x128xbf16>
    %146 = arith.truncf %144 : vector<16x32xf32> to vector<16x32xbf16>
    %cst_60 = arith.constant dense<0.000000e+00> : vector<16x128xf32>
    %147 = tpu.matmul %146, %145, %cst_60 {dimension_numbers = #tpu.dot_dimension_numbers<[1], [0], [0], [1], [0, 0, 1, 1], [], []>} : vector<16x32xbf16>, vector<32x128xbf16>, vector<16x128xf32> -> vector<16x128xf32>
    %c0_61 = arith.constant 0 : index
    %c0_62 = arith.constant 0 : index
    %148 = vector.load %arg18[%c0_61, %c0_62] : memref<1x128xf32, #tpu.memory_space<vmem>>, vector<1x128xf32>
    %149 = vector.broadcast %148 : vector<1x128xf32> to vector<16x128xf32>
    %150 = arith.addf %147, %149 : vector<16x128xf32>
    %151 = arith.mulf %150, %150 : vector<16x128xf32>
    %152 = arith.mulf %150, %151 : vector<16x128xf32>
    %cst_63 = arith.constant 4.471500e-02 : f32
    %153 = vector.broadcast %cst_63 : f32 to vector<16x128xf32>
    %154 = arith.mulf %153, %152 : vector<16x128xf32>
    %155 = arith.addf %150, %154 : vector<16x128xf32>
    %cst_64 = arith.constant 0.797884583 : f32
    %156 = vector.broadcast %cst_64 : f32 to vector<16x128xf32>
    %157 = arith.mulf %156, %155 : vector<16x128xf32>
    %158 = math.tanh %157 : vector<16x128xf32>
    %cst_65 = arith.constant 1.000000e+00 : f32
    %159 = vector.broadcast %cst_65 : f32 to vector<16x128xf32>
    %160 = arith.addf %159, %158 : vector<16x128xf32>
    %cst_66 = arith.constant 5.000000e-01 : f32
    %161 = vector.broadcast %cst_66 : f32 to vector<16x128xf32>
    %162 = arith.mulf %161, %160 : vector<16x128xf32>
    %163 = arith.mulf %150, %162 : vector<16x128xf32>
    %c0_67 = arith.constant 0 : index
    %c0_68 = arith.constant 0 : index
    %164 = vector.load %arg21[%c0_67, %c0_68] : memref<128x32xbf16, #tpu.memory_space<vmem>>, vector<128x32xbf16>
    %165 = arith.truncf %163 : vector<16x128xf32> to vector<16x128xbf16>
    %cst_69 = arith.constant dense<0.000000e+00> : vector<16x32xf32>
    %166 = tpu.matmul %165, %164, %cst_69 {dimension_numbers = #tpu.dot_dimension_numbers<[1], [0], [0], [1], [0, 0, 1, 1], [], []>} : vector<16x128xbf16>, vector<128x32xbf16>, vector<16x32xf32> -> vector<16x32xf32>
    %c0_70 = arith.constant 0 : index
    %c0_71 = arith.constant 0 : index
    %167 = vector.load %arg20[%c0_70, %c0_71] : memref<1x32xf32, #tpu.memory_space<vmem>>, vector<1x32xf32>
    %168 = vector.broadcast %167 : vector<1x32xf32> to vector<16x32xf32>
    %169 = arith.addf %166, %168 : vector<16x32xf32>
    %170 = arith.addf %120, %169 : vector<16x32xf32>
    %c0_72 = arith.constant 0 : index
    %c0_73 = arith.constant 0 : index
    %c0_74 = arith.constant 0 : index
    %171 = vector.load %arg53[%c0_72, %c0_73, %c0_74] : memref<4x4x16xbf16, #tpu.memory_space<vmem>>, vector<1x4x16xbf16>
    %172 = vector.shape_cast %171 : vector<1x4x16xbf16> to vector<4x16xbf16>
    %173 = arith.truncf %170 : vector<16x32xf32> to vector<16x32xbf16>
    %cst_75 = arith.constant dense<0.000000e+00> : vector<4x32xf32>
    %174 = tpu.matmul %172, %173, %cst_75 {dimension_numbers = #tpu.dot_dimension_numbers<[1], [0], [0], [1], [0, 0, 1, 1], [], []>} : vector<4x16xbf16>, vector<16x32xbf16>, vector<4x32xf32> -> vector<4x32xf32>
    %c1_76 = arith.constant 1 : index
    %c0_77 = arith.constant 0 : index
    %c0_78 = arith.constant 0 : index
    %175 = vector.load %arg53[%c1_76, %c0_77, %c0_78] : memref<4x4x16xbf16, #tpu.memory_space<vmem>>, vector<1x4x16xbf16>
    %176 = vector.shape_cast %175 : vector<1x4x16xbf16> to vector<4x16xbf16>
    %177 = arith.truncf %170 : vector<16x32xf32> to vector<16x32xbf16>
    %cst_79 = arith.constant dense<0.000000e+00> : vector<4x32xf32>
    %178 = tpu.matmul %176, %177, %cst_79 {dimension_numbers = #tpu.dot_dimension_numbers<[1], [0], [0], [1], [0, 0, 1, 1], [], []>} : vector<4x16xbf16>, vector<16x32xbf16>, vector<4x32xf32> -> vector<4x32xf32>
    %c2 = arith.constant 2 : index
    %c0_80 = arith.constant 0 : index
    %c0_81 = arith.constant 0 : index
    %179 = vector.load %arg53[%c2, %c0_80, %c0_81] : memref<4x4x16xbf16, #tpu.memory_space<vmem>>, vector<1x4x16xbf16>
    %180 = vector.shape_cast %179 : vector<1x4x16xbf16> to vector<4x16xbf16>
    %181 = arith.truncf %170 : vector<16x32xf32> to vector<16x32xbf16>
    %cst_82 = arith.constant dense<0.000000e+00> : vector<4x32xf32>
    %182 = tpu.matmul %180, %181, %cst_82 {dimension_numbers = #tpu.dot_dimension_numbers<[1], [0], [0], [1], [0, 0, 1, 1], [], []>} : vector<4x16xbf16>, vector<16x32xbf16>, vector<4x32xf32> -> vector<4x32xf32>
    %c3 = arith.constant 3 : index
    %c0_83 = arith.constant 0 : index
    %c0_84 = arith.constant 0 : index
    %183 = vector.load %arg53[%c3, %c0_83, %c0_84] : memref<4x4x16xbf16, #tpu.memory_space<vmem>>, vector<1x4x16xbf16>
    %184 = vector.shape_cast %183 : vector<1x4x16xbf16> to vector<4x16xbf16>
    %185 = arith.truncf %170 : vector<16x32xf32> to vector<16x32xbf16>
    %cst_85 = arith.constant dense<0.000000e+00> : vector<4x32xf32>
    %186 = tpu.matmul %184, %185, %cst_85 {dimension_numbers = #tpu.dot_dimension_numbers<[1], [0], [0], [1], [0, 0, 1, 1], [], []>} : vector<4x16xbf16>, vector<16x32xbf16>, vector<4x32xf32> -> vector<4x32xf32>
    %187 = tpu.concatenate %174, %178, %182, %186 in 1 : vector<4x32xf32>, vector<4x32xf32>, vector<4x32xf32>, vector<4x32xf32> -> vector<4x128xf32>
    %c0_86 = arith.constant 0 : index
    %c0_87 = arith.constant 0 : index
    %188 = vector.load %arg52[%c0_86, %c0_87] : memref<1x128xf32, #tpu.memory_space<vmem>>, vector<1x128xf32>
    %c0_88 = arith.constant 0 : index
    %c0_89 = arith.constant 0 : index
    %189 = vector.load %arg51[%c0_88, %c0_89] : memref<1x128xf32, #tpu.memory_space<vmem>>, vector<1x128xf32>
    %cst_90 = arith.constant dense<0.000000e+00> : vector<4xf32>
    %190 = vector.multi_reduction <add>, %187, %cst_90 [1] : vector<4x128xf32> to vector<4xf32>
    %191 = vector.shape_cast %190 : vector<4xf32> to vector<4x1xf32>
    %cst_91 = arith.constant 1.280000e+02 : f32
    %192 = vector.broadcast %cst_91 : f32 to vector<4x1xf32>
    %193 = arith.divf %191, %192 : vector<4x1xf32>
    %194 = vector.broadcast %193 : vector<4x1xf32> to vector<4x128xf32>
    %195 = arith.subf %187, %194 : vector<4x128xf32>
    %196 = arith.mulf %195, %195 : vector<4x128xf32>
    %cst_92 = arith.constant dense<0.000000e+00> : vector<4xf32>
    %197 = vector.multi_reduction <add>, %196, %cst_92 [1] : vector<4x128xf32> to vector<4xf32>
    %198 = vector.shape_cast %197 : vector<4xf32> to vector<4x1xf32>
    %cst_93 = arith.constant 1.280000e+02 : f32
    %199 = vector.broadcast %cst_93 : f32 to vector<4x1xf32>
    %200 = arith.divf %198, %199 : vector<4x1xf32>
    %201 = vector.broadcast %193 : vector<4x1xf32> to vector<4x128xf32>
    %202 = arith.subf %187, %201 : vector<4x128xf32>
    %cst_94 = arith.constant 9.99999974E-6 : f32
    %203 = vector.broadcast %cst_94 : f32 to vector<4x1xf32>
    %204 = arith.addf %200, %203 : vector<4x1xf32>
    %205 = math.rsqrt %204 : vector<4x1xf32>
    %206 = vector.broadcast %205 : vector<4x1xf32> to vector<4x128xf32>
    %207 = arith.mulf %202, %206 : vector<4x128xf32>
    %208 = vector.broadcast %188 : vector<1x128xf32> to vector<4x128xf32>
    %209 = arith.mulf %207, %208 : vector<4x128xf32>
    %210 = vector.broadcast %189 : vector<1x128xf32> to vector<4x128xf32>
    %211 = arith.addf %209, %210 : vector<4x128xf32>
    %c0_95 = arith.constant 0 : index
    %c0_96 = arith.constant 0 : index
    %212 = vector.load %arg54[%c0_95, %c0_96] : memref<128x64xbf16, #tpu.memory_space<vmem>>, vector<128x64xbf16>
    %213 = arith.truncf %211 : vector<4x128xf32> to vector<4x128xbf16>
    %cst_97 = arith.constant dense<0.000000e+00> : vector<4x64xf32>
    %214 = tpu.matmul %213, %212, %cst_97 {dimension_numbers = #tpu.dot_dimension_numbers<[1], [0], [0], [1], [0, 0, 1, 1], [], []>} : vector<4x128xbf16>, vector<128x64xbf16>, vector<4x64xf32> -> vector<4x64xf32>
    %c0_98 = arith.constant 0 : index
    %c0_99 = arith.constant 0 : index
    %215 = vector.load %arg36[%c0_98, %c0_99] : memref<1x64xf32, #tpu.memory_space<vmem>>, vector<1x64xf32>
    %c0_100 = arith.constant 0 : index
    %c0_101 = arith.constant 0 : index
    %216 = vector.load %arg35[%c0_100, %c0_101] : memref<1x64xf32, #tpu.memory_space<vmem>>, vector<1x64xf32>
    %cst_102 = arith.constant dense<0.000000e+00> : vector<4xf32>
    %217 = vector.multi_reduction <add>, %214, %cst_102 [1] : vector<4x64xf32> to vector<4xf32>
    %218 = vector.shape_cast %217 : vector<4xf32> to vector<4x1xf32>
    %cst_103 = arith.constant 6.400000e+01 : f32
    %219 = vector.broadcast %cst_103 : f32 to vector<4x1xf32>
    %220 = arith.divf %218, %219 : vector<4x1xf32>
    %221 = vector.broadcast %220 : vector<4x1xf32> to vector<4x64xf32>
    %222 = arith.subf %214, %221 : vector<4x64xf32>
    %223 = arith.mulf %222, %222 : vector<4x64xf32>
    %cst_104 = arith.constant dense<0.000000e+00> : vector<4xf32>
    %224 = vector.multi_reduction <add>, %223, %cst_104 [1] : vector<4x64xf32> to vector<4xf32>
    %225 = vector.shape_cast %224 : vector<4xf32> to vector<4x1xf32>
    %cst_105 = arith.constant 6.400000e+01 : f32
    %226 = vector.broadcast %cst_105 : f32 to vector<4x1xf32>
    %227 = arith.divf %225, %226 : vector<4x1xf32>
    %228 = vector.broadcast %220 : vector<4x1xf32> to vector<4x64xf32>
    %229 = arith.subf %214, %228 : vector<4x64xf32>
    %cst_106 = arith.constant 9.99999974E-6 : f32
    %230 = vector.broadcast %cst_106 : f32 to vector<4x1xf32>
    %231 = arith.addf %227, %230 : vector<4x1xf32>
    %232 = math.rsqrt %231 : vector<4x1xf32>
    %233 = vector.broadcast %232 : vector<4x1xf32> to vector<4x64xf32>
    %234 = arith.mulf %229, %233 : vector<4x64xf32>
    %235 = vector.broadcast %215 : vector<1x64xf32> to vector<4x64xf32>
    %236 = arith.mulf %234, %235 : vector<4x64xf32>
    %237 = vector.broadcast %216 : vector<1x64xf32> to vector<4x64xf32>
    %238 = arith.addf %236, %237 : vector<4x64xf32>
    %c0_107 = arith.constant 0 : index
    %c0_108 = arith.constant 0 : index
    %239 = vector.load %arg42[%c0_107, %c0_108] : memref<64x192xbf16, #tpu.memory_space<vmem>>, vector<64x192xbf16>
    %240 = arith.truncf %238 : vector<4x64xf32> to vector<4x64xbf16>
    %cst_109 = arith.constant dense<0.000000e+00> : vector<4x192xf32>
    %241 = tpu.matmul %240, %239, %cst_109 {dimension_numbers = #tpu.dot_dimension_numbers<[1], [0], [0], [1], [0, 0, 1, 1], [], []>} : vector<4x64xbf16>, vector<64x192xbf16>, vector<4x192xf32> -> vector<4x192xf32>
    %c0_110 = arith.constant 0 : index
    %c0_111 = arith.constant 0 : index
    %242 = vector.load %arg41[%c0_110, %c0_111] : memref<1x192xf32, #tpu.memory_space<vmem>>, vector<1x192xf32>
    %243 = vector.broadcast %242 : vector<1x192xf32> to vector<4x192xf32>
    %244 = arith.addf %241, %243 : vector<4x192xf32>
    %c0_112 = arith.constant 0 : index
    %c0_113 = arith.constant 0 : index
    %245 = vector.load %arg40[%c0_112, %c0_113] : memref<64x64xbf16, #tpu.memory_space<vmem>>, vector<64x64xbf16>
    %246 = vector.extract_strided_slice %244 {offsets = [0, 0], sizes = [4, 16], strides = [1, 1]} : vector<4x192xf32> to vector<4x16xf32>
    %247 = vector.extract_strided_slice %244 {offsets = [0, 64], sizes = [4, 16], strides = [1, 1]} : vector<4x192xf32> to vector<4x16xf32>
    %248 = vector.extract_strided_slice %244 {offsets = [0, 128], sizes = [4, 16], strides = [1, 1]} : vector<4x192xf32> to vector<4x16xf32>
    %249 = arith.truncf %246 : vector<4x16xf32> to vector<4x16xbf16>
    %250 = arith.truncf %247 : vector<4x16xf32> to vector<4x16xbf16>
    "tpu.trace_start"() <{level = 10 : i32, message = "qd,kd->qk"}> : () -> ()
    %cst_114 = arith.constant dense<0.000000e+00> : vector<4x4xf32>
    %251 = tpu.matmul %249, %250, %cst_114 {dimension_numbers = #tpu.dot_dimension_numbers<[1], [1], [0], [0], [0, 0, 1, 0], [], []>} : vector<4x16xbf16>, vector<4x16xbf16>, vector<4x4xf32> -> vector<4x4xf32>
    "tpu.trace_stop"() : () -> ()
    %cst_115 = arith.constant 2.500000e-01 : f32
    %252 = vector.broadcast %cst_115 : f32 to vector<4x4xf32>
    %253 = arith.mulf %251, %252 : vector<4x4xf32>
    %c0_116 = arith.constant 0 : index
    %c0_117 = arith.constant 0 : index
    %c0_118 = arith.constant 0 : index
    %254 = vector.load %arg30[%c0_116, %c0_117, %c0_118] : memref<4x4x4xf32, #tpu.memory_space<vmem>>, vector<1x4x4xf32>
    %255 = vector.shape_cast %254 : vector<1x4x4xf32> to vector<4x4xf32>
    %256 = arith.addf %253, %255 : vector<4x4xf32>
    %cst_119 = arith.constant dense<0xFF800000> : vector<4xf32>
    %257 = vector.multi_reduction <maximumf>, %256, %cst_119 [1] : vector<4x4xf32> to vector<4xf32>
    %258 = vector.shape_cast %257 : vector<4xf32> to vector<4x1xf32>
    %259 = vector.broadcast %258 : vector<4x1xf32> to vector<4x4xf32>
    %260 = arith.subf %256, %259 : vector<4x4xf32>
    %261 = math.exp %260 : vector<4x4xf32>
    %cst_120 = arith.constant dense<0.000000e+00> : vector<4xf32>
    %262 = vector.multi_reduction <add>, %261, %cst_120 [1] : vector<4x4xf32> to vector<4xf32>
    %263 = vector.shape_cast %262 : vector<4xf32> to vector<4x1xf32>
    %264 = tpu.reciprocal %263 {approx = true} : vector<4x1xf32> -> vector<4x1xf32>
    %265 = vector.broadcast %264 : vector<4x1xf32> to vector<4x4xf32>
    %266 = arith.mulf %261, %265 : vector<4x4xf32>
    %267 = arith.truncf %266 : vector<4x4xf32> to vector<4x4xbf16>
    %268 = arith.truncf %248 : vector<4x16xf32> to vector<4x16xbf16>
    %cst_121 = arith.constant dense<0.000000e+00> : vector<4x16xf32>
    %269 = tpu.matmul %267, %268, %cst_121 {dimension_numbers = #tpu.dot_dimension_numbers<[1], [0], [0], [1], [0, 0, 1, 1], [], []>} : vector<4x4xbf16>, vector<4x16xbf16>, vector<4x16xf32> -> vector<4x16xf32>
    %270 = vector.extract_strided_slice %245 {offsets = [0, 0], sizes = [16, 64], strides = [1, 1]} : vector<64x64xbf16> to vector<16x64xbf16>
    %271 = arith.truncf %269 : vector<4x16xf32> to vector<4x16xbf16>
    %cst_122 = arith.constant dense<0.000000e+00> : vector<4x64xf32>
    %272 = tpu.matmul %271, %270, %cst_122 {dimension_numbers = #tpu.dot_dimension_numbers<[1], [0], [0], [1], [0, 0, 1, 1], [], []>} : vector<4x16xbf16>, vector<16x64xbf16>, vector<4x64xf32> -> vector<4x64xf32>
    %273 = vector.extract_strided_slice %244 {offsets = [0, 16], sizes = [4, 16], strides = [1, 1]} : vector<4x192xf32> to vector<4x16xf32>
    %274 = vector.extract_strided_slice %244 {offsets = [0, 80], sizes = [4, 16], strides = [1, 1]} : vector<4x192xf32> to vector<4x16xf32>
    %275 = vector.extract_strided_slice %244 {offsets = [0, 144], sizes = [4, 16], strides = [1, 1]} : vector<4x192xf32> to vector<4x16xf32>
    %276 = arith.truncf %273 : vector<4x16xf32> to vector<4x16xbf16>
    %277 = arith.truncf %274 : vector<4x16xf32> to vector<4x16xbf16>
    "tpu.trace_start"() <{level = 10 : i32, message = "qd,kd->qk"}> : () -> ()
    %cst_123 = arith.constant dense<0.000000e+00> : vector<4x4xf32>
    %278 = tpu.matmul %276, %277, %cst_123 {dimension_numbers = #tpu.dot_dimension_numbers<[1], [1], [0], [0], [0, 0, 1, 0], [], []>} : vector<4x16xbf16>, vector<4x16xbf16>, vector<4x4xf32> -> vector<4x4xf32>
    "tpu.trace_stop"() : () -> ()
    %cst_124 = arith.constant 2.500000e-01 : f32
    %279 = vector.broadcast %cst_124 : f32 to vector<4x4xf32>
    %280 = arith.mulf %278, %279 : vector<4x4xf32>
    %c1_125 = arith.constant 1 : index
    %c0_126 = arith.constant 0 : index
    %c0_127 = arith.constant 0 : index
    %281 = vector.load %arg30[%c1_125, %c0_126, %c0_127] : memref<4x4x4xf32, #tpu.memory_space<vmem>>, vector<1x4x4xf32>
    %282 = vector.shape_cast %281 : vector<1x4x4xf32> to vector<4x4xf32>
    %283 = arith.addf %280, %282 : vector<4x4xf32>
    %cst_128 = arith.constant dense<0xFF800000> : vector<4xf32>
    %284 = vector.multi_reduction <maximumf>, %283, %cst_128 [1] : vector<4x4xf32> to vector<4xf32>
    %285 = vector.shape_cast %284 : vector<4xf32> to vector<4x1xf32>
    %286 = vector.broadcast %285 : vector<4x1xf32> to vector<4x4xf32>
    %287 = arith.subf %283, %286 : vector<4x4xf32>
    %288 = math.exp %287 : vector<4x4xf32>
    %cst_129 = arith.constant dense<0.000000e+00> : vector<4xf32>
    %289 = vector.multi_reduction <add>, %288, %cst_129 [1] : vector<4x4xf32> to vector<4xf32>
    %290 = vector.shape_cast %289 : vector<4xf32> to vector<4x1xf32>
    %291 = tpu.reciprocal %290 {approx = true} : vector<4x1xf32> -> vector<4x1xf32>
    %292 = vector.broadcast %291 : vector<4x1xf32> to vector<4x4xf32>
    %293 = arith.mulf %288, %292 : vector<4x4xf32>
    %294 = arith.truncf %293 : vector<4x4xf32> to vector<4x4xbf16>
    %295 = arith.truncf %275 : vector<4x16xf32> to vector<4x16xbf16>
    %cst_130 = arith.constant dense<0.000000e+00> : vector<4x16xf32>
    %296 = tpu.matmul %294, %295, %cst_130 {dimension_numbers = #tpu.dot_dimension_numbers<[1], [0], [0], [1], [0, 0, 1, 1], [], []>} : vector<4x4xbf16>, vector<4x16xbf16>, vector<4x16xf32> -> vector<4x16xf32>
    %297 = vector.extract_strided_slice %245 {offsets = [16, 0], sizes = [16, 64], strides = [1, 1]} : vector<64x64xbf16> to vector<16x64xbf16>
    %298 = arith.truncf %296 : vector<4x16xf32> to vector<4x16xbf16>
    %cst_131 = arith.constant dense<0.000000e+00> : vector<4x64xf32>
    %299 = tpu.matmul %298, %297, %cst_131 {dimension_numbers = #tpu.dot_dimension_numbers<[1], [0], [0], [1], [0, 0, 1, 1], [], []>} : vector<4x16xbf16>, vector<16x64xbf16>, vector<4x64xf32> -> vector<4x64xf32>
    %300 = arith.addf %272, %299 : vector<4x64xf32>
    %301 = vector.extract_strided_slice %244 {offsets = [0, 32], sizes = [4, 16], strides = [1, 1]} : vector<4x192xf32> to vector<4x16xf32>
    %302 = vector.extract_strided_slice %244 {offsets = [0, 96], sizes = [4, 16], strides = [1, 1]} : vector<4x192xf32> to vector<4x16xf32>
    %303 = vector.extract_strided_slice %244 {offsets = [0, 160], sizes = [4, 16], strides = [1, 1]} : vector<4x192xf32> to vector<4x16xf32>
    %304 = arith.truncf %301 : vector<4x16xf32> to vector<4x16xbf16>
    %305 = arith.truncf %302 : vector<4x16xf32> to vector<4x16xbf16>
    "tpu.trace_start"() <{level = 10 : i32, message = "qd,kd->qk"}> : () -> ()
    %cst_132 = arith.constant dense<0.000000e+00> : vector<4x4xf32>
    %306 = tpu.matmul %304, %305, %cst_132 {dimension_numbers = #tpu.dot_dimension_numbers<[1], [1], [0], [0], [0, 0, 1, 0], [], []>} : vector<4x16xbf16>, vector<4x16xbf16>, vector<4x4xf32> -> vector<4x4xf32>
    "tpu.trace_stop"() : () -> ()
    %cst_133 = arith.constant 2.500000e-01 : f32
    %307 = vector.broadcast %cst_133 : f32 to vector<4x4xf32>
    %308 = arith.mulf %306, %307 : vector<4x4xf32>
    %c2_134 = arith.constant 2 : index
    %c0_135 = arith.constant 0 : index
    %c0_136 = arith.constant 0 : index
    %309 = vector.load %arg30[%c2_134, %c0_135, %c0_136] : memref<4x4x4xf32, #tpu.memory_space<vmem>>, vector<1x4x4xf32>
    %310 = vector.shape_cast %309 : vector<1x4x4xf32> to vector<4x4xf32>
    %311 = arith.addf %308, %310 : vector<4x4xf32>
    %cst_137 = arith.constant dense<0xFF800000> : vector<4xf32>
    %312 = vector.multi_reduction <maximumf>, %311, %cst_137 [1] : vector<4x4xf32> to vector<4xf32>
    %313 = vector.shape_cast %312 : vector<4xf32> to vector<4x1xf32>
    %314 = vector.broadcast %313 : vector<4x1xf32> to vector<4x4xf32>
    %315 = arith.subf %311, %314 : vector<4x4xf32>
    %316 = math.exp %315 : vector<4x4xf32>
    %cst_138 = arith.constant dense<0.000000e+00> : vector<4xf32>
    %317 = vector.multi_reduction <add>, %316, %cst_138 [1] : vector<4x4xf32> to vector<4xf32>
    %318 = vector.shape_cast %317 : vector<4xf32> to vector<4x1xf32>
    %319 = tpu.reciprocal %318 {approx = true} : vector<4x1xf32> -> vector<4x1xf32>
    %320 = vector.broadcast %319 : vector<4x1xf32> to vector<4x4xf32>
    %321 = arith.mulf %316, %320 : vector<4x4xf32>
    %322 = arith.truncf %321 : vector<4x4xf32> to vector<4x4xbf16>
    %323 = arith.truncf %303 : vector<4x16xf32> to vector<4x16xbf16>
    %cst_139 = arith.constant dense<0.000000e+00> : vector<4x16xf32>
    %324 = tpu.matmul %322, %323, %cst_139 {dimension_numbers = #tpu.dot_dimension_numbers<[1], [0], [0], [1], [0, 0, 1, 1], [], []>} : vector<4x4xbf16>, vector<4x16xbf16>, vector<4x16xf32> -> vector<4x16xf32>
    %325 = vector.extract_strided_slice %245 {offsets = [32, 0], sizes = [16, 64], strides = [1, 1]} : vector<64x64xbf16> to vector<16x64xbf16>
    %326 = arith.truncf %324 : vector<4x16xf32> to vector<4x16xbf16>
    %cst_140 = arith.constant dense<0.000000e+00> : vector<4x64xf32>
    %327 = tpu.matmul %326, %325, %cst_140 {dimension_numbers = #tpu.dot_dimension_numbers<[1], [0], [0], [1], [0, 0, 1, 1], [], []>} : vector<4x16xbf16>, vector<16x64xbf16>, vector<4x64xf32> -> vector<4x64xf32>
    %328 = arith.addf %300, %327 : vector<4x64xf32>
    %329 = vector.extract_strided_slice %244 {offsets = [0, 48], sizes = [4, 16], strides = [1, 1]} : vector<4x192xf32> to vector<4x16xf32>
    %330 = vector.extract_strided_slice %244 {offsets = [0, 112], sizes = [4, 16], strides = [1, 1]} : vector<4x192xf32> to vector<4x16xf32>
    %331 = vector.extract_strided_slice %244 {offsets = [0, 176], sizes = [4, 16], strides = [1, 1]} : vector<4x192xf32> to vector<4x16xf32>
    %332 = arith.truncf %329 : vector<4x16xf32> to vector<4x16xbf16>
    %333 = arith.truncf %330 : vector<4x16xf32> to vector<4x16xbf16>
    "tpu.trace_start"() <{level = 10 : i32, message = "qd,kd->qk"}> : () -> ()
    %cst_141 = arith.constant dense<0.000000e+00> : vector<4x4xf32>
    %334 = tpu.matmul %332, %333, %cst_141 {dimension_numbers = #tpu.dot_dimension_numbers<[1], [1], [0], [0], [0, 0, 1, 0], [], []>} : vector<4x16xbf16>, vector<4x16xbf16>, vector<4x4xf32> -> vector<4x4xf32>
    "tpu.trace_stop"() : () -> ()
    %cst_142 = arith.constant 2.500000e-01 : f32
    %335 = vector.broadcast %cst_142 : f32 to vector<4x4xf32>
    %336 = arith.mulf %334, %335 : vector<4x4xf32>
    %c3_143 = arith.constant 3 : index
    %c0_144 = arith.constant 0 : index
    %c0_145 = arith.constant 0 : index
    %337 = vector.load %arg30[%c3_143, %c0_144, %c0_145] : memref<4x4x4xf32, #tpu.memory_space<vmem>>, vector<1x4x4xf32>
    %338 = vector.shape_cast %337 : vector<1x4x4xf32> to vector<4x4xf32>
    %339 = arith.addf %336, %338 : vector<4x4xf32>
    %cst_146 = arith.constant dense<0xFF800000> : vector<4xf32>
    %340 = vector.multi_reduction <maximumf>, %339, %cst_146 [1] : vector<4x4xf32> to vector<4xf32>
    %341 = vector.shape_cast %340 : vector<4xf32> to vector<4x1xf32>
    %342 = vector.broadcast %341 : vector<4x1xf32> to vector<4x4xf32>
    %343 = arith.subf %339, %342 : vector<4x4xf32>
    %344 = math.exp %343 : vector<4x4xf32>
    %cst_147 = arith.constant dense<0.000000e+00> : vector<4xf32>
    %345 = vector.multi_reduction <add>, %344, %cst_147 [1] : vector<4x4xf32> to vector<4xf32>
    %346 = vector.shape_cast %345 : vector<4xf32> to vector<4x1xf32>
    %347 = tpu.reciprocal %346 {approx = true} : vector<4x1xf32> -> vector<4x1xf32>
    %348 = vector.broadcast %347 : vector<4x1xf32> to vector<4x4xf32>
    %349 = arith.mulf %344, %348 : vector<4x4xf32>
    %350 = arith.truncf %349 : vector<4x4xf32> to vector<4x4xbf16>
    %351 = arith.truncf %331 : vector<4x16xf32> to vector<4x16xbf16>
    %cst_148 = arith.constant dense<0.000000e+00> : vector<4x16xf32>
    %352 = tpu.matmul %350, %351, %cst_148 {dimension_numbers = #tpu.dot_dimension_numbers<[1], [0], [0], [1], [0, 0, 1, 1], [], []>} : vector<4x4xbf16>, vector<4x16xbf16>, vector<4x16xf32> -> vector<4x16xf32>
    %353 = vector.extract_strided_slice %245 {offsets = [48, 0], sizes = [16, 64], strides = [1, 1]} : vector<64x64xbf16> to vector<16x64xbf16>
    %354 = arith.truncf %352 : vector<4x16xf32> to vector<4x16xbf16>
    %cst_149 = arith.constant dense<0.000000e+00> : vector<4x64xf32>
    %355 = tpu.matmul %354, %353, %cst_149 {dimension_numbers = #tpu.dot_dimension_numbers<[1], [0], [0], [1], [0, 0, 1, 1], [], []>} : vector<4x16xbf16>, vector<16x64xbf16>, vector<4x64xf32> -> vector<4x64xf32>
    %356 = arith.addf %328, %355 : vector<4x64xf32>
    %357 = arith.addf %214, %356 : vector<4x64xf32>
    %c0_150 = arith.constant 0 : index
    %c0_151 = arith.constant 0 : index
    %358 = vector.load %arg39[%c0_150, %c0_151] : memref<1x64xf32, #tpu.memory_space<vmem>>, vector<1x64xf32>
    %359 = vector.broadcast %358 : vector<1x64xf32> to vector<4x64xf32>
    %360 = arith.addf %357, %359 : vector<4x64xf32>
    %c0_152 = arith.constant 0 : index
    %c0_153 = arith.constant 0 : index
    %361 = vector.load %arg38[%c0_152, %c0_153] : memref<1x64xf32, #tpu.memory_space<vmem>>, vector<1x64xf32>
    %c0_154 = arith.constant 0 : index
    %c0_155 = arith.constant 0 : index
    %362 = vector.load %arg37[%c0_154, %c0_155] : memref<1x64xf32, #tpu.memory_space<vmem>>, vector<1x64xf32>
    %cst_156 = arith.constant dense<0.000000e+00> : vector<4xf32>
    %363 = vector.multi_reduction <add>, %360, %cst_156 [1] : vector<4x64xf32> to vector<4xf32>
    %364 = vector.shape_cast %363 : vector<4xf32> to vector<4x1xf32>
    %cst_157 = arith.constant 6.400000e+01 : f32
    %365 = vector.broadcast %cst_157 : f32 to vector<4x1xf32>
    %366 = arith.divf %364, %365 : vector<4x1xf32>
    %367 = vector.broadcast %366 : vector<4x1xf32> to vector<4x64xf32>
    %368 = arith.subf %360, %367 : vector<4x64xf32>
    %369 = arith.mulf %368, %368 : vector<4x64xf32>
    %cst_158 = arith.constant dense<0.000000e+00> : vector<4xf32>
    %370 = vector.multi_reduction <add>, %369, %cst_158 [1] : vector<4x64xf32> to vector<4xf32>
    %371 = vector.shape_cast %370 : vector<4xf32> to vector<4x1xf32>
    %cst_159 = arith.constant 6.400000e+01 : f32
    %372 = vector.broadcast %cst_159 : f32 to vector<4x1xf32>
    %373 = arith.divf %371, %372 : vector<4x1xf32>
    %374 = vector.broadcast %366 : vector<4x1xf32> to vector<4x64xf32>
    %375 = arith.subf %360, %374 : vector<4x64xf32>
    %cst_160 = arith.constant 9.99999974E-6 : f32
    %376 = vector.broadcast %cst_160 : f32 to vector<4x1xf32>
    %377 = arith.addf %373, %376 : vector<4x1xf32>
    %378 = math.rsqrt %377 : vector<4x1xf32>
    %379 = vector.broadcast %378 : vector<4x1xf32> to vector<4x64xf32>
    %380 = arith.mulf %375, %379 : vector<4x64xf32>
    %381 = vector.broadcast %361 : vector<1x64xf32> to vector<4x64xf32>
    %382 = arith.mulf %380, %381 : vector<4x64xf32>
    %383 = vector.broadcast %362 : vector<1x64xf32> to vector<4x64xf32>
    %384 = arith.addf %382, %383 : vector<4x64xf32>
    %c0_161 = arith.constant 0 : index
    %c0_162 = arith.constant 0 : index
    %385 = vector.load %arg32[%c0_161, %c0_162] : memref<64x256xbf16, #tpu.memory_space<vmem>>, vector<64x256xbf16>
    %386 = arith.truncf %384 : vector<4x64xf32> to vector<4x64xbf16>
    %cst_163 = arith.constant dense<0.000000e+00> : vector<4x256xf32>
    %387 = tpu.matmul %386, %385, %cst_163 {dimension_numbers = #tpu.dot_dimension_numbers<[1], [0], [0], [1], [0, 0, 1, 1], [], []>} : vector<4x64xbf16>, vector<64x256xbf16>, vector<4x256xf32> -> vector<4x256xf32>
    %c0_164 = arith.constant 0 : index
    %c0_165 = arith.constant 0 : index
    %388 = vector.load %arg31[%c0_164, %c0_165] : memref<1x256xf32, #tpu.memory_space<vmem>>, vector<1x256xf32>
    %389 = vector.broadcast %388 : vector<1x256xf32> to vector<4x256xf32>
    %390 = arith.addf %387, %389 : vector<4x256xf32>
    %391 = arith.mulf %390, %390 : vector<4x256xf32>
    %392 = arith.mulf %390, %391 : vector<4x256xf32>
    %cst_166 = arith.constant 4.471500e-02 : f32
    %393 = vector.broadcast %cst_166 : f32 to vector<4x256xf32>
    %394 = arith.mulf %393, %392 : vector<4x256xf32>
    %395 = arith.addf %390, %394 : vector<4x256xf32>
    %cst_167 = arith.constant 0.797884583 : f32
    %396 = vector.broadcast %cst_167 : f32 to vector<4x256xf32>
    %397 = arith.mulf %396, %395 : vector<4x256xf32>
    %398 = math.tanh %397 : vector<4x256xf32>
    %cst_168 = arith.constant 1.000000e+00 : f32
    %399 = vector.broadcast %cst_168 : f32 to vector<4x256xf32>
    %400 = arith.addf %399, %398 : vector<4x256xf32>
    %cst_169 = arith.constant 5.000000e-01 : f32
    %401 = vector.broadcast %cst_169 : f32 to vector<4x256xf32>
    %402 = arith.mulf %401, %400 : vector<4x256xf32>
    %403 = arith.mulf %390, %402 : vector<4x256xf32>
    %c0_170 = arith.constant 0 : index
    %c0_171 = arith.constant 0 : index
    %404 = vector.load %arg34[%c0_170, %c0_171] : memref<256x64xbf16, #tpu.memory_space<vmem>>, vector<256x64xbf16>
    %405 = arith.truncf %403 : vector<4x256xf32> to vector<4x256xbf16>
    %cst_172 = arith.constant dense<0.000000e+00> : vector<4x64xf32>
    %406 = tpu.matmul %405, %404, %cst_172 {dimension_numbers = #tpu.dot_dimension_numbers<[1], [0], [0], [1], [0, 0, 1, 1], [], []>} : vector<4x256xbf16>, vector<256x64xbf16>, vector<4x64xf32> -> vector<4x64xf32>
    %c0_173 = arith.constant 0 : index
    %c0_174 = arith.constant 0 : index
    %407 = vector.load %arg33[%c0_173, %c0_174] : memref<1x64xf32, #tpu.memory_space<vmem>>, vector<1x64xf32>
    %408 = vector.broadcast %407 : vector<1x64xf32> to vector<4x64xf32>
    %409 = arith.addf %406, %408 : vector<4x64xf32>
    %410 = arith.addf %360, %409 : vector<4x64xf32>
    %c0_175 = arith.constant 0 : index
    %c0_176 = arith.constant 0 : index
    %411 = vector.load %arg56[%c0_175, %c0_176] : memref<1x64xf32, #tpu.memory_space<vmem>>, vector<1x64xf32>
    %c0_177 = arith.constant 0 : index
    %c0_178 = arith.constant 0 : index
    %412 = vector.load %arg55[%c0_177, %c0_178] : memref<1x64xf32, #tpu.memory_space<vmem>>, vector<1x64xf32>
    %cst_179 = arith.constant dense<0.000000e+00> : vector<4xf32>
    %413 = vector.multi_reduction <add>, %410, %cst_179 [1] : vector<4x64xf32> to vector<4xf32>
    %414 = vector.shape_cast %413 : vector<4xf32> to vector<4x1xf32>
    %cst_180 = arith.constant 6.400000e+01 : f32
    %415 = vector.broadcast %cst_180 : f32 to vector<4x1xf32>
    %416 = arith.divf %414, %415 : vector<4x1xf32>
    %417 = vector.broadcast %416 : vector<4x1xf32> to vector<4x64xf32>
    %418 = arith.subf %410, %417 : vector<4x64xf32>
    %419 = arith.mulf %418, %418 : vector<4x64xf32>
    %cst_181 = arith.constant dense<0.000000e+00> : vector<4xf32>
    %420 = vector.multi_reduction <add>, %419, %cst_181 [1] : vector<4x64xf32> to vector<4xf32>
    %421 = vector.shape_cast %420 : vector<4xf32> to vector<4x1xf32>
    %cst_182 = arith.constant 6.400000e+01 : f32
    %422 = vector.broadcast %cst_182 : f32 to vector<4x1xf32>
    %423 = arith.divf %421, %422 : vector<4x1xf32>
    %424 = vector.broadcast %416 : vector<4x1xf32> to vector<4x64xf32>
    %425 = arith.subf %410, %424 : vector<4x64xf32>
    %cst_183 = arith.constant 9.99999974E-6 : f32
    %426 = vector.broadcast %cst_183 : f32 to vector<4x1xf32>
    %427 = arith.addf %423, %426 : vector<4x1xf32>
    %428 = math.rsqrt %427 : vector<4x1xf32>
    %429 = vector.broadcast %428 : vector<4x1xf32> to vector<4x64xf32>
    %430 = arith.mulf %425, %429 : vector<4x64xf32>
    %431 = vector.broadcast %411 : vector<1x64xf32> to vector<4x64xf32>
    %432 = arith.mulf %430, %431 : vector<4x64xf32>
    %433 = vector.broadcast %412 : vector<1x64xf32> to vector<4x64xf32>
    %434 = arith.addf %432, %433 : vector<4x64xf32>
    %c0_184 = arith.constant 0 : index
    %c0_185 = arith.constant 0 : index
    %435 = vector.load %arg46[%c0_184, %c0_185] : memref<64x128xbf16, #tpu.memory_space<vmem>>, vector<64x128xbf16>
    %436 = arith.truncf %434 : vector<4x64xf32> to vector<4x64xbf16>
    %cst_186 = arith.constant dense<0.000000e+00> : vector<4x128xf32>
    %437 = tpu.matmul %436, %435, %cst_186 {dimension_numbers = #tpu.dot_dimension_numbers<[1], [0], [0], [1], [0, 0, 1, 1], [], []>} : vector<4x64xbf16>, vector<64x128xbf16>, vector<4x128xf32> -> vector<4x128xf32>
    %c0_187 = arith.constant 0 : index
    %c0_188 = arith.constant 0 : index
    %c0_189 = arith.constant 0 : index
    %438 = vector.load %arg45[%c0_187, %c0_188, %c0_189] : memref<4x16x4xbf16, #tpu.memory_space<vmem>>, vector<1x16x4xbf16>
    %439 = vector.shape_cast %438 : vector<1x16x4xbf16> to vector<16x4xbf16>
    %440 = vector.extract_strided_slice %437 {offsets = [0, 0], sizes = [4, 32], strides = [1, 1]} : vector<4x128xf32> to vector<4x32xf32>
    %441 = arith.truncf %440 : vector<4x32xf32> to vector<4x32xbf16>
    %cst_190 = arith.constant dense<0.000000e+00> : vector<16x32xf32>
    %442 = tpu.matmul %439, %441, %cst_190 {dimension_numbers = #tpu.dot_dimension_numbers<[1], [0], [0], [1], [0, 0, 1, 1], [], []>} : vector<16x4xbf16>, vector<4x32xbf16>, vector<16x32xf32> -> vector<16x32xf32>
    %c1_191 = arith.constant 1 : index
    %c0_192 = arith.constant 0 : index
    %c0_193 = arith.constant 0 : index
    %443 = vector.load %arg45[%c1_191, %c0_192, %c0_193] : memref<4x16x4xbf16, #tpu.memory_space<vmem>>, vector<1x16x4xbf16>
    %444 = vector.shape_cast %443 : vector<1x16x4xbf16> to vector<16x4xbf16>
    %445 = vector.extract_strided_slice %437 {offsets = [0, 32], sizes = [4, 32], strides = [1, 1]} : vector<4x128xf32> to vector<4x32xf32>
    %446 = arith.truncf %445 : vector<4x32xf32> to vector<4x32xbf16>
    %cst_194 = arith.constant dense<0.000000e+00> : vector<16x32xf32>
    %447 = tpu.matmul %444, %446, %cst_194 {dimension_numbers = #tpu.dot_dimension_numbers<[1], [0], [0], [1], [0, 0, 1, 1], [], []>} : vector<16x4xbf16>, vector<4x32xbf16>, vector<16x32xf32> -> vector<16x32xf32>
    %448 = arith.addf %442, %447 : vector<16x32xf32>
    %c2_195 = arith.constant 2 : index
    %c0_196 = arith.constant 0 : index
    %c0_197 = arith.constant 0 : index
    %449 = vector.load %arg45[%c2_195, %c0_196, %c0_197] : memref<4x16x4xbf16, #tpu.memory_space<vmem>>, vector<1x16x4xbf16>
    %450 = vector.shape_cast %449 : vector<1x16x4xbf16> to vector<16x4xbf16>
    %451 = vector.extract_strided_slice %437 {offsets = [0, 64], sizes = [4, 32], strides = [1, 1]} : vector<4x128xf32> to vector<4x32xf32>
    %452 = arith.truncf %451 : vector<4x32xf32> to vector<4x32xbf16>
    %cst_198 = arith.constant dense<0.000000e+00> : vector<16x32xf32>
    %453 = tpu.matmul %450, %452, %cst_198 {dimension_numbers = #tpu.dot_dimension_numbers<[1], [0], [0], [1], [0, 0, 1, 1], [], []>} : vector<16x4xbf16>, vector<4x32xbf16>, vector<16x32xf32> -> vector<16x32xf32>
    %454 = arith.addf %448, %453 : vector<16x32xf32>
    %c3_199 = arith.constant 3 : index
    %c0_200 = arith.constant 0 : index
    %c0_201 = arith.constant 0 : index
    %455 = vector.load %arg45[%c3_199, %c0_200, %c0_201] : memref<4x16x4xbf16, #tpu.memory_space<vmem>>, vector<1x16x4xbf16>
    %456 = vector.shape_cast %455 : vector<1x16x4xbf16> to vector<16x4xbf16>
    %457 = vector.extract_strided_slice %437 {offsets = [0, 96], sizes = [4, 32], strides = [1, 1]} : vector<4x128xf32> to vector<4x32xf32>
    %458 = arith.truncf %457 : vector<4x32xf32> to vector<4x32xbf16>
    %cst_202 = arith.constant dense<0.000000e+00> : vector<16x32xf32>
    %459 = tpu.matmul %456, %458, %cst_202 {dimension_numbers = #tpu.dot_dimension_numbers<[1], [0], [0], [1], [0, 0, 1, 1], [], []>} : vector<16x4xbf16>, vector<4x32xbf16>, vector<16x32xf32> -> vector<16x32xf32>
    %460 = arith.addf %454, %459 : vector<16x32xf32>
    %c0_203 = arith.constant 0 : index
    %c0_204 = arith.constant 0 : index
    %461 = vector.load %arg44[%c0_203, %c0_204] : memref<1x32xf32, #tpu.memory_space<vmem>>, vector<1x32xf32>
    %c0_205 = arith.constant 0 : index
    %c0_206 = arith.constant 0 : index
    %462 = vector.load %arg43[%c0_205, %c0_206] : memref<1x32xf32, #tpu.memory_space<vmem>>, vector<1x32xf32>
    %cst_207 = arith.constant dense<0.000000e+00> : vector<16xf32>
    %463 = vector.multi_reduction <add>, %460, %cst_207 [1] : vector<16x32xf32> to vector<16xf32>
    %464 = vector.shape_cast %463 : vector<16xf32> to vector<16x1xf32>
    %cst_208 = arith.constant 3.200000e+01 : f32
    %465 = vector.broadcast %cst_208 : f32 to vector<16x1xf32>
    %466 = arith.divf %464, %465 : vector<16x1xf32>
    %467 = vector.broadcast %466 : vector<16x1xf32> to vector<16x32xf32>
    %468 = arith.subf %460, %467 : vector<16x32xf32>
    %469 = arith.mulf %468, %468 : vector<16x32xf32>
    %cst_209 = arith.constant dense<0.000000e+00> : vector<16xf32>
    %470 = vector.multi_reduction <add>, %469, %cst_209 [1] : vector<16x32xf32> to vector<16xf32>
    %471 = vector.shape_cast %470 : vector<16xf32> to vector<16x1xf32>
    %cst_210 = arith.constant 3.200000e+01 : f32
    %472 = vector.broadcast %cst_210 : f32 to vector<16x1xf32>
    %473 = arith.divf %471, %472 : vector<16x1xf32>
    %474 = vector.broadcast %466 : vector<16x1xf32> to vector<16x32xf32>
    %475 = arith.subf %460, %474 : vector<16x32xf32>
    %cst_211 = arith.constant 9.99999974E-6 : f32
    %476 = vector.broadcast %cst_211 : f32 to vector<16x1xf32>
    %477 = arith.addf %473, %476 : vector<16x1xf32>
    %478 = math.rsqrt %477 : vector<16x1xf32>
    %479 = vector.broadcast %478 : vector<16x1xf32> to vector<16x32xf32>
    %480 = arith.mulf %475, %479 : vector<16x32xf32>
    %481 = vector.broadcast %461 : vector<1x32xf32> to vector<16x32xf32>
    %482 = arith.mulf %480, %481 : vector<16x32xf32>
    %483 = vector.broadcast %462 : vector<1x32xf32> to vector<16x32xf32>
    %484 = arith.addf %482, %483 : vector<16x32xf32>
    %c0_212 = arith.constant 0 : index
    %c0_213 = arith.constant 0 : index
    %485 = vector.load %arg3[%c0_212, %c0_213] : memref<64x32xbf16, #tpu.memory_space<vmem>>, vector<64x32xbf16>
    %486 = vector.extract_strided_slice %485 {offsets = [0, 0], sizes = [32, 32], strides = [1, 1]} : vector<64x32xbf16> to vector<32x32xbf16>
    %487 = arith.truncf %484 : vector<16x32xf32> to vector<16x32xbf16>
    %cst_214 = arith.constant dense<0.000000e+00> : vector<16x32xf32>
    %488 = tpu.matmul %487, %486, %cst_214 {dimension_numbers = #tpu.dot_dimension_numbers<[1], [0], [0], [1], [0, 0, 1, 1], [], []>} : vector<16x32xbf16>, vector<32x32xbf16>, vector<16x32xf32> -> vector<16x32xf32>
    %489 = vector.extract_strided_slice %485 {offsets = [32, 0], sizes = [32, 32], strides = [1, 1]} : vector<64x32xbf16> to vector<32x32xbf16>
    %490 = arith.truncf %170 : vector<16x32xf32> to vector<16x32xbf16>
    %cst_215 = arith.constant dense<0.000000e+00> : vector<16x32xf32>
    %491 = tpu.matmul %490, %489, %cst_215 {dimension_numbers = #tpu.dot_dimension_numbers<[1], [0], [0], [1], [0, 0, 1, 1], [], []>} : vector<16x32xbf16>, vector<32x32xbf16>, vector<16x32xf32> -> vector<16x32xf32>
    %492 = arith.addf %488, %491 : vector<16x32xf32>
    %c0_216 = arith.constant 0 : index
    %c0_217 = arith.constant 0 : index
    %493 = vector.load %arg2[%c0_216, %c0_217] : memref<1x32xf32, #tpu.memory_space<vmem>>, vector<1x32xf32>
    %494 = vector.broadcast %493 : vector<1x32xf32> to vector<16x32xf32>
    %495 = arith.addf %492, %494 : vector<16x32xf32>
    %c0_218 = arith.constant 0 : index
    %c0_219 = arith.constant 0 : index
    %496 = vector.load %arg10[%c0_218, %c0_219] : memref<1x32xf32, #tpu.memory_space<vmem>>, vector<1x32xf32>
    %c0_220 = arith.constant 0 : index
    %c0_221 = arith.constant 0 : index
    %497 = vector.load %arg9[%c0_220, %c0_221] : memref<1x32xf32, #tpu.memory_space<vmem>>, vector<1x32xf32>
    %cst_222 = arith.constant dense<0.000000e+00> : vector<16xf32>
    %498 = vector.multi_reduction <add>, %495, %cst_222 [1] : vector<16x32xf32> to vector<16xf32>
    %499 = vector.shape_cast %498 : vector<16xf32> to vector<16x1xf32>
    %cst_223 = arith.constant 3.200000e+01 : f32
    %500 = vector.broadcast %cst_223 : f32 to vector<16x1xf32>
    %501 = arith.divf %499, %500 : vector<16x1xf32>
    %502 = vector.broadcast %501 : vector<16x1xf32> to vector<16x32xf32>
    %503 = arith.subf %495, %502 : vector<16x32xf32>
    %504 = arith.mulf %503, %503 : vector<16x32xf32>
    %cst_224 = arith.constant dense<0.000000e+00> : vector<16xf32>
    %505 = vector.multi_reduction <add>, %504, %cst_224 [1] : vector<16x32xf32> to vector<16xf32>
    %506 = vector.shape_cast %505 : vector<16xf32> to vector<16x1xf32>
    %cst_225 = arith.constant 3.200000e+01 : f32
    %507 = vector.broadcast %cst_225 : f32 to vector<16x1xf32>
    %508 = arith.divf %506, %507 : vector<16x1xf32>
    %509 = vector.broadcast %501 : vector<16x1xf32> to vector<16x32xf32>
    %510 = arith.subf %495, %509 : vector<16x32xf32>
    %cst_226 = arith.constant 9.99999974E-6 : f32
    %511 = vector.broadcast %cst_226 : f32 to vector<16x1xf32>
    %512 = arith.addf %508, %511 : vector<16x1xf32>
    %513 = math.rsqrt %512 : vector<16x1xf32>
    %514 = vector.broadcast %513 : vector<16x1xf32> to vector<16x32xf32>
    %515 = arith.mulf %510, %514 : vector<16x32xf32>
    %516 = vector.broadcast %496 : vector<1x32xf32> to vector<16x32xf32>
    %517 = arith.mulf %515, %516 : vector<16x32xf32>
    %518 = vector.broadcast %497 : vector<1x32xf32> to vector<16x32xf32>
    %519 = arith.addf %517, %518 : vector<16x32xf32>
    %c0_227 = arith.constant 0 : index
    %c0_228 = arith.constant 0 : index
    %520 = vector.load %arg16[%c0_227, %c0_228] : memref<32x96xbf16, #tpu.memory_space<vmem>>, vector<32x96xbf16>
    %521 = arith.truncf %519 : vector<16x32xf32> to vector<16x32xbf16>
    %cst_229 = arith.constant dense<0.000000e+00> : vector<16x96xf32>
    %522 = tpu.matmul %521, %520, %cst_229 {dimension_numbers = #tpu.dot_dimension_numbers<[1], [0], [0], [1], [0, 0, 1, 1], [], []>} : vector<16x32xbf16>, vector<32x96xbf16>, vector<16x96xf32> -> vector<16x96xf32>
    %c0_230 = arith.constant 0 : index
    %c0_231 = arith.constant 0 : index
    %523 = vector.load %arg15[%c0_230, %c0_231] : memref<1x96xf32, #tpu.memory_space<vmem>>, vector<1x96xf32>
    %524 = vector.broadcast %523 : vector<1x96xf32> to vector<16x96xf32>
    %525 = arith.addf %522, %524 : vector<16x96xf32>
    %c0_232 = arith.constant 0 : index
    %c0_233 = arith.constant 0 : index
    %526 = vector.load %arg14[%c0_232, %c0_233] : memref<32x32xbf16, #tpu.memory_space<vmem>>, vector<32x32xbf16>
    %527 = vector.extract_strided_slice %525 {offsets = [0, 0], sizes = [16, 16], strides = [1, 1]} : vector<16x96xf32> to vector<16x16xf32>
    %528 = vector.extract_strided_slice %525 {offsets = [0, 32], sizes = [16, 16], strides = [1, 1]} : vector<16x96xf32> to vector<16x16xf32>
    %529 = vector.extract_strided_slice %525 {offsets = [0, 64], sizes = [16, 16], strides = [1, 1]} : vector<16x96xf32> to vector<16x16xf32>
    %530 = arith.truncf %527 : vector<16x16xf32> to vector<16x16xbf16>
    %531 = arith.truncf %528 : vector<16x16xf32> to vector<16x16xbf16>
    "tpu.trace_start"() <{level = 10 : i32, message = "qd,kd->qk"}> : () -> ()
    %cst_234 = arith.constant dense<0.000000e+00> : vector<16x16xf32>
    %532 = tpu.matmul %530, %531, %cst_234 {dimension_numbers = #tpu.dot_dimension_numbers<[1], [1], [0], [0], [0, 0, 1, 0], [], []>} : vector<16x16xbf16>, vector<16x16xbf16>, vector<16x16xf32> -> vector<16x16xf32>
    "tpu.trace_stop"() : () -> ()
    %cst_235 = arith.constant 2.500000e-01 : f32
    %533 = vector.broadcast %cst_235 : f32 to vector<16x16xf32>
    %534 = arith.mulf %532, %533 : vector<16x16xf32>
    %c0_236 = arith.constant 0 : index
    %c0_237 = arith.constant 0 : index
    %c0_238 = arith.constant 0 : index
    %535 = vector.load %arg4[%c0_236, %c0_237, %c0_238] : memref<2x16x16xf32, #tpu.memory_space<vmem>>, vector<1x16x16xf32>
    %536 = vector.shape_cast %535 : vector<1x16x16xf32> to vector<16x16xf32>
    %537 = arith.addf %534, %536 : vector<16x16xf32>
    %cst_239 = arith.constant dense<0xFF800000> : vector<16xf32>
    %538 = vector.multi_reduction <maximumf>, %537, %cst_239 [1] : vector<16x16xf32> to vector<16xf32>
    %539 = vector.shape_cast %538 : vector<16xf32> to vector<16x1xf32>
    %540 = vector.broadcast %539 : vector<16x1xf32> to vector<16x16xf32>
    %541 = arith.subf %537, %540 : vector<16x16xf32>
    %542 = math.exp %541 : vector<16x16xf32>
    %cst_240 = arith.constant dense<0.000000e+00> : vector<16xf32>
    %543 = vector.multi_reduction <add>, %542, %cst_240 [1] : vector<16x16xf32> to vector<16xf32>
    %544 = vector.shape_cast %543 : vector<16xf32> to vector<16x1xf32>
    %545 = tpu.reciprocal %544 {approx = true} : vector<16x1xf32> -> vector<16x1xf32>
    %546 = vector.broadcast %545 : vector<16x1xf32> to vector<16x16xf32>
    %547 = arith.mulf %542, %546 : vector<16x16xf32>
    %548 = arith.truncf %547 : vector<16x16xf32> to vector<16x16xbf16>
    %549 = arith.truncf %529 : vector<16x16xf32> to vector<16x16xbf16>
    %cst_241 = arith.constant dense<0.000000e+00> : vector<16x16xf32>
    %550 = tpu.matmul %548, %549, %cst_241 {dimension_numbers = #tpu.dot_dimension_numbers<[1], [0], [0], [1], [0, 0, 1, 1], [], []>} : vector<16x16xbf16>, vector<16x16xbf16>, vector<16x16xf32> -> vector<16x16xf32>
    %551 = vector.extract_strided_slice %526 {offsets = [0, 0], sizes = [16, 32], strides = [1, 1]} : vector<32x32xbf16> to vector<16x32xbf16>
    %552 = arith.truncf %550 : vector<16x16xf32> to vector<16x16xbf16>
    %cst_242 = arith.constant dense<0.000000e+00> : vector<16x32xf32>
    %553 = tpu.matmul %552, %551, %cst_242 {dimension_numbers = #tpu.dot_dimension_numbers<[1], [0], [0], [1], [0, 0, 1, 1], [], []>} : vector<16x16xbf16>, vector<16x32xbf16>, vector<16x32xf32> -> vector<16x32xf32>
    %554 = vector.extract_strided_slice %525 {offsets = [0, 16], sizes = [16, 16], strides = [1, 1]} : vector<16x96xf32> to vector<16x16xf32>
    %555 = vector.extract_strided_slice %525 {offsets = [0, 48], sizes = [16, 16], strides = [1, 1]} : vector<16x96xf32> to vector<16x16xf32>
    %556 = vector.extract_strided_slice %525 {offsets = [0, 80], sizes = [16, 16], strides = [1, 1]} : vector<16x96xf32> to vector<16x16xf32>
    %557 = arith.truncf %554 : vector<16x16xf32> to vector<16x16xbf16>
    %558 = arith.truncf %555 : vector<16x16xf32> to vector<16x16xbf16>
    "tpu.trace_start"() <{level = 10 : i32, message = "qd,kd->qk"}> : () -> ()
    %cst_243 = arith.constant dense<0.000000e+00> : vector<16x16xf32>
    %559 = tpu.matmul %557, %558, %cst_243 {dimension_numbers = #tpu.dot_dimension_numbers<[1], [1], [0], [0], [0, 0, 1, 0], [], []>} : vector<16x16xbf16>, vector<16x16xbf16>, vector<16x16xf32> -> vector<16x16xf32>
    "tpu.trace_stop"() : () -> ()
    %cst_244 = arith.constant 2.500000e-01 : f32
    %560 = vector.broadcast %cst_244 : f32 to vector<16x16xf32>
    %561 = arith.mulf %559, %560 : vector<16x16xf32>
    %c1_245 = arith.constant 1 : index
    %c0_246 = arith.constant 0 : index
    %c0_247 = arith.constant 0 : index
    %562 = vector.load %arg4[%c1_245, %c0_246, %c0_247] : memref<2x16x16xf32, #tpu.memory_space<vmem>>, vector<1x16x16xf32>
    %563 = vector.shape_cast %562 : vector<1x16x16xf32> to vector<16x16xf32>
    %564 = arith.addf %561, %563 : vector<16x16xf32>
    %cst_248 = arith.constant dense<0xFF800000> : vector<16xf32>
    %565 = vector.multi_reduction <maximumf>, %564, %cst_248 [1] : vector<16x16xf32> to vector<16xf32>
    %566 = vector.shape_cast %565 : vector<16xf32> to vector<16x1xf32>
    %567 = vector.broadcast %566 : vector<16x1xf32> to vector<16x16xf32>
    %568 = arith.subf %564, %567 : vector<16x16xf32>
    %569 = math.exp %568 : vector<16x16xf32>
    %cst_249 = arith.constant dense<0.000000e+00> : vector<16xf32>
    %570 = vector.multi_reduction <add>, %569, %cst_249 [1] : vector<16x16xf32> to vector<16xf32>
    %571 = vector.shape_cast %570 : vector<16xf32> to vector<16x1xf32>
    %572 = tpu.reciprocal %571 {approx = true} : vector<16x1xf32> -> vector<16x1xf32>
    %573 = vector.broadcast %572 : vector<16x1xf32> to vector<16x16xf32>
    %574 = arith.mulf %569, %573 : vector<16x16xf32>
    %575 = arith.truncf %574 : vector<16x16xf32> to vector<16x16xbf16>
    %576 = arith.truncf %556 : vector<16x16xf32> to vector<16x16xbf16>
    %cst_250 = arith.constant dense<0.000000e+00> : vector<16x16xf32>
    %577 = tpu.matmul %575, %576, %cst_250 {dimension_numbers = #tpu.dot_dimension_numbers<[1], [0], [0], [1], [0, 0, 1, 1], [], []>} : vector<16x16xbf16>, vector<16x16xbf16>, vector<16x16xf32> -> vector<16x16xf32>
    %578 = vector.extract_strided_slice %526 {offsets = [16, 0], sizes = [16, 32], strides = [1, 1]} : vector<32x32xbf16> to vector<16x32xbf16>
    %579 = arith.truncf %577 : vector<16x16xf32> to vector<16x16xbf16>
    %cst_251 = arith.constant dense<0.000000e+00> : vector<16x32xf32>
    %580 = tpu.matmul %579, %578, %cst_251 {dimension_numbers = #tpu.dot_dimension_numbers<[1], [0], [0], [1], [0, 0, 1, 1], [], []>} : vector<16x16xbf16>, vector<16x32xbf16>, vector<16x32xf32> -> vector<16x32xf32>
    %581 = arith.addf %553, %580 : vector<16x32xf32>
    %582 = arith.addf %495, %581 : vector<16x32xf32>
    %c0_252 = arith.constant 0 : index
    %c0_253 = arith.constant 0 : index
    %583 = vector.load %arg13[%c0_252, %c0_253] : memref<1x32xf32, #tpu.memory_space<vmem>>, vector<1x32xf32>
    %584 = vector.broadcast %583 : vector<1x32xf32> to vector<16x32xf32>
    %585 = arith.addf %582, %584 : vector<16x32xf32>
    %c0_254 = arith.constant 0 : index
    %c0_255 = arith.constant 0 : index
    %586 = vector.load %arg12[%c0_254, %c0_255] : memref<1x32xf32, #tpu.memory_space<vmem>>, vector<1x32xf32>
    %c0_256 = arith.constant 0 : index
    %c0_257 = arith.constant 0 : index
    %587 = vector.load %arg11[%c0_256, %c0_257] : memref<1x32xf32, #tpu.memory_space<vmem>>, vector<1x32xf32>
    %cst_258 = arith.constant dense<0.000000e+00> : vector<16xf32>
    %588 = vector.multi_reduction <add>, %585, %cst_258 [1] : vector<16x32xf32> to vector<16xf32>
    %589 = vector.shape_cast %588 : vector<16xf32> to vector<16x1xf32>
    %cst_259 = arith.constant 3.200000e+01 : f32
    %590 = vector.broadcast %cst_259 : f32 to vector<16x1xf32>
    %591 = arith.divf %589, %590 : vector<16x1xf32>
    %592 = vector.broadcast %591 : vector<16x1xf32> to vector<16x32xf32>
    %593 = arith.subf %585, %592 : vector<16x32xf32>
    %594 = arith.mulf %593, %593 : vector<16x32xf32>
    %cst_260 = arith.constant dense<0.000000e+00> : vector<16xf32>
    %595 = vector.multi_reduction <add>, %594, %cst_260 [1] : vector<16x32xf32> to vector<16xf32>
    %596 = vector.shape_cast %595 : vector<16xf32> to vector<16x1xf32>
    %cst_261 = arith.constant 3.200000e+01 : f32
    %597 = vector.broadcast %cst_261 : f32 to vector<16x1xf32>
    %598 = arith.divf %596, %597 : vector<16x1xf32>
    %599 = vector.broadcast %591 : vector<16x1xf32> to vector<16x32xf32>
    %600 = arith.subf %585, %599 : vector<16x32xf32>
    %cst_262 = arith.constant 9.99999974E-6 : f32
    %601 = vector.broadcast %cst_262 : f32 to vector<16x1xf32>
    %602 = arith.addf %598, %601 : vector<16x1xf32>
    %603 = math.rsqrt %602 : vector<16x1xf32>
    %604 = vector.broadcast %603 : vector<16x1xf32> to vector<16x32xf32>
    %605 = arith.mulf %600, %604 : vector<16x32xf32>
    %606 = vector.broadcast %586 : vector<1x32xf32> to vector<16x32xf32>
    %607 = arith.mulf %605, %606 : vector<16x32xf32>
    %608 = vector.broadcast %587 : vector<1x32xf32> to vector<16x32xf32>
    %609 = arith.addf %607, %608 : vector<16x32xf32>
    %c0_263 = arith.constant 0 : index
    %c0_264 = arith.constant 0 : index
    %610 = vector.load %arg6[%c0_263, %c0_264] : memref<32x128xbf16, #tpu.memory_space<vmem>>, vector<32x128xbf16>
    %611 = arith.truncf %609 : vector<16x32xf32> to vector<16x32xbf16>
    %cst_265 = arith.constant dense<0.000000e+00> : vector<16x128xf32>
    %612 = tpu.matmul %611, %610, %cst_265 {dimension_numbers = #tpu.dot_dimension_numbers<[1], [0], [0], [1], [0, 0, 1, 1], [], []>} : vector<16x32xbf16>, vector<32x128xbf16>, vector<16x128xf32> -> vector<16x128xf32>
    %c0_266 = arith.constant 0 : index
    %c0_267 = arith.constant 0 : index
    %613 = vector.load %arg5[%c0_266, %c0_267] : memref<1x128xf32, #tpu.memory_space<vmem>>, vector<1x128xf32>
    %614 = vector.broadcast %613 : vector<1x128xf32> to vector<16x128xf32>
    %615 = arith.addf %612, %614 : vector<16x128xf32>
    %616 = arith.mulf %615, %615 : vector<16x128xf32>
    %617 = arith.mulf %615, %616 : vector<16x128xf32>
    %cst_268 = arith.constant 4.471500e-02 : f32
    %618 = vector.broadcast %cst_268 : f32 to vector<16x128xf32>
    %619 = arith.mulf %618, %617 : vector<16x128xf32>
    %620 = arith.addf %615, %619 : vector<16x128xf32>
    %cst_269 = arith.constant 0.797884583 : f32
    %621 = vector.broadcast %cst_269 : f32 to vector<16x128xf32>
    %622 = arith.mulf %621, %620 : vector<16x128xf32>
    %623 = math.tanh %622 : vector<16x128xf32>
    %cst_270 = arith.constant 1.000000e+00 : f32
    %624 = vector.broadcast %cst_270 : f32 to vector<16x128xf32>
    %625 = arith.addf %624, %623 : vector<16x128xf32>
    %cst_271 = arith.constant 5.000000e-01 : f32
    %626 = vector.broadcast %cst_271 : f32 to vector<16x128xf32>
    %627 = arith.mulf %626, %625 : vector<16x128xf32>
    %628 = arith.mulf %615, %627 : vector<16x128xf32>
    %c0_272 = arith.constant 0 : index
    %c0_273 = arith.constant 0 : index
    %629 = vector.load %arg8[%c0_272, %c0_273] : memref<128x32xbf16, #tpu.memory_space<vmem>>, vector<128x32xbf16>
    %630 = arith.truncf %628 : vector<16x128xf32> to vector<16x128xbf16>
    %cst_274 = arith.constant dense<0.000000e+00> : vector<16x32xf32>
    %631 = tpu.matmul %630, %629, %cst_274 {dimension_numbers = #tpu.dot_dimension_numbers<[1], [0], [0], [1], [0, 0, 1, 1], [], []>} : vector<16x128xbf16>, vector<128x32xbf16>, vector<16x32xf32> -> vector<16x32xf32>
    %c0_275 = arith.constant 0 : index
    %c0_276 = arith.constant 0 : index
    %632 = vector.load %arg7[%c0_275, %c0_276] : memref<1x32xf32, #tpu.memory_space<vmem>>, vector<1x32xf32>
    %633 = vector.broadcast %632 : vector<1x32xf32> to vector<16x32xf32>
    %634 = arith.addf %631, %633 : vector<16x32xf32>
    %635 = arith.addf %585, %634 : vector<16x32xf32>
    %c0_277 = arith.constant 0 : index
    %c0_278 = arith.constant 0 : index
    %636 = vector.load %arg58[%c0_277, %c0_278] : memref<1x32xf32, #tpu.memory_space<vmem>>, vector<1x32xf32>
    %c0_279 = arith.constant 0 : index
    %c0_280 = arith.constant 0 : index
    %637 = vector.load %arg57[%c0_279, %c0_280] : memref<1x32xf32, #tpu.memory_space<vmem>>, vector<1x32xf32>
    %cst_281 = arith.constant dense<0.000000e+00> : vector<16xf32>
    %638 = vector.multi_reduction <add>, %635, %cst_281 [1] : vector<16x32xf32> to vector<16xf32>
    %639 = vector.shape_cast %638 : vector<16xf32> to vector<16x1xf32>
    %cst_282 = arith.constant 3.200000e+01 : f32
    %640 = vector.broadcast %cst_282 : f32 to vector<16x1xf32>
    %641 = arith.divf %639, %640 : vector<16x1xf32>
    %642 = vector.broadcast %641 : vector<16x1xf32> to vector<16x32xf32>
    %643 = arith.subf %635, %642 : vector<16x32xf32>
    %644 = arith.mulf %643, %643 : vector<16x32xf32>
    %cst_283 = arith.constant dense<0.000000e+00> : vector<16xf32>
    %645 = vector.multi_reduction <add>, %644, %cst_283 [1] : vector<16x32xf32> to vector<16xf32>
    %646 = vector.shape_cast %645 : vector<16xf32> to vector<16x1xf32>
    %cst_284 = arith.constant 3.200000e+01 : f32
    %647 = vector.broadcast %cst_284 : f32 to vector<16x1xf32>
    %648 = arith.divf %646, %647 : vector<16x1xf32>
    %649 = vector.broadcast %641 : vector<16x1xf32> to vector<16x32xf32>
    %650 = arith.subf %635, %649 : vector<16x32xf32>
    %cst_285 = arith.constant 9.99999974E-6 : f32
    %651 = vector.broadcast %cst_285 : f32 to vector<16x1xf32>
    %652 = arith.addf %648, %651 : vector<16x1xf32>
    %653 = math.rsqrt %652 : vector<16x1xf32>
    %654 = vector.broadcast %653 : vector<16x1xf32> to vector<16x32xf32>
    %655 = arith.mulf %650, %654 : vector<16x32xf32>
    %656 = vector.broadcast %636 : vector<1x32xf32> to vector<16x32xf32>
    %657 = arith.mulf %655, %656 : vector<16x32xf32>
    %658 = vector.broadcast %637 : vector<1x32xf32> to vector<16x32xf32>
    %659 = arith.addf %657, %658 : vector<16x32xf32>
    %c0_286 = arith.constant 0 : index
    %c0_287 = arith.constant 0 : index
    %660 = vector.load %arg47[%c0_286, %c0_287] : memref<32x512xbf16, #tpu.memory_space<vmem>>, vector<32x512xbf16>
    %661 = arith.truncf %659 : vector<16x32xf32> to vector<16x32xbf16>
    %cst_288 = arith.constant dense<0.000000e+00> : vector<16x512xf32>
    %662 = tpu.matmul %661, %660, %cst_288 {dimension_numbers = #tpu.dot_dimension_numbers<[1], [0], [0], [1], [0, 0, 1, 1], [], []>} : vector<16x32xbf16>, vector<32x512xbf16>, vector<16x512xf32> -> vector<16x512xf32>
    %c0_289 = arith.constant 0 : index
    %c0_290 = arith.constant 0 : index
    %c0_291 = arith.constant 0 : index
    %663 = vector.load %arg50[%c0_289, %c0_290, %c0_291] : memref<16x256x16xbf16, #tpu.memory_space<vmem>>, vector<1x256x16xbf16>
    %664 = vector.shape_cast %663 : vector<1x256x16xbf16> to vector<256x16xbf16>
    %665 = vector.extract_strided_slice %662 {offsets = [0, 0], sizes = [16, 32], strides = [1, 1]} : vector<16x512xf32> to vector<16x32xf32>
    %666 = arith.truncf %665 : vector<16x32xf32> to vector<16x32xbf16>
    %cst_292 = arith.constant dense<0.000000e+00> : vector<256x32xf32>
    %667 = tpu.matmul %664, %666, %cst_292 {dimension_numbers = #tpu.dot_dimension_numbers<[1], [0], [0], [1], [0, 0, 1, 1], [], []>} : vector<256x16xbf16>, vector<16x32xbf16>, vector<256x32xf32> -> vector<256x32xf32>
    %c1_293 = arith.constant 1 : index
    %c0_294 = arith.constant 0 : index
    %c0_295 = arith.constant 0 : index
    %668 = vector.load %arg50[%c1_293, %c0_294, %c0_295] : memref<16x256x16xbf16, #tpu.memory_space<vmem>>, vector<1x256x16xbf16>
    %669 = vector.shape_cast %668 : vector<1x256x16xbf16> to vector<256x16xbf16>
    %670 = vector.extract_strided_slice %662 {offsets = [0, 32], sizes = [16, 32], strides = [1, 1]} : vector<16x512xf32> to vector<16x32xf32>
    %671 = arith.truncf %670 : vector<16x32xf32> to vector<16x32xbf16>
    %cst_296 = arith.constant dense<0.000000e+00> : vector<256x32xf32>
    %672 = tpu.matmul %669, %671, %cst_296 {dimension_numbers = #tpu.dot_dimension_numbers<[1], [0], [0], [1], [0, 0, 1, 1], [], []>} : vector<256x16xbf16>, vector<16x32xbf16>, vector<256x32xf32> -> vector<256x32xf32>
    %673 = arith.addf %667, %672 : vector<256x32xf32>
    %c2_297 = arith.constant 2 : index
    %c0_298 = arith.constant 0 : index
    %c0_299 = arith.constant 0 : index
    %674 = vector.load %arg50[%c2_297, %c0_298, %c0_299] : memref<16x256x16xbf16, #tpu.memory_space<vmem>>, vector<1x256x16xbf16>
    %675 = vector.shape_cast %674 : vector<1x256x16xbf16> to vector<256x16xbf16>
    %676 = vector.extract_strided_slice %662 {offsets = [0, 64], sizes = [16, 32], strides = [1, 1]} : vector<16x512xf32> to vector<16x32xf32>
    %677 = arith.truncf %676 : vector<16x32xf32> to vector<16x32xbf16>
    %cst_300 = arith.constant dense<0.000000e+00> : vector<256x32xf32>
    %678 = tpu.matmul %675, %677, %cst_300 {dimension_numbers = #tpu.dot_dimension_numbers<[1], [0], [0], [1], [0, 0, 1, 1], [], []>} : vector<256x16xbf16>, vector<16x32xbf16>, vector<256x32xf32> -> vector<256x32xf32>
    %679 = arith.addf %673, %678 : vector<256x32xf32>
    %c3_301 = arith.constant 3 : index
    %c0_302 = arith.constant 0 : index
    %c0_303 = arith.constant 0 : index
    %680 = vector.load %arg50[%c3_301, %c0_302, %c0_303] : memref<16x256x16xbf16, #tpu.memory_space<vmem>>, vector<1x256x16xbf16>
    %681 = vector.shape_cast %680 : vector<1x256x16xbf16> to vector<256x16xbf16>
    %682 = vector.extract_strided_slice %662 {offsets = [0, 96], sizes = [16, 32], strides = [1, 1]} : vector<16x512xf32> to vector<16x32xf32>
    %683 = arith.truncf %682 : vector<16x32xf32> to vector<16x32xbf16>
    %cst_304 = arith.constant dense<0.000000e+00> : vector<256x32xf32>
    %684 = tpu.matmul %681, %683, %cst_304 {dimension_numbers = #tpu.dot_dimension_numbers<[1], [0], [0], [1], [0, 0, 1, 1], [], []>} : vector<256x16xbf16>, vector<16x32xbf16>, vector<256x32xf32> -> vector<256x32xf32>
    %685 = arith.addf %679, %684 : vector<256x32xf32>
    %c4 = arith.constant 4 : index
    %c0_305 = arith.constant 0 : index
    %c0_306 = arith.constant 0 : index
    %686 = vector.load %arg50[%c4, %c0_305, %c0_306] : memref<16x256x16xbf16, #tpu.memory_space<vmem>>, vector<1x256x16xbf16>
    %687 = vector.shape_cast %686 : vector<1x256x16xbf16> to vector<256x16xbf16>
    %688 = vector.extract_strided_slice %662 {offsets = [0, 128], sizes = [16, 32], strides = [1, 1]} : vector<16x512xf32> to vector<16x32xf32>
    %689 = arith.truncf %688 : vector<16x32xf32> to vector<16x32xbf16>
    %cst_307 = arith.constant dense<0.000000e+00> : vector<256x32xf32>
    %690 = tpu.matmul %687, %689, %cst_307 {dimension_numbers = #tpu.dot_dimension_numbers<[1], [0], [0], [1], [0, 0, 1, 1], [], []>} : vector<256x16xbf16>, vector<16x32xbf16>, vector<256x32xf32> -> vector<256x32xf32>
    %691 = arith.addf %685, %690 : vector<256x32xf32>
    %c5 = arith.constant 5 : index
    %c0_308 = arith.constant 0 : index
    %c0_309 = arith.constant 0 : index
    %692 = vector.load %arg50[%c5, %c0_308, %c0_309] : memref<16x256x16xbf16, #tpu.memory_space<vmem>>, vector<1x256x16xbf16>
    %693 = vector.shape_cast %692 : vector<1x256x16xbf16> to vector<256x16xbf16>
    %694 = vector.extract_strided_slice %662 {offsets = [0, 160], sizes = [16, 32], strides = [1, 1]} : vector<16x512xf32> to vector<16x32xf32>
    %695 = arith.truncf %694 : vector<16x32xf32> to vector<16x32xbf16>
    %cst_310 = arith.constant dense<0.000000e+00> : vector<256x32xf32>
    %696 = tpu.matmul %693, %695, %cst_310 {dimension_numbers = #tpu.dot_dimension_numbers<[1], [0], [0], [1], [0, 0, 1, 1], [], []>} : vector<256x16xbf16>, vector<16x32xbf16>, vector<256x32xf32> -> vector<256x32xf32>
    %697 = arith.addf %691, %696 : vector<256x32xf32>
    %c6 = arith.constant 6 : index
    %c0_311 = arith.constant 0 : index
    %c0_312 = arith.constant 0 : index
    %698 = vector.load %arg50[%c6, %c0_311, %c0_312] : memref<16x256x16xbf16, #tpu.memory_space<vmem>>, vector<1x256x16xbf16>
    %699 = vector.shape_cast %698 : vector<1x256x16xbf16> to vector<256x16xbf16>
    %700 = vector.extract_strided_slice %662 {offsets = [0, 192], sizes = [16, 32], strides = [1, 1]} : vector<16x512xf32> to vector<16x32xf32>
    %701 = arith.truncf %700 : vector<16x32xf32> to vector<16x32xbf16>
    %cst_313 = arith.constant dense<0.000000e+00> : vector<256x32xf32>
    %702 = tpu.matmul %699, %701, %cst_313 {dimension_numbers = #tpu.dot_dimension_numbers<[1], [0], [0], [1], [0, 0, 1, 1], [], []>} : vector<256x16xbf16>, vector<16x32xbf16>, vector<256x32xf32> -> vector<256x32xf32>
    %703 = arith.addf %697, %702 : vector<256x32xf32>
    %c7 = arith.constant 7 : index
    %c0_314 = arith.constant 0 : index
    %c0_315 = arith.constant 0 : index
    %704 = vector.load %arg50[%c7, %c0_314, %c0_315] : memref<16x256x16xbf16, #tpu.memory_space<vmem>>, vector<1x256x16xbf16>
    %705 = vector.shape_cast %704 : vector<1x256x16xbf16> to vector<256x16xbf16>
    %706 = vector.extract_strided_slice %662 {offsets = [0, 224], sizes = [16, 32], strides = [1, 1]} : vector<16x512xf32> to vector<16x32xf32>
    %707 = arith.truncf %706 : vector<16x32xf32> to vector<16x32xbf16>
    %cst_316 = arith.constant dense<0.000000e+00> : vector<256x32xf32>
    %708 = tpu.matmul %705, %707, %cst_316 {dimension_numbers = #tpu.dot_dimension_numbers<[1], [0], [0], [1], [0, 0, 1, 1], [], []>} : vector<256x16xbf16>, vector<16x32xbf16>, vector<256x32xf32> -> vector<256x32xf32>
    %709 = arith.addf %703, %708 : vector<256x32xf32>
    %c8 = arith.constant 8 : index
    %c0_317 = arith.constant 0 : index
    %c0_318 = arith.constant 0 : index
    %710 = vector.load %arg50[%c8, %c0_317, %c0_318] : memref<16x256x16xbf16, #tpu.memory_space<vmem>>, vector<1x256x16xbf16>
    %711 = vector.shape_cast %710 : vector<1x256x16xbf16> to vector<256x16xbf16>
    %712 = vector.extract_strided_slice %662 {offsets = [0, 256], sizes = [16, 32], strides = [1, 1]} : vector<16x512xf32> to vector<16x32xf32>
    %713 = arith.truncf %712 : vector<16x32xf32> to vector<16x32xbf16>
    %cst_319 = arith.constant dense<0.000000e+00> : vector<256x32xf32>
    %714 = tpu.matmul %711, %713, %cst_319 {dimension_numbers = #tpu.dot_dimension_numbers<[1], [0], [0], [1], [0, 0, 1, 1], [], []>} : vector<256x16xbf16>, vector<16x32xbf16>, vector<256x32xf32> -> vector<256x32xf32>
    %715 = arith.addf %709, %714 : vector<256x32xf32>
    %c9 = arith.constant 9 : index
    %c0_320 = arith.constant 0 : index
    %c0_321 = arith.constant 0 : index
    %716 = vector.load %arg50[%c9, %c0_320, %c0_321] : memref<16x256x16xbf16, #tpu.memory_space<vmem>>, vector<1x256x16xbf16>
    %717 = vector.shape_cast %716 : vector<1x256x16xbf16> to vector<256x16xbf16>
    %718 = vector.extract_strided_slice %662 {offsets = [0, 288], sizes = [16, 32], strides = [1, 1]} : vector<16x512xf32> to vector<16x32xf32>
    %719 = arith.truncf %718 : vector<16x32xf32> to vector<16x32xbf16>
    %cst_322 = arith.constant dense<0.000000e+00> : vector<256x32xf32>
    %720 = tpu.matmul %717, %719, %cst_322 {dimension_numbers = #tpu.dot_dimension_numbers<[1], [0], [0], [1], [0, 0, 1, 1], [], []>} : vector<256x16xbf16>, vector<16x32xbf16>, vector<256x32xf32> -> vector<256x32xf32>
    %721 = arith.addf %715, %720 : vector<256x32xf32>
    %c10 = arith.constant 10 : index
    %c0_323 = arith.constant 0 : index
    %c0_324 = arith.constant 0 : index
    %722 = vector.load %arg50[%c10, %c0_323, %c0_324] : memref<16x256x16xbf16, #tpu.memory_space<vmem>>, vector<1x256x16xbf16>
    %723 = vector.shape_cast %722 : vector<1x256x16xbf16> to vector<256x16xbf16>
    %724 = vector.extract_strided_slice %662 {offsets = [0, 320], sizes = [16, 32], strides = [1, 1]} : vector<16x512xf32> to vector<16x32xf32>
    %725 = arith.truncf %724 : vector<16x32xf32> to vector<16x32xbf16>
    %cst_325 = arith.constant dense<0.000000e+00> : vector<256x32xf32>
    %726 = tpu.matmul %723, %725, %cst_325 {dimension_numbers = #tpu.dot_dimension_numbers<[1], [0], [0], [1], [0, 0, 1, 1], [], []>} : vector<256x16xbf16>, vector<16x32xbf16>, vector<256x32xf32> -> vector<256x32xf32>
    %727 = arith.addf %721, %726 : vector<256x32xf32>
    %c11 = arith.constant 11 : index
    %c0_326 = arith.constant 0 : index
    %c0_327 = arith.constant 0 : index
    %728 = vector.load %arg50[%c11, %c0_326, %c0_327] : memref<16x256x16xbf16, #tpu.memory_space<vmem>>, vector<1x256x16xbf16>
    %729 = vector.shape_cast %728 : vector<1x256x16xbf16> to vector<256x16xbf16>
    %730 = vector.extract_strided_slice %662 {offsets = [0, 352], sizes = [16, 32], strides = [1, 1]} : vector<16x512xf32> to vector<16x32xf32>
    %731 = arith.truncf %730 : vector<16x32xf32> to vector<16x32xbf16>
    %cst_328 = arith.constant dense<0.000000e+00> : vector<256x32xf32>
    %732 = tpu.matmul %729, %731, %cst_328 {dimension_numbers = #tpu.dot_dimension_numbers<[1], [0], [0], [1], [0, 0, 1, 1], [], []>} : vector<256x16xbf16>, vector<16x32xbf16>, vector<256x32xf32> -> vector<256x32xf32>
    %733 = arith.addf %727, %732 : vector<256x32xf32>
    %c12 = arith.constant 12 : index
    %c0_329 = arith.constant 0 : index
    %c0_330 = arith.constant 0 : index
    %734 = vector.load %arg50[%c12, %c0_329, %c0_330] : memref<16x256x16xbf16, #tpu.memory_space<vmem>>, vector<1x256x16xbf16>
    %735 = vector.shape_cast %734 : vector<1x256x16xbf16> to vector<256x16xbf16>
    %736 = vector.extract_strided_slice %662 {offsets = [0, 384], sizes = [16, 32], strides = [1, 1]} : vector<16x512xf32> to vector<16x32xf32>
    %737 = arith.truncf %736 : vector<16x32xf32> to vector<16x32xbf16>
    %cst_331 = arith.constant dense<0.000000e+00> : vector<256x32xf32>
    %738 = tpu.matmul %735, %737, %cst_331 {dimension_numbers = #tpu.dot_dimension_numbers<[1], [0], [0], [1], [0, 0, 1, 1], [], []>} : vector<256x16xbf16>, vector<16x32xbf16>, vector<256x32xf32> -> vector<256x32xf32>
    %739 = arith.addf %733, %738 : vector<256x32xf32>
    %c13 = arith.constant 13 : index
    %c0_332 = arith.constant 0 : index
    %c0_333 = arith.constant 0 : index
    %740 = vector.load %arg50[%c13, %c0_332, %c0_333] : memref<16x256x16xbf16, #tpu.memory_space<vmem>>, vector<1x256x16xbf16>
    %741 = vector.shape_cast %740 : vector<1x256x16xbf16> to vector<256x16xbf16>
    %742 = vector.extract_strided_slice %662 {offsets = [0, 416], sizes = [16, 32], strides = [1, 1]} : vector<16x512xf32> to vector<16x32xf32>
    %743 = arith.truncf %742 : vector<16x32xf32> to vector<16x32xbf16>
    %cst_334 = arith.constant dense<0.000000e+00> : vector<256x32xf32>
    %744 = tpu.matmul %741, %743, %cst_334 {dimension_numbers = #tpu.dot_dimension_numbers<[1], [0], [0], [1], [0, 0, 1, 1], [], []>} : vector<256x16xbf16>, vector<16x32xbf16>, vector<256x32xf32> -> vector<256x32xf32>
    %745 = arith.addf %739, %744 : vector<256x32xf32>
    %c14 = arith.constant 14 : index
    %c0_335 = arith.constant 0 : index
    %c0_336 = arith.constant 0 : index
    %746 = vector.load %arg50[%c14, %c0_335, %c0_336] : memref<16x256x16xbf16, #tpu.memory_space<vmem>>, vector<1x256x16xbf16>
    %747 = vector.shape_cast %746 : vector<1x256x16xbf16> to vector<256x16xbf16>
    %748 = vector.extract_strided_slice %662 {offsets = [0, 448], sizes = [16, 32], strides = [1, 1]} : vector<16x512xf32> to vector<16x32xf32>
    %749 = arith.truncf %748 : vector<16x32xf32> to vector<16x32xbf16>
    %cst_337 = arith.constant dense<0.000000e+00> : vector<256x32xf32>
    %750 = tpu.matmul %747, %749, %cst_337 {dimension_numbers = #tpu.dot_dimension_numbers<[1], [0], [0], [1], [0, 0, 1, 1], [], []>} : vector<256x16xbf16>, vector<16x32xbf16>, vector<256x32xf32> -> vector<256x32xf32>
    %751 = arith.addf %745, %750 : vector<256x32xf32>
    %c15 = arith.constant 15 : index
    %c0_338 = arith.constant 0 : index
    %c0_339 = arith.constant 0 : index
    %752 = vector.load %arg50[%c15, %c0_338, %c0_339] : memref<16x256x16xbf16, #tpu.memory_space<vmem>>, vector<1x256x16xbf16>
    %753 = vector.shape_cast %752 : vector<1x256x16xbf16> to vector<256x16xbf16>
    %754 = vector.extract_strided_slice %662 {offsets = [0, 480], sizes = [16, 32], strides = [1, 1]} : vector<16x512xf32> to vector<16x32xf32>
    %755 = arith.truncf %754 : vector<16x32xf32> to vector<16x32xbf16>
    %cst_340 = arith.constant dense<0.000000e+00> : vector<256x32xf32>
    %756 = tpu.matmul %753, %755, %cst_340 {dimension_numbers = #tpu.dot_dimension_numbers<[1], [0], [0], [1], [0, 0, 1, 1], [], []>} : vector<256x16xbf16>, vector<16x32xbf16>, vector<256x32xf32> -> vector<256x32xf32>
    %757 = arith.addf %751, %756 : vector<256x32xf32>
    %c0_341 = arith.constant 0 : index
    %c0_342 = arith.constant 0 : index
    %758 = vector.load %arg49[%c0_341, %c0_342] : memref<1x32xf32, #tpu.memory_space<vmem>>, vector<1x32xf32>
    %c0_343 = arith.constant 0 : index
    %c0_344 = arith.constant 0 : index
    %759 = vector.load %arg48[%c0_343, %c0_344] : memref<1x32xf32, #tpu.memory_space<vmem>>, vector<1x32xf32>
    %cst_345 = arith.constant dense<0.000000e+00> : vector<256xf32>
    %760 = vector.multi_reduction <add>, %757, %cst_345 [1] : vector<256x32xf32> to vector<256xf32>
    %761 = vector.shape_cast %760 : vector<256xf32> to vector<256x1xf32>
    %cst_346 = arith.constant 3.200000e+01 : f32
    %762 = vector.broadcast %cst_346 : f32 to vector<256x1xf32>
    %763 = arith.divf %761, %762 : vector<256x1xf32>
    %764 = vector.broadcast %763 : vector<256x1xf32> to vector<256x32xf32>
    %765 = arith.subf %757, %764 : vector<256x32xf32>
    %766 = arith.mulf %765, %765 : vector<256x32xf32>
    %cst_347 = arith.constant dense<0.000000e+00> : vector<256xf32>
    %767 = vector.multi_reduction <add>, %766, %cst_347 [1] : vector<256x32xf32> to vector<256xf32>
    %768 = vector.shape_cast %767 : vector<256xf32> to vector<256x1xf32>
    %cst_348 = arith.constant 3.200000e+01 : f32
    %769 = vector.broadcast %cst_348 : f32 to vector<256x1xf32>
    %770 = arith.divf %768, %769 : vector<256x1xf32>
    %771 = vector.broadcast %763 : vector<256x1xf32> to vector<256x32xf32>
    %772 = arith.subf %757, %771 : vector<256x32xf32>
    %cst_349 = arith.constant 9.99999974E-6 : f32
    %773 = vector.broadcast %cst_349 : f32 to vector<256x1xf32>
    %774 = arith.addf %770, %773 : vector<256x1xf32>
    %775 = math.rsqrt %774 : vector<256x1xf32>
    %776 = vector.broadcast %775 : vector<256x1xf32> to vector<256x32xf32>
    %777 = arith.mulf %772, %776 : vector<256x32xf32>
    %778 = vector.broadcast %758 : vector<1x32xf32> to vector<256x32xf32>
    %779 = arith.mulf %777, %778 : vector<256x32xf32>
    %780 = vector.broadcast %759 : vector<1x32xf32> to vector<256x32xf32>
    %781 = arith.addf %779, %780 : vector<256x32xf32>
    %c0_350 = arith.constant 0 : index
    %c0_351 = arith.constant 0 : index
    %782 = vector.load %arg59[%c0_350, %c0_351] : memref<32x4xbf16, #tpu.memory_space<vmem>>, vector<32x4xbf16>
    %783 = arith.truncf %781 : vector<256x32xf32> to vector<256x32xbf16>
    %cst_352 = arith.constant dense<0.000000e+00> : vector<256x4xf32>
    %784 = tpu.matmul %783, %782, %cst_352 {dimension_numbers = #tpu.dot_dimension_numbers<[1], [0], [0], [1], [0, 0, 1, 1], [], []>} : vector<256x32xbf16>, vector<32x4xbf16>, vector<256x4xf32> -> vector<256x4xf32>
    %c0_353 = arith.constant 0 : index
    %c0_354 = arith.constant 0 : index
    %785 = vector.load %arg64[%c0_353, %c0_354] : memref<256x4xf32, #tpu.memory_space<vmem>>, vector<256x4xf32>
    tpu.vector_store %arg64[%c0_353, %c0_354], %784 {strides = array<i32>} : memref<256x4xf32, #tpu.memory_space<vmem>>, vector<256x4xf32>,
    return
  }
  func.func @transform_0(%arg0: i32) -> (i32, i32) {
    %c0_i32 = arith.constant 0 : i32
    %c0_i32_0 = arith.constant 0 : i32
    return %arg0, %c0_i32 : i32, i32
  }
  func.func @transform_1(%arg0: i32) -> (i32, i32) {
    %c0_i32 = arith.constant 0 : i32
    %c0_i32_0 = arith.constant 0 : i32
    %c0_i32_1 = arith.constant 0 : i32
    return %c0_i32, %c0_i32_0 : i32, i32
  }
  func.func @transform_2(%arg0: i32) -> (i32, i32) {
    %c0_i32 = arith.constant 0 : i32
    %c0_i32_0 = arith.constant 0 : i32
    %c0_i32_1 = arith.constant 0 : i32
    return %c0_i32, %c0_i32_0 : i32, i32
  }
  func.func @transform_3(%arg0: i32) -> (i32, i32, i32) {
    %c0_i32 = arith.constant 0 : i32
    %c0_i32_0 = arith.constant 0 : i32
    %c0_i32_1 = arith.constant 0 : i32
    %c0_i32_2 = arith.constant 0 : i32
    return %c0_i32, %c0_i32_0, %c0_i32_1 : i32, i32, i32
  }
  func.func @transform_4(%arg0: i32) -> (i32, i32) {
    %c0_i32 = arith.constant 0 : i32
    %c0_i32_0 = arith.constant 0 : i32
    %c0_i32_1 = arith.constant 0 : i32
    return %c0_i32, %c0_i32_0 : i32, i32
  }
  func.func @transform_5(%arg0: i32) -> (i32, i32) {
    %c0_i32 = arith.constant 0 : i32
    %c0_i32_0 = arith.constant 0 : i32
    %c0_i32_1 = arith.constant 0 : i32
    return %c0_i32, %c0_i32_0 : i32, i32
  }
  func.func @transform_6(%arg0: i32) -> (i32, i32) {
    %c0_i32 = arith.constant 0 : i32
    %c0_i32_0 = arith.constant 0 : i32
    %c0_i32_1 = arith.constant 0 : i32
    return %c0_i32, %c0_i32_0 : i32, i32
  }
  func.func @transform_7(%arg0: i32) -> (i32, i32) {
    %c0_i32 = arith.constant 0 : i32
    %c0_i32_0 = arith.constant 0 : i32
    %c0_i32_1 = arith.constant 0 : i32
    return %c0_i32, %c0_i32_0 : i32, i32
  }
  func.func @transform_8(%arg0: i32) -> (i32, i32) {
    %c0_i32 = arith.constant 0 : i32
    %c0_i32_0 = arith.constant 0 : i32
    %c0_i32_1 = arith.constant 0 : i32
    return %c0_i32, %c0_i32_0 : i32, i32
  }
  func.func @transform_9(%arg0: i32) -> (i32, i32) {
    %c0_i32 = arith.constant 0 : i32
    %c0_i32_0 = arith.constant 0 : i32
    %c0_i32_1 = arith.constant 0 : i32
    return %c0_i32, %c0_i32_0 : i32, i32
  }
  func.func @transform_10(%arg0: i32) -> (i32, i32) {
    %c0_i32 = arith.constant 0 : i32
    %c0_i32_0 = arith.constant 0 : i32
    %c0_i32_1 = arith.constant 0 : i32
    return %c0_i32, %c0_i32_0 : i32, i32
  }
  func.func @transform_11(%arg0: i32) -> (i32, i32) {
    %c0_i32 = arith.constant 0 : i32
    %c0_i32_0 = arith.constant 0 : i32
    %c0_i32_1 = arith.constant 0 : i32
    return %c0_i32, %c0_i32_0 : i32, i32
  }
  func.func @transform_12(%arg0: i32) -> (i32, i32) {
    %c0_i32 = arith.constant 0 : i32
    %c0_i32_0 = arith.constant 0 : i32
    %c0_i32_1 = arith.constant 0 : i32
    return %c0_i32, %c0_i32_0 : i32, i32
  }
  func.func @transform_13(%arg0: i32) -> (i32, i32) {
    %c0_i32 = arith.constant 0 : i32
    %c0_i32_0 = arith.constant 0 : i32
    %c0_i32_1 = arith.constant 0 : i32
    return %c0_i32, %c0_i32_0 : i32, i32
  }
  func.func @transform_14(%arg0: i32) -> (i32, i32) {
    %c0_i32 = arith.constant 0 : i32
    %c0_i32_0 = arith.constant 0 : i32
    %c0_i32_1 = arith.constant 0 : i32
    return %c0_i32, %c0_i32_0 : i32, i32
  }
  func.func @transform_15(%arg0: i32) -> (i32, i32) {
    %c0_i32 = arith.constant 0 : i32
    %c0_i32_0 = arith.constant 0 : i32
    %c0_i32_1 = arith.constant 0 : i32
    return %c0_i32, %c0_i32_0 : i32, i32
  }
  func.func @transform_16(%arg0: i32) -> (i32, i32, i32) {
    %c0_i32 = arith.constant 0 : i32
    %c0_i32_0 = arith.constant 0 : i32
    %c0_i32_1 = arith.constant 0 : i32
    %c0_i32_2 = arith.constant 0 : i32
    return %c0_i32, %c0_i32_0, %c0_i32_1 : i32, i32, i32
  }
  func.func @transform_17(%arg0: i32) -> (i32, i32) {
    %c0_i32 = arith.constant 0 : i32
    %c0_i32_0 = arith.constant 0 : i32
    %c0_i32_1 = arith.constant 0 : i32
    return %c0_i32, %c0_i32_0 : i32, i32
  }
  func.func @transform_18(%arg0: i32) -> (i32, i32) {
    %c0_i32 = arith.constant 0 : i32
    %c0_i32_0 = arith.constant 0 : i32
    %c0_i32_1 = arith.constant 0 : i32
    return %c0_i32, %c0_i32_0 : i32, i32
  }
  func.func @transform_19(%arg0: i32) -> (i32, i32) {
    %c0_i32 = arith.constant 0 : i32
    %c0_i32_0 = arith.constant 0 : i32
    %c0_i32_1 = arith.constant 0 : i32
    return %c0_i32, %c0_i32_0 : i32, i32
  }
  func.func @transform_20(%arg0: i32) -> (i32, i32) {
    %c0_i32 = arith.constant 0 : i32
    %c0_i32_0 = arith.constant 0 : i32
    %c0_i32_1 = arith.constant 0 : i32
    return %c0_i32, %c0_i32_0 : i32, i32
  }
  func.func @transform_21(%arg0: i32) -> (i32, i32) {
    %c0_i32 = arith.constant 0 : i32
    %c0_i32_0 = arith.constant 0 : i32
    %c0_i32_1 = arith.constant 0 : i32
    return %c0_i32, %c0_i32_0 : i32, i32
  }
  func.func @transform_22(%arg0: i32) -> (i32, i32) {
    %c0_i32 = arith.constant 0 : i32
    %c0_i32_0 = arith.constant 0 : i32
    %c0_i32_1 = arith.constant 0 : i32
    return %c0_i32, %c0_i32_0 : i32, i32
  }
  func.func @transform_23(%arg0: i32) -> (i32, i32) {
    %c0_i32 = arith.constant 0 : i32
    %c0_i32_0 = arith.constant 0 : i32
    %c0_i32_1 = arith.constant 0 : i32
    return %c0_i32, %c0_i32_0 : i32, i32
  }
  func.func @transform_24(%arg0: i32) -> (i32, i32) {
    %c0_i32 = arith.constant 0 : i32
    %c0_i32_0 = arith.constant 0 : i32
    %c0_i32_1 = arith.constant 0 : i32
    return %c0_i32, %c0_i32_0 : i32, i32
  }
  func.func @transform_25(%arg0: i32) -> (i32, i32) {
    %c0_i32 = arith.constant 0 : i32
    %c0_i32_0 = arith.constant 0 : i32
    %c0_i32_1 = arith.constant 0 : i32
    return %c0_i32, %c0_i32_0 : i32, i32
  }
  func.func @transform_26(%arg0: i32) -> (i32, i32) {
    %c0_i32 = arith.constant 0 : i32
    %c0_i32_0 = arith.constant 0 : i32
    %c0_i32_1 = arith.constant 0 : i32
    return %c0_i32, %c0_i32_0 : i32, i32
  }
  func.func @transform_27(%arg0: i32) -> (i32, i32) {
    %c0_i32 = arith.constant 0 : i32
    %c0_i32_0 = arith.constant 0 : i32
    %c0_i32_1 = arith.constant 0 : i32
    return %c0_i32, %c0_i32_0 : i32, i32
  }
  func.func @transform_28(%arg0: i32) -> (i32, i32) {
    %c0_i32 = arith.constant 0 : i32
    %c0_i32_0 = arith.constant 0 : i32
    %c0_i32_1 = arith.constant 0 : i32
    return %c0_i32, %c0_i32_0 : i32, i32
  }
  func.func @transform_29(%arg0: i32) -> (i32, i32, i32) {
    %c0_i32 = arith.constant 0 : i32
    %c0_i32_0 = arith.constant 0 : i32
    %c0_i32_1 = arith.constant 0 : i32
    %c0_i32_2 = arith.constant 0 : i32
    return %c0_i32, %c0_i32_0, %c0_i32_1 : i32, i32, i32
  }
  func.func @transform_30(%arg0: i32) -> (i32, i32) {
    %c0_i32 = arith.constant 0 : i32
    %c0_i32_0 = arith.constant 0 : i32
    %c0_i32_1 = arith.constant 0 : i32
    return %c0_i32, %c0_i32_0 : i32, i32
  }
  func.func @transform_31(%arg0: i32) -> (i32, i32) {
    %c0_i32 = arith.constant 0 : i32
    %c0_i32_0 = arith.constant 0 : i32
    %c0_i32_1 = arith.constant 0 : i32
    return %c0_i32, %c0_i32_0 : i32, i32
  }
  func.func @transform_32(%arg0: i32) -> (i32, i32) {
    %c0_i32 = arith.constant 0 : i32
    %c0_i32_0 = arith.constant 0 : i32
    %c0_i32_1 = arith.constant 0 : i32
    return %c0_i32, %c0_i32_0 : i32, i32
  }
  func.func @transform_33(%arg0: i32) -> (i32, i32) {
    %c0_i32 = arith.constant 0 : i32
    %c0_i32_0 = arith.constant 0 : i32
    %c0_i32_1 = arith.constant 0 : i32
    return %c0_i32, %c0_i32_0 : i32, i32
  }
  func.func @transform_34(%arg0: i32) -> (i32, i32) {
    %c0_i32 = arith.constant 0 : i32
    %c0_i32_0 = arith.constant 0 : i32
    %c0_i32_1 = arith.constant 0 : i32
    return %c0_i32, %c0_i32_0 : i32, i32
  }
  func.func @transform_35(%arg0: i32) -> (i32, i32) {
    %c0_i32 = arith.constant 0 : i32
    %c0_i32_0 = arith.constant 0 : i32
    %c0_i32_1 = arith.constant 0 : i32
    return %c0_i32, %c0_i32_0 : i32, i32
  }
  func.func @transform_36(%arg0: i32) -> (i32, i32) {
    %c0_i32 = arith.constant 0 : i32
    %c0_i32_0 = arith.constant 0 : i32
    %c0_i32_1 = arith.constant 0 : i32
    return %c0_i32, %c0_i32_0 : i32, i32
  }
  func.func @transform_37(%arg0: i32) -> (i32, i32) {
    %c0_i32 = arith.constant 0 : i32
    %c0_i32_0 = arith.constant 0 : i32
    %c0_i32_1 = arith.constant 0 : i32
    return %c0_i32, %c0_i32_0 : i32, i32
  }
  func.func @transform_38(%arg0: i32) -> (i32, i32) {
    %c0_i32 = arith.constant 0 : i32
    %c0_i32_0 = arith.constant 0 : i32
    %c0_i32_1 = arith.constant 0 : i32
    return %c0_i32, %c0_i32_0 : i32, i32
  }
  func.func @transform_39(%arg0: i32) -> (i32, i32) {
    %c0_i32 = arith.constant 0 : i32
    %c0_i32_0 = arith.constant 0 : i32
    %c0_i32_1 = arith.constant 0 : i32
    return %c0_i32, %c0_i32_0 : i32, i32
  }
  func.func @transform_40(%arg0: i32) -> (i32, i32) {
    %c0_i32 = arith.constant 0 : i32
    %c0_i32_0 = arith.constant 0 : i32
    %c0_i32_1 = arith.constant 0 : i32
    return %c0_i32, %c0_i32_0 : i32, i32
  }
  func.func @transform_41(%arg0: i32) -> (i32, i32) {
    %c0_i32 = arith.constant 0 : i32
    %c0_i32_0 = arith.constant 0 : i32
    %c0_i32_1 = arith.constant 0 : i32
    return %c0_i32, %c0_i32_0 : i32, i32
  }
  func.func @transform_42(%arg0: i32) -> (i32, i32) {
    %c0_i32 = arith.constant 0 : i32
    %c0_i32_0 = arith.constant 0 : i32
    %c0_i32_1 = arith.constant 0 : i32
    return %c0_i32, %c0_i32_0 : i32, i32
  }
  func.func @transform_43(%arg0: i32) -> (i32, i32) {
    %c0_i32 = arith.constant 0 : i32
    %c0_i32_0 = arith.constant 0 : i32
    %c0_i32_1 = arith.constant 0 : i32
    return %c0_i32, %c0_i32_0 : i32, i32
  }
  func.func @transform_44(%arg0: i32) -> (i32, i32, i32) {
    %c0_i32 = arith.constant 0 : i32
    %c0_i32_0 = arith.constant 0 : i32
    %c0_i32_1 = arith.constant 0 : i32
    %c0_i32_2 = arith.constant 0 : i32
    return %c0_i32, %c0_i32_0, %c0_i32_1 : i32, i32, i32
  }
  func.func @transform_45(%arg0: i32) -> (i32, i32) {
    %c0_i32 = arith.constant 0 : i32
    %c0_i32_0 = arith.constant 0 : i32
    %c0_i32_1 = arith.constant 0 : i32
    return %c0_i32, %c0_i32_0 : i32, i32
  }
  func.func @transform_46(%arg0: i32) -> (i32, i32) {
    %c0_i32 = arith.constant 0 : i32
    %c0_i32_0 = arith.constant 0 : i32
    %c0_i32_1 = arith.constant 0 : i32
    return %c0_i32, %c0_i32_0 : i32, i32
  }
  func.func @transform_47(%arg0: i32) -> (i32, i32) {
    %c0_i32 = arith.constant 0 : i32
    %c0_i32_0 = arith.constant 0 : i32
    %c0_i32_1 = arith.constant 0 : i32
    return %c0_i32, %c0_i32_0 : i32, i32
  }
  func.func @transform_48(%arg0: i32) -> (i32, i32) {
    %c0_i32 = arith.constant 0 : i32
    %c0_i32_0 = arith.constant 0 : i32
    %c0_i32_1 = arith.constant 0 : i32
    return %c0_i32, %c0_i32_0 : i32, i32
  }
  func.func @transform_49(%arg0: i32) -> (i32, i32, i32) {
    %c0_i32 = arith.constant 0 : i32
    %c0_i32_0 = arith.constant 0 : i32
    %c0_i32_1 = arith.constant 0 : i32
    %c0_i32_2 = arith.constant 0 : i32
    return %c0_i32, %c0_i32_0, %c0_i32_1 : i32, i32, i32
  }
  func.func @transform_50(%arg0: i32) -> (i32, i32) {
    %c0_i32 = arith.constant 0 : i32
    %c0_i32_0 = arith.constant 0 : i32
    %c0_i32_1 = arith.constant 0 : i32
    return %c0_i32, %c0_i32_0 : i32, i32
  }
  func.func @transform_51(%arg0: i32) -> (i32, i32) {
    %c0_i32 = arith.constant 0 : i32
    %c0_i32_0 = arith.constant 0 : i32
    %c0_i32_1 = arith.constant 0 : i32
    return %c0_i32, %c0_i32_0 : i32, i32
  }
  func.func @transform_52(%arg0: i32) -> (i32, i32, i32) {
    %c0_i32 = arith.constant 0 : i32
    %c0_i32_0 = arith.constant 0 : i32
    %c0_i32_1 = arith.constant 0 : i32
    %c0_i32_2 = arith.constant 0 : i32
    return %c0_i32, %c0_i32_0, %c0_i32_1 : i32, i32, i32
  }
  func.func @transform_53(%arg0: i32) -> (i32, i32) {
    %c0_i32 = arith.constant 0 : i32
    %c0_i32_0 = arith.constant 0 : i32
    %c0_i32_1 = arith.constant 0 : i32
    return %c0_i32, %c0_i32_0 : i32, i32
  }
  func.func @transform_54(%arg0: i32) -> (i32, i32) {
    %c0_i32 = arith.constant 0 : i32
    %c0_i32_0 = arith.constant 0 : i32
    %c0_i32_1 = arith.constant 0 : i32
    return %c0_i32, %c0_i32_0 : i32, i32
  }
  func.func @transform_55(%arg0: i32) -> (i32, i32) {
    %c0_i32 = arith.constant 0 : i32
    %c0_i32_0 = arith.constant 0 : i32
    %c0_i32_1 = arith.constant 0 : i32
    return %c0_i32, %c0_i32_0 : i32, i32
  }
  func.func @transform_56(%arg0: i32) -> (i32, i32) {
    %c0_i32 = arith.constant 0 : i32
    %c0_i32_0 = arith.constant 0 : i32
    %c0_i32_1 = arith.constant 0 : i32
    return %c0_i32, %c0_i32_0 : i32, i32
  }
  func.func @transform_57(%arg0: i32) -> (i32, i32) {
    %c0_i32 = arith.constant 0 : i32
    %c0_i32_0 = arith.constant 0 : i32
    %c0_i32_1 = arith.constant 0 : i32
    return %c0_i32, %c0_i32_0 : i32, i32
  }
  func.func @transform_58(%arg0: i32) -> (i32, i32) {
    %c0_i32 = arith.constant 0 : i32
    %c0_i32_0 = arith.constant 0 : i32
    %c0_i32_1 = arith.constant 0 : i32
    return %c0_i32, %c0_i32_0 : i32, i32
  }
  func.func @transform_59(%arg0: i32) -> (i32, i32) {
    %c0_i32 = arith.constant 0 : i32
    %c0_i32_0 = arith.constant 0 : i32
    %c0_i32_1 = arith.constant 0 : i32
    return %c0_i32, %c0_i32_0 : i32, i32
  }
  func.func @transform_60(%arg0: i32) -> (i32, i32) {
    %c0_i32 = arith.constant 0 : i32
    %c0_i32_0 = arith.constant 0 : i32
    %c0_i32_1 = arith.constant 0 : i32
    return %c0_i32, %c0_i32_0 : i32, i32
  }
  func.func @transform_61(%arg0: i32) -> (i32, i32) {
    %c0_i32 = arith.constant 0 : i32
    %c0_i32_0 = arith.constant 0 : i32
    %c0_i32_1 = arith.constant 0 : i32
    return %c0_i32, %c0_i32_0 : i32, i32
  }
  func.func @transform_62(%arg0: i32) -> (i32, i32) {
    %c0_i32 = arith.constant 0 : i32
    %c0_i32_0 = arith.constant 0 : i32
    %c0_i32_1 = arith.constant 0 : i32
    return %c0_i32, %c0_i32_0 : i32, i32
  }
  func.func @transform_63(%arg0: i32) -> (i32, i32) {
    %c0_i32 = arith.constant 0 : i32
    %c0_i32_0 = arith.constant 0 : i32
    return %arg0, %c0_i32 : i32, i32
  }
}

</mosaic_0001>

<bundles_post_ra>
// kernel: lcab_two_forward.1
= control target key start
LH: loop header
LB: loop body
LE: loop exit
PB: predicated region body
PF: predicated region fallthrough
CT: control target
= control target key end

     0   :  { %s12514_s6 = smov 1   ;;  %s12515_s10 = smov 2   ;;  %s14868_s0 = inlined_call_operand.smem [shape: u32[64], index: -1, kind: input, shape index: {}] }
   0x1   :  { %s12598_s5 = sld [smem:[%s14868_s0]]   ;;  %s12516_s14 = smov 3  }
   0x2   :  { %s12603_s9 = sld [smem:[%s14868_s0 + %s12514_s6]]   ;;  %s12517_s18 = smov 4  }
   0x3   :  { %s12608_s13 = sld [smem:[%s14868_s0 + %s12515_s10]]   ;;  %s12518_s22 = smov 5  }
   0x4   :  { %s12613_s17 = sld [smem:[%s14868_s0 + %s12516_s14]]   ;;  %s12519_s26 = smov 6  }
   0x5   :  { %s12618_s21 = sld [smem:[%s14868_s0 + %s12517_s18]]   ;;  %s12520_s30 = smov 7  }
   0x6   :  { %s12623_s25 = sld [smem:[%s14868_s0 + %s12518_s22]]   ;;  %s12521_s4 = smov 8  }
   0x7   :  { %14905 = sst [smem:[#allocation5_spill]] %s12598_s5  ;;  %s12522_s10 = smov 9  }
   0x8   :  { %14906 = sst [smem:[#allocation6_spill]] %s12603_s9  ;;  %s12523_s15 = smov 10  }
   0x9   :  { %14907 = sst [smem:[#allocation7_spill]] %s12608_s13  ;;  %s12524_s20 = smov 11  }
   0xa   :  { %14908 = sst [smem:[#allocation8_spill]] %s12613_s17  ;;  %s12526_s1 = smov 13  }
   0xb   :  { %14909 = sst [smem:[#allocation9_spill]] %s12618_s21  ;;  %s12527_s7 = smov 14  }
   0xc   :  { %14910 = sst [smem:[#allocation10_spill]] %s12623_s25  ;;  %s12529_s22 = smov 16  }
   0xd   :  { %s12628_s29 = sld [smem:[%s14868_s0 + %s12519_s26]]   ;;  %s12525_s26 = smov 12  }
   0xe   :  { %s12633_s3 = sld [smem:[%s14868_s0 + %s12520_s30]]   ;;  %s12530_s28 = smov 17  }
   0xf   :  { %s12638_s8 = sld [smem:[%s14868_s0 + %s12521_s4]]  }
  0x10   :  { %s12643_s14 = sld [smem:[%s14868_s0 + %s12522_s10]]  }
  0x11   :  { %s12648_s19 = sld [smem:[%s14868_s0 + %s12523_s15]]   ;;  %s12528_s15 = smov 15  }
  0x12   :  { %s12653_s24 = sld [smem:[%s14868_s0 + %s12524_s20]]  }
  0x13   :  { %14911 = sst [smem:[#allocation11_spill]] %s12628_s29 }
  0x14   :  { %14912 = sst [smem:[#allocation12_spill]] %s12633_s3 }
  0x15   :  { %14913 = sst [smem:[#allocation13_spill]] %s12638_s8 }
  0x16   :  { %14914 = sst [smem:[#allocation14_spill]] %s12643_s14 }
  0x17   :  { %14915 = sst [smem:[#allocation15_spill]] %s12648_s19 }
  0x18   :  { %14916 = sst [smem:[#allocation16_spill]] %s12653_s24 }
  0x19   :  { %s12658_s30 = sld [smem:[%s14868_s0 + %s12525_s26]]  }
  0x1a   :  { %s12663_s6 = sld [smem:[%s14868_s0 + %s12526_s1]]  }
  0x1b   :  { %s12668_s12 = sld [smem:[%s14868_s0 + %s12527_s7]]   ;;  %s12531_s7 = smov 18  }
  0x1c   :  { %s12673_s20 = sld [smem:[%s14868_s0 + %s12528_s15]]   ;;  %s12532_s15 = smov 19  }
  0x1d   :  { %s12678_s27 = sld [smem:[%s14868_s0 + %s12529_s22]]   ;;  %s12533_s22 = smov 20  }
  0x1e   :  { %s12683_s4 = sld [smem:[%s14868_s0 + %s12530_s28]]   ;;  %s12534_s28 = smov 21  }
  0x1f   :  { %14917 = sst [smem:[#allocation17_spill]] %s12658_s30 }
  0x20   :  { %14918 = sst [smem:[#allocation18_spill]] %s12663_s6 }
  0x21   :  { %14919 = sst [smem:[#allocation19_spill]] %s12668_s12 }
  0x22   :  { %14920 = sst [smem:[#allocation20_spill]] %s12673_s20 }
  0x23   :  { %s12688_s29 = sld [smem:[%s14868_s0 + %s12531_s7]]   ;;  %s12535_s7 = smov 22  }
  0x24   :  { %14921 = sst [smem:[#allocation21_spill]] %s12683_s4 }
  0x25   :  { %s12693_s21 = sld [smem:[%s14868_s0 + %s12532_s15]]   ;;  %s12536_s15 = smov 23  }
  0x26   :  { %s12698_s3 = sld [smem:[%s14868_s0 + %s12533_s22]]   ;;  %s12537_s22 = smov 24  }
  0x27   :  { %s12703_s19 = sld [smem:[%s14868_s0 + %s12534_s28]]   ;;  %s12538_s28 = smov 25  }
  0x28   :  { %s12708_s24 = sld [smem:[%s14868_s0 + %s12535_s7]]   ;;  %s12539_s7 = smov 26  }
  0x29   :  { %s12713_s25 = sld [smem:[%s14868_s0 + %s12536_s15]]   ;;  %s12540_s15 = smov 27  }
  0x2a   :  { %s12718_s30 = sld [smem:[%s14868_s0 + %s12537_s22]]   ;;  %s12541_s22 = smov 28  }
  0x2b   :  { %14922 = sst [smem:[#allocation22_spill]] %s12693_s21 }
  0x2c   :  { %14923 = sst [smem:[#allocation23_spill]] %s12698_s3 }
  0x2d   :  { %s12723_s6 = sld [smem:[%s14868_s0 + %s12538_s28]]   ;;  %s12542_s28 = smov 29  }
  0x2e   :  { %s12728_s17 = sld [smem:[%s14868_s0 + %s12539_s7]]   ;;  %s12543_s7 = smov 30  }
  0x2f   :  { %s12733_s12 = sld [smem:[%s14868_s0 + %s12540_s15]]   ;;  %s12544_s15 = smov 31  }
  0x30   :  { %s12738_s8 = sld [smem:[%s14868_s0 + %s12541_s22]]   ;;  %s12545_s22 = smov 32  }
  0x31   :  { %s12743_s14 = sld [smem:[%s14868_s0 + %s12542_s28]]   ;;  %s12546_s28 = smov 33  }
  0x32   :  { %s12748_s20 = sld [smem:[%s14868_s0 + %s12543_s7]]   ;;  %s12547_s7 = smov 34  }
  0x33   :  { %14924 = sst [smem:[#allocation24_spill]] %s12723_s6 }
  0x34   :  { %s12753_s9 = sld [smem:[%s14868_s0 + %s12544_s15]]   ;;  %s12548_s15 = smov 35  }
  0x35   :  { %s12758_s13 = sld [smem:[%s14868_s0 + %s12545_s22]]   ;;  %s12549_s22 = smov 36  }
  0x37   :  { %14925 = sst [smem:[#allocation25_spill]] %s12743_s14 }
  0x38   :  { %14926 = sst [smem:[#allocation26_spill]] %s12748_s20 }
  0x39   :  { %s12763_s14 = sld [smem:[%s14868_s0 + %s12546_s28]]   ;;  %s12550_s28 = smov 37  }
  0x3a   :  { %14927 = sst [smem:[#allocation27_spill]] %s12753_s9 }
  0x3b   :  { %14928 = sst [smem:[#allocation28_spill]] %s12758_s13 }
  0x3c   :  { %s12768_s20 = sld [smem:[%s14868_s0 + %s12547_s7]]   ;;  %s12551_s7 = smov 38  }
  0x3d   :  { %s12773_s9 = sld [smem:[%s14868_s0 + %s12548_s15]]   ;;  %s12552_s15 = smov 39  }
  0x3e   :  { %s12778_s13 = sld [smem:[%s14868_s0 + %s12549_s22]]   ;;  %s12553_s22 = smov 40  }
  0x3f   :  { %14929 = sst [smem:[#allocation29_spill]] %s12763_s14 }
  0x40   :  { %s12783_s14 = sld [smem:[%s14868_s0 + %s12550_s28]]   ;;  %s12554_s28 = smov 41  }
  0x42   :  { %14930 = sst [smem:[#allocation30_spill]] %s12768_s20 }
  0x43   :  { %14931 = sst [smem:[#allocation31_spill]] %s12773_s9 }
  0x44   :  { %14932 = sst [smem:[#allocation32_spill]] %s12778_s13 }
  0x45   :  { %s12788_s20 = sld [smem:[%s14868_s0 + %s12551_s7]]   ;;  %s12555_s7 = smov 42  }
  0x46   :  { %14933 = sst [smem:[#allocation33_spill]] %s12783_s14 }
  0x47   :  { %s12793_s9 = sld [smem:[%s14868_s0 + %s12552_s15]]   ;;  %s12556_s15 = smov 43  }
  0x48   :  { %s12798_s13 = sld [smem:[%s14868_s0 + %s12553_s22]]   ;;  %s12557_s22 = smov 44  }
  0x49   :  { %s12803_s14 = sld [smem:[%s14868_s0 + %s12554_s28]]   ;;  %s12558_s28 = smov 45  }
  0x4b   :  { %14934 = sst [smem:[#allocation34_spill]] %s12788_s20 }
  0x4c   :  { %s12808_s20 = sld [smem:[%s14868_s0 + %s12555_s7]]   ;;  %s12559_s7 = smov 46  }
  0x4d   :  { %14935 = sst [smem:[#allocation35_spill]] %s12793_s9 }
  0x4e   :  { %14936 = sst [smem:[#allocation36_spill]] %s12798_s13 }
  0x4f   :  { %14937 = sst [smem:[#allocation37_spill]] %s12803_s14 }
  0x50   :  { %s12813_s9 = sld [smem:[%s14868_s0 + %s12556_s15]]   ;;  %s12560_s15 = smov 47  }
  0x51   :  { %s12818_s13 = sld [smem:[%s14868_s0 + %s12557_s22]]   ;;  %s12561_s22 = smov 48  }
  0x52   :  { %14938 = sst [smem:[#allocation38_spill]] %s12808_s20 }
  0x53   :  { %s12823_s14 = sld [smem:[%s14868_s0 + %s12558_s28]]   ;;  %s12562_s28 = smov 49  }
  0x54   :  { %s12828_s20 = sld [smem:[%s14868_s0 + %s12559_s7]]   ;;  %s12563_s7 = smov 50  }
  0x56   :  { %14939 = sst [smem:[#allocation39_spill]] %s12813_s9 }
  0x57   :  { %14940 = sst [smem:[#allocation40_spill]] %s12818_s13 }
  0x58   :  { %s12833_s9 = sld [smem:[%s14868_s0 + %s12560_s15]]   ;;  %s12564_s15 = smov 51  }
  0x59   :  { %14941 = sst [smem:[#allocation41_spill]] %s12823_s14 }
  0x5a   :  { %14942 = sst [smem:[#allocation42_spill]] %s12828_s20 }
  0x5b   :  { %s12838_s13 = sld [smem:[%s14868_s0 + %s12561_s22]]   ;;  %s12565_s22 = smov 52  }
  0x5c   :  { %s12843_s14 = sld [smem:[%s14868_s0 + %s12562_s28]]   ;;  %s12566_s28 = smov 53  }
  0x5d   :  { %s12848_s20 = sld [smem:[%s14868_s0 + %s12563_s7]]   ;;  %s12567_s7 = smov 54  }
  0x5e   :  { %14943 = sst [smem:[#allocation43_spill]] %s12833_s9 }
  0x5f   :  { %s12853_s9 = sld [smem:[%s14868_s0 + %s12564_s15]]   ;;  %s12568_s15 = smov 55  }
  0x60   :  { %s12863_s21 = sld [smem:[%s14868_s0 + %s12566_s28]]   ;;  %s12570_s28 = smov 57  }
  0x61   :  { %14944 = sst [smem:[#allocation44_spill]] %s12838_s13 }
  0x62   :  { %s12858_s13 = sld [smem:[%s14868_s0 + %s12565_s22]]   ;;  %s12569_s22 = smov 56  }
  0x63   :  { %14945 = sst [smem:[#allocation45_spill]] %s12848_s20 }
  0x64   :  { %s12868_s20 = sld [smem:[%s14868_s0 + %s12567_s7]]   ;;  %s12571_s7 = smov 58  }
  0x65   :  { %14946 = sst [smem:[#allocation46_spill]] %s12853_s9 }
  0x66   :  { %14948 = sst [smem:[#allocation48_spill]] %s12863_s21 }
  0x67   :  { %s12873_s9 = sld [smem:[%s14868_s0 + %s12568_s15]]   ;;  %s12572_s15 = smov 59  }
  0x68   :  { %14947 = sst [smem:[#allocation47_spill]] %s12858_s13 }
  0x69   :  { %s12878_s13 = sld [smem:[%s14868_s0 + %s12569_s22]]   ;;  %s12573_s22 = smov 60  }
  0x6a   :  { %14949 = sst [smem:[#allocation49_spill]] %s12868_s20 }
  0x6b   :  { %s12883_s21 = sld [smem:[%s14868_s0 + %s12570_s28]]   ;;  %s12574_s28 = smov 61  }
  0x6c   :  { %s12888_s20 = sld [smem:[%s14868_s0 + %s12571_s7]]   ;;  %s12575_s7 = smov 62  }
  0x6d   :  { %14950 = sst [smem:[#allocation50_spill]] %s12873_s9 }
  0x6e   :  { %s12893_s9 = sld [smem:[%s14868_s0 + %s12572_s15]]   ;;  %s12576_s15 = smov 63  }
  0x6f   :  { %14951 = sst [smem:[#allocation51_spill]] %s12878_s13 }
  0x70   :  { %s12898_s13 = sld [smem:[%s14868_s0 + %s12573_s22]]  }
  0x71   :  { %14952 = sst [smem:[#allocation52_spill]] %s12883_s21 }
  0x72   :  { %14953 = sst [smem:[#allocation53_spill]] %s12888_s20 }
  0x73   :  { %s12903_s21 = sld [smem:[%s14868_s0 + %s12574_s28]]  }
  0x74   :  { %s12908_s20 = sld [smem:[%s14868_s0 + %s12575_s7]]  }
  0x75   :  { %s12913_s4 = sld [smem:[%s14868_s0 + %s12576_s15]]  }
  0x76   :  { %132 = vsyncpa [#allocation3], 0  ;;  %s12915_s22 = smov 0  }
  0x77 LB: > { %s14954_s3 = sld [smem:[#allocation23_spill]]  ;;  %s1652_s23 = sshll.u32 %s12843_s14, 4  ;;  %s12512_s22 = sphi %s12915_s22, %s138_s22   ;;  %s1653_s23 = int_to_ptr.hbm [resolvable:$true] %s1652_s23 }
  0x78   : > { %s12922_s26 = sadd.s32 4294967295, %s12512_s22   ;;  %p10060_p0 = scmp.ge.s32.totalorder %s12512_s22, 1 }
  0x79   : > { %p1497_p1 = scmp.lt.s32.totalorder %s12512_s22, 3  ;;  %p12182_p2 = scmp.eq.s32.totalorder %s12922_s26, 0 }
  0x7a   : > { %s12577_s28 = smov [#allocation2]   ;;  %s12472_s7 = sshra.s32 %s1653_s23, 4  ;;  %s12473_s7 = int_to_ptr.hbm [resolvable:$true] %s12472_s7 }
  0x7b   : > { %p12927_p3 = pnand %p10060_p0, %p1497_p1  ;;  %s1654_s1 = sshll.u32 %s12577_s28, 4  ;;  %s1655_s1 = int_to_ptr.vmem [resolvable:$true] %s1654_s1 }
  0x7c   : > { %s12474_s10 = scalar_lea.hbm %s12473_s7, 2048  ;;  %s12479_s11 = scalar_lea.hbm %s12843_s14, 2048 }
  0x7d   : > { %p12178_p4 = pneg %p12927_p3  ;;  %p12475_p6 = scmp.ne.s32.totalorder %s12473_s7, %s12474_s10 }
  0x7e   : > { %p12480_p10 = scmp.lt.s32.totalorder %s12473_s7, %s12843_s14  ;;  %p12481_p11 = scmp.lt.s32.totalorder %s12479_s11, %s12474_s10 }
  0x7f   : > { %p12935_p5 = pnand %p12182_p2, %p12178_p4 }
  0x80   : > { %p12482_p12 = por %p12481_p11, %p12480_p10 }
  0x81   : > { %p12476_p7 = pneg %p12935_p5 }
  0x83   : > { %p12477_p8 = pnand %p12476_p7, %p12475_p6 }
  0x85   : > { %p12478_p9 = pneg %p12477_p8 }
  0x87   : > { %p12483_p13 = pnand %p12482_p12, %p12478_p9 }
  0x89   : > { %12486 = shalt.err (!%p12483_p13)
}
  0x8a   : > { %s12578_s15 = smov 64   ;;  %s12579_s16 = smov 4  }
  0x8b   : > { %12181 = dma.hbm_to_vmem [thread:$0]  (!%p12935_p5), %s1653_s23, 32768, %s1655_s1, [#allocation3], %s12578_s15, %s12578_s15, %s12579_s16  }
  0x8c   : > { %1718 = sbr.rel (%p12927_p3) target bundleno = 11067 (0x2b3b), region = 272 }
  0x91   : > { %12507 = dma.done.wait (%p12182_p2), [#allocation3], 32768  }
  0x92   : > { %12509 = vsyncadd (%p12182_p2), [#allocation3], 4294934528  ;;  %s14957_s5 = sld [smem:[#allocation5_spill]]  ;;  %s10065_s18 = sshll.u32 %s12922_s26, 1  ;;  %v11821_v0 = vld [vmem:[%s12908_s20 + $0x10] sm:$0xff]  ;;  %v11820_v1 = vld [vmem:[%s12908_s20 + $0x8] sm:$0xff] }
  0x93   : > { %p1864_p0 = scmp.lt.s32.totalorder %s10065_s18, 3  ;;  %1916 = vmatpush.bf16.msra.mxu1 %v11821_v0  ;;  %vm1907_vm0 = vcmask 392192   ;;  %v11819_v2 = vld [vmem:[%s12908_s20] sm:$0xff]  ;;  %vm1927_vm1 = vcmask 261120   ;;  %v12580_v13 = vmov 32.0   ;;  %s14888_s0 = smov 96  }
  0x94   : > { %v12268_v6 = vld [vmem:[%s12893_s9] ss:$0 sm:$0xff]  ;;  %12304 = vrcp.f32 %v12580_v13  ;;  %s14892_s1 = smov 112   ;;  %vm2091_vm15 = vcmask 130048   ;;  %s14893_s2 = smov 64  }
  0x95   : > { %s15025_s18 = smov (!%p1864_p0, %s10065_s18), 3  ;;  %v12269_v44 = vld [vmem:[%s12903_s21] ss:$0 sm:$0xff]  ;;  %s14891_s7 = smov 80  }
  0x96   : > { %s10066_s28 = sshll.u32 %s15025_s18, 3  ;;  %v12270_v48 = vld [vmem:[%s12898_s13] ss:$0 sm:$0xff]  ;;  %s14890_s10 = smov 48  }
  0x97   : > { %1917 = vmatpush.bf16.msra.mxu1 %v11820_v1  ;;  %s14958_s6 = sld [smem:[#allocation24_spill]]  ;;  %s14895_s18 = smov 32  }
  0x98   : > { %s1867_s23 = scalar_lea.vmem %s14957_s5, %s10066_s28  ;;  %s14959_s11 = sld [smem:[#allocation21_spill]] }
  0x99   : > { %v1876_v3 = vld [vmem:[%s1867_s23] sm:$0xff]  ;;  %v1877_v4 = vld [vmem:[%s1867_s23 + $0x8] sm:$0xff]  ;;  %s14960_s15 = sld [smem:[#allocation22_spill]]  ;;  %s14984_s5 = smov 32  }
  0x9a   : > { %v1884_v5 = vpack.c.bf16 %v1877_v4, %v1876_v3  ;;  %v12305_v14 = vpop.eup %12304  ;;  %s14961_s16 = sld [smem:[#allocation47_spill]] }
  0x9b   : > { %1918 = vmatpush.bf16.msra.mxu1 %v11819_v2  ;;  %v1935_v15 = vmul.f32 32.0, %v12305_v14  ;;  %vm1939_vm2 = vweird.f32 %v12305_v14  ;;  %s14962_s28 = sld [smem:[#allocation48_spill]] }
  0x9c   : > { %s14963_s23 = sld [smem:[#allocation46_spill]] }
  0x9d   : > { %v1936_v16 = vsub.f32 1.0, %v1935_v15 }
  0x9e   : > { %10081 = vmatmul.msk.bf16.vlgmr.msra.gmra.mxu1 %vm1907_vm0, %v1884_v5 }
  0x9f   : > { %v1937_v17 = vmul.f32 %v12305_v14, %v1936_v16 }
  0xa1   : > { %v1938_v18 = vadd.f32 %v12305_v14, %v1937_v17 }
  0xa3   : > { %v12959_v19 = vsel %vm1939_vm2, %v12305_v14, %v1938_v18 }
 0x11b   : > { %v1920_v7 = vpop.f32.mrf.mxu1 }
 0x11c   : > { %v1921_v8 = vadd.f32 %v12268_v6, %v1920_v7 }
 0x11e   : > { %v1928_v9 = vsel %vm1927_vm1, %v1921_v8, 0.0 }
 0x11f   : > { %1929 = vadd.xlane.f32.xlu0 %v1928_v9 }
 0x123   : > { %v1922_v10 = vpop.f32.mrf.mxu1 }
 0x124   : > { %v1923_v11 = vadd.f32 %v12268_v6, %v1922_v10  ;;  %v11823_v6 = vld [vmem:[%s12738_s8 + $0x8] sm:$0xff] }
 0x125   : > { %2075 = vmatpush.bf16.msrb.mxu1 %v11823_v6 }
 0x126   : > { %v1931_v12 = vsel %vm1927_vm1, %v1923_v11, 0.0 }
 0x127   : > { %1932 = vadd.xlane.f32.xlu0 %v1931_v12 }
 0x192   : > { %v1930_v20 = vpop.xlane.xlu0 %1929 }
 0x193   : > { %v1941_v21 = vmul.f32 %v12959_v19, %v1930_v20 }
 0x195   : > { %v1943_v22 = vsub.f32 %v1921_v8, %v1941_v21  ;;  %v11822_v8 = vld [vmem:[%s12738_s8] sm:$0xff] }
 0x196   : > { %2076 = vmatpush.bf16.msrb.mxu1 %v11822_v8 }
 0x197   : > { %v1945_v23 = vmul.f32 %v1943_v22, %v1943_v22 }
 0x199   : > { %v1947_v24 = vsel %vm1927_vm1, %v1945_v23, 0.0 }
 0x19a   : > { %1948 = vadd.xlane.f32.xlu1 %v1947_v24  ;;  %v1933_v25 = vpop.xlane.xlu0 %1932 }
 0x19b   : > { %v1942_v26 = vmul.f32 %v12959_v19, %v1933_v25 }
 0x19d   : > { %v1944_v27 = vsub.f32 %v1923_v11, %v1942_v26 }
 0x19f   : > { %v1946_v28 = vmul.f32 %v1944_v27, %v1944_v27 }
 0x1a1   : > { %v1950_v29 = vsel %vm1927_vm1, %v1946_v28, 0.0  ;;  %v12271_v28 = vld [vmem:[%s12708_s24] ss:$0 sm:$0xff] }
 0x1a2   : > { %1951 = vadd.xlane.f32.xlu1 %v1950_v29 }
 0x20d   : > { %v1949_v30 = vpop.xlane.xlu1 %1948 }
 0x20e   : > { %v1953_v31 = vmul.f32 %v1949_v30, %v12959_v19 }
 0x210   : > { %v1955_v32 = vadd.f32 1e-05, %v1953_v31 }
 0x212   : > { %12306 = vrsqrt.f32 %v1955_v32  ;;  %vm1963_vm4 = vweird.f32 %v1955_v32 }
 0x215   : > { %v1952_v33 = vpop.xlane.xlu1 %1951 }
 0x216   : > { %v1954_v34 = vmul.f32 %v1952_v33, %v12959_v19  ;;  %v12272_v33 = vld [vmem:[%s12703_s19] ss:$0 sm:$0xff] }
 0x218   : > { %v12307_v35 = vpop.eup %12306  ;;  %v1956_v36 = vadd.f32 1e-05, %v1954_v34 }
 0x219   : > { %v1958_v37 = vmul.f32 %v12307_v35, %v1955_v32  ;;  %vm1964_vm3 = vweird.f32 %v12307_v35 }
 0x21a   : > { %12308 = vrsqrt.f32 %v1956_v36  ;;  %vm1965_vm5 = vmor %vm1963_vm4, %vm1964_vm3  ;;  %vm1973_vm7 = vweird.f32 %v1956_v36 }
 0x21b   : > { %v1959_v38 = vmul.f32 %v12307_v35, %v1958_v37 }
 0x21d   : > { %v1960_v39 = vmul.f32 0.5, %v1959_v38 }
 0x21f   : > { %v1961_v40 = vsub.f32 1.5, %v1960_v39  ;;  %v12273_v39 = vld [vmem:[%s12733_s12] ss:$0 sm:$0xff] }
 0x220   : > { %v12309_v41 = vpop.eup %12308 }
 0x221   : > { %v1962_v42 = vmul.f32 %v12307_v35, %v1961_v40  ;;  %v1968_v43 = vmul.f32 %v12309_v41, %v1956_v36  ;;  %vm1974_vm6 = vweird.f32 %v12309_v41 }
 0x222   : > { %vm1975_vm8 = vmor %vm1973_vm7, %vm1974_vm6  ;;  %vm2573_vm7 = vcmask 523264  }
 0x223   : > { %v1969_v45 = vmul.f32 %v12309_v41, %v1968_v43  ;;  %v1966_v46 = vsel %vm1965_vm5, %v12307_v35, %v1962_v42 }
 0x224   : > { %v1977_v47 = vmul.f32 %v1966_v46, %v1943_v22 }
 0x225   : > { %v1970_v49 = vmul.f32 0.5, %v1969_v45 }
 0x226   : > { %v1982_v50 = vmul.f32 %v12269_v44, %v1977_v47  ;;  %v2114_v47 = vld [vmem:[%s12678_s27] sm:$0xff] }
 0x227   : > { %v1971_v51 = vsub.f32 1.5, %v1970_v49 }
 0x228   : > { %v12969_v52 = vadd.f32 %v12270_v48, %v1982_v50 }
 0x229   : > { %v1972_v53 = vmul.f32 %v12309_v41, %v1971_v51 }
 0x22a   : > { %v1991_v54 = vsel %vm1927_vm1, %v12969_v52, 0.0 }
 0x22b   : > { %1992 = vadd.xlane.f32.xlu2 %v1991_v54  ;;  %v1976_v55 = vsel %vm1975_vm8, %v12309_v41, %v1972_v53  ;;  %v2115_v53 = vld [vmem:[%s12678_s27 + $0x8] sm:$0xff]  ;;  %vm2575_vm8 = vcmask 785408  }
 0x22c   : > { %v1978_v56 = vmul.f32 %v1976_v55, %v1944_v27 }
 0x22e   : > { %v1983_v57 = vmul.f32 %v12269_v44, %v1978_v56 }
 0x230   : > { %v12973_v58 = vadd.f32 %v12270_v48, %v1983_v57 }
 0x232   : > { %v1994_v59 = vsel %vm1927_vm1, %v12973_v58, 0.0 }
 0x233   : > { %1995 = vadd.xlane.f32.xlu2 %v1994_v59 }
 0x29e   : > { %v1993_v60 = vpop.xlane.xlu2 %1992 }
 0x29f   : > { %v1997_v61 = vmul.f32 %v1993_v60, %v12959_v19 }
 0x2a1   : > { %v1999_v62 = vsub.f32 %v12969_v52, %v1997_v61 }
 0x2a3   : > { %v2001_v63 = vmul.f32 %v1999_v62, %v1999_v62 }
 0x2a5   : > { %v2003_v0 = vsel %vm1927_vm1, %v2001_v63, 0.0 }
 0x2a6   : > { %2004 = vadd.xlane.f32.xlu0 %v2003_v0  ;;  %v1996_v1 = vpop.xlane.xlu2 %1995 }
 0x2a7   : > { %v1998_v2 = vmul.f32 %v1996_v1, %v12959_v19 }
 0x2a9   : > { %v2000_v3 = vsub.f32 %v12973_v58, %v1998_v2 }
 0x2ab   : > { %v2002_v4 = vmul.f32 %v2000_v3, %v2000_v3 }
 0x2ad   : > { %v2006_v5 = vsel %vm1927_vm1, %v2002_v4, 0.0 }
 0x2ae   : > { %2007 = vadd.xlane.f32.xlu1 %v2006_v5 }
 0x319   : > { %v2005_v7 = vpop.xlane.xlu0 %2004 }
 0x31a   : > { %v2009_v9 = vmul.f32 %v2005_v7, %v12959_v19 }
 0x31c   : > { %v2011_v10 = vadd.f32 1e-05, %v2009_v9 }
 0x31e   : > { %12310 = vrsqrt.f32 %v2011_v10  ;;  %vm2019_vm10 = vweird.f32 %v2011_v10 }
 0x321   : > { %v2008_v11 = vpop.xlane.xlu1 %2007 }
 0x322   : > { %v2010_v12 = vmul.f32 %v2008_v11, %v12959_v19 }
 0x324   : > { %v12311_v13 = vpop.eup %12310  ;;  %v2012_v14 = vadd.f32 1e-05, %v2010_v12 }
 0x325   : > { %v2014_v15 = vmul.f32 %v12311_v13, %v2011_v10  ;;  %vm2020_vm9 = vweird.f32 %v12311_v13 }
 0x326   : > { %12312 = vrsqrt.f32 %v2012_v14  ;;  %vm2021_vm11 = vmor %vm2019_vm10, %vm2020_vm9  ;;  %vm2029_vm13 = vweird.f32 %v2012_v14  ;;  %vm2579_vm9 = vcmask 1043456  }
 0x327   : > { %v2015_v16 = vmul.f32 %v12311_v13, %v2014_v15 }
 0x329   : > { %v2016_v17 = vmul.f32 0.5, %v2015_v16 }
 0x32b   : > { %v2017_v18 = vsub.f32 1.5, %v2016_v17 }
 0x32c   : > { %v12313_v20 = vpop.eup %12312 }
 0x32d   : > { %v2018_v21 = vmul.f32 %v12311_v13, %v2017_v18  ;;  %v2024_v22 = vmul.f32 %v12313_v20, %v2012_v14  ;;  %vm2030_vm12 = vweird.f32 %v12313_v20  ;;  %v10094_v18 = vld [vmem:[%s12678_s27 + $0x10] sm:$0xff] }
 0x32e   : > { %vm2031_vm14 = vmor %vm2029_vm13, %vm2030_vm12 }
 0x32f   : > { %v2025_v23 = vmul.f32 %v12313_v20, %v2024_v22  ;;  %v2022_v24 = vsel %vm2021_vm11, %v12311_v13, %v2018_v21 }
 0x330   : > { %v2033_v27 = vmul.f32 %v2022_v24, %v1999_v62  ;;  %v10095_v24 = vld [vmem:[%s12678_s27 + $0x18] sm:$0xff] }
 0x331   : > { %v2026_v25 = vmul.f32 0.5, %v2025_v23 }
 0x332   : > { %v2038_v32 = vmul.f32 %v12271_v28, %v2033_v27 }
 0x333   : > { %v2027_v26 = vsub.f32 1.5, %v2026_v25 }
 0x334   : > { %v2043_v35 = vadd.f32 %v12272_v33, %v2038_v32 }
 0x335   : > { %v2028_v29 = vmul.f32 %v12313_v20, %v2027_v26 }
 0x337   : > { %v2032_v30 = vsel %vm2031_vm14, %v12313_v20, %v2028_v29  ;;  %vm2697_vm14 = vcmask 519168  }
 0x338   : > { %v2034_v31 = vmul.f32 %v2032_v30, %v2000_v3 }
 0x33a   : > { %v2039_v34 = vmul.f32 %v12271_v28, %v2034_v31 }
 0x33c   : > { %v2044_v36 = vadd.f32 %v12272_v33, %v2039_v34 }
 0x33e   : > { %v2049_v37 = vpack.c.bf16 %v2044_v36, %v2043_v35 }
 0x340   : > { %10090 = vmatmul.msk.bf16.vlgmr.msrb.gmra.mxu1 %vm1927_vm1, %v2049_v37 }
 0x3bd   : > { %v2078_v38 = vpop.f32.mrf.mxu1 }
 0x3be   : > { %v2079_v41 = vadd.f32 %v12273_v39, %v2078_v38 }
 0x3c5   : > { %v2080_v40 = vpop.f32.mrf.mxu1 }
 0x3c6   : > { %v2081_v42 = vadd.f32 %v12273_v39, %v2080_v40 }
 0x3c8   : > { %v12991_v43 = vpack.c.bf16 %v2081_v42, %v2079_v41 }
 0x3ca   : > { %2089 = vrot.lane.b32.xlu2 %v12991_v43, %s14888_s0 }
 0x3d2   : > { %2162 = vrot.lane.b32.xlu2 %v12991_v43, %s14892_s1 }
 0x424   : > { %v2090_v44 = vpop.permute.xlu2 %2089 }
 0x425   : > { %v2096_v45 = vsel %vm2091_vm15, %v2090_v44, 0 }
 0x426   : > { %2105 = vmatpush.bf16.xpose.msra.mxu2 %v2096_v45 }
 0x42c   : > { %v2163_v14 = vpop.permute.xlu2 %2162 }
 0x42d   : > { %10091 = vmatmul.msk.bf16.vlgmr.msra.gmra.mxu2 %vm2091_vm15, %v12991_v43 }
 0x4b0   : > { %v2107_v46 = vpop.f32.mrf.mxu2 }
 0x4b1   : > { %v2112_v48 = vmul.f32 0.25, %v2107_v46 }
 0x4b3   : > { %v2116_v49 = vadd.f32 %v2114_v47, %v2112_v48  ;;  %v11825_v47 = vld [vmem:[%s12728_s17 + $0x8] sm:$0xff]  ;;  %v11824_v48 = vld [vmem:[%s12728_s17] sm:$0xff] }
 0x4b4   : > { %2253 = vmatpush.bf16.msra.mxu0 %v11825_v47  ;;  %v11832_v47 = vld [vmem:[%s14954_s3 + $0x20] sm:$0xff] }
 0x4b5   : > { %v2118_v50 = vsel %vm2091_vm15, %v2116_v49, -inf }
 0x4b6   : > { %2119 = vmax.xlane.f32.xlu0 %v2118_v50 }
 0x4b8   : > { %v2109_v51 = vpop.f32.mrf.mxu2  ;;  %2276 = vmatpush.bf16.msrb.mxu0 %v11824_v48  ;;  %v11831_v48 = vld [vmem:[%s14954_s3 + $0x18] sm:$0xff] }
 0x4b9   : > { %v2113_v54 = vmul.f32 0.25, %v2109_v51 }
 0x4bb   : > { %v2117_v55 = vadd.f32 %v2115_v53, %v2113_v54 }
 0x4bd   : > { %v2121_v56 = vsel %vm2091_vm15, %v2117_v55, -inf }
 0x4be   : > { %2122 = vmax.xlane.f32.xlu1 %v2121_v56 }
 0x529   : > { %v2120_v57 = vpop.xlane.xlu0 %2119 }
 0x52a   : > { %v2124_v59 = vsub.f32 %v2116_v49, %v2120_v57  ;;  %v12274_v57 = vld [vmem:[%s14958_s6] ss:$0 sm:$0xff]  ;;  %s14985_s6 = smov 64  }
 0x52c   : > { %v2126_v60 = vmul.f32 1.442695, %v2124_v59 }
 0x52e   : > { %12314 = vpow2.f32 %v2126_v60 }
 0x531   : > { %v2123_v61 = vpop.xlane.xlu1 %2122 }
 0x532   : > { %v2125_v62 = vsub.f32 %v2117_v55, %v2123_v61 }
 0x534   : > { %v12315_v63 = vpop.eup %12314  ;;  %v2128_v0 = vmul.f32 1.442695, %v2125_v62 }
 0x535   : > { %v2130_v1 = vsel %vm2091_vm15, %v12315_v63, 0.0 }
 0x536   : > { %12316 = vpow2.f32 %v2128_v0  ;;  %2131 = vadd.xlane.f32.xlu0 %v2130_v1 }
 0x53c   : > { %v12317_v2 = vpop.eup %12316 }
 0x53d   : > { %v2133_v3 = vsel %vm2091_vm15, %v12317_v2, 0.0 }
 0x53e   : > { %2134 = vadd.xlane.f32.xlu1 %v2133_v3 }
 0x54a   : > { %2141 = vrot.lane.b32.xlu0 %v12991_v43, %s14893_s2 }
 0x557   : > { %2164 = vrot.lane.b32.xlu1 %v12991_v43, %s14891_s7 }
 0x5a9   : > { %v2132_v4 = vpop.xlane.xlu0 %2131 }
 0x5b1   : > { %v2135_v5 = vpop.xlane.xlu1 %2134 }
 0x5b2   : > { %12318 = vrcp.f32 %v2135_v5 }
 0x5b3   : > { %12320 = vrcp.f32 %v2132_v4 }
 0x5b8   : > { %v12319_v6 = vpop.eup %12318 }
 0x5b9   : > { %v12321_v7 = vpop.eup %12320  ;;  %v2139_v8 = vmul.f32 %v12319_v6, %v12317_v2 }
 0x5ba   : > { %v2138_v10 = vmul.f32 %v12321_v7, %v12315_v63 }
 0x5bc   : > { %v2142_v9 = vpop.permute.xlu0 %2141  ;;  %v2140_v11 = vpack.c.bf16 %v2139_v8, %v2138_v10 }
 0x5bd   : > { %2154 = vmatpush.bf16.msra.mxu3 %v2142_v9 }
 0x5c0   : > { %10092 = vmatmul.msk.bf16.vlgmr.msra.gmra.mxu3 %vm2091_vm15, %v2140_v11  ;;  %v11827_v11 = vld [vmem:[%s12688_s29 + $0x8] sm:$0xff] }
 0x5c9   : > { %v2165_v12 = vpop.permute.xlu1 %2164 }
 0x5ca   : > { %v2170_v13 = vsel %vm2091_vm15, %v2165_v12, 0 }
 0x5cb   : > { %2179 = vmatpush.bf16.xpose.msrb.mxu3 %v2170_v13 }
 0x5d2   : > { %10093 = vmatmul.msk.bf16.vlgmr.msrb.gmra.mxu3 %vm2091_vm15, %v2163_v14  ;;  %v11826_v14 = vld [vmem:[%s12688_s29] sm:$0xff] }
 0x5d3   : > { %2377 = vmatpush.bf16.msra.mxu3 %v11827_v11 }
 0x5d7   : > { %2378 = vmatpush.bf16.msra.mxu3 %v11826_v14  ;;  %v12278_v14 = vld [vmem:[%s14960_s15] ss:$0 sm:$0xff]  ;;  %s14965_s15 = sld [smem:[#allocation37_spill]] }
 0x643   : > { %v2156_v15 = vpop.f32.mrf.mxu3 }
 0x64b   : > { %v2158_v16 = vpop.f32.mrf.mxu3 }
 0x64c   : > { %v2161_v51 = vpack.c.bf16 %v2158_v16, %v2156_v15 }
 0x655   : > { %v2181_v17 = vpop.f32.mrf.mxu3 }
 0x656   : > { %v2186_v20 = vmul.f32 0.25, %v2181_v17 }
 0x658   : > { %v2191_v21 = vadd.f32 %v10094_v18, %v2186_v20 }
 0x65a   : > { %v2193_v22 = vsel %vm2091_vm15, %v2191_v21, -inf }
 0x65b   : > { %2194 = vmax.xlane.f32.xlu2 %v2193_v22 }
 0x65d   : > { %v2183_v23 = vpop.f32.mrf.mxu3 }
 0x65e   : > { %v2187_v25 = vmul.f32 0.25, %v2183_v23 }
 0x660   : > { %v2192_v26 = vadd.f32 %v10095_v24, %v2187_v25 }
 0x662   : > { %v2196_v27 = vsel %vm2091_vm15, %v2192_v26, -inf }
 0x663   : > { %2197 = vmax.xlane.f32.xlu0 %v2196_v27 }
 0x6ce   : > { %v2195_v28 = vpop.xlane.xlu2 %2194 }
 0x6cf   : > { %v2199_v29 = vsub.f32 %v2191_v21, %v2195_v28 }
 0x6d1   : > { %v2201_v30 = vmul.f32 1.442695, %v2199_v29 }
 0x6d3   : > { %12322 = vpow2.f32 %v2201_v30 }
 0x6d6   : > { %v2198_v31 = vpop.xlane.xlu0 %2197 }
 0x6d7   : > { %v2200_v32 = vsub.f32 %v2192_v26, %v2198_v31 }
 0x6d9   : > { %v12323_v33 = vpop.eup %12322  ;;  %v2203_v34 = vmul.f32 1.442695, %v2200_v32  ;;  %v12275_v32 = vld [vmem:[%s12718_s30] ss:$0 sm:$0xff] }
 0x6da   : > { %v2205_v35 = vsel %vm2091_vm15, %v12323_v33, 0.0 }
 0x6db   : > { %12324 = vpow2.f32 %v2203_v34  ;;  %2206 = vadd.xlane.f32.xlu1 %v2205_v35 }
 0x6e1   : > { %v12325_v36 = vpop.eup %12324 }
 0x6e2   : > { %v2208_v37 = vsel %vm2091_vm15, %v12325_v36, 0.0 }
 0x6e3   : > { %2209 = vadd.xlane.f32.xlu2 %v2208_v37 }
 0x6fb   : > { %2216 = vrot.lane.b32.xlu2 %v12991_v43, %s14890_s10 }
 0x74e   : > { %v2207_v38 = vpop.xlane.xlu1 %2206 }
 0x74f   : > { %12326 = vrcp.f32 %v2207_v38 }
 0x755   : > { %v12327_v40 = vpop.eup %12326 }
 0x756   : > { %v2210_v39 = vpop.xlane.xlu2 %2209  ;;  %v2213_v42 = vmul.f32 %v12327_v40, %v12323_v33 }
 0x757   : > { %12328 = vrcp.f32 %v2210_v39 }
 0x75d   : > { %v12329_v41 = vpop.eup %12328 }
 0x75e   : > { %v2214_v44 = vmul.f32 %v12329_v41, %v12325_v36  ;;  %v2217_v45 = vpop.permute.xlu2 %2216  ;;  %v12276_v36 = vld [vmem:[%s12713_s25] ss:$0 sm:$0xff] }
 0x75f   : > { %2229 = vmatpush.bf16.msra.mxu1 %v2217_v45  ;;  %v11834_v45 = vld [vmem:[%s14954_s3 + $0x30] sm:$0xff] }
 0x760   : > { %v2215_v46 = vpack.c.bf16 %v2214_v44, %v2213_v42  ;;  %v11835_v44 = vld [vmem:[%s14954_s3 + $0x38] sm:$0xff] }
 0x762   : > { %10096 = vmatmul.msk.bf16.vlgmr.msra.gmra.mxu1 %vm2091_vm15, %v2215_v46  ;;  %v11833_v46 = vld [vmem:[%s14954_s3 + $0x28] sm:$0xff] }
 0x763   : > { %2472 = vmatpush.bf16.msrb.mxu1 %v11835_v44 }
 0x767   : > { %2473 = vmatpush.bf16.msrb.mxu1 %v11834_v45 }
 0x76b   : > { %2474 = vmatpush.bf16.msrb.mxu1 %v11833_v46 }
 0x76f   : > { %2475 = vmatpush.bf16.msrb.mxu1 %v11832_v47 }
 0x773   : > { %2476 = vmatpush.bf16.msrb.mxu1 %v11831_v48 }
 0x7df   : > { %v2231_v49 = vpop.f32.mrf.mxu1 }
 0x7e7   : > { %v2233_v43 = vpop.f32.mrf.mxu1 }
 0x7e8   : > { %v2236_v50 = vpack.c.bf16 %v2233_v43, %v2231_v49  ;;  %v11830_v49 = vld [vmem:[%s14954_s3 + $0x10] sm:$0xff]  ;;  %v11829_v43 = vld [vmem:[%s14954_s3 + $0x8] sm:$0xff] }
 0x7e9   : > { %2477 = vmatpush.bf16.msrb.mxu1 %v11830_v49 }
 0x7ea   : > { %10101 = vmatmul.msk.bf16.vlgmr.msra.gmra.mxu0 %vm2091_vm15, %v2236_v50  ;;  %v12277_v50 = vld [vmem:[%s14959_s11] ss:$0 sm:$0xff]  ;;  %s14964_s11 = sld [smem:[#allocation45_spill]] }
 0x7ed   : > { %2478 = vmatpush.bf16.msrb.mxu1 %v11829_v43 }
 0x7fa   : > { %10106 = vmatmul.msk.bf16.vlgmr.msrb.gmra.mxu0 %vm2091_vm15, %v2161_v51  ;;  %v11828_v51 = vld [vmem:[%s14954_s3] sm:$0xff]  ;;  %s14983_s3 = sld [smem:[#allocation40_spill]] }
 0x7fb   : > { %2479 = vmatpush.bf16.msrb.mxu1 %v11828_v51 }
 0x867   : > { %v2255_v53 = vpop.f32.mrf.mxu0 }
 0x86f   : > { %v2257_v54 = vpop.f32.mrf.mxu0 }
 0x877   : > { %v2278_v55 = vpop.f32.mrf.mxu0 }
 0x878   : > { %v2279_v56 = vadd.f32 %v2278_v55, %v2255_v53 }
 0x87a   : > { %v2283_v59 = vadd.f32 %v2279_v56, %v12969_v52 }
 0x87c   : > { %v13028_v60 = vadd.f32 %v12274_v57, %v2283_v59 }
 0x87e   : > { %v2293_v61 = vsel %vm1927_vm1, %v13028_v60, 0.0 }
 0x87f   : > { %v2280_v62 = vpop.f32.mrf.mxu0  ;;  %2294 = vadd.xlane.f32.xlu0 %v2293_v61 }
 0x880   : > { %v2281_v63 = vadd.f32 %v2280_v62, %v2257_v54 }
 0x882   : > { %v2284_v0 = vadd.f32 %v2281_v63, %v12973_v58 }
 0x884   : > { %v13033_v1 = vadd.f32 %v12274_v57, %v2284_v0 }
 0x886   : > { %v2296_v2 = vsel %vm1927_vm1, %v13033_v1, 0.0 }
 0x887   : > { %2297 = vadd.xlane.f32.xlu1 %v2296_v2 }
 0x8f2   : > { %v2295_v3 = vpop.xlane.xlu0 %2294 }
 0x8f3   : > { %v2299_v52 = vmul.f32 %v2295_v3, %v12959_v19 }
 0x8f5   : > { %v2301_v4 = vsub.f32 %v13028_v60, %v2299_v52 }
 0x8f7   : > { %v2303_v5 = vmul.f32 %v2301_v4, %v2301_v4 }
 0x8f9   : > { %v2305_v6 = vsel %vm1927_vm1, %v2303_v5, 0.0 }
 0x8fa   : > { %v2298_v7 = vpop.xlane.xlu1 %2297  ;;  %2306 = vadd.xlane.f32.xlu0 %v2305_v6 }
 0x8fb   : > { %v2300_v58 = vmul.f32 %v2298_v7, %v12959_v19 }
 0x8fd   : > { %v2302_v8 = vsub.f32 %v13033_v1, %v2300_v58 }
 0x8ff   : > { %v2304_v9 = vmul.f32 %v2302_v8, %v2302_v8 }
 0x901   : > { %v2308_v10 = vsel %vm1927_vm1, %v2304_v9, 0.0 }
 0x902   : > { %2309 = vadd.xlane.f32.xlu1 %v2308_v10 }
 0x96d   : > { %v2307_v12 = vpop.xlane.xlu0 %2306 }
 0x96e   : > { %v2311_v13 = vmul.f32 %v2307_v12, %v12959_v19 }
 0x970   : > { %v2313_v15 = vadd.f32 1e-05, %v2311_v13 }
 0x972   : > { %12330 = vrsqrt.f32 %v2313_v15  ;;  %vm2321_vm2 = vweird.f32 %v2313_v15 }
 0x975   : > { %v2310_v16 = vpop.xlane.xlu1 %2309 }
 0x976   : > { %v2312_v17 = vmul.f32 %v2310_v16, %v12959_v19 }
 0x978   : > { %v12331_v18 = vpop.eup %12330  ;;  %v2314_v20 = vadd.f32 1e-05, %v2312_v17 }
 0x979   : > { %v2316_v21 = vmul.f32 %v12331_v18, %v2313_v15  ;;  %vm2322_vm0 = vweird.f32 %v12331_v18 }
 0x97a   : > { %12332 = vrsqrt.f32 %v2314_v20  ;;  %vm2323_vm3 = vmor %vm2321_vm2, %vm2322_vm0  ;;  %vm2331_vm5 = vweird.f32 %v2314_v20 }
 0x97b   : > { %v2317_v22 = vmul.f32 %v12331_v18, %v2316_v21 }
 0x97d   : > { %v2318_v23 = vmul.f32 0.5, %v2317_v22  ;;  %v2488_v22 = vld [vmem:[%s14961_s16] sm:$0x3] }
 0x97f   : > { %v2319_v24 = vsub.f32 1.5, %v2318_v23  ;;  %v10149_v23 = vld [vmem:[%s14961_s16 + $0x2] sm:$0x3] }
 0x980   : > { %v12333_v25 = vpop.eup %12332 }
 0x981   : > { %v2320_v26 = vmul.f32 %v12331_v18, %v2319_v24  ;;  %v2326_v27 = vmul.f32 %v12333_v25, %v2314_v20  ;;  %vm2332_vm4 = vweird.f32 %v12333_v25  ;;  %v10151_v24 = vld [vmem:[%s14961_s16 + $0x4] sm:$0x3] }
 0x982   : > { %vm2333_vm6 = vmor %vm2331_vm5, %vm2332_vm4  ;;  %vm2871_vm5 = vcmask 1041408  }
 0x983   : > { %v2327_v28 = vmul.f32 %v12333_v25, %v2326_v27  ;;  %v2324_v29 = vsel %vm2323_vm3, %v12331_v18, %v2320_v26 }
 0x984   : > { %v2335_v33 = vmul.f32 %v2324_v29, %v2301_v4 }
 0x985   : > { %v2328_v30 = vmul.f32 0.5, %v2327_v28 }
 0x986   : > { %v2340_v37 = vmul.f32 %v12275_v32, %v2335_v33 }
 0x987   : > { %v2329_v31 = vsub.f32 1.5, %v2328_v30 }
 0x988   : > { %v2345_v40 = vadd.f32 %v12276_v36, %v2340_v37 }
 0x989   : > { %v2330_v34 = vmul.f32 %v12333_v25, %v2329_v31 }
 0x98b   : > { %v2334_v35 = vsel %vm2333_vm6, %v12333_v25, %v2330_v34  ;;  %vm2853_vm6 = vcmask 27648  }
 0x98c   : > { %v2336_v38 = vmul.f32 %v2334_v35, %v2302_v8 }
 0x98e   : > { %v2341_v39 = vmul.f32 %v12275_v32, %v2336_v38 }
 0x990   : > { %v2346_v41 = vadd.f32 %v12276_v36, %v2341_v39  ;;  %v12587_v39 = vmov 128.0  }
 0x992   : > { %v2351_v42 = vpack.c.bf16 %v2346_v41, %v2345_v40  ;;  %v11843_v40 = vld [vmem:[%s14962_s28 + $0x38] sm:$0xff] }
 0x994   : > { %10115 = vmatmul.msk.bf16.vlgmr.msra.gmra.mxu3 %vm1927_vm1, %v2351_v42 }
 0xa17   : > { %v2380_v53 = vpop.f32.mrf.mxu3 }
 0xa18   : > { %v2381_v54 = vadd.f32 %v12277_v50, %v2380_v53  ;;  %v11842_v53 = vld [vmem:[%s14962_s28 + $0x30] sm:$0xff] }
 0xa1a   : > { %v2385_v55 = vmul.f32 %v2381_v54, %v2381_v54 }
 0xa1c   : > { %v2387_v56 = vmul.f32 %v2385_v55, %v2381_v54  ;;  %v11840_v55 = vld [vmem:[%s14962_s28 + $0x20] sm:$0xff] }
 0xa1e   : > { %v2389_v57 = vmul.f32 0.044715, %v2387_v56  ;;  %v11839_v56 = vld [vmem:[%s14962_s28 + $0x18] sm:$0xff] }
 0xa1f   : > { %v2382_v59 = vpop.f32.mrf.mxu3 }
 0xa20   : > { %v2391_v61 = vadd.f32 %v2389_v57, %v2381_v54  ;;  %v2383_v62 = vadd.f32 %v12277_v50, %v2382_v59  ;;  %v11838_v57 = vld [vmem:[%s14962_s28 + $0x10] sm:$0xff]  ;;  %v11837_v59 = vld [vmem:[%s14962_s28 + $0x8] sm:$0xff] }
 0xa22   : > { %v2393_v63 = vmul.f32 0.7978846, %v2391_v61  ;;  %v2386_v0 = vmul.f32 %v2383_v62, %v2383_v62  ;;  %v11836_v61 = vld [vmem:[%s14962_s28] sm:$0xff] }
 0xa24   : > { %v2388_v2 = vmul.f32 %v2386_v0, %v2383_v62  ;;  %12334 = vtanh.f32 %v2393_v63 }
 0xa26   : > { %v2390_v3 = vmul.f32 0.044715, %v2388_v2 }
 0xa28   : > { %v2392_v52 = vadd.f32 %v2390_v3, %v2383_v62 }
 0xa2a   : > { %v2394_v4 = vmul.f32 0.7978846, %v2392_v52  ;;  %v12335_v5 = vpop.eup %12334 }
 0xa2b   : > { %v2397_v6 = vadd.f32 1.0, %v12335_v5 }
 0xa2c   : > { %12336 = vtanh.f32 %v2394_v4 }
 0xa2d   : > { %v2399_v58 = vmul.f32 0.5, %v2397_v6  ;;  %12338 = vrcp.f32 %v12587_v39 }
 0xa2f   : > { %v2401_v10 = vmul.f32 %v2399_v58, %v2381_v54  ;;  %v11841_v54 = vld [vmem:[%s14962_s28 + $0x28] sm:$0xff] }
 0xa32   : > { %v12337_v7 = vpop.eup %12336 }
 0xa33   : > { %v2398_v8 = vadd.f32 1.0, %v12337_v7  ;;  %v12339_v41 = vpop.eup %12338  ;;  %v12279_v7 = vld [vmem:[%s14963_s23] ss:$0 sm:$0xff]  ;;  %s14966_s23 = sld [smem:[#allocation31_spill]] }
 0xa34   : > { %v2584_v42 = vmul.f32 128.0, %v12339_v41  ;;  %vm2588_vm10 = vweird.f32 %v12339_v41 }
 0xa35   : > { %v2400_v9 = vmul.f32 0.5, %v2398_v8 }
 0xa36   : > { %v2585_v44 = vsub.f32 1.0, %v2584_v42  ;;  %v11846_v42 = vld [vmem:[%s14965_s15 + $0x14] sm:$0xf] }
 0xa37   : > { %v2402_v11 = vmul.f32 %v2400_v9, %v2383_v62  ;;  %v12280_v9 = vld [vmem:[%s14964_s11] ss:$0 sm:$0xff]  ;;  %s14967_s11 = sld [smem:[#allocation30_spill]] }
 0xa38   : > { %v2586_v45 = vmul.f32 %v12339_v41, %v2585_v44 }
 0xa39   : > { %v2419_v12 = vpack.c.bf16 %v2402_v11, %v2401_v10 }
 0xa3a   : > { %v2587_v46 = vadd.f32 %v12339_v41, %v2586_v45  ;;  %v10199_v45 = vld [vmem:[%s14965_s15 + $0x18] sm:$0xf0] }
 0xa3b   : > { %2480 = vmatmul.bf16.vlgmr.msrb.gmra.mxu1 %v2419_v12 }
 0xa3c   : > { %v2589_v47 = vsel %vm2588_vm10, %v12339_v41, %v2587_v46  ;;  %v11847_v41 = vld [vmem:[%s14965_s15 + $0x14] sm:$0xf0]  ;;  %v10202_v46 = vor.u32 %v11846_v42, %v10199_v45 }
 0xab8   : > { %v2481_v13 = vpop.f32.mrf.mxu1 }
 0xab9   : > { %v2482_v15 = vadd.f32 %v12278_v14, %v2481_v13 }
 0xabb   : > { %v2486_v18 = vadd.f32 %v2482_v15, %v13028_v60  ;;  %v10153_v60 = vld [vmem:[%s14961_s16 + $0x6] sm:$0x3] }
 0xac0   : > { %v2483_v16 = vpop.f32.mrf.mxu1 }
 0xac1   : > { %v2484_v17 = vadd.f32 %v12278_v14, %v2483_v16  ;;  %v12588_v16 = vmov 64.0  }
 0xac3   : > { %v2487_v20 = vadd.f32 %v2484_v17, %v13033_v1 }
 0xac5   : > { %v13062_v21 = vpack.c.bf16 %v2487_v20, %v2486_v18 }
 0xac7   : > { %2500 = vmatpush.bf16.msrb.mxu2 %v13062_v21  ;;  %2518 = vmatpush.bf16.msra.mxu0 %v13062_v21 }
 0xac8   : > { %2536 = vmatpush.bf16.msrb.mxu3 %v13062_v21 }
 0xaca   : > { %10148 = vmatmul.msk.bf16.vlgmr.msrb.gmra.mxu2 %vm2091_vm15, %v2488_v22  ;;  %10150 = vmatmul.msk.bf16.vlgmr.msra.gmra.mxu0 %vm2091_vm15, %v10149_v23 }
 0xacb   : > { %2554 = vmatpush.bf16.msra.mxu2 %v13062_v21  ;;  %10152 = vmatmul.msk.bf16.vlgmr.msrb.gmra.mxu3 %vm2091_vm15, %v10151_v24 }
 0xacc   : > { %2682 = vmatpush.bf16.msrb.mxu0 %v11843_v40  ;;  %v10197_v40 = vld [vmem:[%s14965_s15 + $0x10] sm:$0xf] }
 0xacd   : > { %v10198_v44 = vor.u32 %v11847_v41, %v10197_v40 }
 0xad0   : > { %2683 = vmatpush.bf16.msrb.mxu0 %v11842_v53 }
 0xad4   : > { %2684 = vmatpush.bf16.msrb.mxu0 %v11841_v54 }
 0xad8   : > { %2685 = vmatpush.bf16.msrb.mxu0 %v11840_v55 }
 0xada   : > { %10154 = vmatmul.msk.bf16.vlgmr.msra.gmra.mxu2 %vm2091_vm15, %v10153_v60 }
 0xadc   : > { %2686 = vmatpush.bf16.msrb.mxu0 %v11839_v56 }
 0xae0   : > { %2687 = vmatpush.bf16.msrb.mxu0 %v11838_v57 }
 0xae4   : > { %2688 = vmatpush.bf16.msrb.mxu0 %v11837_v59 }
 0xae8   : > { %2689 = vmatpush.bf16.msrb.mxu0 %v11836_v61 }
 0xb47   : > { %v2520_v1 = vpop.f32.mrf.mxu0 }
 0xb48   : > { %2561 = vrot.lane.b32.xlu0 %v2520_v1, %s14895_s18 }
 0xb4d   : > { %v2502_v25 = vpop.f32.mrf.mxu2 }
 0xb4e   : > { %v2538_v26 = vpop.f32.mrf.mxu3 }
 0xb4f   : > { %v2522_v27 = vpop.f32.mrf.mxu0  ;;  %2565 = vrot.lane.b32.xlu2 %v2538_v26, %s14893_s2 }
 0xb55   : > { %v2504_v28 = vpop.f32.mrf.mxu2 }
 0xb56   : > { %v2540_v29 = vpop.f32.mrf.mxu3  ;;  %v10213_v28 = vld [vmem:[%s14965_s15 + $0x30] sm:$0xf] }
 0xb57   : > { %v11851_v29 = vld [vmem:[%s14965_s15 + $0x34] sm:$0xf0] }
 0xb5d   : > { %v2556_v30 = vpop.f32.mrf.mxu2 }
 0xb5e   : > { %2569 = vrot.lane.b32.xlu1 %v2556_v30, %s14888_s0  ;;  %v11850_v30 = vld [vmem:[%s14965_s15 + $0x34] sm:$0xf]  ;;  %s14968_s0 = sld [smem:[#allocation36_spill]] }
 0xb65   : > { %v2558_v31 = vpop.f32.mrf.mxu2 }
 0xb66   : > { %v10214_v31 = vor.u32 %v11851_v29, %v10213_v28 }
 0xb68   : > { %2797 = vmatpush.bf16.msra.mxu3 %v10214_v31 }
 0xba9   : > { %v2566_v34 = vpop.permute.xlu2 %2565 }
 0xbba   : > { %v2562_v32 = vpop.permute.xlu0 %2561 }
 0xbbb   : > { %v2572_v33 = vsel %vm1927_vm1, %v2502_v25, %v2562_v32  ;;  %v10215_v32 = vld [vmem:[%s14965_s15 + $0x38] sm:$0xf0] }
 0xbbc   : > { %v2574_v35 = vsel %vm2573_vm7, %v2572_v33, %v2566_v34  ;;  %v10218_v33 = vor.u32 %v11850_v30, %v10215_v32  ;;  %v10205_v34 = vld [vmem:[%s14965_s15 + $0x20] sm:$0xf] }
 0xbbe   : > { %2810 = vmatpush.bf16.msra.mxu1 %v10218_v33 }
 0xbd0   : > { %v2570_v36 = vpop.permute.xlu1 %2569 }
 0xbd1   : > { %v2576_v37 = vsel %vm2575_vm8, %v2574_v35, %v2570_v36  ;;  %v11849_v35 = vld [vmem:[%s14965_s15 + $0x24] sm:$0xf0]  ;;  %v11848_v36 = vld [vmem:[%s14965_s15 + $0x24] sm:$0xf]  ;;  %vm2867_vm8 = vcmask 31744  }
 0xbd2   : > { %v2580_v38 = vsel %vm2579_vm9, %v2576_v37, 0.0 }
 0xbd3   : > { %2581 = vadd.xlane.f32.xlu2 %v2580_v38  ;;  %v10207_v38 = vld [vmem:[%s14965_s15 + $0x28] sm:$0xf0] }
 0xbd4   : > { %v10210_v39 = vor.u32 %v11848_v36, %v10207_v38 }
 0xbd6   : > { %2811 = vmatpush.bf16.msra.mxu1 %v10210_v39 }
 0xbda   : > { %2812 = vmatpush.bf16.msra.mxu1 %v10202_v46 }
 0xc46   : > { %v2582_v48 = vpop.xlane.xlu2 %2581 }
 0xc47   : > { %v2590_v49 = vmul.f32 %v2589_v47, %v2582_v48  ;;  %v11845_v48 = vld [vmem:[%s14965_s15 + $0x4] sm:$0xf0] }
 0xc49   : > { %v2591_v43 = vsub.f32 %v2576_v37, %v2590_v49  ;;  %v10206_v37 = vor.u32 %v11849_v35, %v10205_v34  ;;  %v11844_v49 = vld [vmem:[%s14965_s15 + $0x4] sm:$0xf] }
 0xc4b   : > { %v2592_v50 = vmul.f32 %v2591_v43, %v2591_v43  ;;  %2798 = vmatpush.bf16.msra.mxu3 %v10206_v37 }
 0xc4d   : > { %v2593_v51 = vsel %vm2579_vm9, %v2592_v50, 0.0  ;;  %v10191_v50 = vld [vmem:[%s14965_s15 + $0x8] sm:$0xf0] }
 0xc4e   : > { %2594 = vadd.xlane.f32.xlu0 %v2593_v51  ;;  %v10194_v51 = vor.u32 %v11844_v49, %v10191_v50 }
 0xc4f   : > { %2799 = vmatpush.bf16.msra.mxu3 %v10198_v44 }
 0xc50   : > { %2813 = vmatpush.bf16.msra.mxu1 %v10194_v51 }
 0xcc1   : > { %v2595_v62 = vpop.xlane.xlu0 %2594 }
 0xcc2   : > { %v2596_v63 = vmul.f32 %v2595_v62, %v2589_v47  ;;  %v10189_v47 = vld [vmem:[%s14965_s15] sm:$0xf] }
 0xcc4   : > { %v2597_v0 = vadd.f32 1e-05, %v2596_v63 }
 0xcc6   : > { %12340 = vrsqrt.f32 %v2597_v0  ;;  %vm2604_vm12 = vweird.f32 %v2597_v0 }
 0xcc7   : > { %12342 = vrcp.f32 %v12588_v16 }
 0xccc   : > { %v12341_v2 = vpop.eup %12340 }
 0xccd   : > { %v2599_v3 = vmul.f32 %v12341_v2, %v2597_v0  ;;  %vm2605_vm11 = vweird.f32 %v12341_v2  ;;  %v12343_v17 = vpop.eup %12342  ;;  %v12281_v0 = vld [vmem:[%s14966_s23] ss:$0 sm:$0xff]  ;;  %s12589_s23 = smov 16  }
 0xcce   : > { %vm2606_vm13 = vmor %vm2604_vm12, %vm2605_vm11  ;;  %v2702_v18 = vmul.f32 64.0, %v12343_v17  ;;  %vm2706_vm0 = vweird.f32 %v12343_v17 }
 0xccf   : > { %v2600_v52 = vmul.f32 %v12341_v2, %v2599_v3 }
 0xcd0   : > { %v2703_v20 = vsub.f32 1.0, %v2702_v18 }
 0xcd1   : > { %v2601_v4 = vmul.f32 0.5, %v2600_v52  ;;  %v12282_v52 = vld [vmem:[%s14967_s11] ss:$0 sm:$0xff]  ;;  %s14970_s11 = sld [smem:[#allocation35_spill]] }
 0xcd2   : > { %v2704_v22 = vmul.f32 %v12343_v17, %v2703_v20 }
 0xcd3   : > { %v2602_v5 = vsub.f32 1.5, %v2601_v4 }
 0xcd4   : > { %v2705_v23 = vadd.f32 %v12343_v17, %v2704_v22 }
 0xcd5   : > { %v2603_v6 = vmul.f32 %v12341_v2, %v2602_v5 }
 0xcd6   : > { %v13097_v24 = vsel %vm2706_vm0, %v12343_v17, %v2705_v23 }
 0xcd7   : > { %v2607_v58 = vsel %vm2606_vm13, %v12341_v2, %v2603_v6  ;;  %v11852_v38 = vld [vmem:[%s14970_s11] sm:$0xff] }
 0xcd8   : > { %v2608_v8 = vmul.f32 %v2607_v58, %v2591_v43  ;;  %v10190_v43 = vor.u32 %v11845_v48, %v10189_v47 }
 0xcda   : > { %v2612_v10 = vmul.f32 %v12279_v7, %v2608_v8  ;;  %2800 = vmatpush.bf16.msra.mxu3 %v10190_v43  ;;  %v2744_v7 = vld [vmem:[%s14968_s0] sm:$0x3]  ;;  %s14969_s0 = sld [smem:[#allocation25_spill]] }
 0xcdb   : > { %v2747_v58 = vperm.slane %v2744_v7, 1 }
 0xcdc   : > { %v2616_v11 = vadd.f32 %v12280_v9, %v2612_v10 }
 0xcde   : > { %v2633_v12 = vpack.c.bf16 %v2616_v11, %v2616_v11  ;;  %v2746_v11 = vperm.slane %v2744_v7, 0 }
 0xce0   : > { %2690 = vmatmul.bf16.vlgmr.msrb.gmra.mxu0 %v2633_v12  ;;  %v2851_v28 = vld [vmem:[%s14969_s0] sm:$0xf]  ;;  %v10224_v43 = vld [vmem:[%s14969_s0 + $0x4] sm:$0xf] }
 0xd5d   : > { %v13093_v13 = vpop.f32.mrf.mxu0 }
 0xd5e   : > { %v2698_v14 = vsel %vm2697_vm14, %v13093_v13, 0.0 }
 0xd5f   : > { %2699 = vadd.xlane.f32.xlu1 %v2698_v14 }
 0xd65   : > { %v2693_v15 = vpop.f32.mrf.mxu0 }
 0xdd2   : > { %v2700_v60 = vpop.xlane.xlu1 %2699 }
 0xdd3   : > { %v2708_v1 = vmul.f32 %v13097_v24, %v2700_v60 }
 0xdd5   : > { %v2709_v25 = vsub.f32 %v13093_v13, %v2708_v1 }
 0xdd7   : > { %v2710_v26 = vmul.f32 %v2709_v25, %v2709_v25 }
 0xdd9   : > { %v2711_v27 = vsel %vm2697_vm14, %v2710_v26, 0.0 }
 0xdda   : > { %2712 = vadd.xlane.f32.xlu2 %v2711_v27 }
 0xe4d   : > { %v2713_v53 = vpop.xlane.xlu2 %2712 }
 0xe4e   : > { %v2714_v54 = vmul.f32 %v2713_v53, %v13097_v24 }
 0xe50   : > { %v2715_v55 = vadd.f32 1e-05, %v2714_v54 }
 0xe52   : > { %12344 = vrsqrt.f32 %v2715_v55  ;;  %vm2722_vm3 = vweird.f32 %v2715_v55 }
 0xe58   : > { %v12345_v56 = vpop.eup %12344 }
 0xe59   : > { %v2717_v57 = vmul.f32 %v12345_v56, %v2715_v55  ;;  %vm2723_vm2 = vweird.f32 %v12345_v56 }
 0xe5a   : > { %vm2724_vm4 = vmor %vm2722_vm3, %vm2723_vm2 }
 0xe5b   : > { %v2718_v59 = vmul.f32 %v12345_v56, %v2717_v57 }
 0xe5d   : > { %v2719_v61 = vmul.f32 0.5, %v2718_v59  ;;  %v10237_v59 = vld [vmem:[%s14969_s0 + $0x8] sm:$0xf] }
 0xe5f   : > { %v2720_v62 = vsub.f32 1.5, %v2719_v61 }
 0xe61   : > { %v2721_v63 = vmul.f32 %v12345_v56, %v2720_v62 }
 0xe63   : > { %v2725_v2 = vsel %vm2724_vm4, %v12345_v56, %v2721_v63 }
 0xe64   : > { %v2726_v3 = vmul.f32 %v2725_v2, %v2709_v25 }
 0xe66   : > { %v2730_v4 = vmul.f32 %v12281_v0, %v2726_v3 }
 0xe68   : > { %v2734_v5 = vadd.f32 %v12282_v52, %v2730_v4 }
 0xe6a   : > { %v2743_v6 = vpack.c.bf16 %v2734_v5, %v2734_v5 }
 0xe6c   : > { %10219 = vmatmul.msk.bf16.vlgmr.msra.gmra.mxu3 %vm2573_vm7, %v2743_v6  ;;  %10220 = vmatmul.msk.bf16.vlgmr.msra.gmra.mxu1 %vm2573_vm7, %v2743_v6 }
 0xee9   : > { %v2815_v8 = vpop.f32.mrf.mxu1 }
 0xeea   : > { %v2816_v9 = vadd.f32 %v2815_v8, %v2747_v58 }
 0xeec   : > { %v13124_v10 = vpack.c.bf16 %v2816_v9, %v2816_v9 }
 0xeee   : > { %v2873_v12 = vsel %vm2871_vm5, %v13124_v10, 0 }
 0xeef   : > { %v2802_v14 = vpop.f32.mrf.mxu3  ;;  %2882 = vmatpush.bf16.msrb.mxu3 %v2873_v12  ;;  %v10245_v12 = vld [vmem:[%s14969_s0 + $0xc] sm:$0xf]  ;;  %s14982_s0 = sld [smem:[#allocation49_spill]] }
 0xef0   : > { %v2803_v15 = vadd.f32 %v2802_v14, %v2746_v11 }
 0xef1   : > { %v2817_v16 = vpop.f32.mrf.mxu1 }
 0xef2   : > { %v2827_v17 = vpack.c.bf16 %v2803_v15, %v2803_v15 }
 0xef3   : > { %2989 = vmatpush.bf16.msra.mxu3 %v11852_v38  ;;  %v11853_v38 = vld [vmem:[%s14970_s11 + $0x8] sm:$0xff] }
 0xef4   : > { %2891 = vrot.lane.b32.xlu1 %v2827_v17, %s14890_s10  ;;  %2829 = vrot.lane.b32.xlu2 %v2827_v17, %s14893_s2  ;;  %s14972_s10 = sld [smem:[#allocation34_spill]] }
 0xef5   : > { %2967 = vmatpush.bf16.msra.mxu0 %v11853_v38  ;;  %s14976_s2 = sld [smem:[#allocation32_spill]] }
 0xef7   : > { %v2804_v18 = vpop.f32.mrf.mxu3 }
 0xefc   : > { %3079 = vrot.lane.b32.xlu1 %v2827_v17, %s14891_s7  ;;  %3081 = vrot.lane.b32.xlu2 %v2827_v17, %s12589_s23  ;;  %s14971_s23 = smov 96  }
 0xf04   : > { %2997 = vrot.lane.b32.xlu2 %v2827_v17, %s14895_s18  ;;  %s14980_s18 = sld [smem:[#allocation41_spill]] }
 0xf4e   : > { %v2830_v20 = vpop.permute.xlu2 %2829 }
 0xf4f   : > { %v2835_v22 = vsel %vm2091_vm15, %v2830_v20, 0 }
 0xf50   : > { %2844 = vmatpush.bf16.xpose.msrb.mxu2 %v2835_v22 }
 0xf56   : > { %v3082_v23 = vpop.permute.xlu2 %3081 }
 0xf57   : > { %10221 = vmatmul.msk.bf16.vlgmr.msrb.gmra.mxu2 %vm2091_vm15, %v2827_v17  ;;  %v3087_v44 = vsel %vm2091_vm15, %v3082_v23, 0 }
 0xf5e   : > { %v2998_v60 = vpop.permute.xlu2 %2997 }
 0xf5f   : > { %v3003_v26 = vsel %vm2091_vm15, %v2998_v60, 0 }
 0xf66   : > { %v2892_v1 = vpop.permute.xlu1 %2891 }
 0xf67   : > { %v2897_v25 = vsel %vm2091_vm15, %v2892_v1, 0 }
 0xf68   : > { %2906 = vmatpush.bf16.xpose.msrb.mxu1 %v2897_v25 }
 0xf6e   : > { %v3080_v56 = vpop.permute.xlu1 %3079 }
 0xf70   : > { %3012 = vmatpush.bf16.xpose.msra.mxu1 %v3003_v26 }
 0xfda   : > { %v2846_v27 = vpop.f32.mrf.mxu2 }
 0xfdb   : > { %v2850_v29 = vmul.f32 0.25, %v2846_v27 }
 0xfdd   : > { %v2852_v30 = vadd.f32 %v2851_v28, %v2850_v29 }
 0xfdf   : > { %v2854_v31 = vsel %vm2853_vm6, %v2852_v30, -inf }
 0xfe0   : > { %2855 = vmax.xlane.f32.xlu0 %v2854_v31 }
 0xfe2   : > { %v2848_v32 = vpop.f32.mrf.mxu2 }
0x1053   : > { %v2856_v33 = vpop.xlane.xlu0 %2855 }
0x1054   : > { %v2857_v34 = vsub.f32 %v2852_v30, %v2856_v33 }
0x1056   : > { %v2858_v35 = vmul.f32 1.442695, %v2857_v34 }
0x1058   : > { %12346 = vpow2.f32 %v2858_v35 }
0x105e   : > { %v12347_v36 = vpop.eup %12346 }
0x105f   : > { %v2860_v37 = vsel %vm2853_vm6, %v12347_v36, 0.0 }
0x1060   : > { %2861 = vadd.xlane.f32.xlu0 %v2860_v37 }
0x1074   : > { %2889 = vrot.lane.b32.xlu0 %v2827_v17, %s14892_s1 }
0x107c   : > { %2995 = vrot.lane.b32.xlu0 %v2827_v17, %s14971_s23 }
0x10d3   : > { %v2862_v39 = vpop.xlane.xlu0 %2861 }
0x10d4   : > { %12348 = vrcp.f32 %v2862_v39 }
0x10da   : > { %v12349_v40 = vpop.eup %12348 }
0x10db   : > { %v2864_v41 = vmul.f32 %v12349_v40, %v12347_v36 }
0x10dd   : > { %v2865_v42 = vpack.c.bf16 %v2864_v41, %v2864_v41 }
0x10df   : > { %10222 = vmatmul.msk.bf16.vlgmr.msrb.gmra.mxu3 %vm2867_vm8, %v2865_v42  ;;  %v11854_v42 = vld [vmem:[%s14970_s11 + $0x10] sm:$0xff] }
0x10e0   : > { %3096 = vmatpush.bf16.xpose.msrb.mxu3 %v3087_v44  ;;  %3072 = vmatpush.bf16.msrb.mxu0 %v11854_v42 }
0x10e6   : > { %v2890_v45 = vpop.permute.xlu0 %2889 }
0x10e7   : > { %10223 = vmatmul.msk.bf16.vlgmr.msrb.gmra.mxu1 %vm2091_vm15, %v2890_v45 }
0x10ee   : > { %v2996_v46 = vpop.permute.xlu0 %2995 }
0x10f7   : > { %10236 = vmatmul.msk.bf16.vlgmr.msra.gmra.mxu1 %vm2091_vm15, %v2996_v46 }
0x1162   : > { %v2884_v47 = vpop.f32.mrf.mxu3 }
0x1163   : > { %v2888_v48 = vpack.c.bf16 %v2884_v47, %v2884_v47 }
0x1164   : > { %v2908_v49 = vpop.f32.mrf.mxu1 }
0x1165   : > { %v2912_v50 = vmul.f32 0.25, %v2908_v49  ;;  %10235 = vmatmul.msk.bf16.vlgmr.msra.gmra.mxu3 %vm2091_vm15, %v2888_v48 }
0x1167   : > { %v2915_v51 = vadd.f32 %v10224_v43, %v2912_v50 }
0x1169   : > { %v2916_v53 = vsel %vm2853_vm6, %v2915_v51, -inf }
0x116a   : > { %v2886_v54 = vpop.f32.mrf.mxu3  ;;  %2917 = vmax.xlane.f32.xlu2 %v2916_v53 }
0x116c   : > { %v2910_v55 = vpop.f32.mrf.mxu1 }
0x1174   : > { %v3014_v57 = vpop.f32.mrf.mxu1 }
0x1175   : > { %v3018_v61 = vmul.f32 0.25, %v3014_v57  ;;  %10244 = vmatmul.msk.bf16.vlgmr.msrb.gmra.mxu3 %vm2091_vm15, %v3080_v56 }
0x1177   : > { %v3021_v62 = vadd.f32 %v10237_v59, %v3018_v61 }
0x1179   : > { %v3022_v63 = vsel %vm2853_vm6, %v3021_v62, -inf }
0x117a   : > { %3023 = vmax.xlane.f32.xlu1 %v3022_v63 }
0x117c   : > { %v3016_v0 = vpop.f32.mrf.mxu1 }
0x1193   : > { %2929 = vrot.lane.b32.xlu1 %v13124_v10, %s14892_s1  ;;  %s14975_s1 = sld [smem:[#allocation33_spill]] }
0x11dd   : > { %v2918_v2 = vpop.xlane.xlu2 %2917 }
0x11de   : > { %v2919_v3 = vsub.f32 %v2915_v51, %v2918_v2  ;;  %v11855_v51 = vld [vmem:[%s14970_s11 + $0x18] sm:$0xff] }
0x11e0   : > { %v2920_v52 = vmul.f32 1.442695, %v2919_v3  ;;  %v12283_v3 = vld [vmem:[%s14972_s10] ss:$0 sm:$0xff]  ;;  %s14974_s10 = sld [smem:[#allocation29_spill]] }
0x11e2   : > { %12350 = vpow2.f32 %v2920_v52 }
0x11e8   : > { %v12351_v4 = vpop.eup %12350  ;;  %v13154_v5 = vpop.f32.mrf.mxu3 }
0x11e9   : > { %v2922_v6 = vsel %vm2853_vm6, %v12351_v4, 0.0 }
0x11ea   : > { %2923 = vadd.xlane.f32.xlu2 %v2922_v6 }
0x11ed   : > { %v3024_v58 = vpop.xlane.xlu1 %3023 }
0x11ee   : > { %v3025_v8 = vsub.f32 %v3021_v62, %v3024_v58 }
0x11f0   : > { %v2993_v7 = vpop.f32.mrf.mxu3  ;;  %v3026_v9 = vmul.f32 1.442695, %v3025_v8 }
0x11f2   : > { %12352 = vpow2.f32 %v3026_v9 }
0x11f8   : > { %v3098_v11 = vpop.f32.mrf.mxu3  ;;  %v12353_v18 = vpop.eup %12352 }
0x11f9   : > { %v3102_v14 = vmul.f32 0.25, %v3098_v11  ;;  %v3028_v22 = vsel %vm2853_vm6, %v12353_v18, 0.0 }
0x11fb   : > { %v3105_v15 = vadd.f32 %v10245_v12, %v3102_v14 }
0x11fd   : > { %v3106_v16 = vsel %vm2853_vm6, %v3105_v15, -inf }
0x11fe   : > { %3107 = vmax.xlane.f32.xlu0 %v3106_v16 }
0x1200   : > { %v3100_v17 = vpop.f32.mrf.mxu3 }
0x1205   : > { %v2930_v20 = vpop.permute.xlu1 %2929 }
0x1206   : > { %v2935_v23 = vsel %vm2871_vm5, %v2930_v20, 0  ;;  %3029 = vadd.xlane.f32.xlu0 %v3028_v22 }
0x1207   : > { %2944 = vmatpush.bf16.msra.mxu2 %v2935_v23 }
0x121a   : > { %3034 = vrot.lane.b32.xlu0 %v13124_v10, %s14971_s23 }
0x125d   : > { %v2924_v60 = vpop.xlane.xlu2 %2923 }
0x125e   : > { %12354 = vrcp.f32 %v2924_v60 }
0x1264   : > { %v12355_v1 = vpop.eup %12354 }
0x1265   : > { %v2926_v25 = vmul.f32 %v12355_v1, %v12351_v4 }
0x1267   : > { %v2927_v26 = vpack.c.bf16 %v2926_v25, %v2926_v25 }
0x1269   : > { %10225 = vmatmul.msk.bf16.vlgmr.msra.gmra.mxu2 %vm2867_vm8, %v2927_v26 }
0x1271   : > { %v3108_v27 = vpop.xlane.xlu0 %3107 }
0x1272   : > { %v3109_v28 = vsub.f32 %v3105_v15, %v3108_v27 }
0x1274   : > { %v3110_v29 = vmul.f32 1.442695, %v3109_v28 }
0x1276   : > { %12356 = vpow2.f32 %v3110_v29 }
0x1279   : > { %v3030_v32 = vpop.xlane.xlu0 %3029 }
0x127a   : > { %12358 = vrcp.f32 %v3030_v32 }
0x127c   : > { %v12357_v30 = vpop.eup %12356 }
0x127d   : > { %v3112_v31 = vsel %vm2853_vm6, %v12357_v30, 0.0 }
0x127e   : > { %3113 = vadd.xlane.f32.xlu2 %v3112_v31 }
0x1280   : > { %v12359_v33 = vpop.eup %12358 }
0x1281   : > { %v3032_v34 = vmul.f32 %v12359_v33, %v12353_v18 }
0x1283   : > { %v3033_v37 = vpack.c.bf16 %v3032_v34, %v3032_v34 }
0x128c   : > { %v3035_v35 = vpop.permute.xlu0 %3034 }
0x128d   : > { %v3040_v36 = vsel %vm2871_vm5, %v3035_v35, 0 }
0x128e   : > { %3049 = vmatpush.bf16.msrb.mxu2 %v3040_v36 }
0x1291   : > { %10238 = vmatmul.msk.bf16.vlgmr.msrb.gmra.mxu2 %vm2867_vm8, %v3033_v37  ;;  %v11871_v37 = vld [vmem:[%s14974_s10 + $0x38] sm:$0xff] }
0x1292   : > { %3156 = vmatpush.bf16.msra.mxu2 %v11855_v51 }
0x1296   : > { %3118 = vrot.lane.b32.xlu2 %v13124_v10, %s14891_s7  ;;  %s14973_s7 = sld [smem:[#allocation27_spill]] }
0x129c   : > { %v11863_v12 = vld [vmem:[%s14973_s7 + $0x34] sm:$0xf0]  ;;  %v11862_v14 = vld [vmem:[%s14973_s7 + $0x34] sm:$0xf]  ;;  %v10280_v16 = vld [vmem:[%s14973_s7 + $0x38] sm:$0xf0] }
0x129d   : > { %v10283_v17 = vor.u32 %v11862_v14, %v10280_v16  ;;  %v10270_v18 = vld [vmem:[%s14973_s7 + $0x20] sm:$0xf]  ;;  %v11861_v20 = vld [vmem:[%s14973_s7 + $0x24] sm:$0xf0]  ;;  %v11860_v22 = vld [vmem:[%s14973_s7 + $0x24] sm:$0xf] }
0x129e   : > { %v10271_v23 = vor.u32 %v11861_v20, %v10270_v18  ;;  %v10272_v60 = vld [vmem:[%s14973_s7 + $0x28] sm:$0xf0]  ;;  %v10262_v25 = vld [vmem:[%s14973_s7 + $0x10] sm:$0xf]  ;;  %v11859_v26 = vld [vmem:[%s14973_s7 + $0x14] sm:$0xf0] }
0x129f   : > { %3276 = vmatpush.bf16.msra.mxu3 %v10283_v17  ;;  %v10275_v1 = vor.u32 %v11860_v22, %v10272_v60  ;;  %v11858_v27 = vld [vmem:[%s14973_s7 + $0x14] sm:$0xf]  ;;  %v10263_v28 = vor.u32 %v11859_v26, %v10262_v25  ;;  %v10264_v29 = vld [vmem:[%s14973_s7 + $0x18] sm:$0xf0]  ;;  %v10254_v31 = vld [vmem:[%s14973_s7] sm:$0xf] }
0x12a0   : > { %v11857_v32 = vld [vmem:[%s14973_s7 + $0x4] sm:$0xf0]  ;;  %v11856_v33 = vld [vmem:[%s14973_s7 + $0x4] sm:$0xf]  ;;  %v10256_v35 = vld [vmem:[%s14973_s7 + $0x8] sm:$0xf0] }
0x12a1   : > { %v10255_v34 = vor.u32 %v11857_v32, %v10254_v31  ;;  %v10259_v36 = vor.u32 %v11856_v33, %v10256_v35 }
0x12a3   : > { %3277 = vmatpush.bf16.msra.mxu3 %v10275_v1 }
0x12ec   : > { %v2946_v39 = vpop.f32.mrf.mxu2 }
0x12ed   : > { %v2950_v40 = vpack.c.bf16 %v2946_v39, %v2946_v39 }
0x12ef   : > { %10230 = vmatmul.msk.bf16.vlgmr.msra.gmra.mxu0 %vm2091_vm15, %v2950_v40 }
0x12f1   : > { %v3114_v41 = vpop.xlane.xlu2 %3113 }
0x12f2   : > { %12360 = vrcp.f32 %v3114_v41 }
0x12f4   : > { %v2948_v44 = vpop.f32.mrf.mxu2 }
0x12f8   : > { %v12361_v45 = vpop.eup %12360 }
0x12f9   : > { %v3116_v46 = vmul.f32 %v12361_v45, %v12357_v30  ;;  %v3119_v47 = vpop.permute.xlu2 %3118  ;;  %v10267_v30 = vor.u32 %v11858_v27, %v10264_v29 }
0x12fa   : > { %v3124_v48 = vsel %vm2871_vm5, %v3119_v47, 0 }
0x12fb   : > { %v3117_v49 = vpack.c.bf16 %v3116_v46, %v3116_v46  ;;  %3133 = vmatpush.bf16.msrb.mxu1 %v3124_v48  ;;  %3278 = vmatpush.bf16.msra.mxu3 %v10267_v30  ;;  %v12284_v48 = vld [vmem:[%s14975_s1] ss:$0 sm:$0xff]  ;;  %s14977_s1 = sld [smem:[#allocation26_spill]] }
0x12fe   : > { %10246 = vmatmul.msk.bf16.vlgmr.msrb.gmra.mxu1 %vm2867_vm8, %v3117_v49 }
0x12ff   : > { %3279 = vmatpush.bf16.msra.mxu3 %v10259_v36  ;;  %3437 = vmatpush.bf16.msra.mxu1 %v11871_v37 }
0x1314   : > { %v3051_v10 = vpop.f32.mrf.mxu2 }
0x1315   : > { %v3055_v43 = vpack.c.bf16 %v3051_v10, %v3051_v10 }
0x1317   : > { %10243 = vmatmul.msk.bf16.vlgmr.msrb.gmra.mxu0 %vm2091_vm15, %v3055_v43  ;;  %v12285_v43 = vld [vmem:[%s14976_s2] ss:$0 sm:$0xff]  ;;  %s14978_s2 = sld [smem:[#allocation7_spill]] }
0x131c   : > { %v3053_v50 = vpop.f32.mrf.mxu2 }
0x136c   : > { %v2969_v53 = vpop.f32.mrf.mxu0 }
0x136d   : > { %v2992_v59 = vadd.f32 %v13154_v5, %v2969_v53 }
0x1374   : > { %v2971_v54 = vpop.f32.mrf.mxu0 }
0x1375   : > { %v11870_v54 = vld [vmem:[%s14974_s10 + $0x30] sm:$0xff] }
0x1376   : > { %3438 = vmatpush.bf16.msra.mxu1 %v11870_v54  ;;  %v11882_v54 = vld [vmem:[%s14980_s18 + $0x10] sm:$0xff] }
0x137b   : > { %v3135_v55 = vpop.f32.mrf.mxu1 }
0x137c   : > { %v3139_v56 = vpack.c.bf16 %v3135_v55, %v3135_v55  ;;  %v11879_v55 = vld [vmem:[%s14974_s10 + $0x78] sm:$0xff] }
0x137d   : > { %3450 = vmatpush.bf16.msrb.mxu2 %v11879_v55  ;;  %v11881_v55 = vld [vmem:[%s14980_s18 + $0x8] sm:$0xff] }
0x137e   : > { %10251 = vmatmul.msk.bf16.vlgmr.msra.gmra.mxu2 %vm2091_vm15, %v3139_v56  ;;  %v11869_v56 = vld [vmem:[%s14974_s10 + $0x28] sm:$0xff] }
0x137f   : > { %3439 = vmatpush.bf16.msra.mxu1 %v11869_v56 }
0x1383   : > { %v3137_v57 = vpop.f32.mrf.mxu1 }
0x1384   : > { %v11878_v57 = vld [vmem:[%s14974_s10 + $0x70] sm:$0xff] }
0x1385   : > { %3451 = vmatpush.bf16.msrb.mxu2 %v11878_v57 }
0x1394   : > { %v3074_v61 = vpop.f32.mrf.mxu0 }
0x1395   : > { %v3078_v62 = vadd.f32 %v3074_v61, %v2992_v59  ;;  %v11868_v59 = vld [vmem:[%s14974_s10 + $0x20] sm:$0xff]  ;;  %v11877_v61 = vld [vmem:[%s14974_s10 + $0x68] sm:$0xff] }
0x1396   : > { %3440 = vmatpush.bf16.msra.mxu1 %v11868_v59  ;;  %3452 = vmatpush.bf16.msrb.mxu2 %v11877_v61 }
0x139c   : > { %v3076_v63 = vpop.f32.mrf.mxu0 }
0x139d   : > { %v11876_v63 = vld [vmem:[%s14974_s10 + $0x60] sm:$0xff] }
0x139e   : > { %3453 = vmatpush.bf16.msrb.mxu2 %v11876_v63 }
0x1401   : > { %v3158_v0 = vpop.f32.mrf.mxu2 }
0x1402   : > { %v3162_v2 = vadd.f32 %v3158_v0, %v3078_v62  ;;  %v11867_v62 = vld [vmem:[%s14974_s10 + $0x18] sm:$0xff]  ;;  %v11866_v0 = vld [vmem:[%s14974_s10 + $0x10] sm:$0xff] }
0x1403   : > { %3441 = vmatpush.bf16.msra.mxu1 %v11867_v62 }
0x1404   : > { %v3163_v52 = vadd.f32 %v3162_v2, %v13093_v13  ;;  %v10278_v13 = vld [vmem:[%s14973_s7 + $0x30] sm:$0xf]  ;;  %v11875_v2 = vld [vmem:[%s14974_s10 + $0x58] sm:$0xff] }
0x1405   : > { %v10279_v15 = vor.u32 %v11863_v12, %v10278_v13  ;;  %3454 = vmatpush.bf16.msrb.mxu2 %v11875_v2  ;;  %v11891_v13 = vld [vmem:[%s14978_s2 + $0x18] sm:$0xff] }
0x1406   : > { %v13180_v4 = vadd.f32 %v12283_v3, %v3163_v52  ;;  %v11865_v3 = vld [vmem:[%s14974_s10 + $0x8] sm:$0xff]  ;;  %v11874_v52 = vld [vmem:[%s14974_s10 + $0x50] sm:$0xff] }
0x1407   : > { %3263 = vmatpush.bf16.msra.mxu0 %v10279_v15  ;;  %3442 = vmatpush.bf16.msra.mxu1 %v11866_v0  ;;  %v11890_v15 = vld [vmem:[%s14978_s2 + $0x10] sm:$0xff] }
0x1408   : > { %v3171_v6 = vsel %vm2697_vm14, %v13180_v4, 0.0 }
0x1409   : > { %3172 = vadd.xlane.f32.xlu1 %v3171_v6  ;;  %v3160_v5 = vpop.f32.mrf.mxu2  ;;  %v11864_v6 = vld [vmem:[%s14974_s10] sm:$0xff]  ;;  %3455 = vmatpush.bf16.msrb.mxu2 %v11874_v52 }
0x140a   : > { %v11873_v5 = vld [vmem:[%s14974_s10 + $0x48] sm:$0xff] }
0x140b   : > { %3264 = vmatpush.bf16.msra.mxu0 %v10271_v23  ;;  %3443 = vmatpush.bf16.msra.mxu1 %v11865_v3 }
0x140d   : > { %3456 = vmatpush.bf16.msrb.mxu2 %v11873_v5 }
0x140f   : > { %3265 = vmatpush.bf16.msra.mxu0 %v10263_v28  ;;  %3444 = vmatpush.bf16.msra.mxu1 %v11864_v6 }
0x1413   : > { %3266 = vmatpush.bf16.msra.mxu0 %v10255_v34 }
0x147c   : > { %v3173_v7 = vpop.xlane.xlu1 %3172 }
0x147d   : > { %v3174_v58 = vmul.f32 %v3173_v7, %v13097_v24  ;;  %v3210_v7 = vld [vmem:[%s14977_s1] sm:$0x3]  ;;  %s14979_s1 = sld [smem:[#allocation28_spill]] }
0x147e   : > { %v3213_v14 = vperm.slane %v3210_v7, 1 }
0x147f   : > { %v3175_v8 = vsub.f32 %v13180_v4, %v3174_v58  ;;  %v11872_v58 = vld [vmem:[%s14974_s10 + $0x40] sm:$0xff] }
0x1480   : > { %3457 = vmatpush.bf16.msrb.mxu2 %v11872_v58 }
0x1481   : > { %v3176_v9 = vmul.f32 %v3175_v8, %v3175_v8 }
0x1483   : > { %v3177_v11 = vsel %vm2697_vm14, %v3176_v9, 0.0 }
0x1484   : > { %3178 = vadd.xlane.f32.xlu0 %v3177_v11  ;;  %3754 = vmatpush.bf16.msra.mxu2 %v11891_v13 }
0x1488   : > { %3755 = vmatpush.bf16.msra.mxu2 %v11890_v15 }
0x14f7   : > { %v3179_v38 = vpop.xlane.xlu0 %3178 }
0x14f8   : > { %v3180_v39 = vmul.f32 %v3179_v38, %v13097_v24 }
0x14fa   : > { %v3181_v40 = vadd.f32 1e-05, %v3180_v39 }
0x14fc   : > { %12362 = vrsqrt.f32 %v3181_v40  ;;  %vm3188_vm10 = vweird.f32 %v3181_v40 }
0x1502   : > { %v12363_v41 = vpop.eup %12362 }
0x1503   : > { %v3183_v42 = vmul.f32 %v12363_v41, %v3181_v40  ;;  %vm3189_vm9 = vweird.f32 %v12363_v41 }
0x1504   : > { %vm3190_vm11 = vmor %vm3188_vm10, %vm3189_vm9 }
0x1505   : > { %v3184_v44 = vmul.f32 %v12363_v41, %v3183_v42 }
0x1507   : > { %v3185_v45 = vmul.f32 0.5, %v3184_v44 }
0x1509   : > { %v3186_v46 = vsub.f32 1.5, %v3185_v45 }
0x150b   : > { %v3187_v47 = vmul.f32 %v12363_v41, %v3186_v46 }
0x150d   : > { %v3191_v49 = vsel %vm3190_vm11, %v12363_v41, %v3187_v47  ;;  %v12286_v41 = vld [vmem:[%s14979_s1] ss:$0 sm:$0xff]  ;;  %s14981_s1 = sld [smem:[#allocation50_spill]] }
0x150e   : > { %v3192_v10 = vmul.f32 %v3191_v49, %v3175_v8  ;;  %v3212_v8 = vperm.slane %v3210_v7, 0  ;;  %v12288_v7 = vld [vmem:[%s14982_s0] ss:$0 sm:$0xff]  ;;  %s14986_s0 = sld [smem:[#allocation39_spill]] }
0x1510   : > { %v3196_v50 = vmul.f32 %v12284_v48, %v3192_v10 }
0x1512   : > { %v3200_v51 = vadd.f32 %v12285_v43, %v3196_v50 }
0x1513   : > { %v12287_v52 = vld [vmem:[%s14981_s1] ss:$0 sm:$0xff]  ;;  %s14987_s1 = sld [smem:[#allocation38_spill]] }
0x1514   : > { %v3209_v53 = vpack.c.bf16 %v3200_v51, %v3200_v51 }
0x1516   : > { %10284 = vmatmul.msk.bf16.vlgmr.msra.gmra.mxu0 %vm2573_vm7, %v3209_v53  ;;  %10285 = vmatmul.msk.bf16.vlgmr.msra.gmra.mxu3 %vm2573_vm7, %v3209_v53  ;;  %v11883_v53 = vld [vmem:[%s14980_s18 + $0x18] sm:$0xff] }
0x1517   : > { %3536 = vmatpush.bf16.msrb.mxu0 %v11883_v53  ;;  %v11888_v53 = vld [vmem:[%s14978_s2] sm:$0xff] }
0x151b   : > { %3537 = vmatpush.bf16.msrb.mxu0 %v11882_v54 }
0x151f   : > { %3538 = vmatpush.bf16.msrb.mxu0 %v11881_v55 }
0x1593   : > { %v3268_v9 = vpop.f32.mrf.mxu0 }
0x1594   : > { %v3269_v11 = vadd.f32 %v3268_v9, %v3212_v8 }
0x1596   : > { %v3285_v12 = vmul.f32 %v3269_v11, %v3269_v11 }
0x1598   : > { %v3287_v16 = vmul.f32 %v3285_v12, %v3269_v11 }
0x1599   : > { %v3281_v17 = vpop.f32.mrf.mxu3 }
0x159a   : > { %v3289_v18 = vmul.f32 0.044715, %v3287_v16  ;;  %v3282_v20 = vadd.f32 %v3281_v17, %v3213_v14  ;;  %v11884_v14 = vld [vmem:[%s14983_s3] sm:$0xff]  ;;  %v11887_v17 = vld [vmem:[%s14983_s3 + $0x18] sm:$0xff] }
0x159b   : > { %v3270_v22 = vpop.f32.mrf.mxu0 }
0x159c   : > { %v3291_v23 = vadd.f32 %v3289_v18, %v3269_v11  ;;  %v3286_v60 = vmul.f32 %v3282_v20, %v3282_v20 }
0x159e   : > { %v3293_v1 = vmul.f32 0.7978846, %v3291_v23  ;;  %v3288_v25 = vmul.f32 %v3286_v60, %v3282_v20  ;;  %v11885_v60 = vld [vmem:[%s14983_s3 + $0x8] sm:$0xff] }
0x15a0   : > { %12364 = vtanh.f32 %v3293_v1  ;;  %v3290_v26 = vmul.f32 0.044715, %v3288_v25  ;;  %v11886_v1 = vld [vmem:[%s14983_s3 + $0x10] sm:$0xff]  ;;  %s14993_s3 = sld [smem:[#allocation8_spill]] }
0x15a1   : > { %v3283_v27 = vpop.f32.mrf.mxu3 }
0x15a2   : > { %v3292_v28 = vadd.f32 %v3290_v26, %v3282_v20 }
0x15a4   : > { %v3294_v29 = vmul.f32 0.7978846, %v3292_v28 }
0x15a6   : > { %v12365_v30 = vpop.eup %12364  ;;  %12366 = vtanh.f32 %v3294_v29 }
0x15a7   : > { %v3297_v31 = vadd.f32 1.0, %v12365_v30 }
0x15a9   : > { %v3299_v32 = vmul.f32 0.5, %v3297_v31 }
0x15ab   : > { %v3301_v33 = vmul.f32 %v3299_v32, %v3269_v11 }
0x15ac   : > { %v12367_v34 = vpop.eup %12366 }
0x15ad   : > { %v3335_v35 = vpack.c.bf16 %v3301_v33, %v3301_v33  ;;  %v3298_v36 = vadd.f32 1.0, %v12367_v34 }
0x15af   : > { %3445 = vmatmul.bf16.vlgmr.msra.gmra.mxu1 %v3335_v35  ;;  %v3300_v37 = vmul.f32 0.5, %v3298_v36 }
0x15b1   : > { %v3302_v38 = vmul.f32 %v3300_v37, %v3282_v20 }
0x15b3   : > { %v3336_v39 = vpack.c.bf16 %v3302_v38, %v3302_v38 }
0x15b5   : > { %3458 = vmatmul.bf16.vlgmr.msrb.gmra.mxu2 %v3336_v39 }
0x15c5   : > { %10401 = vmatmul.msk.bf16.vlgmr.msra.gmra.mxu2 %vm1927_vm1, %v13062_v21 }
0x162c   : > { %v3446_v40 = vpop.f32.mrf.mxu1 }
0x162d   : > { %v3447_v44 = vadd.f32 %v12286_v41, %v3446_v40 }
0x1634   : > { %v3448_v42 = vpop.f32.mrf.mxu1 }
0x1638   : > { %v3459_v45 = vpop.f32.mrf.mxu2 }
0x1639   : > { %v3460_v46 = vadd.f32 %v3459_v45, %v3447_v44 }
0x163b   : > { %v3463_v47 = vadd.f32 %v3460_v46, %v13180_v4  ;;  %v11880_v4 = vld [vmem:[%s14980_s18] sm:$0xff] }
0x163c   : > { %3539 = vmatpush.bf16.msrb.mxu0 %v11880_v4 }
0x163d   : > { %v3466_v48 = vsel %vm2697_vm14, %v3463_v47, 0.0 }
0x163e   : > { %3467 = vadd.xlane.f32.xlu2 %v3466_v48 }
0x1640   : > { %v3461_v49 = vpop.f32.mrf.mxu2 }
0x16b1   : > { %v3468_v10 = vpop.xlane.xlu2 %3467 }
0x16b2   : > { %v3469_v43 = vmul.f32 %v3468_v10, %v13097_v24 }
0x16b4   : > { %v3470_v21 = vsub.f32 %v3463_v47, %v3469_v43 }
0x16b6   : > { %v3471_v50 = vmul.f32 %v3470_v21, %v3470_v21 }
0x16b8   : > { %v3472_v51 = vsel %vm2697_vm14, %v3471_v50, 0.0 }
0x16b9   : > { %3473 = vadd.xlane.f32.xlu1 %v3472_v51 }
0x172c   : > { %v3474_v56 = vpop.xlane.xlu1 %3473 }
0x172d   : > { %v3475_v57 = vmul.f32 %v3474_v56, %v13097_v24 }
0x172f   : > { %v3476_v59 = vadd.f32 1e-05, %v3475_v57 }
0x1731   : > { %12368 = vrsqrt.f32 %v3476_v59  ;;  %vm3483_vm13 = vweird.f32 %v3476_v59 }
0x1737   : > { %v12369_v61 = vpop.eup %12368 }
0x1738   : > { %v3478_v62 = vmul.f32 %v12369_v61, %v3476_v59  ;;  %vm3484_vm12 = vweird.f32 %v12369_v61 }
0x1739   : > { %vm3485_vm14 = vmor %vm3483_vm13, %vm3484_vm12 }
0x173a   : > { %v3479_v63 = vmul.f32 %v12369_v61, %v3478_v62 }
0x173c   : > { %v3480_v0 = vmul.f32 0.5, %v3479_v63 }
0x173e   : > { %v3481_v2 = vsub.f32 1.5, %v3480_v0 }
0x1740   : > { %v3482_v3 = vmul.f32 %v12369_v61, %v3481_v2 }
0x1742   : > { %v3486_v6 = vsel %vm3485_vm14, %v12369_v61, %v3482_v3 }
0x1743   : > { %v3487_v5 = vmul.f32 %v3486_v6, %v3470_v21  ;;  %v11889_v21 = vld [vmem:[%s14978_s2 + $0x8] sm:$0xff]  ;;  %s14988_s2 = sld [smem:[#allocation6_spill]] }
0x1745   : > { %v3491_v58 = vmul.f32 %v12287_v52, %v3487_v5 }
0x1747   : > { %v3495_v8 = vadd.f32 %v12288_v7, %v3491_v58  ;;  %v12289_v58 = vld [vmem:[%s14986_s0] ss:$0 sm:$0xff]  ;;  %s14989_s0 = sld [smem:[#allocation20_spill]] }
0x1749   : > { %v3504_v24 = vpack.c.bf16 %v3495_v8, %v3495_v8 }
0x174b   : > { %10366 = vmatmul.msk.bf16.vlgmr.msrb.gmra.mxu0 %vm2573_vm7, %v3504_v24 }
0x17c8   : > { %v3541_v9 = vpop.f32.mrf.mxu0 }
0x17c9   : > { %v3547_v11 = vpack.c.bf16 %v3541_v9, %v3541_v9 }
0x17cb   : > { %3644 = vrot.lane.b32.xlu2 %v3547_v11, %s14984_s5  ;;  %3612 = vrot.lane.b32.xlu1 %v3547_v11, %s14985_s6  ;;  %v3588_v13 = vsel %vm2871_vm5, %v3547_v11, 0 }
0x17cc   : > { %3557 = vrot.lane.b32.xlu0 %v3547_v11, %s14971_s23  ;;  %3597 = vmatpush.bf16.msra.mxu0 %v3588_v13  ;;  %v12290_v11 = vld [vmem:[%s14987_s1] ss:$0 sm:$0xff]  ;;  %s14991_s1 = sld [smem:[#allocation13_spill]] }
0x17cf   : > { %10378 = vmatmul.msk.bf16.vlgmr.msra.gmra.mxu0 %vm2867_vm8, %v11884_v14 }
0x17d0   : > { %v3543_v12 = vpop.f32.mrf.mxu0  ;;  %3783 = vmatpush.bf16.msrb.mxu0 %v11889_v21 }
0x17d4   : > { %3784 = vmatpush.bf16.msrb.mxu0 %v11888_v53 }
0x1825   : > { %v3645_v15 = vpop.permute.xlu2 %3644 }
0x1826   : > { %v3650_v16 = vsel %vm2871_vm5, %v3645_v15, 0 }
0x1827   : > { %3659 = vmatpush.bf16.msrb.mxu1 %v3650_v16 }
0x182a   : > { %10392 = vmatmul.msk.bf16.vlgmr.msrb.gmra.mxu1 %vm2867_vm8, %v11887_v17 }
0x183d   : > { %v3613_v18 = vpop.permute.xlu1 %3612 }
0x183e   : > { %v3618_v20 = vsel %vm2871_vm5, %v3613_v18, 0  ;;  %v3558_v22 = vpop.permute.xlu0 %3557  ;;  %v3757_v18 = vpop.f32.mrf.mxu2 }
0x183f   : > { %v3563_v23 = vsel %vm2871_vm5, %v3558_v22, 0 }
0x1840   : > { %3572 = vmatpush.bf16.msrb.mxu3 %v3563_v23 }
0x1843   : > { %10373 = vmatmul.msk.bf16.vlgmr.msrb.gmra.mxu3 %vm2867_vm8, %v11885_v60 }
0x1844   : > { %3627 = vmatpush.bf16.msra.mxu3 %v3618_v20  ;;  %v12291_v20 = vld [vmem:[%s14988_s2] ss:$0 sm:$0xff]  ;;  %s14990_s2 = sld [smem:[#allocation14_spill]] }
0x184c   : > { %v3599_v27 = vpop.f32.mrf.mxu0 }
0x1853   : > { %10385 = vmatmul.msk.bf16.vlgmr.msra.gmra.mxu3 %vm2867_vm8, %v11886_v1 }
0x1854   : > { %v3601_v33 = vpop.f32.mrf.mxu0 }
0x18a7   : > { %v3661_v29 = vpop.f32.mrf.mxu1 }
0x18af   : > { %v3663_v38 = vpop.f32.mrf.mxu1 }
0x18c6   : > { %v3574_v25 = vpop.f32.mrf.mxu3 }
0x18c7   : > { %v3600_v28 = vadd.f32 %v3599_v27, %v3574_v25  ;;  %v3759_v25 = vpop.f32.mrf.mxu2 }
0x18ce   : > { %v3576_v26 = vpop.f32.mrf.mxu3 }
0x18cf   : > { %v3602_v35 = vadd.f32 %v3601_v33, %v3576_v26 }
0x18d6   : > { %v3629_v30 = vpop.f32.mrf.mxu3 }
0x18d7   : > { %v3634_v31 = vadd.f32 %v3629_v30, %v3600_v28 }
0x18d9   : > { %v3666_v32 = vadd.f32 %v3661_v29, %v3634_v31 }
0x18db   : > { %v3670_v34 = vsel %vm1927_vm1, %v3666_v32, 0.0 }
0x18dc   : > { %3671 = vadd.xlane.f32.xlu0 %v3670_v34 }
0x18de   : > { %v3631_v36 = vpop.f32.mrf.mxu3 }
0x18df   : > { %v3635_v37 = vadd.f32 %v3631_v36, %v3602_v35 }
0x18e1   : > { %v3667_v39 = vadd.f32 %v3663_v38, %v3635_v37 }
0x18e3   : > { %v3673_v40 = vsel %vm1927_vm1, %v3667_v39, 0.0 }
0x18e4   : > { %3674 = vadd.xlane.f32.xlu2 %v3673_v40  ;;  %v11893_v40 = vld [vmem:[%s14989_s0 + $0x8] sm:$0xff] }
0x18e5   : > { %3883 = vmatpush.bf16.msrb.mxu3 %v11893_v40 }
0x194f   : > { %v3672_v41 = vpop.xlane.xlu0 %3671 }
0x1950   : > { %v3676_v42 = vmul.f32 %v3672_v41, %v12959_v19 }
0x1952   : > { %v3678_v44 = vsub.f32 %v3666_v32, %v3676_v42 }
0x1954   : > { %v3680_v45 = vmul.f32 %v3678_v44, %v3678_v44 }
0x1956   : > { %v3682_v46 = vsel %vm1927_vm1, %v3680_v45, 0.0 }
0x1957   : > { %v3675_v47 = vpop.xlane.xlu2 %3674  ;;  %3683 = vadd.xlane.f32.xlu1 %v3682_v46 }
0x1958   : > { %v3677_v48 = vmul.f32 %v3675_v47, %v12959_v19 }
0x195a   : > { %v3679_v49 = vsub.f32 %v3667_v39, %v3677_v48 }
0x195c   : > { %v3681_v10 = vmul.f32 %v3679_v49, %v3679_v49 }
0x195e   : > { %v3685_v43 = vsel %vm1927_vm1, %v3681_v10, 0.0 }
0x195f   : > { %3686 = vadd.xlane.f32.xlu0 %v3685_v43 }
0x19ca   : > { %v3684_v50 = vpop.xlane.xlu1 %3683 }
0x19cb   : > { %v3688_v51 = vmul.f32 %v3684_v50, %v12959_v19 }
0x19cd   : > { %v3690_v54 = vadd.f32 1e-05, %v3688_v51 }
0x19cf   : > { %12370 = vrsqrt.f32 %v3690_v54  ;;  %vm3698_vm0 = vweird.f32 %v3690_v54 }
0x19d2   : > { %v3687_v55 = vpop.xlane.xlu0 %3686 }
0x19d3   : > { %v3689_v4 = vmul.f32 %v3687_v55, %v12959_v19 }
0x19d5   : > { %v12371_v56 = vpop.eup %12370  ;;  %v3691_v57 = vadd.f32 1e-05, %v3689_v4 }
0x19d6   : > { %v3693_v59 = vmul.f32 %v12371_v56, %v3690_v54  ;;  %vm3699_vm7 = vweird.f32 %v12371_v56 }
0x19d7   : > { %12372 = vrsqrt.f32 %v3691_v57  ;;  %vm3700_vm2 = vmor %vm3698_vm0, %vm3699_vm7  ;;  %vm3708_vm4 = vweird.f32 %v3691_v57 }
0x19d8   : > { %v3694_v61 = vmul.f32 %v12371_v56, %v3693_v59  ;;  %v12292_v59 = vld [vmem:[%s14990_s2] ss:$0 sm:$0xff]  ;;  %s14994_s2 = smov 112  }
0x19da   : > { %v3695_v62 = vmul.f32 0.5, %v3694_v61 }
0x19dc   : > { %v3696_v63 = vsub.f32 1.5, %v3695_v62 }
0x19dd   : > { %v12373_v0 = vpop.eup %12372 }
0x19de   : > { %v3697_v2 = vmul.f32 %v12371_v56, %v3696_v63  ;;  %v3703_v3 = vmul.f32 %v12373_v0, %v3691_v57  ;;  %vm3709_vm3 = vweird.f32 %v12373_v0 }
0x19df   : > { %vm3710_vm5 = vmor %vm3708_vm4, %vm3709_vm3 }
0x19e0   : > { %v3704_v52 = vmul.f32 %v12373_v0, %v3703_v3  ;;  %v3701_v6 = vsel %vm3700_vm2, %v12371_v56, %v3697_v2 }
0x19e1   : > { %v3712_v8 = vmul.f32 %v3701_v6, %v3678_v44  ;;  %v11892_v44 = vld [vmem:[%s14989_s0] sm:$0xff]  ;;  %s14992_s0 = sld [smem:[#allocation19_spill]] }
0x19e2   : > { %v3705_v5 = vmul.f32 0.5, %v3704_v52  ;;  %3884 = vmatpush.bf16.msrb.mxu3 %v11892_v44 }
0x19e3   : > { %v3717_v13 = vmul.f32 %v12289_v58, %v3712_v8 }
0x19e4   : > { %v3706_v7 = vsub.f32 1.5, %v3705_v5 }
0x19e5   : > { %v3722_v15 = vadd.f32 %v12290_v11, %v3717_v13 }
0x19e6   : > { %v3707_v24 = vmul.f32 %v12373_v0, %v3706_v7 }
0x19e7   : > { %v12294_v8 = vld [vmem:[%s14992_s0] ss:$0 sm:$0xff]  ;;  %s14996_s0 = smov 48  }
0x19e8   : > { %v3711_v9 = vsel %vm3710_vm5, %v12373_v0, %v3707_v24  ;;  %v12293_v0 = vld [vmem:[%s14991_s1] ss:$0 sm:$0xff]  ;;  %s14995_s1 = smov 80  }
0x19e9   : > { %v3713_v12 = vmul.f32 %v3711_v9, %v3679_v49 }
0x19eb   : > { %v3718_v14 = vmul.f32 %v12289_v58, %v3713_v12 }
0x19ed   : > { %v3723_v16 = vadd.f32 %v12290_v11, %v3718_v14 }
0x19ef   : > { %v3732_v17 = vpack.c.bf16 %v3723_v16, %v3722_v15 }
0x19f1   : > { %10410 = vmatmul.msk.bf16.vlgmr.msrb.gmra.mxu0 %vm1927_vm1, %v3732_v17 }
0x1a6e   : > { %v3786_v22 = vpop.f32.mrf.mxu0 }
0x1a6f   : > { %v3787_v23 = vadd.f32 %v3786_v22, %v3757_v18 }
0x1a71   : > { %v13271_v60 = vadd.f32 %v12291_v20, %v3787_v23 }
0x1a73   : > { %v3799_v1 = vsel %vm1927_vm1, %v13271_v60, 0.0 }
0x1a74   : > { %3800 = vadd.xlane.f32.xlu2 %v3799_v1  ;;  %v3921_v1 = vld [vmem:[%s14993_s3] sm:$0xff] }
0x1a76   : > { %v3788_v26 = vpop.f32.mrf.mxu0 }
0x1a77   : > { %v3789_v27 = vadd.f32 %v3788_v26, %v3759_v25 }
0x1a79   : > { %v13275_v28 = vadd.f32 %v12291_v20, %v3789_v27  ;;  %v10423_v20 = vld [vmem:[%s14993_s3 + $0x10] sm:$0xff] }
0x1a7b   : > { %v3802_v29 = vsel %vm1927_vm1, %v13275_v28, 0.0 }
0x1a7c   : > { %3803 = vadd.xlane.f32.xlu0 %v3802_v29 }
0x1ae7   : > { %v3801_v30 = vpop.xlane.xlu2 %3800 }
0x1ae8   : > { %v3805_v31 = vmul.f32 %v3801_v30, %v12959_v19 }
0x1aea   : > { %v3807_v32 = vsub.f32 %v13271_v60, %v3805_v31 }
0x1aec   : > { %v3809_v33 = vmul.f32 %v3807_v32, %v3807_v32 }
0x1aee   : > { %v3811_v34 = vsel %vm1927_vm1, %v3809_v33, 0.0 }
0x1aef   : > { %v3804_v35 = vpop.xlane.xlu0 %3803  ;;  %3812 = vadd.xlane.f32.xlu1 %v3811_v34 }
0x1af0   : > { %v3806_v36 = vmul.f32 %v3804_v35, %v12959_v19  ;;  %v3922_v35 = vld [vmem:[%s14993_s3 + $0x8] sm:$0xff] }
0x1af2   : > { %v3808_v37 = vsub.f32 %v13275_v28, %v3806_v36 }
0x1af4   : > { %v3810_v38 = vmul.f32 %v3808_v37, %v3808_v37 }
0x1af6   : > { %v3814_v39 = vsel %vm1927_vm1, %v3810_v38, 0.0 }
0x1af7   : > { %3815 = vadd.xlane.f32.xlu2 %v3814_v39 }
0x1b62   : > { %v3813_v41 = vpop.xlane.xlu1 %3812 }
0x1b63   : > { %v3817_v42 = vmul.f32 %v3813_v41, %v12959_v19 }
0x1b65   : > { %v3819_v45 = vadd.f32 1e-05, %v3817_v42 }
0x1b67   : > { %12374 = vrsqrt.f32 %v3819_v45  ;;  %vm3827_vm9 = vweird.f32 %v3819_v45 }
0x1b6a   : > { %v3816_v46 = vpop.xlane.xlu2 %3815 }
0x1b6b   : > { %v3818_v47 = vmul.f32 %v3816_v46, %v12959_v19 }
0x1b6d   : > { %v12375_v48 = vpop.eup %12374  ;;  %v3820_v49 = vadd.f32 1e-05, %v3818_v47 }
0x1b6e   : > { %v3822_v10 = vmul.f32 %v12375_v48, %v3819_v45  ;;  %vm3828_vm6 = vweird.f32 %v12375_v48 }
0x1b6f   : > { %12376 = vrsqrt.f32 %v3820_v49  ;;  %vm3829_vm10 = vmor %vm3827_vm9, %vm3828_vm6  ;;  %vm3837_vm12 = vweird.f32 %v3820_v49 }
0x1b70   : > { %v3823_v43 = vmul.f32 %v12375_v48, %v3822_v10 }
0x1b72   : > { %v3824_v21 = vmul.f32 0.5, %v3823_v43 }
0x1b74   : > { %v3825_v50 = vsub.f32 1.5, %v3824_v21 }
0x1b75   : > { %v12377_v51 = vpop.eup %12376 }
0x1b76   : > { %v3826_v53 = vmul.f32 %v12375_v48, %v3825_v50  ;;  %v3832_v54 = vmul.f32 %v12377_v51, %v3820_v49  ;;  %vm3838_vm11 = vweird.f32 %v12377_v51 }
0x1b77   : > { %vm3839_vm13 = vmor %vm3837_vm12, %vm3838_vm11 }
0x1b78   : > { %v3833_v55 = vmul.f32 %v12377_v51, %v3832_v54  ;;  %v3830_v4 = vsel %vm3829_vm10, %v12375_v48, %v3826_v53 }
0x1b79   : > { %v3841_v61 = vmul.f32 %v3830_v4, %v3807_v32  ;;  %v10424_v32 = vld [vmem:[%s14993_s3 + $0x18] sm:$0xff]  ;;  %s15003_s3 = sld [smem:[#allocation9_spill]] }
0x1b7a   : > { %v3834_v56 = vmul.f32 0.5, %v3833_v55 }
0x1b7b   : > { %v3846_v2 = vmul.f32 %v12292_v59, %v3841_v61 }
0x1b7c   : > { %v3835_v57 = vsub.f32 1.5, %v3834_v56 }
0x1b7d   : > { %v3851_v6 = vadd.f32 %v12293_v0, %v3846_v2 }
0x1b7e   : > { %v3836_v62 = vmul.f32 %v12377_v51, %v3835_v57 }
0x1b80   : > { %v3840_v63 = vsel %vm3839_vm13, %v12377_v51, %v3836_v62 }
0x1b81   : > { %v3842_v3 = vmul.f32 %v3840_v63, %v3808_v37 }
0x1b83   : > { %v3847_v52 = vmul.f32 %v12292_v59, %v3842_v3 }
0x1b85   : > { %v3852_v5 = vadd.f32 %v12293_v0, %v3847_v52 }
0x1b87   : > { %v3857_v7 = vpack.c.bf16 %v3852_v5, %v3851_v6 }
0x1b89   : > { %10419 = vmatmul.msk.bf16.vlgmr.msrb.gmra.mxu3 %vm1927_vm1, %v3857_v7 }
0x1c0c   : > { %v3886_v58 = vpop.f32.mrf.mxu3 }
0x1c0d   : > { %v3887_v9 = vadd.f32 %v12294_v8, %v3886_v58 }
0x1c14   : > { %v3888_v24 = vpop.f32.mrf.mxu3 }
0x1c15   : > { %v3889_v11 = vadd.f32 %v12294_v8, %v3888_v24 }
0x1c17   : > { %v13293_v13 = vpack.c.bf16 %v3889_v11, %v3887_v9 }
0x1c19   : > { %3969 = vrot.lane.b32.xlu2 %v13293_v13, %s14994_s2  ;;  %3971 = vrot.lane.b32.xlu1 %v13293_v13, %s14995_s1  ;;  %s14997_s2 = sld [smem:[#allocation18_spill]] }
0x1c1a   : > { %3897 = vrot.lane.b32.xlu0 %v13293_v13, %s14971_s23  ;;  %s14998_s1 = sld [smem:[#allocation17_spill]] }
0x1c73   : > { %v3970_v17 = vpop.permute.xlu2 %3969 }
0x1c8b   : > { %v3972_v12 = vpop.permute.xlu1 %3971 }
0x1c8c   : > { %v3977_v14 = vsel %vm2091_vm15, %v3972_v12, 0  ;;  %v3898_v15 = vpop.permute.xlu0 %3897  ;;  %v11895_v12 = vld [vmem:[%s14997_s2 + $0x8] sm:$0xff] }
0x1c8d   : > { %v3903_v16 = vsel %vm2091_vm15, %v3898_v15, 0  ;;  %3986 = vmatpush.bf16.xpose.msra.mxu0 %v3977_v14  ;;  %v11894_v14 = vld [vmem:[%s14997_s2] sm:$0xff]  ;;  %s15001_s2 = sld [smem:[#allocation15_spill]] }
0x1c8e   : > { %3912 = vmatpush.bf16.xpose.msra.mxu1 %v3903_v16 }
0x1c94   : > { %10422 = vmatmul.msk.bf16.vlgmr.msra.gmra.mxu0 %vm2091_vm15, %v3970_v17 }
0x1c95   : > { %10420 = vmatmul.msk.bf16.vlgmr.msra.gmra.mxu1 %vm2091_vm15, %v13293_v13 }
0x1c96   : > { %4060 = vmatpush.bf16.msrb.mxu1 %v11895_v12 }
0x1d11   : > { %v3988_v18 = vpop.f32.mrf.mxu0 }
0x1d12   : > { %v3914_v22 = vpop.f32.mrf.mxu1  ;;  %v3993_v23 = vmul.f32 0.25, %v3988_v18 }
0x1d13   : > { %v3919_v25 = vmul.f32 0.25, %v3914_v22 }
0x1d14   : > { %v3998_v26 = vadd.f32 %v10423_v20, %v3993_v23 }
0x1d15   : > { %v3923_v27 = vadd.f32 %v3921_v1, %v3919_v25 }
0x1d16   : > { %v4000_v29 = vsel %vm2091_vm15, %v3998_v26, -inf }
0x1d17   : > { %4001 = vmax.xlane.f32.xlu2 %v4000_v29  ;;  %v3925_v30 = vsel %vm2091_vm15, %v3923_v27, -inf }
0x1d18   : > { %3926 = vmax.xlane.f32.xlu0 %v3925_v30 }
0x1d19   : > { %v3990_v31 = vpop.f32.mrf.mxu0 }
0x1d1a   : > { %v3916_v33 = vpop.f32.mrf.mxu1  ;;  %v3994_v34 = vmul.f32 0.25, %v3990_v31 }
0x1d1b   : > { %v3920_v36 = vmul.f32 0.25, %v3916_v33 }
0x1d1c   : > { %v3999_v37 = vadd.f32 %v10424_v32, %v3994_v34 }
0x1d1d   : > { %v3924_v38 = vadd.f32 %v3922_v35, %v3920_v36 }
0x1d1e   : > { %v4003_v39 = vsel %vm2091_vm15, %v3999_v37, -inf }
0x1d1f   : > { %v3928_v40 = vsel %vm2091_vm15, %v3924_v38, -inf }
0x1d20   : > { %4004 = vmax.xlane.f32.xlu0 %v4003_v39  ;;  %3929 = vmax.xlane.f32.xlu1 %v3928_v40 }
0x1d8a   : > { %v4002_v41 = vpop.xlane.xlu2 %4001 }
0x1d8b   : > { %v4006_v42 = vsub.f32 %v3998_v26, %v4002_v41  ;;  %v3927_v44 = vpop.xlane.xlu0 %3926  ;;  %v12295_v26 = vld [vmem:[%s14998_s1] ss:$0 sm:$0xff]  ;;  %s15000_s1 = sld [smem:[#allocation16_spill]] }
0x1d8c   : > { %v3931_v45 = vsub.f32 %v3923_v27, %v3927_v44 }
0x1d8d   : > { %v4008_v46 = vmul.f32 1.442695, %v4006_v42 }
0x1d8e   : > { %v3933_v47 = vmul.f32 1.442695, %v3931_v45 }
0x1d8f   : > { %12378 = vpow2.f32 %v4008_v46 }
0x1d90   : > { %12380 = vpow2.f32 %v3933_v47 }
0x1d93   : > { %v4005_v48 = vpop.xlane.xlu0 %4004  ;;  %v3930_v49 = vpop.xlane.xlu1 %3929 }
0x1d94   : > { %v4007_v10 = vsub.f32 %v3999_v37, %v4005_v48  ;;  %v3932_v43 = vsub.f32 %v3924_v38, %v3930_v49 }
0x1d95   : > { %v12379_v21 = vpop.eup %12378 }
0x1d96   : > { %v12381_v50 = vpop.eup %12380  ;;  %v4010_v51 = vmul.f32 1.442695, %v4007_v10  ;;  %v3935_v53 = vmul.f32 1.442695, %v3932_v43  ;;  %v4012_v54 = vsel %vm2091_vm15, %v12379_v21, 0.0 }
0x1d97   : > { %4013 = vadd.xlane.f32.xlu2 %v4012_v54  ;;  %v3937_v55 = vsel %vm2091_vm15, %v12381_v50, 0.0 }
0x1d98   : > { %12382 = vpow2.f32 %v4010_v51  ;;  %3938 = vadd.xlane.f32.xlu1 %v3937_v55 }
0x1d99   : > { %12384 = vpow2.f32 %v3935_v53 }
0x1d9e   : > { %v12383_v4 = vpop.eup %12382 }
0x1d9f   : > { %v12385_v56 = vpop.eup %12384  ;;  %v4015_v57 = vsel %vm2091_vm15, %v12383_v4, 0.0 }
0x1da0   : > { %4016 = vadd.xlane.f32.xlu1 %v4015_v57  ;;  %v3940_v59 = vsel %vm2091_vm15, %v12385_v56, 0.0 }
0x1da1   : > { %3941 = vadd.xlane.f32.xlu0 %v3940_v59 }
0x1daf   : > { %4023 = vrot.lane.b32.xlu2 %v13293_v13, %s14996_s0  ;;  %s14999_s0 = sld [smem:[#allocation10_spill]] }
0x1db5   : > { %3948 = vrot.lane.b32.xlu0 %v13293_v13, %s14985_s6  ;;  %v11897_v46 = vld [vmem:[%s14999_s0 + $0x8] sm:$0xff]  ;;  %v11896_v49 = vld [vmem:[%s14999_s0] sm:$0xff]  ;;  %s15002_s0 = sld [smem:[#allocation12_spill]] }
0x1db6   : > { %4184 = vmatpush.bf16.msrb.mxu0 %v11897_v46 }
0x1dba   : > { %4185 = vmatpush.bf16.msrb.mxu0 %v11896_v49 }
0x1dbb   : > { %v11904_v12 = vld [vmem:[%s15002_s0 + $0x30] sm:$0xff] }
0x1e0a   : > { %v4014_v61 = vpop.xlane.xlu2 %4013 }
0x1e0b   : > { %v3939_v62 = vpop.xlane.xlu1 %3938  ;;  %12386 = vrcp.f32 %v4014_v61 }
0x1e11   : > { %v12387_v2 = vpop.eup %12386 }
0x1e12   : > { %v4024_v63 = vpop.permute.xlu2 %4023  ;;  %v4020_v6 = vmul.f32 %v12387_v2, %v12379_v21  ;;  %v12296_v2 = vld [vmem:[%s15000_s1] ss:$0 sm:$0xff]  ;;  %s15006_s1 = sld [smem:[#allocation52_spill]] }
0x1e13   : > { %v4017_v0 = vpop.xlane.xlu1 %4016  ;;  %4036 = vmatpush.bf16.msra.mxu3 %v4024_v63 }
0x1e14   : > { %12388 = vrcp.f32 %v4017_v0  ;;  %v3942_v3 = vpop.xlane.xlu0 %3941 }
0x1e15   : > { %12390 = vrcp.f32 %v3942_v3 }
0x1e16   : > { %12392 = vrcp.f32 %v3939_v62 }
0x1e1a   : > { %v12389_v52 = vpop.eup %12388 }
0x1e1b   : > { %v4021_v5 = vmul.f32 %v12389_v52, %v12383_v4  ;;  %v12391_v58 = vpop.eup %12390 }
0x1e1c   : > { %v12393_v8 = vpop.eup %12392  ;;  %v3946_v24 = vmul.f32 %v12391_v58, %v12385_v56 }
0x1e1d   : > { %v4022_v7 = vpack.c.bf16 %v4021_v5, %v4020_v6  ;;  %v3945_v9 = vmul.f32 %v12393_v8, %v12381_v50  ;;  %v12297_v5 = vld [vmem:[%s15001_s2] ss:$0 sm:$0xff]  ;;  %s15004_s2 = sld [smem:[#allocation11_spill]] }
0x1e1f   : > { %10425 = vmatmul.msk.bf16.vlgmr.msra.gmra.mxu3 %vm2091_vm15, %v4022_v7  ;;  %v3947_v13 = vpack.c.bf16 %v3946_v24, %v3945_v9 }
0x1e27   : > { %v3949_v11 = vpop.permute.xlu0 %3948 }
0x1e28   : > { %3961 = vmatpush.bf16.msrb.mxu2 %v3949_v11 }
0x1e2b   : > { %10421 = vmatmul.msk.bf16.vlgmr.msrb.gmra.mxu2 %vm2091_vm15, %v3947_v13  ;;  %v11905_v13 = vld [vmem:[%s15002_s0 + $0x38] sm:$0xff] }
0x1e2c   : > { %4083 = vmatpush.bf16.msra.mxu2 %v11894_v14  ;;  %4279 = vmatpush.bf16.msra.mxu1 %v11905_v13  ;;  %v11903_v14 = vld [vmem:[%s15002_s0 + $0x28] sm:$0xff] }
0x1e30   : > { %4280 = vmatpush.bf16.msra.mxu1 %v11904_v12 }
0x1e34   : > { %4281 = vmatpush.bf16.msra.mxu1 %v11903_v14 }
0x1ea2   : > { %v4038_v15 = vpop.f32.mrf.mxu3 }
0x1eaa   : > { %v4040_v16 = vpop.f32.mrf.mxu3 }
0x1eab   : > { %v4043_v17 = vpack.c.bf16 %v4040_v16, %v4038_v15  ;;  %v11902_v15 = vld [vmem:[%s15002_s0 + $0x20] sm:$0xff]  ;;  %v11901_v16 = vld [vmem:[%s15002_s0 + $0x18] sm:$0xff] }
0x1eac   : > { %4282 = vmatpush.bf16.msra.mxu1 %v11902_v15 }
0x1ead   : > { %10430 = vmatmul.msk.bf16.vlgmr.msrb.gmra.mxu1 %vm2091_vm15, %v4043_v17  ;;  %v11900_v17 = vld [vmem:[%s15002_s0 + $0x10] sm:$0xff] }
0x1eae   : > { %v3963_v18 = vpop.f32.mrf.mxu2 }
0x1eb0   : > { %4283 = vmatpush.bf16.msra.mxu1 %v11901_v16 }
0x1eb4   : > { %4284 = vmatpush.bf16.msra.mxu1 %v11900_v17 }
0x1eb6   : > { %v3965_v20 = vpop.f32.mrf.mxu2 }
0x1eb7   : > { %v3968_v22 = vpack.c.bf16 %v3965_v20, %v3963_v18  ;;  %v11899_v18 = vld [vmem:[%s15002_s0 + $0x8] sm:$0xff]  ;;  %v12298_v20 = vld [vmem:[%s15003_s3] ss:$0 sm:$0xff]  ;;  %s15005_s3 = sld [smem:[#allocation42_spill]] }
0x1eb8   : > { %4285 = vmatpush.bf16.msra.mxu1 %v11899_v18 }
0x1eb9   : > { %10435 = vmatmul.msk.bf16.vlgmr.msra.gmra.mxu2 %vm2091_vm15, %v3968_v22  ;;  %v11898_v22 = vld [vmem:[%s15002_s0] sm:$0xff] }
0x1ebc   : > { %4286 = vmatpush.bf16.msra.mxu1 %v11898_v22 }
0x1ebd   : > { %v11908_v13 = vld [vmem:[%s15005_s3 + $0xc] sm:$0xf0]  ;;  %v11906_v12 = vld [vmem:[%s15005_s3 + $0x4] sm:$0xf]  ;;  %v10481_v15 = vld [vmem:[%s15005_s3 + $0x10] sm:$0xf0] }
0x1ebe   : > { %v10487_v16 = vld [vmem:[%s15005_s3 + $0x8] sm:$0xf]  ;;  %v11909_v17 = vld [vmem:[%s15005_s3 + $0x14] sm:$0xf0] }
0x1ebf   : > { %v10488_v22 = vor.u32 %v11909_v17, %v10487_v16  ;;  %v11941_v16 = vld [vmem:[#allocation2 + $0xd8] sm:$0xff] }
0x1ec0   : > { %v11965_v17 = vld [vmem:[#allocation2 + $0x198] sm:$0xff] }
0x1f2a   : > { %v4062_v23 = vpop.f32.mrf.mxu1 }
0x1f32   : > { %v4064_v31 = vpop.f32.mrf.mxu1 }
0x1f3c   : > { %v4085_v1 = vpop.f32.mrf.mxu2 }
0x1f3d   : > { %v4086_v25 = vadd.f32 %v4085_v1, %v4062_v23 }
0x1f3f   : > { %v4090_v27 = vadd.f32 %v4086_v25, %v13271_v60 }
0x1f41   : > { %v13330_v29 = vadd.f32 %v12295_v26, %v4090_v27 }
0x1f43   : > { %v4100_v30 = vsel %vm1927_vm1, %v13330_v29, 0.0 }
0x1f44   : > { %v4087_v32 = vpop.f32.mrf.mxu2  ;;  %4101 = vadd.xlane.f32.xlu1 %v4100_v30 }
0x1f45   : > { %v4088_v33 = vadd.f32 %v4087_v32, %v4064_v31 }
0x1f47   : > { %v4091_v34 = vadd.f32 %v4088_v33, %v13275_v28 }
0x1f49   : > { %v13335_v35 = vadd.f32 %v12295_v26, %v4091_v34 }
0x1f4b   : > { %v4103_v36 = vsel %vm1927_vm1, %v13335_v35, 0.0 }
0x1f4c   : > { %4104 = vadd.xlane.f32.xlu1 %v4103_v36 }
0x1fb7   : > { %v4102_v37 = vpop.xlane.xlu1 %4101 }
0x1fb8   : > { %v4106_v60 = vmul.f32 %v4102_v37, %v12959_v19 }
0x1fba   : > { %v4108_v38 = vsub.f32 %v13330_v29, %v4106_v60 }
0x1fbc   : > { %v4110_v39 = vmul.f32 %v4108_v38, %v4108_v38 }
0x1fbe   : > { %v4112_v40 = vsel %vm1927_vm1, %v4110_v39, 0.0 }
0x1fbf   : > { %4113 = vadd.xlane.f32.xlu0 %v4112_v40  ;;  %v4105_v41 = vpop.xlane.xlu1 %4104 }
0x1fc0   : > { %v4107_v28 = vmul.f32 %v4105_v41, %v12959_v19 }
0x1fc2   : > { %v4109_v42 = vsub.f32 %v13335_v35, %v4107_v28 }
0x1fc4   : > { %v4111_v44 = vmul.f32 %v4109_v42, %v4109_v42 }
0x1fc6   : > { %v4115_v45 = vsel %vm1927_vm1, %v4111_v44, 0.0 }
0x1fc7   : > { %4116 = vadd.xlane.f32.xlu1 %v4115_v45 }
0x2032   : > { %v4114_v47 = vpop.xlane.xlu0 %4113 }
0x2033   : > { %v4118_v48 = vmul.f32 %v4114_v47, %v12959_v19 }
0x2035   : > { %v4120_v10 = vadd.f32 1e-05, %v4118_v48  ;;  %v12299_v48 = vld [vmem:[%s15004_s2] ss:$0 sm:$0xff]  ;;  %s15007_s2 = sld [smem:[#allocation51_spill]] }
0x2037   : > { %12394 = vrsqrt.f32 %v4120_v10  ;;  %vm4128_vm7 = vweird.f32 %v4120_v10 }
0x203a   : > { %v4117_v43 = vpop.xlane.xlu1 %4116 }
0x203b   : > { %v4119_v21 = vmul.f32 %v4117_v43, %v12959_v19 }
0x203d   : > { %v12395_v50 = vpop.eup %12394  ;;  %v4121_v51 = vadd.f32 1e-05, %v4119_v21 }
0x203e   : > { %v4123_v53 = vmul.f32 %v12395_v50, %v4120_v10  ;;  %vm4129_vm14 = vweird.f32 %v12395_v50 }
0x203f   : > { %12396 = vrsqrt.f32 %v4121_v51  ;;  %vm4130_vm0 = vmor %vm4128_vm7, %vm4129_vm14  ;;  %vm4138_vm3 = vweird.f32 %v4121_v51 }
0x2040   : > { %v4124_v54 = vmul.f32 %v12395_v50, %v4123_v53 }
0x2042   : > { %v4125_v55 = vmul.f32 0.5, %v4124_v54 }
0x2044   : > { %v4126_v4 = vsub.f32 1.5, %v4125_v55 }
0x2045   : > { %v12397_v56 = vpop.eup %12396 }
0x2046   : > { %v4127_v57 = vmul.f32 %v12395_v50, %v4126_v4  ;;  %v4133_v59 = vmul.f32 %v12397_v56, %v4121_v51  ;;  %vm4139_vm2 = vweird.f32 %v12397_v56 }
0x2047   : > { %vm4140_vm4 = vmor %vm4138_vm3, %vm4139_vm2 }
0x2048   : > { %v4134_v61 = vmul.f32 %v12397_v56, %v4133_v59  ;;  %v4131_v62 = vsel %vm4130_vm0, %v12395_v50, %v4127_v57 }
0x2049   : > { %v4142_v3 = vmul.f32 %v4131_v62, %v4108_v38 }
0x204a   : > { %v4135_v63 = vmul.f32 0.5, %v4134_v61 }
0x204b   : > { %v4147_v7 = vmul.f32 %v12296_v2, %v4142_v3  ;;  %v11910_v3 = vld [vmem:[%s15005_s3 + $0x24] sm:$0xf] }
0x204c   : > { %v4136_v0 = vsub.f32 1.5, %v4135_v63 }
0x204d   : > { %v4152_v24 = vadd.f32 %v12297_v5, %v4147_v7  ;;  %v11913_v7 = vld [vmem:[%s15005_s3 + $0x34] sm:$0xf0] }
0x204e   : > { %v4137_v52 = vmul.f32 %v12397_v56, %v4136_v0  ;;  %v10495_v0 = vld [vmem:[%s15005_s3 + $0x20] sm:$0xf] }
0x2050   : > { %v4141_v6 = vsel %vm4140_vm4, %v12397_v56, %v4137_v52 }
0x2051   : > { %v4143_v58 = vmul.f32 %v4141_v6, %v4109_v42  ;;  %v10497_v6 = vld [vmem:[%s15005_s3 + $0x30] sm:$0xf0] }
0x2053   : > { %v4148_v8 = vmul.f32 %v12296_v2, %v4143_v58  ;;  %v11912_v2 = vld [vmem:[%s15005_s3 + $0x2c] sm:$0xf0]  ;;  %v10500_v58 = vor.u32 %v11910_v3, %v10497_v6  ;;  %v11963_v6 = vld [vmem:[#allocation2 + $0x188] sm:$0xff] }
0x2054   : > { %v10496_v52 = vor.u32 %v11912_v2, %v10495_v0 }
0x2055   : > { %v4153_v9 = vadd.f32 %v12297_v5, %v4148_v8  ;;  %v10503_v5 = vld [vmem:[%s15005_s3 + $0x28] sm:$0xf]  ;;  %4423 = vmatpush.bf16.msrb.mxu2 %v10500_v58  ;;  %v11930_v58 = vld [vmem:[#allocation2 + $0x80] sm:$0xff] }
0x2056   : > { %v10504_v8 = vor.u32 %v11913_v7, %v10503_v5  ;;  %4409 = vmatpush.bf16.msrb.mxu1 %v10496_v52  ;;  %v11962_v52 = vld [vmem:[#allocation2 + $0x180] sm:$0xff] }
0x2057   : > { %v4158_v11 = vpack.c.bf16 %v4153_v9, %v4152_v24 }
0x2058   : > { %4437 = vmatpush.bf16.msra.mxu0 %v10504_v8  ;;  %v11935_v8 = vld [vmem:[#allocation2 + $0xa8] sm:$0xff] }
0x2059   : > { %10444 = vmatmul.msk.bf16.vlgmr.msrb.gmra.mxu0 %vm1927_vm1, %v4158_v11  ;;  %v10479_v11 = vld [vmem:[%s15005_s3] sm:$0xf] }
0x205a   : > { %v10480_v14 = vor.u32 %v11908_v13, %v10479_v11  ;;  %v11964_v11 = vld [vmem:[#allocation2 + $0x190] sm:$0xff] }
0x205c   : > { %4410 = vmatpush.bf16.msrb.mxu1 %v10480_v14  ;;  %4438 = vmatpush.bf16.msra.mxu0 %v10488_v22  ;;  %v11931_v14 = vld [vmem:[#allocation2 + $0x88] sm:$0xff]  ;;  %v11937_v22 = vld [vmem:[#allocation2 + $0xb8] sm:$0xff] }
0x20d6   : > { %v4187_v23 = vpop.f32.mrf.mxu0 }
0x20d7   : > { %v4188_v1 = vadd.f32 %v12298_v20, %v4187_v23 }
0x20d9   : > { %v4192_v25 = vmul.f32 %v4188_v1, %v4188_v1 }
0x20db   : > { %v4194_v26 = vmul.f32 %v4192_v25, %v4188_v1  ;;  %v10505_v25 = vld [vmem:[%s15005_s3 + $0x38] sm:$0xf0] }
0x20dd   : > { %v4196_v27 = vmul.f32 0.044715, %v4194_v26  ;;  %v11907_v26 = vld [vmem:[%s15005_s3 + $0xc] sm:$0xf] }
0x20de   : > { %v4189_v30 = vpop.f32.mrf.mxu0 }
0x20df   : > { %v4198_v31 = vadd.f32 %v4196_v27, %v4188_v1  ;;  %v4190_v32 = vadd.f32 %v12298_v20, %v4189_v30  ;;  %v10484_v20 = vor.u32 %v11906_v12, %v10481_v15  ;;  %v11936_v15 = vld [vmem:[#allocation2 + $0xb0] sm:$0xff] }
0x20e1   : > { %v4200_v33 = vmul.f32 0.7978846, %v4198_v31  ;;  %v4193_v34 = vmul.f32 %v4190_v32, %v4190_v32  ;;  %4424 = vmatpush.bf16.msrb.mxu2 %v10484_v20  ;;  %v10489_v31 = vld [vmem:[%s15005_s3 + $0x18] sm:$0xf0]  ;;  %v11932_v20 = vld [vmem:[#allocation2 + $0x90] sm:$0xff] }
0x20e3   : > { %v4195_v36 = vmul.f32 %v4193_v34, %v4190_v32  ;;  %12398 = vtanh.f32 %v4200_v33  ;;  %v10492_v34 = vor.u32 %v11907_v26, %v10489_v31  ;;  %v11938_v26 = vld [vmem:[#allocation2 + $0xc0] sm:$0xff] }
0x20e4   : > { %v11934_v31 = vld [vmem:[#allocation2 + $0xa0] sm:$0xff] }
0x20e5   : > { %v4197_v37 = vmul.f32 0.044715, %v4195_v36 }
0x20e7   : > { %v4199_v60 = vadd.f32 %v4197_v37, %v4190_v32 }
0x20e9   : > { %v4201_v38 = vmul.f32 0.7978846, %v4199_v60  ;;  %v12399_v39 = vpop.eup %12398 }
0x20ea   : > { %v4204_v40 = vadd.f32 1.0, %v12399_v39 }
0x20eb   : > { %12400 = vtanh.f32 %v4201_v38 }
0x20ec   : > { %v4206_v28 = vmul.f32 0.5, %v4204_v40 }
0x20ee   : > { %v4208_v45 = vmul.f32 %v4206_v28, %v4188_v1  ;;  %v11911_v1 = vld [vmem:[%s15005_s3 + $0x2c] sm:$0xf] }
0x20ef   : > { %v10508_v30 = vor.u32 %v11911_v1, %v10505_v25  ;;  %v11966_v1 = vld [vmem:[#allocation2 + $0x1a0] sm:$0xff]  ;;  %v11933_v25 = vld [vmem:[#allocation2 + $0x98] sm:$0xff] }
0x20f1   : > { %v12401_v41 = vpop.eup %12400 }
0x20f2   : > { %v4205_v42 = vadd.f32 1.0, %v12401_v41 }
0x20f4   : > { %v4207_v44 = vmul.f32 0.5, %v4205_v42 }
0x20f6   : > { %v4209_v46 = vmul.f32 %v4207_v44, %v4190_v32 }
0x20f8   : > { %v4226_v47 = vpack.c.bf16 %v4209_v46, %v4208_v45  ;;  %v12300_v46 = vld [vmem:[%s15006_s1] ss:$0 sm:$0xff]  ;;  %s10067_s1 = sshll.u32 %s12922_s26, 5 }
0x20f9   : > { %p14421_p1 = scmp.lt.s32.totalorder %s10067_s1, 63 }
0x20fa   : > { %4287 = vmatmul.bf16.vlgmr.msra.gmra.mxu1 %v4226_v47 }
0x20fb   : > { %4451 = vmatpush.bf16.msra.mxu1 %v10508_v30  ;;  %v11967_v30 = vld [vmem:[#allocation2 + $0x1a8] sm:$0xff]  ;;  %s15027_s1 = smov (!%p14421_p1, %s10067_s1), 63 }
0x20fc   : > { %s10068_s26 = sshll.u32 %s15027_s1, 3 }
0x20fd   : > { %s14477_s1 = scalar_lea.vmem %s12913_s4, %s10068_s26 }
0x20ff   : > { %4452 = vmatpush.bf16.msra.mxu1 %v10492_v34  ;;  %v11968_v34 = vld [vmem:[#allocation2 + $0x1b0] sm:$0xff] }
0x2177   : > { %v4288_v49 = vpop.f32.mrf.mxu1 }
0x2178   : > { %v4289_v10 = vadd.f32 %v12299_v48, %v4288_v49 }
0x217a   : > { %v4293_v43 = vadd.f32 %v4289_v10, %v13330_v29  ;;  %v12301_v10 = vld [vmem:[%s15007_s2] ss:$0 sm:$0xff] }
0x217c   : > { %v4297_v21 = vsel %vm1927_vm1, %v4293_v43, 0.0 }
0x217d   : > { %4298 = vadd.xlane.f32.xlu2 %v4297_v21 }
0x217f   : > { %v4290_v50 = vpop.f32.mrf.mxu1 }
0x2180   : > { %v4291_v51 = vadd.f32 %v12299_v48, %v4290_v50 }
0x2182   : > { %v4294_v53 = vadd.f32 %v4291_v51, %v13335_v35 }
0x2184   : > { %v4300_v54 = vsel %vm1927_vm1, %v4294_v53, 0.0 }
0x2185   : > { %4301 = vadd.xlane.f32.xlu1 %v4300_v54 }
0x21f0   : > { %v4299_v55 = vpop.xlane.xlu2 %4298 }
0x21f1   : > { %v4303_v4 = vmul.f32 %v4299_v55, %v12959_v19 }
0x21f3   : > { %v13367_v56 = vsub.f32 %v4293_v43, %v4303_v4 }
0x21f5   : > { %v4307_v29 = vmul.f32 %v13367_v56, %v13367_v56 }
0x21f7   : > { %v4309_v57 = vsel %vm1927_vm1, %v4307_v29, 0.0 }
0x21f8   : > { %v4302_v59 = vpop.xlane.xlu1 %4301  ;;  %4310 = vadd.xlane.f32.xlu1 %v4309_v57 }
0x21f9   : > { %v4304_v35 = vmul.f32 %v4302_v59, %v12959_v19 }
0x21fb   : > { %v13373_v61 = vsub.f32 %v4294_v53, %v4304_v35 }
0x21fd   : > { %v4308_v62 = vmul.f32 %v13373_v61, %v13373_v61 }
0x21ff   : > { %v4312_v63 = vsel %vm1927_vm1, %v4308_v62, 0.0 }
0x2200   : > { %4313 = vadd.xlane.f32.xlu1 %v4312_v63 }
0x226b   : > { %v4311_v24 = vpop.xlane.xlu1 %4310 }
0x226c   : > { %v4315_v9 = vmul.f32 %v4311_v24, %v12959_v19  ;;  %v11940_v24 = vld [vmem:[#allocation2 + $0xd0] sm:$0xff] }
0x226e   : > { %v4317_v18 = vadd.f32 1e-05, %v4315_v9 }
0x2270   : > { %12402 = vrsqrt.f32 %v4317_v18  ;;  %vm4325_vm6 = vweird.f32 %v4317_v18 }
0x2273   : > { %v4314_v23 = vpop.xlane.xlu1 %4313 }
0x2274   : > { %v4316_v27 = vmul.f32 %v4314_v23, %v12959_v19  ;;  %v11942_v23 = vld [vmem:[#allocation2 + $0xe0] sm:$0xff] }
0x2276   : > { %v12403_v32 = vpop.eup %12402  ;;  %v4318_v33 = vadd.f32 1e-05, %v4316_v27  ;;  %v11943_v27 = vld [vmem:[#allocation2 + $0xe8] sm:$0xff] }
0x2277   : > { %v4320_v36 = vmul.f32 %v12403_v32, %v4317_v18  ;;  %vm4326_vm5 = vweird.f32 %v12403_v32 }
0x2278   : > { %12404 = vrsqrt.f32 %v4318_v33  ;;  %vm4327_vm9 = vmor %vm4325_vm6, %vm4326_vm5  ;;  %vm4335_vm11 = vweird.f32 %v4318_v33 }
0x2279   : > { %v4321_v37 = vmul.f32 %v12403_v32, %v4320_v36  ;;  %v11914_v36 = vld [vmem:[#allocation2] sm:$0xff] }
0x227b   : > { %v4322_v60 = vmul.f32 0.5, %v4321_v37  ;;  %v11978_v37 = vld [vmem:[#allocation2 + $0x200] sm:$0xff] }
0x227d   : > { %v4323_v38 = vsub.f32 1.5, %v4322_v60  ;;  %v11945_v60 = vld [vmem:[#allocation2 + $0xf8] sm:$0xff] }
0x227e   : > { %v12405_v39 = vpop.eup %12404 }
0x227f   : > { %v4324_v40 = vmul.f32 %v12403_v32, %v4323_v38  ;;  %v4330_v41 = vmul.f32 %v12405_v39, %v4318_v33  ;;  %vm4336_vm10 = vweird.f32 %v12405_v39  ;;  %v11944_v33 = vld [vmem:[#allocation2 + $0xf0] sm:$0xff] }
0x2280   : > { %vm4337_vm12 = vmor %vm4335_vm11, %vm4336_vm10 }
0x2281   : > { %v4331_v28 = vmul.f32 %v12405_v39, %v4330_v41  ;;  %v4328_v42 = vsel %vm4327_vm9, %v12403_v32, %v4324_v40  ;;  %v11939_v32 = vld [vmem:[#allocation2 + $0xc8] sm:$0xff] }
0x2282   : > { %v4339_v47 = vmul.f32 %v4328_v42, %v13367_v56  ;;  %v11915_v40 = vld [vmem:[#allocation2 + $0x8] sm:$0xff] }
0x2283   : > { %v4332_v44 = vmul.f32 0.5, %v4331_v28  ;;  %v11979_v41 = vld [vmem:[#allocation2 + $0x208] sm:$0xff]  ;;  %v11946_v28 = vld [vmem:[#allocation2 + $0x100] sm:$0xff] }
0x2284   : > { %v4344_v43 = vmul.f32 %v12300_v46, %v4339_v47  ;;  %v11947_v47 = vld [vmem:[#allocation2 + $0x108] sm:$0xff] }
0x2285   : > { %v4333_v45 = vsub.f32 1.5, %v4332_v44  ;;  %v11970_v44 = vld [vmem:[#allocation2 + $0x1c0] sm:$0xff] }
0x2286   : > { %v4349_v51 = vadd.f32 %v12301_v10, %v4344_v43 }
0x2287   : > { %v4334_v48 = vmul.f32 %v12405_v39, %v4333_v45  ;;  %v11916_v45 = vld [vmem:[#allocation2 + $0x10] sm:$0xff] }
0x2289   : > { %v4338_v49 = vsel %vm4337_vm12, %v12405_v39, %v4334_v48  ;;  %v11969_v39 = vld [vmem:[#allocation2 + $0x1b8] sm:$0xff]  ;;  %v11971_v48 = vld [vmem:[#allocation2 + $0x1c8] sm:$0xff] }
0x228a   : > { %v4340_v21 = vmul.f32 %v4338_v49, %v13373_v61  ;;  %v11917_v49 = vld [vmem:[#allocation2 + $0x18] sm:$0xff] }
0x228c   : > { %v4345_v50 = vmul.f32 %v12300_v46, %v4340_v21  ;;  %v11980_v46 = vld [vmem:[#allocation2 + $0x210] sm:$0xff] }
0x228d   : > { %v11948_v21 = vld [vmem:[#allocation2 + $0x110] sm:$0xff] }
0x228e   : > { %v4350_v53 = vadd.f32 %v12301_v10, %v4345_v50  ;;  %v11981_v10 = vld [vmem:[#allocation2 + $0x218] sm:$0xff]  ;;  %v11972_v50 = vld [vmem:[#allocation2 + $0x1d0] sm:$0xff] }
0x2290   : > { %v4359_v54 = vpack.c.bf16 %v4350_v53, %v4349_v51 }
0x2292   : > { %10509 = vmatmul.msk.bf16.vlgmr.msrb.gmra.mxu1 %vm1927_vm1, %v4359_v54  ;;  %10510 = vmatmul.msk.bf16.vlgmr.msrb.gmra.mxu2 %vm1927_vm1, %v4359_v54 }
0x2293   : > { %10511 = vmatmul.msk.bf16.vlgmr.msra.gmra.mxu0 %vm1927_vm1, %v4359_v54 }
0x22a2   : > { %10512 = vmatmul.msk.bf16.vlgmr.msra.gmra.mxu1 %vm1927_vm1, %v4359_v54 }
0x230f   : > { %v4412_v55 = vpop.f32.mrf.mxu1 }
0x2310   : > { %v4440_v4 = vpop.f32.mrf.mxu0 }
0x2315   : > { %v4426_v56 = vpop.f32.mrf.mxu2 }
0x2317   : > { %v4414_v29 = vpop.f32.mrf.mxu1 }
0x2318   : > { %v4491_v57 = vpack.c.bf16 %v4414_v29, %v4412_v55  ;;  %v4442_v59 = vpop.f32.mrf.mxu0  ;;  %v11918_v29 = vld [vmem:[#allocation2 + $0x20] sm:$0xff] }
0x2319   : > { %v6705_v62 = vpack.c.bf16 %v4442_v59, %v4440_v4 }
0x231a   : > { %5361 = vrot.lane.b32.xlu2 %v4491_v57, %s14984_s5  ;;  %5076 = vrot.lane.b32.xlu0 %v4491_v57, %s14985_s6 }
0x231b   : > { %4606 = vrot.lane.b32.xlu1 %v4491_v57, %s14971_s23 }
0x231d   : > { %v4428_v35 = vpop.f32.mrf.mxu2 }
0x231e   : > { %v5566_v63 = vpack.c.bf16 %v4428_v35, %v4426_v56  ;;  %v11949_v35 = vld [vmem:[#allocation2 + $0x118] sm:$0xff] }
0x231f   : > { %v4454_v61 = vpop.f32.mrf.mxu1 }
0x2322   : > { %7069 = vrot.lane.b32.xlu2 %v6705_v62, %s14971_s23  ;;  %5930 = vrot.lane.b32.xlu0 %v5566_v63, %s14971_s23 }
0x2323   : > { %6215 = vrot.lane.b32.xlu1 %v5566_v63, %s14985_s6 }
0x2327   : > { %v4456_v0 = vpop.f32.mrf.mxu1 }
0x2328   : > { %v13410_v2 = vpack.c.bf16 %v4456_v0, %v4454_v61  ;;  %v11973_v61 = vld [vmem:[#allocation2 + $0x1d8] sm:$0xff] }
0x232a   : > { %7354 = vrot.lane.b32.xlu0 %v6705_v62, %s14985_s6  ;;  %8208 = vrot.lane.b32.xlu2 %v13410_v2, %s14971_s23  ;;  %s15012_s23 = sld [smem:[#allocation43_spill]] }
0x232b   : > { %6500 = vrot.lane.b32.xlu1 %v5566_v63, %s14984_s5 }
0x2332   : > { %8493 = vrot.lane.b32.xlu0 %v13410_v2, %s14985_s6  ;;  %s15009_s6 = sld [smem:[#allocation44_spill]] }
0x2333   : > { %7639 = vrot.lane.b32.xlu1 %v6705_v62, %s14984_s5 }
0x233b   : > { %8778 = vrot.lane.b32.xlu1 %v13410_v2, %s14984_s5  ;;  %s15008_s5 = sld [smem:[#allocation53_spill]] }
0x2374   : > { %v5362_v3 = vpop.permute.xlu2 %5361 }
0x2375   : > { %5419 = vmatpush.bf16.msrb.mxu1 %v5362_v3 }
0x2378   : > { %10817 = vmatmul.msk.bf16.vlgmr.msrb.gmra.mxu1 %vm2091_vm15, %v11962_v52 }
0x237c   : > { %v7070_v38 = vpop.permute.xlu2 %7069 }
0x2388   : > { %10818 = vmatmul.msk.bf16.gmra.mxu1 %vm2091_vm15, %v11963_v6  ;;  %v11919_v6 = vld [vmem:[#allocation2 + $0x28] sm:$0xff] }
0x238c   : > { %v5077_v5 = vpop.permute.xlu0 %5076 }
0x238d   : > { %v4607_v7 = vpop.permute.xlu1 %4606 }
0x238e   : > { %4664 = vmatpush.bf16.msrb.mxu0 %v4607_v7  ;;  %12172 = vmatpush.bf16.msra.mxu2 %v4607_v7 }
0x238f   : > { %12173 = vmatpush.bf16.msrb.mxu3 %v4607_v7 }
0x2391   : > { %10577 = vmatmul.msk.bf16.vlgmr.msrb.gmra.mxu0 %vm2091_vm15, %v11930_v58  ;;  %10582 = vmatmul.msk.bf16.vlgmr.msra.gmra.mxu2 %vm2091_vm15, %v11935_v8  ;;  %v11950_v58 = vld [vmem:[#allocation2 + $0x120] sm:$0xff] }
0x2392   : > { %4881 = vmatpush.bf16.msra.mxu0 %v4491_v57  ;;  %5702 = vmatpush.bf16.msrb.mxu2 %v5566_v63  ;;  %v11982_v57 = vld [vmem:[#allocation2 + $0x220] sm:$0xff] }
0x2393   : > { %5134 = vmatpush.bf16.msra.mxu3 %v5077_v5  ;;  %v11983_v5 = vld [vmem:[#allocation2 + $0x228] sm:$0xff] }
0x2394   : > { %10587 = vmatmul.msk.bf16.vlgmr.msrb.gmra.mxu3 %vm2091_vm15, %v11940_v24  ;;  %v5931_v9 = vpop.permute.xlu0 %5930  ;;  %v11974_v24 = vld [vmem:[#allocation2 + $0x1e0] sm:$0xff] }
0x2395   : > { %v6216_v13 = vpop.permute.xlu1 %6215 }
0x2396   : > { %6841 = vmatpush.bf16.msra.mxu2 %v6705_v62  ;;  %5988 = vmatpush.bf16.msrb.mxu0 %v5931_v9 }
0x2397   : > { %6273 = vmatpush.bf16.msrb.mxu3 %v6216_v13 }
0x2398   : > { %10819 = vmatmul.msk.bf16.gmra.mxu1 %vm2091_vm15, %v11964_v11 }
0x239c   : > { %v7355_v42 = vpop.permute.xlu0 %7354 }
0x239d   : > { %v6501_v12 = vpop.permute.xlu1 %6500 }
0x239e   : > { %6558 = vmatpush.bf16.msra.mxu1 %v6501_v12 }
0x23a1   : > { %10578 = vmatmul.msk.bf16.gmra.mxu0 %vm2091_vm15, %v11931_v14  ;;  %10583 = vmatmul.msk.bf16.gmra.mxu2 %vm2091_vm15, %v11936_v15 }
0x23a4   : > { %10588 = vmatmul.msk.bf16.gmra.mxu3 %vm2091_vm15, %v11941_v16  ;;  %v11920_v16 = vld [vmem:[#allocation2 + $0x30] sm:$0xff] }
0x23a5   : > { %v7640_v18 = vpop.permute.xlu1 %7639 }
0x23a6   : > { %7697 = vmatpush.bf16.msrb.mxu1 %v7640_v18 }
0x23a8   : > { %10820 = vmatmul.msk.bf16.gmra.mxu1 %vm2091_vm15, %v11965_v17  ;;  %v11984_v17 = vld [vmem:[#allocation2 + $0x230] sm:$0xff] }
0x23b1   : > { %10579 = vmatmul.msk.bf16.gmra.mxu0 %vm2091_vm15, %v11932_v20  ;;  %10584 = vmatmul.msk.bf16.gmra.mxu2 %vm2091_vm15, %v11937_v22  ;;  %v11951_v20 = vld [vmem:[#allocation2 + $0x128] sm:$0xff] }
0x23b2   : > { %v11975_v22 = vld [vmem:[#allocation2 + $0x1e8] sm:$0xff] }
0x23b4   : > { %10589 = vmatmul.msk.bf16.gmra.mxu3 %vm2091_vm15, %v11942_v23 }
0x23b8   : > { %10821 = vmatmul.msk.bf16.gmra.mxu1 %vm2091_vm15, %v11966_v1 }
0x23c1   : > { %10580 = vmatmul.msk.bf16.gmra.mxu0 %vm2091_vm15, %v11933_v25  ;;  %10585 = vmatmul.msk.bf16.gmra.mxu2 %vm2091_vm15, %v11938_v26 }
0x23c4   : > { %10590 = vmatmul.msk.bf16.gmra.mxu3 %vm2091_vm15, %v11943_v27 }
0x23c8   : > { %10822 = vmatmul.msk.bf16.gmra.mxu1 %vm2091_vm15, %v11967_v30 }
0x23d1   : > { %10581 = vmatmul.msk.bf16.gmra.mxu0 %vm2091_vm15, %v11934_v31  ;;  %10586 = vmatmul.msk.bf16.gmra.mxu2 %vm2091_vm15, %v11939_v32  ;;  %v11921_v31 = vld [vmem:[#allocation2 + $0x38] sm:$0xff] }
0x23d2   : > { %v11985_v32 = vld [vmem:[#allocation2 + $0x238] sm:$0xff] }
0x23d4   : > { %10591 = vmatmul.msk.bf16.gmra.mxu3 %vm2091_vm15, %v11944_v33 }
0x23d8   : > { %10823 = vmatmul.msk.bf16.gmra.mxu1 %vm2091_vm15, %v11968_v34  ;;  %v11952_v34 = vld [vmem:[#allocation2 + $0x130] sm:$0xff] }
0x23e1   : > { %10657 = vmatmul.msk.bf16.vlgmr.msra.gmra.mxu0 %vm2091_vm15, %v11914_v36  ;;  %10897 = vmatmul.msk.bf16.vlgmr.msrb.gmra.mxu2 %vm2091_vm15, %v11978_v37  ;;  %v11976_v37 = vld [vmem:[#allocation2 + $0x1f0] sm:$0xff] }
0x23e2   : > { %7127 = vmatpush.bf16.msra.mxu0 %v7070_v38  ;;  %7980 = vmatpush.bf16.msrb.mxu2 %v13410_v2 }
0x23e4   : > { %10592 = vmatmul.msk.bf16.gmra.mxu3 %vm2091_vm15, %v11945_v60 }
0x23e8   : > { %10824 = vmatmul.msk.bf16.gmra.mxu1 %vm2091_vm15, %v11969_v39 }
0x23f1   : > { %10658 = vmatmul.msk.bf16.gmra.mxu0 %vm2091_vm15, %v11915_v40  ;;  %10898 = vmatmul.msk.bf16.gmra.mxu2 %vm2091_vm15, %v11979_v41 }
0x23f4   : > { %10737 = vmatmul.msk.bf16.vlgmr.msra.gmra.mxu3 %vm2091_vm15, %v11946_v28 }
0x23f5   : > { %7412 = vmatpush.bf16.msra.mxu3 %v7355_v42  ;;  %v13470_v4 = vpop.f32.mrf.mxu1  ;;  %v11922_v42 = vld [vmem:[#allocation2 + $0x40] sm:$0xff] }
0x23f8   : > { %10825 = vmatmul.msk.bf16.gmra.mxu1 %vm2091_vm15, %v11970_v44  ;;  %v11986_v44 = vld [vmem:[#allocation2 + $0x240] sm:$0xff] }
0x23fd   : > { %v13485_v2 = vpop.f32.mrf.mxu1 }
0x2401   : > { %10659 = vmatmul.msk.bf16.gmra.mxu0 %vm2091_vm15, %v11916_v45  ;;  %10899 = vmatmul.msk.bf16.gmra.mxu2 %vm2091_vm15, %v11980_v46  ;;  %v11953_v46 = vld [vmem:[#allocation2 + $0x138] sm:$0xff] }
0x2404   : > { %10738 = vmatmul.msk.bf16.gmra.mxu3 %vm2091_vm15, %v11947_v47 }
0x2405   : > { %v13494_v8 = vpop.f32.mrf.mxu1 }
0x2408   : > { %10826 = vmatmul.msk.bf16.gmra.mxu1 %vm2091_vm15, %v11971_v48  ;;  %v11977_v48 = vld [vmem:[#allocation2 + $0x1f8] sm:$0xff] }
0x240d   : > { %v13506_v12 = vpop.f32.mrf.mxu1 }
0x240e   : > { %v13456_v43 = vpop.f32.mrf.mxu0 }
0x2411   : > { %10660 = vmatmul.msk.bf16.gmra.mxu0 %vm2091_vm15, %v11917_v49  ;;  %10900 = vmatmul.msk.bf16.gmra.mxu2 %vm2091_vm15, %v11981_v10 }
0x2414   : > { %10739 = vmatmul.msk.bf16.gmra.mxu3 %vm2091_vm15, %v11948_v21  ;;  %v13461_v51 = vpop.f32.mrf.mxu2 }
0x2415   : > { %v13517_v23 = vpop.f32.mrf.mxu1 }
0x2416   : > { %v13465_v54 = vpop.f32.mrf.mxu0 }
0x2417   : > { %v13463_v53 = vpop.f32.mrf.mxu3 }
0x2418   : > { %10827 = vmatmul.msk.bf16.gmra.mxu1 %vm2091_vm15, %v11972_v50 }
0x241c   : > { %v13468_v55 = vpop.f32.mrf.mxu2 }
0x241d   : > { %v13532_v36 = vpop.f32.mrf.mxu1 }
0x241e   : > { %v13474_v59 = vpop.f32.mrf.mxu0 }
0x241f   : > { %v13472_v56 = vpop.f32.mrf.mxu3 }
0x2421   : > { %10661 = vmatmul.msk.bf16.gmra.mxu0 %vm2091_vm15, %v11918_v29  ;;  %10901 = vmatmul.msk.bf16.gmra.mxu2 %vm2091_vm15, %v11982_v57 }
0x2424   : > { %10740 = vmatmul.msk.bf16.gmra.mxu3 %vm2091_vm15, %v11949_v35  ;;  %v13479_v62 = vpop.f32.mrf.mxu2  ;;  %v11923_v35 = vld [vmem:[#allocation2 + $0x48] sm:$0xff] }
0x2425   : > { %v13544_v40 = vpop.f32.mrf.mxu1 }
0x2426   : > { %v13483_v0 = vpop.f32.mrf.mxu0 }
0x2427   : > { %v13481_v63 = vpop.f32.mrf.mxu3 }
0x2428   : > { %10828 = vmatmul.msk.bf16.gmra.mxu1 %vm2091_vm15, %v11973_v61  ;;  %v11987_v61 = vld [vmem:[#allocation2 + $0x248] sm:$0xff] }
0x242c   : > { %v13488_v3 = vpop.f32.mrf.mxu2 }
0x242d   : > { %v13553_v47 = vpop.f32.mrf.mxu1 }
0x242e   : > { %v13492_v7 = vpop.f32.mrf.mxu0 }
0x242f   : > { %v13490_v52 = vpop.f32.mrf.mxu3 }
0x2431   : > { %10662 = vmatmul.msk.bf16.gmra.mxu0 %vm2091_vm15, %v11919_v6  ;;  %10902 = vmatmul.msk.bf16.gmra.mxu2 %vm2091_vm15, %v11983_v5  ;;  %v11954_v5 = vld [vmem:[#allocation2 + $0x140] sm:$0xff] }
0x2434   : > { %10741 = vmatmul.msk.bf16.gmra.mxu3 %vm2091_vm15, %v11950_v58  ;;  %v13499_v9 = vpop.f32.mrf.mxu2 }
0x2435   : > { %v13558_v50 = vpop.f32.mrf.mxu1 }
0x2436   : > { %v13503_v13 = vpop.f32.mrf.mxu0 }
0x2437   : > { %v13501_v11 = vpop.f32.mrf.mxu3 }
0x2438   : > { %10829 = vmatmul.msk.bf16.gmra.mxu1 %vm2091_vm15, %v11974_v24  ;;  %v12026_v24 = vld [vmem:[#allocation2 + $0x380] sm:$0xff] }
0x243c   : > { %v13508_v14 = vpop.f32.mrf.mxu2 }
0x243e   : > { %v13512_v18 = vpop.f32.mrf.mxu0 }
0x243f   : > { %v13510_v15 = vpop.f32.mrf.mxu3 }
0x2441   : > { %10663 = vmatmul.msk.bf16.gmra.mxu0 %vm2091_vm15, %v11920_v16  ;;  %10903 = vmatmul.msk.bf16.gmra.mxu2 %vm2091_vm15, %v11984_v17 }
0x2444   : > { %10742 = vmatmul.msk.bf16.gmra.mxu3 %vm2091_vm15, %v11951_v20  ;;  %v13519_v1 = vpop.f32.mrf.mxu2 }
0x2446   : > { %v13523_v26 = vpop.f32.mrf.mxu0 }
0x2447   : > { %v13521_v25 = vpop.f32.mrf.mxu3 }
0x2448   : > { %10830 = vmatmul.msk.bf16.gmra.mxu1 %vm2091_vm15, %v11975_v22 }
0x244c   : > { %v13526_v27 = vpop.f32.mrf.mxu2 }
0x244e   : > { %v13530_v33 = vpop.f32.mrf.mxu0 }
0x244f   : > { %v13528_v30 = vpop.f32.mrf.mxu3 }
0x2451   : > { %10664 = vmatmul.msk.bf16.gmra.mxu0 %vm2091_vm15, %v11921_v31  ;;  %10904 = vmatmul.msk.bf16.gmra.mxu2 %vm2091_vm15, %v11985_v32  ;;  %v13566_v31 = vpop.f32.mrf.mxu1  ;;  %v8779_v32 = vpop.permute.xlu1 %8778 }
0x2454   : > { %10743 = vmatmul.msk.bf16.gmra.mxu3 %vm2091_vm15, %v11952_v34  ;;  %v13537_v60 = vpop.f32.mrf.mxu2 }
0x2456   : > { %v13541_v39 = vpop.f32.mrf.mxu0 }
0x2457   : > { %v13539_v38 = vpop.f32.mrf.mxu3 }
0x2458   : > { %10831 = vmatmul.msk.bf16.gmra.mxu1 %vm2091_vm15, %v11976_v37 }
0x245c   : > { %v13546_v41 = vpop.f32.mrf.mxu2 }
0x245e   : > { %v4883_v45 = vpop.f32.mrf.mxu0 }
0x245f   : > { %v13548_v28 = vpop.f32.mrf.mxu3  ;;  %v4884_v58 = vadd.f32 %v4883_v45, %v13456_v43  ;;  %v11924_v43 = vld [vmem:[#allocation2 + $0x50] sm:$0xff] }
0x2460   : > { %v11988_v45 = vld [vmem:[#allocation2 + $0x250] sm:$0xff] }
0x2461   : > { %10665 = vmatmul.msk.bf16.gmra.mxu0 %vm2091_vm15, %v11922_v42  ;;  %10905 = vmatmul.msk.bf16.gmra.mxu2 %vm2091_vm15, %v11986_v44 }
0x2464   : > { %10744 = vmatmul.msk.bf16.gmra.mxu3 %vm2091_vm15, %v11953_v46  ;;  %v5704_v49 = vpop.f32.mrf.mxu2 }
0x2466   : > { %v4885_v21 = vpop.f32.mrf.mxu0 }
0x2467   : > { %v13555_v10 = vpop.f32.mrf.mxu3  ;;  %v4886_v42 = vadd.f32 %v4885_v21, %v13465_v54 }
0x2468   : > { %10832 = vmatmul.msk.bf16.gmra.mxu1 %vm2091_vm15, %v11977_v48 }
0x246c   : > { %v5706_v29 = vpop.f32.mrf.mxu2 }
0x246e   : > { %v4888_v6 = vpop.f32.mrf.mxu0 }
0x246f   : > { %v13560_v57 = vpop.f32.mrf.mxu3 }
0x2471   : > { %10666 = vmatmul.msk.bf16.gmra.mxu0 %vm2091_vm15, %v11923_v35  ;;  %10906 = vmatmul.msk.bf16.gmra.mxu2 %vm2091_vm15, %v11987_v61  ;;  %v11955_v61 = vld [vmem:[#allocation2 + $0x148] sm:$0xff] }
0x2474   : > { %10745 = vmatmul.msk.bf16.gmra.mxu3 %vm2091_vm15, %v11954_v5  ;;  %v5709_v16 = vpop.f32.mrf.mxu2 }
0x2476   : > { %v4890_v22 = vpop.f32.mrf.mxu0 }
0x2477   : > { %v5136_v17 = vpop.f32.mrf.mxu3 }
0x2478   : > { %v5216_v20 = vadd.f32 %v5136_v17, %v4884_v58  ;;  %11137 = vmatmul.msk.bf16.vlgmr.msra.gmra.mxu1 %vm2091_vm15, %v12026_v24 }
0x2479   : > { %8836 = vmatpush.bf16.msra.mxu1 %v8779_v32 }
0x247a   : > { %v5501_v34 = vadd.f32 %v13470_v4, %v5216_v20 }
0x247c   : > { %v13570_v37 = vadd.f32 %v5704_v49, %v5501_v34  ;;  %v5711_v44 = vpop.f32.mrf.mxu2  ;;  %v4889_v49 = vadd.f32 %v4888_v6, %v13474_v59 }
0x247e   : > { %v4893_v35 = vpop.f32.mrf.mxu0 }
0x247f   : > { %v5138_v46 = vpop.f32.mrf.mxu3 }
0x2480   : > { %v5217_v48 = vadd.f32 %v5138_v46, %v4886_v42  ;;  %v11925_v42 = vld [vmem:[#allocation2 + $0x58] sm:$0xff] }
0x2481   : > { %10667 = vmatmul.msk.bf16.gmra.mxu0 %vm2091_vm15, %v11924_v43  ;;  %10907 = vmatmul.msk.bf16.gmra.mxu2 %vm2091_vm15, %v11988_v45  ;;  %v11989_v46 = vld [vmem:[#allocation2 + $0x258] sm:$0xff]  ;;  %v11956_v45 = vld [vmem:[#allocation2 + $0x150] sm:$0xff] }
0x2482   : > { %v5502_v5 = vadd.f32 %v13485_v2, %v5217_v48  ;;  %v4891_v2 = vadd.f32 %v4890_v22, %v13483_v0 }
0x2484   : > { %v13576_v4 = vadd.f32 %v5706_v29, %v5502_v5  ;;  %10746 = vmatmul.msk.bf16.gmra.mxu3 %vm2091_vm15, %v11955_v61  ;;  %v5714_v54 = vpop.f32.mrf.mxu2 }
0x2486   : > { %v4895_v24 = vpop.f32.mrf.mxu0 }
0x2487   : > { %v5141_v21 = vpop.f32.mrf.mxu3 }
0x2488   : > { %v5218_v58 = vadd.f32 %v5141_v21, %v4889_v49 }
0x248a   : > { %v5503_v17 = vadd.f32 %v13494_v8, %v5218_v58  ;;  %v4894_v8 = vadd.f32 %v4893_v35, %v13492_v7  ;;  %v11926_v58 = vld [vmem:[#allocation2 + $0x60] sm:$0xff]  ;;  %v5446_v7 = vpop.f32.mrf.mxu1 }
0x248c   : > { %v13581_v20 = vadd.f32 %v5709_v16, %v5503_v17  ;;  %v5716_v32 = vpop.f32.mrf.mxu2  ;;  %v11990_v17 = vld [vmem:[#allocation2 + $0x260] sm:$0xff] }
0x248e   : > { %v4898_v43 = vpop.f32.mrf.mxu0 }
0x248f   : > { %v5143_v34 = vpop.f32.mrf.mxu3 }
0x2490   : > { %v5219_v29 = vadd.f32 %v5143_v34, %v4891_v2  ;;  %v11957_v34 = vld [vmem:[#allocation2 + $0x158] sm:$0xff] }
0x2491   : > { %10668 = vmatmul.msk.bf16.gmra.mxu0 %vm2091_vm15, %v11925_v42  ;;  %10908 = vmatmul.msk.bf16.gmra.mxu2 %vm2091_vm15, %v11989_v46 }
0x2492   : > { %v5504_v48 = vadd.f32 %v13506_v12, %v5219_v29  ;;  %v4896_v12 = vadd.f32 %v4895_v24, %v13503_v13  ;;  %v4899_v13 = vadd.f32 %v4898_v43, %v13512_v18 }
0x2494   : > { %v13587_v59 = vadd.f32 %v5711_v44, %v5504_v48  ;;  %10747 = vmatmul.msk.bf16.gmra.mxu3 %vm2091_vm15, %v11956_v45  ;;  %v5719_v0 = vpop.f32.mrf.mxu2  ;;  %v5448_v45 = vpop.f32.mrf.mxu1 }
0x2496   : > { %v4900_v22 = vpop.f32.mrf.mxu0 }
0x2497   : > { %v5146_v6 = vpop.f32.mrf.mxu3 }
0x2498   : > { %v5220_v16 = vadd.f32 %v5146_v6, %v4894_v8 }
0x249a   : > { %v5505_v61 = vadd.f32 %v13517_v23, %v5220_v16  ;;  %v11927_v16 = vld [vmem:[#allocation2 + $0x68] sm:$0xff] }
0x249c   : > { %v13592_v5 = vadd.f32 %v5714_v54, %v5505_v61  ;;  %v5721_v49 = vpop.f32.mrf.mxu2  ;;  %v5451_v43 = vpop.f32.mrf.mxu1 }
0x249e   : > { %v4903_v2 = vpop.f32.mrf.mxu0 }
0x249f   : > { %v5148_v21 = vpop.f32.mrf.mxu3 }
0x24a0   : > { %v5221_v44 = vadd.f32 %v5148_v21, %v4896_v12  ;;  %v11958_v21 = vld [vmem:[#allocation2 + $0x160] sm:$0xff] }
0x24a1   : > { %10669 = vmatmul.msk.bf16.gmra.mxu0 %vm2091_vm15, %v11926_v58  ;;  %10909 = vmatmul.msk.bf16.gmra.mxu2 %vm2091_vm15, %v11990_v17 }
0x24a2   : > { %v5506_v42 = vadd.f32 %v13532_v36, %v5221_v44  ;;  %v4901_v36 = vadd.f32 %v4900_v22, %v13523_v26  ;;  %v4904_v26 = vadd.f32 %v4903_v2, %v13530_v33 }
0x24a4   : > { %v13598_v35 = vadd.f32 %v5716_v32, %v5506_v42  ;;  %10748 = vmatmul.msk.bf16.gmra.mxu3 %vm2091_vm15, %v11957_v34  ;;  %v5724_v23 = vpop.f32.mrf.mxu2  ;;  %v11991_v32 = vld [vmem:[#allocation2 + $0x268] sm:$0xff]  ;;  %v5453_v34 = vpop.f32.mrf.mxu1 }
0x24a6   : > { %v4905_v46 = vpop.f32.mrf.mxu0 }
0x24a7   : > { %v5151_v54 = vpop.f32.mrf.mxu3 }
0x24a8   : > { %v5222_v24 = vadd.f32 %v5151_v54, %v4899_v13 }
0x24aa   : > { %v5507_v29 = vadd.f32 %v13544_v40, %v5222_v24  ;;  %v11928_v24 = vld [vmem:[#allocation2 + $0x70] sm:$0xff] }
0x24ac   : > { %v13603_v48 = vadd.f32 %v5719_v0, %v5507_v29  ;;  %v5726_v8 = vpop.f32.mrf.mxu2  ;;  %v5456_v2 = vpop.f32.mrf.mxu1 }
0x24ae   : > { %v4908_v12 = vpop.f32.mrf.mxu0 }
0x24af   : > { %v5153_v6 = vpop.f32.mrf.mxu3 }
0x24b0   : > { %v5223_v61 = vadd.f32 %v5153_v6, %v4901_v36  ;;  %v11959_v6 = vld [vmem:[#allocation2 + $0x168] sm:$0xff] }
0x24b1   : > { %10670 = vmatmul.msk.bf16.gmra.mxu0 %vm2091_vm15, %v11927_v16  ;;  %10910 = vmatmul.msk.bf16.gmra.mxu2 %vm2091_vm15, %v11991_v32 }
0x24b2   : > { %v5508_v18 = vadd.f32 %v13553_v47, %v5223_v61  ;;  %v4906_v47 = vadd.f32 %v4905_v46, %v13541_v39 }
0x24b4   : > { %v13609_v40 = vadd.f32 %v5721_v49, %v5508_v18  ;;  %10749 = vmatmul.msk.bf16.gmra.mxu3 %vm2091_vm15, %v11958_v21  ;;  %v5729_v0 = vpop.f32.mrf.mxu2  ;;  %v11992_v49 = vld [vmem:[#allocation2 + $0x270] sm:$0xff]  ;;  %v5458_v21 = vpop.f32.mrf.mxu1 }
0x24b6   : > { %v4910_v17 = vpop.f32.mrf.mxu0 }
0x24b7   : > { %v5156_v22 = vpop.f32.mrf.mxu3 }
0x24b8   : > { %v5224_v58 = vadd.f32 %v5156_v22, %v4904_v26 }
0x24ba   : > { %v5509_v44 = vadd.f32 %v13558_v50, %v5224_v58  ;;  %v4909_v50 = vadd.f32 %v4908_v12, %v13461_v51  ;;  %v11929_v58 = vld [vmem:[#allocation2 + $0x78] sm:$0xff] }
0x24bc   : > { %v13614_v42 = vadd.f32 %v5724_v23, %v5509_v44  ;;  %v5731_v13 = vpop.f32.mrf.mxu2  ;;  %v11993_v44 = vld [vmem:[#allocation2 + $0x278] sm:$0xff] }
0x24be   : > { %v4913_v36 = vpop.f32.mrf.mxu0 }
0x24bf   : > { %v5158_v54 = vpop.f32.mrf.mxu3 }
0x24c0   : > { %v5225_v29 = vadd.f32 %v5158_v54, %v4906_v47  ;;  %v5461_v54 = vpop.f32.mrf.mxu1 }
0x24c1   : > { %10671 = vmatmul.msk.bf16.gmra.mxu0 %vm2091_vm15, %v11928_v24  ;;  %10911 = vmatmul.msk.bf16.gmra.mxu2 %vm2091_vm15, %v11992_v49 }
0x24c2   : > { %v5510_v33 = vadd.f32 %v13566_v31, %v5225_v29  ;;  %v4911_v31 = vadd.f32 %v4910_v17, %v13468_v55 }
0x24c4   : > { %v13621_v23 = vadd.f32 %v5726_v8, %v5510_v33  ;;  %10750 = vmatmul.msk.bf16.gmra.mxu3 %vm2091_vm15, %v11959_v6  ;;  %v5734_v39 = vpop.f32.mrf.mxu2  ;;  %v11960_v8 = vld [vmem:[#allocation2 + $0x170] sm:$0xff] }
0x24c6   : > { %v4915_v32 = vpop.f32.mrf.mxu0 }
0x24c7   : > { %v5161_v46 = vpop.f32.mrf.mxu3 }
0x24c8   : > { %v5226_v16 = vadd.f32 %v5161_v46, %v4909_v50  ;;  %v5463_v6 = vpop.f32.mrf.mxu1 }
0x24ca   : > { %v5511_v61 = vadd.f32 %v5446_v7, %v5226_v16  ;;  %v4914_v7 = vadd.f32 %v4913_v36, %v13479_v62  ;;  %v11994_v16 = vld [vmem:[#allocation2 + $0x280] sm:$0xff] }
0x24cc   : > { %v13624_v18 = vadd.f32 %v5729_v0, %v5511_v61  ;;  %v5736_v26 = vpop.f32.mrf.mxu2  ;;  %v12042_v61 = vld [vmem:[#allocation2 + $0x400] sm:$0xff] }
0x24ce   : > { %v4918_v51 = vpop.f32.mrf.mxu0 }
0x24cf   : > { %v5163_v22 = vpop.f32.mrf.mxu3 }
0x24d0   : > { %v5227_v47 = vadd.f32 %v5163_v22, %v4911_v31  ;;  %v13636_v22 = vpop.f32.mrf.mxu1 }
0x24d1   : > { %10672 = vmatmul.msk.bf16.gmra.mxu0 %vm2091_vm15, %v11929_v58  ;;  %10912 = vmatmul.msk.bf16.gmra.mxu2 %vm2091_vm15, %v11993_v44  ;;  %v8209_v58 = vpop.permute.xlu2 %8208 }
0x24d2   : > { %v5512_v12 = vadd.f32 %v5448_v45, %v5227_v47  ;;  %v4916_v45 = vadd.f32 %v4915_v32, %v13488_v3 }
0x24d4   : > { %v13630_v24 = vadd.f32 %v5731_v13, %v5512_v12  ;;  %10751 = vmatmul.msk.bf16.gmra.mxu3 %vm2091_vm15, %v11960_v8  ;;  %v5739_v55 = vpop.f32.mrf.mxu2  ;;  %v11961_v13 = vld [vmem:[#allocation2 + $0x178] sm:$0xff] }
0x24d6   : > { %v4920_v49 = vpop.f32.mrf.mxu0 }
0x24d7   : > { %v5166_v0 = vpop.f32.mrf.mxu3 }
0x24d8   : > { %v5228_v17 = vadd.f32 %v5166_v0, %v4914_v7  ;;  %v5468_v12 = vpop.f32.mrf.mxu1  ;;  %v4921_v0 = vadd.f32 %v4920_v49, %v13508_v14 }
0x24da   : > { %v5513_v29 = vadd.f32 %v5451_v43, %v5228_v17  ;;  %v12027_v43 = vld [vmem:[#allocation2 + $0x388] sm:$0xff] }
0x24db   : > { %11138 = vmatmul.msk.bf16.gmra.mxu1 %vm2091_vm15, %v12027_v43 }
0x24dc   : > { %v13633_v33 = vadd.f32 %v5734_v39, %v5513_v29  ;;  %v5741_v50 = vpop.f32.mrf.mxu2  ;;  %v4919_v39 = vadd.f32 %v4918_v51, %v13499_v9  ;;  %v11995_v9 = vld [vmem:[#allocation2 + $0x288] sm:$0xff] }
0x24de   : > { %v4923_v62 = vpop.f32.mrf.mxu0 }
0x24df   : > { %v5168_v46 = vpop.f32.mrf.mxu3 }
0x24e0   : > { %v5229_v31 = vadd.f32 %v5168_v46, %v4916_v45  ;;  %v12010_v46 = vld [vmem:[#allocation2 + $0x300] sm:$0xff] }
0x24e1   : > { %10977 = vmatmul.msk.bf16.vlgmr.msrb.gmra.mxu0 %vm2091_vm15, %v11994_v16  ;;  %11217 = vmatmul.msk.bf16.vlgmr.msra.gmra.mxu2 %vm2091_vm15, %v12042_v61  ;;  %v5471_v61 = vpop.f32.mrf.mxu1 }
0x24e2   : > { %v5514_v36 = vadd.f32 %v5453_v34, %v5229_v31  ;;  %8266 = vmatpush.bf16.msrb.mxu0 %v8209_v58  ;;  %v12028_v31 = vld [vmem:[#allocation2 + $0x390] sm:$0xff] }
0x24e4   : > { %v13641_v44 = vadd.f32 %v5736_v26, %v5514_v36  ;;  %10752 = vmatmul.msk.bf16.gmra.mxu3 %vm2091_vm15, %v11961_v13  ;;  %v5744_v3 = vpop.f32.mrf.mxu2  ;;  %v12043_v26 = vld [vmem:[#allocation2 + $0x408] sm:$0xff] }
0x24e6   : > { %v4925_v47 = vpop.f32.mrf.mxu0 }
0x24e7   : > { %v5171_v32 = vpop.f32.mrf.mxu3 }
0x24e8   : > { %v5230_v34 = vadd.f32 %v5171_v32, %v4919_v39  ;;  %v4926_v32 = vadd.f32 %v4925_v47, %v13526_v27 }
0x24e9   : > { %v5473_v43 = vpop.f32.mrf.mxu1 }
0x24ea   : > { %v5515_v8 = vadd.f32 %v5456_v2, %v5230_v34  ;;  %v8494_v2 = vpop.permute.xlu0 %8493 }
0x24eb   : > { %11139 = vmatmul.msk.bf16.gmra.mxu1 %vm2091_vm15, %v12028_v31 }
0x24ec   : > { %v13645_v7 = vadd.f32 %v5739_v55, %v5515_v8  ;;  %v5746_v17 = vpop.f32.mrf.mxu2  ;;  %v4924_v55 = vadd.f32 %v4923_v62, %v13519_v1  ;;  %v11996_v1 = vld [vmem:[#allocation2 + $0x290] sm:$0xff] }
0x24ee   : > { %v4928_v45 = vpop.f32.mrf.mxu0 }
0x24ef   : > { %v5173_v29 = vpop.f32.mrf.mxu3 }
0x24f0   : > { %v5231_v51 = vadd.f32 %v5173_v29, %v4921_v0  ;;  %v12011_v29 = vld [vmem:[#allocation2 + $0x308] sm:$0xff] }
0x24f1   : > { %10978 = vmatmul.msk.bf16.gmra.mxu0 %vm2091_vm15, %v11995_v9  ;;  %11218 = vmatmul.msk.bf16.gmra.mxu2 %vm2091_vm15, %v12043_v26  ;;  %v5476_v26 = vpop.f32.mrf.mxu1 }
0x24f2   : > { %v5516_v16 = vadd.f32 %v5458_v21, %v5231_v51  ;;  %v12029_v51 = vld [vmem:[#allocation2 + $0x398] sm:$0xff] }
0x24f4   : > { %v13651_v13 = vadd.f32 %v5741_v50, %v5516_v16  ;;  %11057 = vmatmul.msk.bf16.vlgmr.msrb.gmra.mxu3 %vm2091_vm15, %v12010_v46  ;;  %v5749_v14 = vpop.f32.mrf.mxu2  ;;  %v12044_v50 = vld [vmem:[#allocation2 + $0x410] sm:$0xff] }
0x24f5   : > { %8551 = vmatpush.bf16.msrb.mxu3 %v8494_v2 }
0x24f6   : > { %v4930_v21 = vpop.f32.mrf.mxu0 }
0x24f7   : > { %v5176_v49 = vpop.f32.mrf.mxu3 }
0x24f8   : > { %v5232_v36 = vadd.f32 %v5176_v49, %v4924_v55  ;;  %v4931_v55 = vadd.f32 %v4930_v21, %v13546_v41 }
0x24f9   : > { %v5478_v31 = vpop.f32.mrf.mxu1 }
0x24fa   : > { %v5517_v58 = vadd.f32 %v5461_v54, %v5232_v36  ;;  %v4929_v54 = vadd.f32 %v4928_v45, %v13537_v60  ;;  %v11997_v60 = vld [vmem:[#allocation2 + $0x298] sm:$0xff] }
0x24fb   : > { %11140 = vmatmul.msk.bf16.gmra.mxu1 %vm2091_vm15, %v12029_v51 }
0x24fc   : > { %v13655_v39 = vadd.f32 %v5744_v3, %v5517_v58  ;;  %v5751_v34 = vpop.f32.mrf.mxu2 }
0x24fe   : > { %v4933_v0 = vpop.f32.mrf.mxu0 }
0x24ff   : > { %v5178_v8 = vpop.f32.mrf.mxu3  ;;  %v4934_v41 = vadd.f32 %v4933_v0, %v13463_v53  ;;  %v12031_v53 = vld [vmem:[#allocation2 + $0x3a8] sm:$0xff] }
0x2500   : > { %v5233_v62 = vadd.f32 %v5178_v8, %v4926_v32  ;;  %v12012_v32 = vld [vmem:[#allocation2 + $0x310] sm:$0xff] }
0x2501   : > { %10979 = vmatmul.msk.bf16.gmra.mxu0 %vm2091_vm15, %v11996_v1  ;;  %11219 = vmatmul.msk.bf16.gmra.mxu2 %vm2091_vm15, %v12044_v50  ;;  %v5481_v1 = vpop.f32.mrf.mxu1  ;;  %v12030_v50 = vld [vmem:[#allocation2 + $0x3a0] sm:$0xff] }
0x2502   : > { %v5518_v9 = vadd.f32 %v5463_v6, %v5233_v62 }
0x2504   : > { %v13661_v3 = vadd.f32 %v5746_v17, %v5518_v9  ;;  %11058 = vmatmul.msk.bf16.gmra.mxu3 %vm2091_vm15, %v12011_v29  ;;  %v5754_v27 = vpop.f32.mrf.mxu2  ;;  %v12045_v17 = vld [vmem:[#allocation2 + $0x418] sm:$0xff] }
0x2506   : > { %v4935_v16 = vpop.f32.mrf.mxu0 }
0x2507   : > { %v5181_v47 = vpop.f32.mrf.mxu3 }
0x2508   : > { %v5234_v46 = vadd.f32 %v5181_v47, %v4929_v54  ;;  %v4936_v54 = vadd.f32 %v4935_v16, %v13472_v56 }
0x250a   : > { %v5519_v6 = vadd.f32 %v13636_v22, %v5234_v46 }
0x250b   : > { %11141 = vmatmul.msk.bf16.gmra.mxu1 %vm2091_vm15, %v12030_v50 }
0x250c   : > { %v13666_v2 = vadd.f32 %v5749_v14, %v5519_v6  ;;  %v5756_v49 = vpop.f32.mrf.mxu2  ;;  %v12046_v6 = vld [vmem:[#allocation2 + $0x420] sm:$0xff] }
0x250e   : > { %v4938_v58 = vpop.f32.mrf.mxu0 }
0x250f   : > { %v5183_v36 = vpop.f32.mrf.mxu3  ;;  %v4939_v56 = vadd.f32 %v4938_v58, %v13481_v63  ;;  %v12032_v63 = vld [vmem:[#allocation2 + $0x3b0] sm:$0xff] }
0x2510   : > { %v5235_v45 = vadd.f32 %v5183_v36, %v4931_v55 }
0x2511   : > { %10980 = vmatmul.msk.bf16.gmra.mxu0 %vm2091_vm15, %v11997_v60  ;;  %11220 = vmatmul.msk.bf16.gmra.mxu2 %vm2091_vm15, %v12045_v17  ;;  %v12013_v60 = vld [vmem:[#allocation2 + $0x318] sm:$0xff] }
0x2512   : > { %v5520_v8 = vadd.f32 %v5468_v12, %v5235_v45  ;;  %v5483_v12 = vpop.f32.mrf.mxu1 }
0x2514   : > { %v13671_v22 = vadd.f32 %v5751_v34, %v5520_v8  ;;  %11059 = vmatmul.msk.bf16.gmra.mxu3 %vm2091_vm15, %v12012_v32  ;;  %v5759_v14 = vpop.f32.mrf.mxu2  ;;  %v11998_v34 = vld [vmem:[#allocation2 + $0x2a0] sm:$0xff] }
0x2516   : > { %v4940_v29 = vpop.f32.mrf.mxu0 }
0x2517   : > { %v5186_v21 = vpop.f32.mrf.mxu3 }
0x2518   : > { %v5236_v62 = vadd.f32 %v5186_v21, %v4934_v41  ;;  %v4941_v41 = vadd.f32 %v4940_v29, %v13490_v52 }
0x251a   : > { %v5521_v9 = vadd.f32 %v5471_v61, %v5236_v62  ;;  %v5486_v45 = vpop.f32.mrf.mxu1 }
0x251b   : > { %11142 = vmatmul.msk.bf16.gmra.mxu1 %vm2091_vm15, %v12031_v53 }
0x251c   : > { %v13676_v51 = vadd.f32 %v5754_v27, %v5521_v9  ;;  %v5761_v47 = vpop.f32.mrf.mxu2  ;;  %v12047_v9 = vld [vmem:[#allocation2 + $0x428] sm:$0xff] }
0x251e   : > { %v4943_v36 = vpop.f32.mrf.mxu0 }
0x251f   : > { %v5188_v46 = vpop.f32.mrf.mxu3  ;;  %v4944_v52 = vadd.f32 %v4943_v36, %v13501_v11  ;;  %v12033_v11 = vld [vmem:[#allocation2 + $0x3b8] sm:$0xff] }
0x2520   : > { %v5237_v55 = vadd.f32 %v5188_v46, %v4936_v54 }
0x2521   : > { %10981 = vmatmul.msk.bf16.gmra.mxu0 %vm2091_vm15, %v11998_v34  ;;  %11221 = vmatmul.msk.bf16.gmra.mxu2 %vm2091_vm15, %v12046_v6  ;;  %v12014_v34 = vld [vmem:[#allocation2 + $0x320] sm:$0xff] }
0x2522   : > { %v5522_v17 = vadd.f32 %v5473_v43, %v5237_v55  ;;  %v5488_v43 = vpop.f32.mrf.mxu1 }
0x2524   : > { %v13681_v61 = vadd.f32 %v5756_v49, %v5522_v17  ;;  %11060 = vmatmul.msk.bf16.gmra.mxu3 %vm2091_vm15, %v12013_v60  ;;  %v5764_v0 = vpop.f32.mrf.mxu2  ;;  %v11999_v49 = vld [vmem:[#allocation2 + $0x2a8] sm:$0xff] }
0x2526   : > { %v4945_v32 = vpop.f32.mrf.mxu0 }
0x2527   : > { %v5191_v27 = vpop.f32.mrf.mxu3 }
0x2528   : > { %v5238_v16 = vadd.f32 %v5191_v27, %v4939_v56  ;;  %v4946_v56 = vadd.f32 %v4945_v32, %v13510_v15 }
0x252a   : > { %v5523_v8 = vadd.f32 %v5476_v26, %v5238_v16  ;;  %v5491_v55 = vpop.f32.mrf.mxu1 }
0x252b   : > { %11143 = vmatmul.msk.bf16.gmra.mxu1 %vm2091_vm15, %v12032_v63 }
0x252c   : > { %v13686_v50 = vadd.f32 %v5759_v14, %v5523_v8  ;;  %v5766_v21 = vpop.f32.mrf.mxu2  ;;  %v12048_v8 = vld [vmem:[#allocation2 + $0x430] sm:$0xff] }
0x252e   : > { %v4948_v46 = vpop.f32.mrf.mxu0 }
0x252f   : > { %v5193_v62 = vpop.f32.mrf.mxu3  ;;  %v4949_v15 = vadd.f32 %v4948_v46, %v13521_v25  ;;  %v12034_v25 = vld [vmem:[#allocation2 + $0x3c0] sm:$0xff] }
0x2530   : > { %v5239_v54 = vadd.f32 %v5193_v62, %v4941_v41 }
0x2531   : > { %10982 = vmatmul.msk.bf16.gmra.mxu0 %vm2091_vm15, %v11999_v49  ;;  %11222 = vmatmul.msk.bf16.gmra.mxu2 %vm2091_vm15, %v12047_v9  ;;  %v12015_v49 = vld [vmem:[#allocation2 + $0x328] sm:$0xff] }
0x2532   : > { %v5524_v6 = vadd.f32 %v5478_v31, %v5239_v54  ;;  %v5493_v31 = vpop.f32.mrf.mxu1 }
0x2534   : > { %v13691_v26 = vadd.f32 %v5761_v47, %v5524_v6  ;;  %11061 = vmatmul.msk.bf16.gmra.mxu3 %vm2091_vm15, %v12014_v34  ;;  %v5769_v58 = vpop.f32.mrf.mxu2  ;;  %v12000_v47 = vld [vmem:[#allocation2 + $0x2b0] sm:$0xff] }
0x2536   : > { %v4950_v60 = vpop.f32.mrf.mxu0 }
0x2537   : > { %v5196_v14 = vpop.f32.mrf.mxu3 }
0x2538   : > { %v5240_v29 = vadd.f32 %v5196_v14, %v4944_v52  ;;  %v4951_v52 = vadd.f32 %v4950_v60, %v13528_v30 }
0x253a   : > { %v5525_v17 = vadd.f32 %v5481_v1, %v5240_v29  ;;  %v5496_v54 = vpop.f32.mrf.mxu1 }
0x253b   : > { %11144 = vmatmul.msk.bf16.gmra.mxu1 %vm2091_vm15, %v12033_v11 }
0x253c   : > { %v13696_v53 = vadd.f32 %v5764_v0, %v5525_v17  ;;  %v5771_v27 = vpop.f32.mrf.mxu2  ;;  %v12049_v17 = vld [vmem:[#allocation2 + $0x438] sm:$0xff] }
0x253e   : > { %v4953_v62 = vpop.f32.mrf.mxu0 }
0x253f   : > { %v5198_v16 = vpop.f32.mrf.mxu3  ;;  %v4954_v30 = vadd.f32 %v4953_v62, %v13539_v38 }
0x2540   : > { %v5241_v41 = vadd.f32 %v5198_v16, %v4946_v56 }
0x2541   : > { %10983 = vmatmul.msk.bf16.gmra.mxu0 %vm2091_vm15, %v12000_v47  ;;  %11223 = vmatmul.msk.bf16.gmra.mxu2 %vm2091_vm15, %v12048_v8  ;;  %v12016_v47 = vld [vmem:[#allocation2 + $0x330] sm:$0xff] }
0x2542   : > { %v5526_v9 = vadd.f32 %v5483_v12, %v5241_v41  ;;  %v5498_v12 = vpop.f32.mrf.mxu1 }
0x2544   : > { %v13701_v1 = vadd.f32 %v5766_v21, %v5526_v9  ;;  %11062 = vmatmul.msk.bf16.gmra.mxu3 %vm2091_vm15, %v12015_v49  ;;  %v5774_v36 = vpop.f32.mrf.mxu2  ;;  %v12001_v21 = vld [vmem:[#allocation2 + $0x2b8] sm:$0xff] }
0x2546   : > { %v4955_v34 = vpop.f32.mrf.mxu0 }
0x2547   : > { %v5201_v0 = vpop.f32.mrf.mxu3 }
0x2548   : > { %v5242_v32 = vadd.f32 %v5201_v0, %v4949_v15  ;;  %v4956_v15 = vadd.f32 %v4955_v34, %v13548_v28 }
0x254a   : > { %v5527_v6 = vadd.f32 %v5486_v45, %v5242_v32  ;;  %v13709_v41 = vpop.f32.mrf.mxu1 }
0x254b   : > { %11145 = vmatmul.msk.bf16.gmra.mxu1 %vm2091_vm15, %v12034_v25 }
0x254c   : > { %v13706_v63 = vadd.f32 %v5769_v58, %v5527_v6  ;;  %v5776_v14 = vpop.f32.mrf.mxu2  ;;  %v12050_v6 = vld [vmem:[#allocation2 + $0x440] sm:$0xff] }
0x254e   : > { %v4958_v16 = vpop.f32.mrf.mxu0 }
0x254f   : > { %v5203_v29 = vpop.f32.mrf.mxu3  ;;  %v4959_v28 = vadd.f32 %v4958_v16, %v13555_v10 }
0x2550   : > { %v5243_v56 = vadd.f32 %v5203_v29, %v4951_v52 }
0x2551   : > { %10984 = vmatmul.msk.bf16.gmra.mxu0 %vm2091_vm15, %v12001_v21  ;;  %11224 = vmatmul.msk.bf16.gmra.mxu2 %vm2091_vm15, %v12049_v17  ;;  %v12017_v21 = vld [vmem:[#allocation2 + $0x338] sm:$0xff] }
0x2552   : > { %v5528_v8 = vadd.f32 %v5488_v43, %v5243_v56  ;;  %v6562_v9 = vpop.f32.mrf.mxu1 }
0x2554   : > { %v13713_v45 = vadd.f32 %v5771_v27, %v5528_v8  ;;  %11063 = vmatmul.msk.bf16.gmra.mxu3 %vm2091_vm15, %v12016_v47  ;;  %v5779_v46 = vpop.f32.mrf.mxu2  ;;  %v12002_v27 = vld [vmem:[#allocation2 + $0x2c0] sm:$0xff] }
0x2556   : > { %v4960_v49 = vpop.f32.mrf.mxu0 }
0x2557   : > { %v5206_v58 = vpop.f32.mrf.mxu3 }
0x2558   : > { %v5244_v60 = vadd.f32 %v5206_v58, %v4954_v30  ;;  %v4961_v58 = vadd.f32 %v4960_v49, %v13560_v57 }
0x255a   : > { %v5529_v43 = vadd.f32 %v5491_v55, %v5244_v60  ;;  %v6565_v62 = vpop.f32.mrf.mxu1  ;;  %v12035_v55 = vld [vmem:[#allocation2 + $0x3c8] sm:$0xff] }
0x255b   : > { %11146 = vmatmul.msk.bf16.gmra.mxu1 %vm2091_vm15, %v12035_v55 }
0x255c   : > { %v13718_v11 = vadd.f32 %v5774_v36, %v5529_v43  ;;  %v5781_v0 = vpop.f32.mrf.mxu2  ;;  %v12003_v43 = vld [vmem:[#allocation2 + $0x2c8] sm:$0xff] }
0x255e   : > { %v5990_v29 = vpop.f32.mrf.mxu0 }
0x255f   : > { %v5208_v32 = vpop.f32.mrf.mxu3  ;;  %v6070_v17 = vadd.f32 %v5990_v29, %v13570_v37 }
0x2560   : > { %v5245_v52 = vadd.f32 %v5208_v32, %v4956_v15  ;;  %v12051_v15 = vld [vmem:[#allocation2 + $0x448] sm:$0xff] }
0x2561   : > { %10985 = vmatmul.msk.bf16.gmra.mxu0 %vm2091_vm15, %v12002_v27  ;;  %11225 = vmatmul.msk.bf16.gmra.mxu2 %vm2091_vm15, %v12050_v6  ;;  %v12018_v6 = vld [vmem:[#allocation2 + $0x340] sm:$0xff] }
0x2562   : > { %v5530_v38 = vadd.f32 %v5493_v31, %v5245_v52  ;;  %v6567_v25 = vpop.f32.mrf.mxu1 }
0x2564   : > { %v13724_v36 = vadd.f32 %v5776_v14, %v5530_v38  ;;  %11064 = vmatmul.msk.bf16.gmra.mxu3 %vm2091_vm15, %v12017_v21  ;;  %v6843_v34 = vpop.f32.mrf.mxu2 }
0x2566   : > { %v5992_v8 = vpop.f32.mrf.mxu0 }
0x2567   : > { %v5211_v56 = vpop.f32.mrf.mxu3  ;;  %v6071_v37 = vadd.f32 %v5992_v8, %v13576_v4  ;;  %v12036_v4 = vld [vmem:[#allocation2 + $0x3d0] sm:$0xff] }
0x2568   : > { %v5246_v47 = vadd.f32 %v5211_v56, %v4959_v28  ;;  %v12004_v56 = vld [vmem:[#allocation2 + $0x2d0] sm:$0xff] }
0x256a   : > { %v5531_v31 = vadd.f32 %v5496_v54, %v5246_v47  ;;  %v6570_v52 = vpop.f32.mrf.mxu1 }
0x256b   : > { %11147 = vmatmul.msk.bf16.gmra.mxu1 %vm2091_vm15, %v12036_v4  ;;  %v12005_v4 = vld [vmem:[#allocation2 + $0x2d8] sm:$0xff] }
0x256c   : > { %v13730_v30 = vadd.f32 %v5779_v46, %v5531_v31  ;;  %v6845_v14 = vpop.f32.mrf.mxu2  ;;  %v12019_v31 = vld [vmem:[#allocation2 + $0x348] sm:$0xff] }
0x256e   : > { %v5995_v27 = vpop.f32.mrf.mxu0 }
0x256f   : > { %v5213_v60 = vpop.f32.mrf.mxu3  ;;  %v6072_v10 = vadd.f32 %v5995_v27, %v13581_v20 }
0x2570   : > { %v5247_v32 = vadd.f32 %v5213_v60, %v4961_v58 }
0x2571   : > { %10986 = vmatmul.msk.bf16.gmra.mxu0 %vm2091_vm15, %v12003_v43  ;;  %11226 = vmatmul.msk.bf16.gmra.mxu2 %vm2091_vm15, %v12051_v15 }
0x2572   : > { %v5532_v16 = vadd.f32 %v5498_v12, %v5247_v32  ;;  %v6572_v12 = vpop.f32.mrf.mxu1 }
0x2574   : > { %v13736_v54 = vadd.f32 %v5781_v0, %v5532_v16  ;;  %11065 = vmatmul.msk.bf16.gmra.mxu3 %vm2091_vm15, %v12018_v6  ;;  %v6848_v57 = vpop.f32.mrf.mxu2  ;;  %v12052_v0 = vld [vmem:[#allocation2 + $0x450] sm:$0xff] }
0x2576   : > { %v5997_v29 = vpop.f32.mrf.mxu0 }
0x2577   : > { %v6275_v46 = vpop.f32.mrf.mxu3  ;;  %v6073_v21 = vadd.f32 %v5997_v29, %v13587_v59  ;;  %v12037_v59 = vld [vmem:[#allocation2 + $0x3d8] sm:$0xff]  ;;  %v12020_v29 = vld [vmem:[#allocation2 + $0x350] sm:$0xff] }
0x2578   : > { %v6355_v49 = vadd.f32 %v6275_v46, %v6070_v17  ;;  %v12053_v46 = vld [vmem:[#allocation2 + $0x458] sm:$0xff] }
0x257a   : > { %v6640_v20 = vadd.f32 %v13709_v41, %v6355_v49  ;;  %v6575_v43 = vpop.f32.mrf.mxu1 }
0x257b   : > { %11148 = vmatmul.msk.bf16.gmra.mxu1 %vm2091_vm15, %v12037_v59  ;;  %v12006_v59 = vld [vmem:[#allocation2 + $0x2e0] sm:$0xff] }
0x257c   : > { %v13742_v38 = vadd.f32 %v6843_v34, %v6640_v20  ;;  %v6850_v55 = vpop.f32.mrf.mxu2 }
0x257e   : > { %v6000_v8 = vpop.f32.mrf.mxu0 }
0x257f   : > { %v6277_v28 = vpop.f32.mrf.mxu3  ;;  %v6074_v58 = vadd.f32 %v6000_v8, %v13592_v5 }
0x2580   : > { %v6356_v47 = vadd.f32 %v6277_v28, %v6071_v37 }
0x2581   : > { %10987 = vmatmul.msk.bf16.gmra.mxu0 %vm2091_vm15, %v12004_v56  ;;  %11227 = vmatmul.msk.bf16.gmra.mxu2 %vm2091_vm15, %v12052_v0 }
0x2582   : > { %v6641_v60 = vadd.f32 %v6562_v9, %v6356_v47  ;;  %v6577_v9 = vpop.f32.mrf.mxu1 }
0x2584   : > { %v13747_v41 = vadd.f32 %v6845_v14, %v6641_v60  ;;  %11066 = vmatmul.msk.bf16.gmra.mxu3 %vm2091_vm15, %v12019_v31  ;;  %v6853_v17 = vpop.f32.mrf.mxu2 }
0x2586   : > { %v6002_v15 = vpop.f32.mrf.mxu0 }
0x2587   : > { %v6280_v34 = vpop.f32.mrf.mxu3  ;;  %v6075_v32 = vadd.f32 %v6002_v15, %v13598_v35  ;;  %v12038_v35 = vld [vmem:[#allocation2 + $0x3e0] sm:$0xff]  ;;  %v12021_v15 = vld [vmem:[#allocation2 + $0x358] sm:$0xff] }
0x2588   : > { %v6357_v37 = vadd.f32 %v6280_v34, %v6072_v10  ;;  %v12054_v34 = vld [vmem:[#allocation2 + $0x460] sm:$0xff] }
0x258a   : > { %v6642_v5 = vadd.f32 %v6565_v62, %v6357_v37  ;;  %v6580_v56 = vpop.f32.mrf.mxu1 }
0x258b   : > { %11149 = vmatmul.msk.bf16.gmra.mxu1 %vm2091_vm15, %v12038_v35  ;;  %v12007_v35 = vld [vmem:[#allocation2 + $0x2e8] sm:$0xff] }
0x258c   : > { %v13752_v27 = vadd.f32 %v6848_v57, %v6642_v5  ;;  %v6855_v6 = vpop.f32.mrf.mxu2 }
0x258e   : > { %v6005_v49 = vpop.f32.mrf.mxu0 }
0x258f   : > { %v6282_v16 = vpop.f32.mrf.mxu3  ;;  %v6076_v20 = vadd.f32 %v6005_v49, %v13603_v48 }
0x2590   : > { %v6358_v14 = vadd.f32 %v6282_v16, %v6073_v21 }
0x2591   : > { %10988 = vmatmul.msk.bf16.gmra.mxu0 %vm2091_vm15, %v12005_v4  ;;  %11228 = vmatmul.msk.bf16.gmra.mxu2 %vm2091_vm15, %v12053_v46 }
0x2592   : > { %v6643_v28 = vadd.f32 %v6567_v25, %v6358_v14  ;;  %v6582_v25 = vpop.f32.mrf.mxu1 }
0x2594   : > { %v13757_v62 = vadd.f32 %v6850_v55, %v6643_v28  ;;  %11067 = vmatmul.msk.bf16.gmra.mxu3 %vm2091_vm15, %v12020_v29  ;;  %v6858_v10 = vpop.f32.mrf.mxu2 }
0x2596   : > { %v6007_v0 = vpop.f32.mrf.mxu0 }
0x2597   : > { %v6285_v57 = vpop.f32.mrf.mxu3  ;;  %v6077_v47 = vadd.f32 %v6007_v0, %v13609_v40  ;;  %v12039_v40 = vld [vmem:[#allocation2 + $0x3e8] sm:$0xff]  ;;  %v12022_v0 = vld [vmem:[#allocation2 + $0x360] sm:$0xff] }
0x2598   : > { %v6359_v21 = vadd.f32 %v6285_v57, %v6074_v58  ;;  %v12055_v57 = vld [vmem:[#allocation2 + $0x468] sm:$0xff] }
0x259a   : > { %v6644_v48 = vadd.f32 %v6570_v52, %v6359_v21  ;;  %v6585_v4 = vpop.f32.mrf.mxu1 }
0x259b   : > { %11150 = vmatmul.msk.bf16.gmra.mxu1 %vm2091_vm15, %v12039_v40  ;;  %v12008_v40 = vld [vmem:[#allocation2 + $0x2f0] sm:$0xff] }
0x259c   : > { %v13762_v8 = vadd.f32 %v6853_v17, %v6644_v48  ;;  %v6860_v31 = vpop.f32.mrf.mxu2 }
0x259e   : > { %v6010_v37 = vpop.f32.mrf.mxu0 }
0x259f   : > { %v6287_v60 = vpop.f32.mrf.mxu3  ;;  %v6078_v5 = vadd.f32 %v6010_v37, %v13614_v42 }
0x25a0   : > { %v6360_v55 = vadd.f32 %v6287_v60, %v6075_v32 }
0x25a1   : > { %10989 = vmatmul.msk.bf16.gmra.mxu0 %vm2091_vm15, %v12006_v59  ;;  %11229 = vmatmul.msk.bf16.gmra.mxu2 %vm2091_vm15, %v12054_v34 }
0x25a2   : > { %v6645_v16 = vadd.f32 %v6572_v12, %v6360_v55  ;;  %v6587_v12 = vpop.f32.mrf.mxu1 }
0x25a4   : > { %v13767_v52 = vadd.f32 %v6855_v6, %v6645_v16  ;;  %11068 = vmatmul.msk.bf16.gmra.mxu3 %vm2091_vm15, %v12021_v15  ;;  %v6863_v58 = vpop.f32.mrf.mxu2 }
0x25a6   : > { %v6012_v46 = vpop.f32.mrf.mxu0 }
0x25a7   : > { %v6290_v17 = vpop.f32.mrf.mxu3  ;;  %v6079_v14 = vadd.f32 %v6012_v46, %v13621_v23  ;;  %v12040_v23 = vld [vmem:[#allocation2 + $0x3f0] sm:$0xff]  ;;  %v12023_v46 = vld [vmem:[#allocation2 + $0x368] sm:$0xff] }
0x25a8   : > { %v6361_v32 = vadd.f32 %v6290_v17, %v6076_v20  ;;  %v12056_v17 = vld [vmem:[#allocation2 + $0x470] sm:$0xff] }
0x25aa   : > { %v6646_v42 = vadd.f32 %v6575_v43, %v6361_v32  ;;  %v6590_v59 = vpop.f32.mrf.mxu1 }
0x25ab   : > { %11151 = vmatmul.msk.bf16.gmra.mxu1 %vm2091_vm15, %v12040_v23  ;;  %v12009_v23 = vld [vmem:[#allocation2 + $0x2f8] sm:$0xff] }
0x25ac   : > { %v13772_v49 = vadd.f32 %v6858_v10, %v6646_v42  ;;  %v6865_v29 = vpop.f32.mrf.mxu2 }
0x25ae   : > { %v6015_v21 = vpop.f32.mrf.mxu0 }
0x25af   : > { %v6292_v28 = vpop.f32.mrf.mxu3  ;;  %v6080_v48 = vadd.f32 %v6015_v21, %v13624_v18 }
0x25b0   : > { %v6362_v6 = vadd.f32 %v6292_v28, %v6077_v47 }
0x25b1   : > { %10990 = vmatmul.msk.bf16.gmra.mxu0 %vm2091_vm15, %v12007_v35  ;;  %11230 = vmatmul.msk.bf16.gmra.mxu2 %vm2091_vm15, %v12055_v57 }
0x25b2   : > { %v6647_v60 = vadd.f32 %v6577_v9, %v6362_v6  ;;  %v6592_v9 = vpop.f32.mrf.mxu1 }
0x25b4   : > { %v13777_v43 = vadd.f32 %v6860_v31, %v6647_v60  ;;  %11069 = vmatmul.msk.bf16.gmra.mxu3 %vm2091_vm15, %v12022_v0  ;;  %v6868_v20 = vpop.f32.mrf.mxu2 }
0x25b6   : > { %v6017_v34 = vpop.f32.mrf.mxu0 }
0x25b7   : > { %v6295_v10 = vpop.f32.mrf.mxu3  ;;  %v6081_v55 = vadd.f32 %v6017_v34, %v13630_v24  ;;  %v12041_v24 = vld [vmem:[#allocation2 + $0x3f8] sm:$0xff]  ;;  %v12024_v34 = vld [vmem:[#allocation2 + $0x370] sm:$0xff] }
0x25b8   : > { %v6363_v47 = vadd.f32 %v6295_v10, %v6078_v5  ;;  %v12057_v10 = vld [vmem:[#allocation2 + $0x478] sm:$0xff] }
0x25ba   : > { %v6648_v18 = vadd.f32 %v6580_v56, %v6363_v47  ;;  %v6595_v35 = vpop.f32.mrf.mxu1 }
0x25bb   : > { %11152 = vmatmul.msk.bf16.gmra.mxu1 %vm2091_vm15, %v12041_v24  ;;  %v12058_v24 = vld [vmem:[#allocation2 + $0x480] sm:$0xff] }
0x25bc   : > { %v13782_v37 = vadd.f32 %v6863_v58, %v6648_v18  ;;  %v6870_v15 = vpop.f32.mrf.mxu2 }
0x25be   : > { %v6020_v32 = vpop.f32.mrf.mxu0 }
0x25bf   : > { %v6297_v16 = vpop.f32.mrf.mxu3  ;;  %v6082_v42 = vadd.f32 %v6020_v32, %v13633_v33 }
0x25c0   : > { %v6364_v31 = vadd.f32 %v6297_v16, %v6079_v14 }
0x25c1   : > { %10991 = vmatmul.msk.bf16.gmra.mxu0 %vm2091_vm15, %v12008_v40  ;;  %11231 = vmatmul.msk.bf16.gmra.mxu2 %vm2091_vm15, %v12056_v17 }
0x25c2   : > { %v6649_v28 = vadd.f32 %v6582_v25, %v6364_v31  ;;  %v6597_v25 = vpop.f32.mrf.mxu1 }
0x25c4   : > { %v13787_v56 = vadd.f32 %v6865_v29, %v6649_v28  ;;  %11070 = vmatmul.msk.bf16.gmra.mxu3 %vm2091_vm15, %v12023_v46  ;;  %v6873_v5 = vpop.f32.mrf.mxu2 }
0x25c6   : > { %v6022_v57 = vpop.f32.mrf.mxu0 }
0x25c7   : > { %v6300_v58 = vpop.f32.mrf.mxu3  ;;  %v6083_v6 = vadd.f32 %v6022_v57, %v13641_v44  ;;  %v12090_v44 = vld [vmem:[#allocation2 + $0x580] sm:$0xff]  ;;  %v12025_v57 = vld [vmem:[#allocation2 + $0x378] sm:$0xff] }
0x25c8   : > { %v6365_v14 = vadd.f32 %v6300_v58, %v6080_v48  ;;  %v12106_v58 = vld [vmem:[#allocation2 + $0x600] sm:$0xff] }
0x25ca   : > { %v6650_v33 = vadd.f32 %v6585_v4, %v6365_v14  ;;  %v6600_v40 = vpop.f32.mrf.mxu1 }
0x25cb   : > { %11457 = vmatmul.msk.bf16.vlgmr.msrb.gmra.mxu1 %vm2091_vm15, %v12090_v44  ;;  %v12059_v44 = vld [vmem:[#allocation2 + $0x488] sm:$0xff] }
0x25cc   : > { %v13792_v21 = vadd.f32 %v6868_v20, %v6650_v33  ;;  %v6875_v0 = vpop.f32.mrf.mxu2 }
0x25ce   : > { %v6025_v47 = vpop.f32.mrf.mxu0 }
0x25cf   : > { %v6302_v60 = vpop.f32.mrf.mxu3  ;;  %v6084_v18 = vadd.f32 %v6025_v47, %v13645_v7 }
0x25d0   : > { %v6366_v29 = vadd.f32 %v6302_v60, %v6081_v55 }
0x25d1   : > { %10992 = vmatmul.msk.bf16.gmra.mxu0 %vm2091_vm15, %v12009_v23  ;;  %11232 = vmatmul.msk.bf16.gmra.mxu2 %vm2091_vm15, %v12057_v10 }
0x25d2   : > { %v6651_v16 = vadd.f32 %v6587_v12, %v6366_v29  ;;  %v6602_v12 = vpop.f32.mrf.mxu1 }
0x25d4   : > { %v13797_v4 = vadd.f32 %v6870_v15, %v6651_v16  ;;  %11071 = vmatmul.msk.bf16.gmra.mxu3 %vm2091_vm15, %v12024_v34  ;;  %v6878_v48 = vpop.f32.mrf.mxu2 }
0x25d6   : > { %v6027_v17 = vpop.f32.mrf.mxu0 }
0x25d7   : > { %v6305_v20 = vpop.f32.mrf.mxu3  ;;  %v6085_v31 = vadd.f32 %v6027_v17, %v13651_v13  ;;  %v12091_v13 = vld [vmem:[#allocation2 + $0x588] sm:$0xff]  ;;  %v12074_v17 = vld [vmem:[#allocation2 + $0x500] sm:$0xff] }
0x25d8   : > { %v6367_v55 = vadd.f32 %v6305_v20, %v6082_v42  ;;  %v12107_v20 = vld [vmem:[#allocation2 + $0x608] sm:$0xff] }
0x25da   : > { %v6652_v7 = vadd.f32 %v6590_v59, %v6367_v55  ;;  %v6605_v23 = vpop.f32.mrf.mxu1 }
0x25db   : > { %11458 = vmatmul.msk.bf16.gmra.mxu1 %vm2091_vm15, %v12091_v13  ;;  %v12060_v13 = vld [vmem:[#allocation2 + $0x490] sm:$0xff] }
0x25dc   : > { %v13802_v32 = vadd.f32 %v6873_v5, %v6652_v7  ;;  %v6880_v46 = vpop.f32.mrf.mxu2 }
0x25de   : > { %v6030_v14 = vpop.f32.mrf.mxu0 }
0x25df   : > { %v6307_v28 = vpop.f32.mrf.mxu3  ;;  %v6086_v33 = vadd.f32 %v6030_v14, %v13655_v39 }
0x25e0   : > { %v6368_v15 = vadd.f32 %v6307_v28, %v6083_v6 }
0x25e1   : > { %11297 = vmatmul.msk.bf16.vlgmr.msra.gmra.mxu0 %vm2091_vm15, %v12058_v24  ;;  %11537 = vmatmul.msk.bf16.vlgmr.msrb.gmra.mxu2 %vm2091_vm15, %v12106_v58 }
0x25e2   : > { %v6653_v60 = vadd.f32 %v6592_v9, %v6368_v15  ;;  %v6607_v9 = vpop.f32.mrf.mxu1 }
0x25e4   : > { %v13807_v59 = vadd.f32 %v6875_v0, %v6653_v60  ;;  %11072 = vmatmul.msk.bf16.gmra.mxu3 %vm2091_vm15, %v12025_v57  ;;  %v6883_v42 = vpop.f32.mrf.mxu2 }
0x25e6   : > { %v6032_v10 = vpop.f32.mrf.mxu0 }
0x25e7   : > { %v6310_v5 = vpop.f32.mrf.mxu3  ;;  %v6087_v29 = vadd.f32 %v6032_v10, %v13661_v3  ;;  %v12092_v3 = vld [vmem:[#allocation2 + $0x590] sm:$0xff]  ;;  %v12075_v10 = vld [vmem:[#allocation2 + $0x508] sm:$0xff] }
0x25e8   : > { %v6369_v6 = vadd.f32 %v6310_v5, %v6084_v18  ;;  %v12108_v5 = vld [vmem:[#allocation2 + $0x610] sm:$0xff] }
0x25ea   : > { %v6654_v39 = vadd.f32 %v6595_v35, %v6369_v6  ;;  %v6610_v24 = vpop.f32.mrf.mxu1 }
0x25eb   : > { %11459 = vmatmul.msk.bf16.gmra.mxu1 %vm2091_vm15, %v12092_v3  ;;  %v12061_v3 = vld [vmem:[#allocation2 + $0x498] sm:$0xff] }
0x25ec   : > { %v13812_v47 = vadd.f32 %v6878_v48, %v6654_v39  ;;  %v6885_v34 = vpop.f32.mrf.mxu2 }
0x25ee   : > { %v6035_v55 = vpop.f32.mrf.mxu0 }
0x25ef   : > { %v6312_v16 = vpop.f32.mrf.mxu3  ;;  %v6088_v7 = vadd.f32 %v6035_v55, %v13666_v2 }
0x25f0   : > { %v6370_v0 = vadd.f32 %v6312_v16, %v6085_v31 }
0x25f1   : > { %11298 = vmatmul.msk.bf16.gmra.mxu0 %vm2091_vm15, %v12059_v44  ;;  %11538 = vmatmul.msk.bf16.gmra.mxu2 %vm2091_vm15, %v12107_v20 }
0x25f2   : > { %v6655_v28 = vadd.f32 %v6597_v25, %v6370_v0  ;;  %v6612_v25 = vpop.f32.mrf.mxu1 }
0x25f4   : > { %v13817_v35 = vadd.f32 %v6880_v46, %v6655_v28  ;;  %11377 = vmatmul.msk.bf16.vlgmr.msra.gmra.mxu3 %vm2091_vm15, %v12074_v17  ;;  %v6888_v18 = vpop.f32.mrf.mxu2 }
0x25f6   : > { %v6037_v58 = vpop.f32.mrf.mxu0 }
0x25f7   : > { %v6315_v48 = vpop.f32.mrf.mxu3  ;;  %v6089_v15 = vadd.f32 %v6037_v58, %v13671_v22  ;;  %v12093_v22 = vld [vmem:[#allocation2 + $0x598] sm:$0xff]  ;;  %v12076_v58 = vld [vmem:[#allocation2 + $0x510] sm:$0xff] }
0x25f8   : > { %v6371_v31 = vadd.f32 %v6315_v48, %v6086_v33  ;;  %v12109_v48 = vld [vmem:[#allocation2 + $0x618] sm:$0xff] }
0x25fa   : > { %v6656_v2 = vadd.f32 %v6600_v40, %v6371_v31  ;;  %v6615_v44 = vpop.f32.mrf.mxu1 }
0x25fb   : > { %11460 = vmatmul.msk.bf16.gmra.mxu1 %vm2091_vm15, %v12093_v22  ;;  %v12062_v22 = vld [vmem:[#allocation2 + $0x4a0] sm:$0xff] }
0x25fc   : > { %v13822_v14 = vadd.f32 %v6883_v42, %v6656_v2  ;;  %v6890_v57 = vpop.f32.mrf.mxu2 }
0x25fe   : > { %v6040_v6 = vpop.f32.mrf.mxu0 }
0x25ff   : > { %v6317_v60 = vpop.f32.mrf.mxu3  ;;  %v6090_v39 = vadd.f32 %v6040_v6, %v13676_v51 }
0x2600   : > { %v6372_v46 = vadd.f32 %v6317_v60, %v6087_v29 }
0x2601   : > { %11299 = vmatmul.msk.bf16.gmra.mxu0 %vm2091_vm15, %v12060_v13  ;;  %11539 = vmatmul.msk.bf16.gmra.mxu2 %vm2091_vm15, %v12108_v5 }
0x2602   : > { %v6657_v16 = vadd.f32 %v6602_v12, %v6372_v46  ;;  %v6617_v12 = vpop.f32.mrf.mxu1 }
0x2604   : > { %v13827_v40 = vadd.f32 %v6885_v34, %v6657_v16  ;;  %11378 = vmatmul.msk.bf16.gmra.mxu3 %vm2091_vm15, %v12075_v10  ;;  %v6893_v33 = vpop.f32.mrf.mxu2 }
0x2606   : > { %v6042_v20 = vpop.f32.mrf.mxu0 }
0x2607   : > { %v6320_v42 = vpop.f32.mrf.mxu3  ;;  %v6091_v0 = vadd.f32 %v6042_v20, %v13681_v61  ;;  %v12094_v61 = vld [vmem:[#allocation2 + $0x5a0] sm:$0xff]  ;;  %v12077_v20 = vld [vmem:[#allocation2 + $0x518] sm:$0xff] }
0x2608   : > { %v6373_v29 = vadd.f32 %v6320_v42, %v6088_v7  ;;  %v12110_v42 = vld [vmem:[#allocation2 + $0x620] sm:$0xff] }
0x260a   : > { %v6658_v51 = vadd.f32 %v6605_v23, %v6373_v29  ;;  %v6620_v13 = vpop.f32.mrf.mxu1 }
0x260b   : > { %11461 = vmatmul.msk.bf16.gmra.mxu1 %vm2091_vm15, %v12094_v61  ;;  %v12063_v61 = vld [vmem:[#allocation2 + $0x4a8] sm:$0xff] }
0x260c   : > { %v13832_v55 = vadd.f32 %v6888_v18, %v6658_v51  ;;  %v6895_v17 = vpop.f32.mrf.mxu2 }
0x260e   : > { %v6045_v31 = vpop.f32.mrf.mxu0 }
0x260f   : > { %v6322_v28 = vpop.f32.mrf.mxu3  ;;  %v6092_v2 = vadd.f32 %v6045_v31, %v13686_v50 }
0x2610   : > { %v6374_v34 = vadd.f32 %v6322_v28, %v6089_v15 }
0x2611   : > { %11300 = vmatmul.msk.bf16.gmra.mxu0 %vm2091_vm15, %v12061_v3  ;;  %11540 = vmatmul.msk.bf16.gmra.mxu2 %vm2091_vm15, %v12109_v48 }
0x2612   : > { %v6659_v60 = vadd.f32 %v6607_v9, %v6374_v34  ;;  %v6622_v9 = vpop.f32.mrf.mxu1 }
0x2614   : > { %v13837_v23 = vadd.f32 %v6890_v57, %v6659_v60  ;;  %11379 = vmatmul.msk.bf16.gmra.mxu3 %vm2091_vm15, %v12076_v58  ;;  %v6898_v7 = vpop.f32.mrf.mxu2 }
0x2616   : > { %v6047_v5 = vpop.f32.mrf.mxu0 }
0x2617   : > { %v6325_v18 = vpop.f32.mrf.mxu3  ;;  %v6093_v46 = vadd.f32 %v6047_v5, %v13691_v26  ;;  %v12095_v26 = vld [vmem:[#allocation2 + $0x5a8] sm:$0xff]  ;;  %v12078_v5 = vld [vmem:[#allocation2 + $0x520] sm:$0xff] }
0x2618   : > { %v6375_v15 = vadd.f32 %v6325_v18, %v6090_v39  ;;  %v12111_v18 = vld [vmem:[#allocation2 + $0x628] sm:$0xff] }
0x261a   : > { %v6660_v50 = vadd.f32 %v6610_v24, %v6375_v15  ;;  %v6625_v3 = vpop.f32.mrf.mxu1 }
0x261b   : > { %11462 = vmatmul.msk.bf16.gmra.mxu1 %vm2091_vm15, %v12095_v26  ;;  %v12064_v26 = vld [vmem:[#allocation2 + $0x4b0] sm:$0xff] }
0x261c   : > { %v13842_v6 = vadd.f32 %v6893_v33, %v6660_v50  ;;  %v6900_v10 = vpop.f32.mrf.mxu2 }
0x261e   : > { %v6050_v29 = vpop.f32.mrf.mxu0 }
0x261f   : > { %v6327_v16 = vpop.f32.mrf.mxu3  ;;  %v6094_v51 = vadd.f32 %v6050_v29, %v13696_v53 }
0x2620   : > { %v6376_v57 = vadd.f32 %v6327_v16, %v6091_v0 }
0x2621   : > { %11301 = vmatmul.msk.bf16.gmra.mxu0 %vm2091_vm15, %v12062_v22  ;;  %11541 = vmatmul.msk.bf16.gmra.mxu2 %vm2091_vm15, %v12110_v42 }
0x2622   : > { %v6661_v28 = vadd.f32 %v6612_v25, %v6376_v57  ;;  %v6627_v25 = vpop.f32.mrf.mxu1 }
0x2624   : > { %v13847_v24 = vadd.f32 %v6895_v17, %v6661_v28  ;;  %11380 = vmatmul.msk.bf16.gmra.mxu3 %vm2091_vm15, %v12077_v20  ;;  %v6903_v39 = vpop.f32.mrf.mxu2 }
0x2626   : > { %v6052_v48 = vpop.f32.mrf.mxu0 }
0x2627   : > { %v6330_v33 = vpop.f32.mrf.mxu3  ;;  %v6095_v34 = vadd.f32 %v6052_v48, %v13701_v1  ;;  %v12096_v1 = vld [vmem:[#allocation2 + $0x5b0] sm:$0xff]  ;;  %v12079_v48 = vld [vmem:[#allocation2 + $0x528] sm:$0xff] }
0x2628   : > { %v6377_v0 = vadd.f32 %v6330_v33, %v6092_v2  ;;  %v12112_v33 = vld [vmem:[#allocation2 + $0x630] sm:$0xff] }
0x262a   : > { %v6662_v53 = vadd.f32 %v6615_v44, %v6377_v0  ;;  %v6630_v22 = vpop.f32.mrf.mxu1 }
0x262b   : > { %11463 = vmatmul.msk.bf16.gmra.mxu1 %vm2091_vm15, %v12096_v1  ;;  %v12065_v1 = vld [vmem:[#allocation2 + $0x4b8] sm:$0xff] }
0x262c   : > { %v13852_v31 = vadd.f32 %v6898_v7, %v6662_v53  ;;  %v6905_v58 = vpop.f32.mrf.mxu2 }
0x262e   : > { %v6055_v15 = vpop.f32.mrf.mxu0 }
0x262f   : > { %v6332_v60 = vpop.f32.mrf.mxu3  ;;  %v6096_v50 = vadd.f32 %v6055_v15, %v13706_v63 }
0x2630   : > { %v6378_v17 = vadd.f32 %v6332_v60, %v6093_v46 }
0x2631   : > { %11302 = vmatmul.msk.bf16.gmra.mxu0 %vm2091_vm15, %v12063_v61  ;;  %11542 = vmatmul.msk.bf16.gmra.mxu2 %vm2091_vm15, %v12111_v18 }
0x2632   : > { %v6663_v16 = vadd.f32 %v6617_v12, %v6378_v17  ;;  %v6632_v12 = vpop.f32.mrf.mxu1 }
0x2634   : > { %v13857_v44 = vadd.f32 %v6900_v10, %v6663_v16  ;;  %11381 = vmatmul.msk.bf16.gmra.mxu3 %vm2091_vm15, %v12078_v5  ;;  %v6908_v2 = vpop.f32.mrf.mxu2 }
0x2636   : > { %v6057_v42 = vpop.f32.mrf.mxu0 }
0x2637   : > { %v6335_v7 = vpop.f32.mrf.mxu3  ;;  %v6097_v57 = vadd.f32 %v6057_v42, %v13713_v45  ;;  %v12097_v45 = vld [vmem:[#allocation2 + $0x5b8] sm:$0xff]  ;;  %v12080_v42 = vld [vmem:[#allocation2 + $0x530] sm:$0xff] }
0x2638   : > { %v6379_v46 = vadd.f32 %v6335_v7, %v6094_v51  ;;  %v12113_v7 = vld [vmem:[#allocation2 + $0x638] sm:$0xff] }
0x263a   : > { %v6664_v63 = vadd.f32 %v6620_v13, %v6379_v46  ;;  %v6635_v61 = vpop.f32.mrf.mxu1 }
0x263b   : > { %11464 = vmatmul.msk.bf16.gmra.mxu1 %vm2091_vm15, %v12097_v45  ;;  %v12114_v45 = vld [vmem:[#allocation2 + $0x640] sm:$0xff] }
0x263c   : > { %v13862_v29 = vadd.f32 %v6903_v39, %v6664_v63  ;;  %v6910_v20 = vpop.f32.mrf.mxu2 }
0x263e   : > { %v6060_v0 = vpop.f32.mrf.mxu0 }
0x263f   : > { %v6337_v28 = vpop.f32.mrf.mxu3  ;;  %v6098_v53 = vadd.f32 %v6060_v0, %v13718_v11 }
0x2640   : > { %v6380_v10 = vadd.f32 %v6337_v28, %v6095_v34 }
0x2641   : > { %11303 = vmatmul.msk.bf16.gmra.mxu0 %vm2091_vm15, %v12064_v26  ;;  %11543 = vmatmul.msk.bf16.gmra.mxu2 %vm2091_vm15, %v12112_v33 }
0x2642   : > { %v6665_v60 = vadd.f32 %v6622_v9, %v6380_v10  ;;  %v6637_v9 = vpop.f32.mrf.mxu1 }
0x2644   : > { %v13867_v13 = vadd.f32 %v6905_v58, %v6665_v60  ;;  %11382 = vmatmul.msk.bf16.gmra.mxu3 %vm2091_vm15, %v12079_v48  ;;  %v6913_v51 = vpop.f32.mrf.mxu2  ;;  %v12066_v60 = vld [vmem:[#allocation2 + $0x4c0] sm:$0xff] }
0x2646   : > { %v6062_v18 = vpop.f32.mrf.mxu0 }
0x2647   : > { %v6340_v39 = vpop.f32.mrf.mxu3  ;;  %v6099_v17 = vadd.f32 %v6062_v18, %v13724_v36  ;;  %v12098_v36 = vld [vmem:[#allocation2 + $0x5c0] sm:$0xff] }
0x2648   : > { %v6381_v34 = vadd.f32 %v6340_v39, %v6096_v50 }
0x264a   : > { %v6666_v11 = vadd.f32 %v6625_v3, %v6381_v34  ;;  %v7699_v26 = vpop.f32.mrf.mxu1  ;;  %v12081_v34 = vld [vmem:[#allocation2 + $0x538] sm:$0xff] }
0x264b   : > { %11465 = vmatmul.msk.bf16.gmra.mxu1 %vm2091_vm15, %v12098_v36  ;;  %v12115_v36 = vld [vmem:[#allocation2 + $0x648] sm:$0xff] }
0x264c   : > { %v13872_v15 = vadd.f32 %v6908_v2, %v6666_v11  ;;  %v6915_v5 = vpop.f32.mrf.mxu2 }
0x264e   : > { %v6065_v46 = vpop.f32.mrf.mxu0 }
0x264f   : > { %v6342_v16 = vpop.f32.mrf.mxu3  ;;  %v6100_v63 = vadd.f32 %v6065_v46, %v13730_v30 }
0x2650   : > { %v6382_v58 = vadd.f32 %v6342_v16, %v6097_v57 }
0x2651   : > { %11304 = vmatmul.msk.bf16.gmra.mxu0 %vm2091_vm15, %v12065_v1  ;;  %11544 = vmatmul.msk.bf16.gmra.mxu2 %vm2091_vm15, %v12113_v7 }
0x2652   : > { %v6667_v28 = vadd.f32 %v6627_v25, %v6382_v58  ;;  %v7701_v25 = vpop.f32.mrf.mxu1 }
0x2654   : > { %v13877_v3 = vadd.f32 %v6910_v20, %v6667_v28  ;;  %11383 = vmatmul.msk.bf16.gmra.mxu3 %vm2091_vm15, %v12080_v42  ;;  %v6918_v2 = vpop.f32.mrf.mxu2  ;;  %v12067_v28 = vld [vmem:[#allocation2 + $0x4c8] sm:$0xff] }
0x2656   : > { %v6067_v33 = vpop.f32.mrf.mxu0 }
0x2657   : > { %v6345_v50 = vpop.f32.mrf.mxu3  ;;  %v6101_v10 = vadd.f32 %v6067_v33, %v13736_v54  ;;  %v12099_v54 = vld [vmem:[#allocation2 + $0x5c8] sm:$0xff] }
0x2658   : > { %v6383_v57 = vadd.f32 %v6345_v50, %v6098_v53 }
0x265a   : > { %v6668_v30 = vadd.f32 %v6630_v22, %v6383_v57  ;;  %v7704_v1 = vpop.f32.mrf.mxu1  ;;  %v12082_v57 = vld [vmem:[#allocation2 + $0x540] sm:$0xff] }
0x265b   : > { %11466 = vmatmul.msk.bf16.gmra.mxu1 %vm2091_vm15, %v12099_v54  ;;  %v12116_v54 = vld [vmem:[#allocation2 + $0x650] sm:$0xff] }
0x265c   : > { %v13882_v0 = vadd.f32 %v6913_v51, %v6668_v30  ;;  %v6920_v11 = vpop.f32.mrf.mxu2 }
0x265e   : > { %v7129_v20 = vpop.f32.mrf.mxu0 }
0x265f   : > { %v6347_v48 = vpop.f32.mrf.mxu3  ;;  %v7209_v18 = vadd.f32 %v7129_v20, %v13742_v38 }
0x2660   : > { %v6384_v39 = vadd.f32 %v6347_v48, %v6099_v17 }
0x2661   : > { %11305 = vmatmul.msk.bf16.gmra.mxu0 %vm2091_vm15, %v12066_v60  ;;  %11545 = vmatmul.msk.bf16.gmra.mxu2 %vm2091_vm15, %v12114_v45 }
0x2662   : > { %v6669_v16 = vadd.f32 %v6632_v12, %v6384_v39  ;;  %v7706_v58 = vpop.f32.mrf.mxu1 }
0x2664   : > { %v13887_v22 = vadd.f32 %v6915_v5, %v6669_v16  ;;  %11384 = vmatmul.msk.bf16.gmra.mxu3 %vm2091_vm15, %v12081_v34  ;;  %v7982_v12 = vpop.f32.mrf.mxu2  ;;  %v12068_v34 = vld [vmem:[#allocation2 + $0x4d0] sm:$0xff] }
0x2666   : > { %v7131_v17 = vpop.f32.mrf.mxu0 }
0x2667   : > { %v6350_v53 = vpop.f32.mrf.mxu3  ;;  %v7210_v7 = vadd.f32 %v7131_v17, %v13747_v41  ;;  %v12100_v41 = vld [vmem:[#allocation2 + $0x5d0] sm:$0xff] }
0x2668   : > { %v6385_v51 = vadd.f32 %v6350_v53, %v6100_v63 }
0x266a   : > { %v6670_v38 = vadd.f32 %v6635_v61, %v6385_v51  ;;  %v7709_v48 = vpop.f32.mrf.mxu1  ;;  %v12083_v51 = vld [vmem:[#allocation2 + $0x548] sm:$0xff] }
0x266b   : > { %11467 = vmatmul.msk.bf16.gmra.mxu1 %vm2091_vm15, %v12100_v41 }
0x266c   : > { %v13892_v46 = vadd.f32 %v6918_v2, %v6670_v38  ;;  %v7984_v63 = vpop.f32.mrf.mxu2 }
0x266e   : > { %v7134_v5 = vpop.f32.mrf.mxu0 }
0x266f   : > { %v6352_v42 = vpop.f32.mrf.mxu3  ;;  %v7211_v33 = vadd.f32 %v7134_v5, %v13752_v27 }
0x2670   : > { %v6386_v50 = vadd.f32 %v6352_v42, %v6101_v10 }
0x2671   : > { %11306 = vmatmul.msk.bf16.gmra.mxu0 %vm2091_vm15, %v12067_v28  ;;  %11546 = vmatmul.msk.bf16.gmra.mxu2 %vm2091_vm15, %v12115_v36 }
0x2672   : > { %v6671_v30 = vadd.f32 %v6637_v9, %v6386_v50  ;;  %v7711_v9 = vpop.f32.mrf.mxu1 }
0x2674   : > { %v13897_v61 = vadd.f32 %v6920_v11, %v6671_v30  ;;  %11385 = vmatmul.msk.bf16.gmra.mxu3 %vm2091_vm15, %v12082_v57  ;;  %v7987_v16 = vpop.f32.mrf.mxu2  ;;  %v12069_v57 = vld [vmem:[#allocation2 + $0x4d8] sm:$0xff] }
0x2675   : > { %v12117_v30 = vld [vmem:[#allocation2 + $0x658] sm:$0xff] }
0x2676   : > { %v7136_v60 = vpop.f32.mrf.mxu0 }
0x2677   : > { %v7414_v2 = vpop.f32.mrf.mxu3  ;;  %v7212_v45 = vadd.f32 %v7136_v60, %v13757_v62  ;;  %v12101_v62 = vld [vmem:[#allocation2 + $0x5d8] sm:$0xff] }
0x2678   : > { %v7494_v10 = vadd.f32 %v7414_v2, %v7209_v18  ;;  %v12084_v2 = vld [vmem:[#allocation2 + $0x550] sm:$0xff] }
0x267a   : > { %v7779_v27 = vadd.f32 %v7699_v26, %v7494_v10  ;;  %v7714_v42 = vpop.f32.mrf.mxu1 }
0x267b   : > { %11468 = vmatmul.msk.bf16.gmra.mxu1 %vm2091_vm15, %v12101_v62 }
0x267c   : > { %v13902_v39 = vadd.f32 %v7982_v12, %v7779_v27  ;;  %v7989_v36 = vpop.f32.mrf.mxu2 }
0x267e   : > { %v7139_v53 = vpop.f32.mrf.mxu0 }
0x267f   : > { %v7416_v20 = vpop.f32.mrf.mxu3  ;;  %v7213_v17 = vadd.f32 %v7139_v53, %v13762_v8 }
0x2680   : > { %v7495_v11 = vadd.f32 %v7416_v20, %v7210_v7 }
0x2681   : > { %11307 = vmatmul.msk.bf16.gmra.mxu0 %vm2091_vm15, %v12068_v34  ;;  %11547 = vmatmul.msk.bf16.gmra.mxu2 %vm2091_vm15, %v12116_v54 }
0x2682   : > { %v7780_v38 = vadd.f32 %v7701_v25, %v7495_v11  ;;  %v7716_v25 = vpop.f32.mrf.mxu1 }
0x2684   : > { %v13907_v26 = vadd.f32 %v7984_v63, %v7780_v38  ;;  %11386 = vmatmul.msk.bf16.gmra.mxu3 %vm2091_vm15, %v12083_v51  ;;  %v12070_v51 = vld [vmem:[#allocation2 + $0x4e0] sm:$0xff] }
0x2685   : > { %v12118_v38 = vld [vmem:[#allocation2 + $0x660] sm:$0xff] }
0x2686   : > { %v7141_v7 = vpop.f32.mrf.mxu0 }
0x2687   : > { %v7419_v18 = vpop.f32.mrf.mxu3  ;;  %v7214_v28 = vadd.f32 %v7141_v7, %v13767_v52  ;;  %v12102_v52 = vld [vmem:[#allocation2 + $0x5e0] sm:$0xff] }
0x2688   : > { %v7496_v12 = vadd.f32 %v7419_v18, %v7211_v33  ;;  %v7992_v33 = vpop.f32.mrf.mxu2 }
0x268a   : > { %v7781_v8 = vadd.f32 %v7704_v1, %v7496_v12  ;;  %v7719_v27 = vpop.f32.mrf.mxu1  ;;  %v12085_v12 = vld [vmem:[#allocation2 + $0x558] sm:$0xff] }
0x268b   : > { %11469 = vmatmul.msk.bf16.gmra.mxu1 %vm2091_vm15, %v12102_v52 }
0x268c   : > { %v13912_v50 = vadd.f32 %v7987_v16, %v7781_v8 }
0x268e   : > { %v7144_v63 = vpop.f32.mrf.mxu0 }
0x268f   : > { %v7421_v5 = vpop.f32.mrf.mxu3  ;;  %v7215_v10 = vadd.f32 %v7144_v63, %v13772_v49 }
0x2690   : > { %v7497_v41 = vadd.f32 %v7421_v5, %v7212_v45  ;;  %v7994_v11 = vpop.f32.mrf.mxu2 }
0x2691   : > { %11308 = vmatmul.msk.bf16.gmra.mxu0 %vm2091_vm15, %v12069_v57  ;;  %11548 = vmatmul.msk.bf16.gmra.mxu2 %vm2091_vm15, %v12117_v30 }
0x2692   : > { %v7782_v60 = vadd.f32 %v7706_v58, %v7497_v41  ;;  %v7721_v58 = vpop.f32.mrf.mxu1 }
0x2694   : > { %v13917_v1 = vadd.f32 %v7989_v36, %v7782_v60  ;;  %11387 = vmatmul.msk.bf16.gmra.mxu3 %vm2091_vm15, %v12084_v2  ;;  %v12071_v2 = vld [vmem:[#allocation2 + $0x4e8] sm:$0xff] }
0x2695   : > { %v12119_v60 = vld [vmem:[#allocation2 + $0x668] sm:$0xff] }
0x2696   : > { %v7146_v34 = vpop.f32.mrf.mxu0 }
0x2697   : > { %v7424_v20 = vpop.f32.mrf.mxu3  ;;  %v7216_v16 = vadd.f32 %v7146_v34, %v13777_v43  ;;  %v12103_v43 = vld [vmem:[#allocation2 + $0x5e8] sm:$0xff] }
0x2698   : > { %v7498_v45 = vadd.f32 %v7424_v20, %v7213_v17  ;;  %v7997_v5 = vpop.f32.mrf.mxu2  ;;  %v12086_v20 = vld [vmem:[#allocation2 + $0x560] sm:$0xff] }
0x269a   : > { %v7783_v49 = vadd.f32 %v7709_v48, %v7498_v45  ;;  %v7724_v8 = vpop.f32.mrf.mxu1 }
0x269b   : > { %11470 = vmatmul.msk.bf16.gmra.mxu1 %vm2091_vm15, %v12103_v43  ;;  %v12087_v43 = vld [vmem:[#allocation2 + $0x568] sm:$0xff] }
0x269c   : > { %v13922_v54 = vadd.f32 %v7992_v33, %v7783_v49 }
0x269e   : > { %v7149_v18 = vpop.f32.mrf.mxu0 }
0x269f   : > { %v7426_v53 = vpop.f32.mrf.mxu3  ;;  %v7217_v7 = vadd.f32 %v7149_v18, %v13782_v37  ;;  %v12120_v18 = vld [vmem:[#allocation2 + $0x670] sm:$0xff] }
0x26a0   : > { %v7499_v62 = vadd.f32 %v7426_v53, %v7214_v28  ;;  %v7999_v34 = vpop.f32.mrf.mxu2 }
0x26a1   : > { %11309 = vmatmul.msk.bf16.gmra.mxu0 %vm2091_vm15, %v12070_v51  ;;  %11549 = vmatmul.msk.bf16.gmra.mxu2 %vm2091_vm15, %v12118_v38 }
0x26a2   : > { %v7784_v36 = vadd.f32 %v7711_v9, %v7499_v62  ;;  %v7726_v9 = vpop.f32.mrf.mxu1  ;;  %v12072_v62 = vld [vmem:[#allocation2 + $0x4f0] sm:$0xff] }
0x26a4   : > { %v13927_v48 = vadd.f32 %v7994_v11, %v7784_v36  ;;  %11388 = vmatmul.msk.bf16.gmra.mxu3 %vm2091_vm15, %v12085_v12 }
0x26a6   : > { %v7151_v57 = vpop.f32.mrf.mxu0 }
0x26a7   : > { %v7429_v17 = vpop.f32.mrf.mxu3  ;;  %v7218_v30 = vadd.f32 %v7151_v57, %v13787_v56  ;;  %v12104_v56 = vld [vmem:[#allocation2 + $0x5f0] sm:$0xff] }
0x26a8   : > { %v7500_v28 = vadd.f32 %v7429_v17, %v7215_v10 }
0x26aa   : > { %v7785_v37 = vadd.f32 %v7714_v42, %v7500_v28  ;;  %v7729_v11 = vpop.f32.mrf.mxu1 }
0x26ab   : > { %11471 = vmatmul.msk.bf16.gmra.mxu1 %vm2091_vm15, %v12104_v56 }
0x26ac   : > { %v13932_v41 = vadd.f32 %v7997_v5, %v7785_v37 }
0x26ae   : > { %v7154_v52 = vpop.f32.mrf.mxu0 }
0x26af   : > { %v7431_v63 = vpop.f32.mrf.mxu3  ;;  %v7219_v45 = vadd.f32 %v7154_v52, %v13792_v21  ;;  %v12088_v52 = vld [vmem:[#allocation2 + $0x570] sm:$0xff] }
0x26b0   : > { %v7501_v33 = vadd.f32 %v7431_v63, %v7216_v16  ;;  %v12073_v63 = vld [vmem:[#allocation2 + $0x4f8] sm:$0xff] }
0x26b1   : > { %11310 = vmatmul.msk.bf16.gmra.mxu0 %vm2091_vm15, %v12071_v2  ;;  %11550 = vmatmul.msk.bf16.gmra.mxu2 %vm2091_vm15, %v12119_v60  ;;  %v12121_v2 = vld [vmem:[#allocation2 + $0x678] sm:$0xff] }
0x26b2   : > { %v7786_v49 = vadd.f32 %v7716_v25, %v7501_v33  ;;  %v7731_v25 = vpop.f32.mrf.mxu1 }
0x26b4   : > { %v13937_v42 = vadd.f32 %v7999_v34, %v7786_v49  ;;  %11389 = vmatmul.msk.bf16.gmra.mxu3 %vm2091_vm15, %v12086_v20 }
0x26b6   : > { %v7156_v53 = vpop.f32.mrf.mxu0 }
0x26b7   : > { %v7434_v10 = vpop.f32.mrf.mxu3  ;;  %v7220_v51 = vadd.f32 %v7156_v53, %v13797_v4  ;;  %v12122_v53 = vld [vmem:[#allocation2 + $0x680] sm:$0xff] }
0x26b8   : > { %v7502_v16 = vadd.f32 %v7434_v10, %v7217_v7  ;;  %v12105_v7 = vld [vmem:[#allocation2 + $0x5f8] sm:$0xff] }
0x26ba   : > { %v13942_v21 = vadd.f32 %v7719_v27, %v7502_v16  ;;  %v7734_v28 = vpop.f32.mrf.mxu1 }
0x26bb   : > { %11472 = vmatmul.msk.bf16.gmra.mxu1 %vm2091_vm15, %v12105_v7 }
0x26be   : > { %v7159_v36 = vpop.f32.mrf.mxu0 }
0x26bf   : > { %v7436_v38 = vpop.f32.mrf.mxu3  ;;  %v7221_v17 = vadd.f32 %v7159_v36, %v13802_v32 }
0x26c0   : > { %v7503_v12 = vadd.f32 %v7436_v38, %v7218_v30 }
0x26c1   : > { %11311 = vmatmul.msk.bf16.gmra.mxu0 %vm2091_vm15, %v12072_v62  ;;  %11551 = vmatmul.msk.bf16.gmra.mxu2 %vm2091_vm15, %v12120_v18  ;;  %v12089_v62 = vld [vmem:[#allocation2 + $0x578] sm:$0xff] }
0x26c2   : > { %v13945_v5 = vadd.f32 %v7721_v58, %v7503_v12  ;;  %v7736_v32 = vpop.f32.mrf.mxu1 }
0x26c4   : > { %11390 = vmatmul.msk.bf16.gmra.mxu3 %vm2091_vm15, %v12087_v43 }
0x26c6   : > { %v7161_v57 = vpop.f32.mrf.mxu0 }
0x26c7   : > { %v7439_v4 = vpop.f32.mrf.mxu3  ;;  %v7222_v30 = vadd.f32 %v7161_v57, %v13807_v59 }
0x26c8   : > { %v7504_v27 = vadd.f32 %v7439_v4, %v7219_v45  ;;  %v12154_v45 = vld [vmem:[#allocation2 + $0x780] sm:$0xff]  ;;  %v12155_v4 = vld [vmem:[#allocation2 + $0x788] sm:$0xff] }
0x26ca   : > { %v13952_v37 = vadd.f32 %v7724_v8, %v7504_v27  ;;  %v7739_v49 = vpop.f32.mrf.mxu1 }
0x26cb   : > { %11777 = vmatmul.msk.bf16.vlgmr.msra.gmra.mxu1 %vm2091_vm15, %v12154_v45  ;;  %v12156_v45 = vld [vmem:[#allocation2 + $0x790] sm:$0xff] }
0x26ce   : > { %v7164_v33 = vpop.f32.mrf.mxu0 }
0x26cf   : > { %v7441_v58 = vpop.f32.mrf.mxu3  ;;  %v7223_v20 = vadd.f32 %v7164_v33, %v13812_v47 }
0x26d0   : > { %v7505_v60 = vadd.f32 %v7441_v58, %v7220_v51  ;;  %v12138_v58 = vld [vmem:[#allocation2 + $0x700] sm:$0xff] }
0x26d1   : > { %11312 = vmatmul.msk.bf16.gmra.mxu0 %vm2091_vm15, %v12073_v63  ;;  %11552 = vmatmul.msk.bf16.gmra.mxu2 %vm2091_vm15, %v12121_v2 }
0x26d2   : > { %v13955_v34 = vadd.f32 %v7726_v9, %v7505_v60  ;;  %v7741_v47 = vpop.f32.mrf.mxu1 }
0x26d4   : > { %11391 = vmatmul.msk.bf16.gmra.mxu3 %vm2091_vm15, %v12088_v52 }
0x26d6   : > { %v7166_v56 = vpop.f32.mrf.mxu0 }
0x26d7   : > { %v7444_v59 = vpop.f32.mrf.mxu3  ;;  %v7224_v10 = vadd.f32 %v7166_v56, %v13817_v35 }
0x26d8   : > { %v7506_v8 = vadd.f32 %v7444_v59, %v7221_v17 }
0x26da   : > { %v13962_v16 = vadd.f32 %v7729_v11, %v7506_v8  ;;  %v7744_v36 = vpop.f32.mrf.mxu1  ;;  %v12124_v8 = vld [vmem:[#allocation2 + $0x690] sm:$0xff] }
0x26db   : > { %11778 = vmatmul.msk.bf16.gmra.mxu1 %vm2091_vm15, %v12155_v4 }
0x26de   : > { %v7169_v38 = vpop.f32.mrf.mxu0 }
0x26df   : > { %v7446_v9 = vpop.f32.mrf.mxu3  ;;  %v7225_v18 = vadd.f32 %v7169_v38, %v13822_v14  ;;  %v12123_v14 = vld [vmem:[#allocation2 + $0x688] sm:$0xff] }
0x26e0   : > { %v7507_v51 = vadd.f32 %v7446_v9, %v7222_v30 }
0x26e1   : > { %11617 = vmatmul.msk.bf16.vlgmr.msrb.gmra.mxu0 %vm2091_vm15, %v12122_v53 }
0x26e2   : > { %v13965_v12 = vadd.f32 %v7731_v25, %v7507_v51  ;;  %v7746_v27 = vpop.f32.mrf.mxu1 }
0x26e4   : > { %11392 = vmatmul.msk.bf16.gmra.mxu3 %vm2091_vm15, %v12089_v62 }
0x26e6   : > { %v7171_v35 = vpop.f32.mrf.mxu0 }
0x26e7   : > { %v7449_v43 = vpop.f32.mrf.mxu3  ;;  %v7226_v11 = vadd.f32 %v7171_v35, %v13827_v40  ;;  %v12125_v35 = vld [vmem:[#allocation2 + $0x698] sm:$0xff] }
0x26e8   : > { %v7508_v17 = vadd.f32 %v7449_v43, %v7223_v20  ;;  %v12157_v43 = vld [vmem:[#allocation2 + $0x798] sm:$0xff] }
0x26ea   : > { %v13970_v7 = vadd.f32 %v7734_v28, %v7508_v17  ;;  %v7749_v40 = vpop.f32.mrf.mxu1 }
0x26eb   : > { %11779 = vmatmul.msk.bf16.gmra.mxu1 %vm2091_vm15, %v12156_v45 }
0x26ee   : > { %v7174_v30 = vpop.f32.mrf.mxu0 }
0x26ef   : > { %v7451_v57 = vpop.f32.mrf.mxu3  ;;  %v7227_v63 = vadd.f32 %v7174_v30, %v13832_v55 }
0x26f0   : > { %v7509_v25 = vadd.f32 %v7451_v57, %v7224_v10  ;;  %v12139_v10 = vld [vmem:[#allocation2 + $0x708] sm:$0xff] }
0x26f1   : > { %11618 = vmatmul.msk.bf16.gmra.mxu0 %vm2091_vm15, %v12123_v14 }
0x26f2   : > { %v13974_v2 = vadd.f32 %v7736_v32, %v7509_v25  ;;  %v7751_v55 = vpop.f32.mrf.mxu1 }
0x26f4   : > { %11697 = vmatmul.msk.bf16.vlgmr.msrb.gmra.mxu3 %vm2091_vm15, %v12138_v58 }
0x26f6   : > { %v7176_v33 = vpop.f32.mrf.mxu0 }
0x26f7   : > { %v7454_v28 = vpop.f32.mrf.mxu3  ;;  %v7228_v52 = vadd.f32 %v7176_v33, %v13837_v23 }
0x26f8   : > { %v7510_v60 = vadd.f32 %v7454_v28, %v7225_v18 }
0x26fa   : > { %v13979_v20 = vadd.f32 %v7739_v49, %v7510_v60  ;;  %v7754_v62 = vpop.f32.mrf.mxu1 }
0x26fb   : > { %11780 = vmatmul.msk.bf16.gmra.mxu1 %vm2091_vm15, %v12157_v43 }
0x26fe   : > { %v7179_v56 = vpop.f32.mrf.mxu0 }
0x26ff   : > { %v7456_v59 = vpop.f32.mrf.mxu3  ;;  %v7229_v9 = vadd.f32 %v7179_v56, %v13842_v6 }
0x2700   : > { %v7511_v32 = vadd.f32 %v7456_v59, %v7226_v11  ;;  %v12140_v11 = vld [vmem:[#allocation2 + $0x710] sm:$0xff] }
0x2701   : > { %11619 = vmatmul.msk.bf16.gmra.mxu0 %vm2091_vm15, %v12124_v8 }
0x2702   : > { %v13983_v53 = vadd.f32 %v7741_v47, %v7511_v32  ;;  %v7756_v14 = vpop.f32.mrf.mxu1 }
0x2704   : > { %11698 = vmatmul.msk.bf16.gmra.mxu3 %vm2091_vm15, %v12139_v10 }
0x2706   : > { %v7181_v51 = vpop.f32.mrf.mxu0 }
0x2707   : > { %v7459_v23 = vpop.f32.mrf.mxu3  ;;  %v7230_v38 = vadd.f32 %v7181_v51, %v13847_v24  ;;  %v12142_v51 = vld [vmem:[#allocation2 + $0x720] sm:$0xff] }
0x2708   : > { %v7512_v49 = vadd.f32 %v7459_v23, %v7227_v63  ;;  %v12158_v63 = vld [vmem:[#allocation2 + $0x7a0] sm:$0xff] }
0x270a   : > { %v13988_v18 = vadd.f32 %v7744_v36, %v7512_v49  ;;  %v7759_v28 = vpop.f32.mrf.mxu1  ;;  %v12127_v49 = vld [vmem:[#allocation2 + $0x6a8] sm:$0xff] }
0x270b   : > { %11781 = vmatmul.msk.bf16.gmra.mxu1 %vm2091_vm15, %v12158_v63 }
0x270e   : > { %v7184_v47 = vpop.f32.mrf.mxu0 }
0x270f   : > { %v7461_v17 = vpop.f32.mrf.mxu3  ;;  %v7231_v4 = vadd.f32 %v7184_v47, %v13852_v31  ;;  %v12126_v31 = vld [vmem:[#allocation2 + $0x6a0] sm:$0xff] }
0x2710   : > { %v7513_v6 = vadd.f32 %v7461_v17, %v7228_v52  ;;  %v12141_v52 = vld [vmem:[#allocation2 + $0x718] sm:$0xff] }
0x2711   : > { %11620 = vmatmul.msk.bf16.gmra.mxu0 %vm2091_vm15, %v12125_v35 }
0x2712   : > { %v13992_v57 = vadd.f32 %v7746_v27, %v7513_v6 }
0x2714   : > { %11699 = vmatmul.msk.bf16.gmra.mxu3 %vm2091_vm15, %v12140_v11 }
0x2716   : > { %v7186_v25 = vpop.f32.mrf.mxu0 }
0x2717   : > { %v7464_v24 = vpop.f32.mrf.mxu3  ;;  %v7232_v30 = vadd.f32 %v7186_v25, %v13857_v44  ;;  %v12143_v25 = vld [vmem:[#allocation2 + $0x728] sm:$0xff] }
0x2718   : > { %v7514_v36 = vadd.f32 %v7464_v24, %v7229_v9  ;;  %v12159_v9 = vld [vmem:[#allocation2 + $0x7a8] sm:$0xff] }
0x271a   : > { %v13997_v58 = vadd.f32 %v7749_v40, %v7514_v36  ;;  %v7761_v40 = vpop.f32.mrf.mxu1 }
0x271b   : > { %11782 = vmatmul.msk.bf16.gmra.mxu1 %vm2091_vm15, %v12159_v9 }
0x271e   : > { %v7189_v33 = vpop.f32.mrf.mxu0 }
0x271f   : > { %v7466_v60 = vpop.f32.mrf.mxu3  ;;  %v7233_v45 = vadd.f32 %v7189_v33, %v13862_v29 }
0x2720   : > { %v7515_v27 = vadd.f32 %v7466_v60, %v7230_v38 }
0x2721   : > { %11621 = vmatmul.msk.bf16.gmra.mxu0 %vm2091_vm15, %v12126_v31 }
0x2722   : > { %v14001_v59 = vadd.f32 %v7751_v55, %v7515_v27  ;;  %v7764_v43 = vpop.f32.mrf.mxu1 }
0x2724   : > { %11700 = vmatmul.msk.bf16.gmra.mxu3 %vm2091_vm15, %v12141_v52  ;;  %v12161_v52 = vld [vmem:[#allocation2 + $0x7b8] sm:$0xff] }
0x2726   : > { %v7191_v32 = vpop.f32.mrf.mxu0 }
0x2727   : > { %v7469_v44 = vpop.f32.mrf.mxu3  ;;  %v7234_v56 = vadd.f32 %v7191_v32, %v13867_v13  ;;  %v12144_v32 = vld [vmem:[#allocation2 + $0x730] sm:$0xff] }
0x2728   : > { %v7516_v8 = vadd.f32 %v7469_v44, %v7231_v4  ;;  %v12160_v4 = vld [vmem:[#allocation2 + $0x7b0] sm:$0xff]  ;;  %v12129_v44 = vld [vmem:[#allocation2 + $0x6b8] sm:$0xff] }
0x272a   : > { %v14006_v10 = vadd.f32 %v7754_v62, %v7516_v8  ;;  %v7766_v11 = vpop.f32.mrf.mxu1 }
0x272b   : > { %11783 = vmatmul.msk.bf16.gmra.mxu1 %vm2091_vm15, %v12160_v4 }
0x272e   : > { %v7194_v55 = vpop.f32.mrf.mxu0 }
0x272f   : > { %v7471_v23 = vpop.f32.mrf.mxu3  ;;  %v7235_v38 = vadd.f32 %v7194_v55, %v13872_v15  ;;  %v12128_v15 = vld [vmem:[#allocation2 + $0x6b0] sm:$0xff] }
0x2730   : > { %v7517_v29 = vadd.f32 %v7471_v23, %v7232_v30 }
0x2731   : > { %11622 = vmatmul.msk.bf16.gmra.mxu0 %vm2091_vm15, %v12127_v49 }
0x2732   : > { %v14010_v17 = vadd.f32 %v7756_v14, %v7517_v29 }
0x2734   : > { %11701 = vmatmul.msk.bf16.gmra.mxu3 %vm2091_vm15, %v12142_v51 }
0x2736   : > { %v7196_v35 = vpop.f32.mrf.mxu0 }
0x2737   : > { %v7474_v13 = vpop.f32.mrf.mxu3  ;;  %v7236_v6 = vadd.f32 %v7196_v35, %v13877_v3  ;;  %v7769_v3 = vpop.f32.mrf.mxu1 }
0x2738   : > { %v7518_v62 = vadd.f32 %v7474_v13, %v7233_v45  ;;  %v12130_v13 = vld [vmem:[#allocation2 + $0x6c0] sm:$0xff] }
0x273a   : > { %v14015_v47 = vadd.f32 %v7759_v28, %v7518_v62  ;;  %v12145_v62 = vld [vmem:[#allocation2 + $0x738] sm:$0xff] }
0x273b   : > { %11784 = vmatmul.msk.bf16.gmra.mxu1 %vm2091_vm15, %v12161_v52 }
0x273e   : > { %v7199_v14 = vpop.f32.mrf.mxu0 }
0x273f   : > { %v7476_v24 = vpop.f32.mrf.mxu3  ;;  %v7237_v30 = vadd.f32 %v7199_v14, %v13882_v0  ;;  %v7771_v0 = vpop.f32.mrf.mxu1 }
0x2740   : > { %v7519_v36 = vadd.f32 %v7476_v24, %v7234_v56 }
0x2741   : > { %11623 = vmatmul.msk.bf16.gmra.mxu0 %vm2091_vm15, %v12128_v15  ;;  %v12163_v15 = vld [vmem:[#allocation2 + $0x7c8] sm:$0xff] }
0x2742   : > { %v14019_v63 = vadd.f32 %v7761_v40, %v7519_v36 }
0x2744   : > { %11702 = vmatmul.msk.bf16.gmra.mxu3 %vm2091_vm15, %v12143_v25  ;;  %v12131_v25 = vld [vmem:[#allocation2 + $0x6c8] sm:$0xff] }
0x2746   : > { %v7201_v31 = vpop.f32.mrf.mxu0 }
0x2747   : > { %v7479_v28 = vpop.f32.mrf.mxu3  ;;  %v7238_v27 = vadd.f32 %v7201_v31, %v13887_v22  ;;  %v7774_v55 = vpop.f32.mrf.mxu1 }
0x2748   : > { %v7520_v60 = vadd.f32 %v7479_v28, %v7235_v38  ;;  %v12162_v38 = vld [vmem:[#allocation2 + $0x7c0] sm:$0xff] }
0x274a   : > { %v14024_v33 = vadd.f32 %v7764_v43, %v7520_v60 }
0x274b   : > { %11785 = vmatmul.msk.bf16.gmra.mxu1 %vm2091_vm15, %v12162_v38 }
0x274e   : > { %v7204_v8 = vpop.f32.mrf.mxu0 }
0x274f   : > { %v7481_v45 = vpop.f32.mrf.mxu3  ;;  %v7239_v56 = vadd.f32 %v7204_v8, %v13892_v46 }
0x2750   : > { %v7521_v40 = vadd.f32 %v7481_v45, %v7236_v6  ;;  %v7776_v6 = vpop.f32.mrf.mxu1 }
0x2751   : > { %11624 = vmatmul.msk.bf16.gmra.mxu0 %vm2091_vm15, %v12129_v44 }
0x2752   : > { %v14028_v9 = vadd.f32 %v7766_v11, %v7521_v40 }
0x2754   : > { %11703 = vmatmul.msk.bf16.gmra.mxu3 %vm2091_vm15, %v12144_v32 }
0x2756   : > { %v7206_v49 = vpop.f32.mrf.mxu0 }
0x2757   : > { %v7484_v22 = vpop.f32.mrf.mxu3  ;;  %v7240_v29 = vadd.f32 %v7206_v49, %v13897_v61 }
0x2758   : > { %v7522_v23 = vadd.f32 %v7484_v22, %v7237_v30  ;;  %v8838_v36 = vpop.f32.mrf.mxu1  ;;  %v12132_v22 = vld [vmem:[#allocation2 + $0x6d0] sm:$0xff] }
0x275a   : > { %v14033_v51 = vadd.f32 %v7769_v3, %v7522_v23  ;;  %v12146_v3 = vld [vmem:[#allocation2 + $0x740] sm:$0xff] }
0x275b   : > { %11786 = vmatmul.msk.bf16.gmra.mxu1 %vm2091_vm15, %v12163_v15 }
0x275e   : > { %v8268_v11 = vpop.f32.mrf.mxu0 }
0x275f   : > { %v7486_v43 = vpop.f32.mrf.mxu3  ;;  %v8348_v31 = vadd.f32 %v8268_v11, %v13902_v39  ;;  %v12147_v39 = vld [vmem:[#allocation2 + $0x748] sm:$0xff] }
0x2760   : > { %v7523_v46 = vadd.f32 %v7486_v43, %v7238_v27  ;;  %v8840_v52 = vpop.f32.mrf.mxu1 }
0x2761   : > { %11625 = vmatmul.msk.bf16.gmra.mxu0 %vm2091_vm15, %v12130_v13 }
0x2762   : > { %v14036_v35 = vadd.f32 %v7771_v0, %v7523_v46  ;;  %v12164_v0 = vld [vmem:[#allocation2 + $0x7d0] sm:$0xff] }
0x2764   : > { %11704 = vmatmul.msk.bf16.gmra.mxu3 %vm2091_vm15, %v12145_v62 }
0x2766   : > { %v8270_v28 = vpop.f32.mrf.mxu0 }
0x2767   : > { %v7489_v4 = vpop.f32.mrf.mxu3  ;;  %v8349_v32 = vadd.f32 %v8270_v28, %v13907_v26 }
0x2768   : > { %v7524_v61 = vadd.f32 %v7489_v4, %v7239_v56  ;;  %v8843_v23 = vpop.f32.mrf.mxu1 }
0x276a   : > { %v14040_v24 = vadd.f32 %v7774_v55, %v7524_v61 }
0x276b   : > { %11787 = vmatmul.msk.bf16.gmra.mxu1 %vm2091_vm15, %v12164_v0 }
0x276e   : > { %v8273_v40 = vpop.f32.mrf.mxu0 }
0x276f   : > { %v7491_v14 = vpop.f32.mrf.mxu3  ;;  %v8350_v43 = vadd.f32 %v8273_v40, %v13912_v50 }
0x2770   : > { %v7525_v30 = vadd.f32 %v7491_v14, %v7240_v29  ;;  %v8845_v46 = vpop.f32.mrf.mxu1 }
0x2771   : > { %11626 = vmatmul.msk.bf16.gmra.mxu0 %vm2091_vm15, %v12131_v25  ;;  %v12148_v25 = vld [vmem:[#allocation2 + $0x750] sm:$0xff] }
0x2772   : > { %v14043_v60 = vadd.f32 %v7776_v6, %v7525_v30  ;;  %v12165_v6 = vld [vmem:[#allocation2 + $0x7d8] sm:$0xff] }
0x2774   : > { %11705 = vmatmul.msk.bf16.gmra.mxu3 %vm2091_vm15, %v12146_v3 }
0x2776   : > { %v8275_v38 = vpop.f32.mrf.mxu0 }
0x2777   : > { %v8553_v27 = vpop.f32.mrf.mxu3  ;;  %v8351_v4 = vadd.f32 %v8275_v38, %v13917_v1 }
0x2778   : > { %v8633_v45 = vadd.f32 %v8553_v27, %v8348_v31  ;;  %v8848_v30 = vpop.f32.mrf.mxu1 }
0x277a   : > { %v14048_v44 = vadd.f32 %v8838_v36, %v8633_v45  ;;  %v12133_v36 = vld [vmem:[#allocation2 + $0x6d8] sm:$0xff]  ;;  %v12166_v45 = vld [vmem:[#allocation2 + $0x7e0] sm:$0xff] }
0x277b   : > { %11788 = vmatmul.msk.bf16.gmra.mxu1 %vm2091_vm15, %v12165_v6  ;;  %v12135_v6 = vld [vmem:[#allocation2 + $0x6e8] sm:$0xff] }
0x277c   : > { %v8952_v8 = vsel %vm1927_vm1, %v14048_v44, 0.0 }
0x277d   : > { %8953 = vadd.xlane.f32.xlu0 %v8952_v8 }
0x277e   : > { %v8278_v61 = vpop.f32.mrf.mxu0 }
0x277f   : > { %v8555_v56 = vpop.f32.mrf.mxu3  ;;  %v8352_v28 = vadd.f32 %v8278_v61, %v13922_v54  ;;  %v12151_v61 = vld [vmem:[#allocation2 + $0x768] sm:$0xff] }
0x2780   : > { %v8634_v49 = vadd.f32 %v8555_v56, %v8349_v32  ;;  %v8850_v40 = vpop.f32.mrf.mxu1  ;;  %v12134_v56 = vld [vmem:[#allocation2 + $0x6e0] sm:$0xff] }
0x2781   : > { %11627 = vmatmul.msk.bf16.gmra.mxu0 %vm2091_vm15, %v12132_v22 }
0x2782   : > { %v14054_v29 = vadd.f32 %v8840_v52, %v8634_v49 }
0x2784   : > { %11706 = vmatmul.msk.bf16.gmra.mxu3 %vm2091_vm15, %v12147_v39  ;;  %v8955_v55 = vsel %vm1927_vm1, %v14054_v29, 0.0 }
0x2785   : > { %8956 = vadd.xlane.f32.xlu2 %v8955_v55 }
0x2786   : > { %v8280_v27 = vpop.f32.mrf.mxu0 }
0x2787   : > { %v8558_v13 = vpop.f32.mrf.mxu3  ;;  %v8353_v8 = vadd.f32 %v8280_v27, %v13927_v48 }
0x2788   : > { %v8635_v26 = vadd.f32 %v8558_v13, %v8350_v43  ;;  %v8853_v43 = vpop.f32.mrf.mxu1 }
0x278a   : > { %v14061_v62 = vadd.f32 %v8843_v23, %v8635_v26  ;;  %v12149_v23 = vld [vmem:[#allocation2 + $0x758] sm:$0xff]  ;;  %v12167_v26 = vld [vmem:[#allocation2 + $0x7e8] sm:$0xff] }
0x278b   : > { %11789 = vmatmul.msk.bf16.gmra.mxu1 %vm2091_vm15, %v12166_v45 }
0x278c   : > { %v8958_v11 = vsel %vm1927_vm1, %v14061_v62, 0.0 }
0x278d   : > { %8959 = vadd.xlane.f32.xlu1 %v8958_v11  ;;  %v12150_v11 = vld [vmem:[#allocation2 + $0x760] sm:$0xff] }
0x278e   : > { %v8283_v49 = vpop.f32.mrf.mxu0 }
0x278f   : > { %v8560_v15 = vpop.f32.mrf.mxu3  ;;  %v8354_v55 = vadd.f32 %v8283_v49, %v13932_v41  ;;  %v12136_v41 = vld [vmem:[#allocation2 + $0x6f0] sm:$0xff] }
0x2790   : > { %v8636_v14 = vadd.f32 %v8560_v15, %v8351_v4  ;;  %v12168_v4 = vld [vmem:[#allocation2 + $0x7f0] sm:$0xff]  ;;  %v12169_v15 = vld [vmem:[#allocation2 + $0x7f8] sm:$0xff] }
0x2791   : > { %11628 = vmatmul.msk.bf16.gmra.mxu0 %vm2091_vm15, %v12133_v36  ;;  %v8855_v36 = vpop.f32.mrf.mxu1 }
0x2792   : > { %v14067_v50 = vadd.f32 %v8845_v46, %v8636_v14  ;;  %v12137_v14 = vld [vmem:[#allocation2 + $0x6f8] sm:$0xff] }
0x2794   : > { %11707 = vmatmul.msk.bf16.gmra.mxu3 %vm2091_vm15, %v12148_v25  ;;  %v8961_v3 = vsel %vm1927_vm1, %v14067_v50, 0.0  ;;  %v12152_v25 = vld [vmem:[#allocation2 + $0x770] sm:$0xff] }
0x2795   : > { %8962 = vadd.xlane.f32.xlu0 %v8961_v3  ;;  %v12153_v3 = vld [vmem:[#allocation2 + $0x778] sm:$0xff] }
0x2797   : > { %v8563_v31 = vpop.f32.mrf.mxu3 }
0x2798   : > { %v8637_v1 = vadd.f32 %v8563_v31, %v8352_v28  ;;  %v8002_v31 = vpop.f32.mrf.mxu2 }
0x279a   : > { %v14074_v52 = vadd.f32 %v8848_v30, %v8637_v1  ;;  %v8285_v30 = vpop.f32.mrf.mxu0 }
0x279b   : > { %11790 = vmatmul.msk.bf16.gmra.mxu1 %vm2091_vm15, %v12167_v26 }
0x279c   : > { %v8964_v0 = vsel %vm1927_vm1, %v14074_v52, 0.0 }
0x279d   : > { %8965 = vadd.xlane.f32.xlu2 %v8964_v0 }
0x279f   : > { %v8565_v32 = vpop.f32.mrf.mxu3 }
0x27a0   : > { %v8638_v22 = vadd.f32 %v8565_v32, %v8353_v8  ;;  %v8858_v8 = vpop.f32.mrf.mxu1  ;;  %v8355_v32 = vadd.f32 %v8285_v30, %v13937_v42 }
0x27a1   : > { %11629 = vmatmul.msk.bf16.gmra.mxu0 %vm2091_vm15, %v12134_v56 }
0x27a2   : > { %v14080_v54 = vadd.f32 %v8850_v40, %v8638_v22  ;;  %v8288_v1 = vpop.f32.mrf.mxu0  ;;  %v8004_v22 = vpop.f32.mrf.mxu2 }
0x27a4   : > { %11708 = vmatmul.msk.bf16.gmra.mxu3 %vm2091_vm15, %v12149_v23  ;;  %v8967_v39 = vsel %vm1927_vm1, %v14080_v54, 0.0 }
0x27a5   : > { %8968 = vadd.xlane.f32.xlu1 %v8967_v39 }
0x27a7   : > { %v8568_v38 = vpop.f32.mrf.mxu3 }
0x27a8   : > { %v8639_v48 = vadd.f32 %v8568_v38, %v8354_v55 }
0x27aa   : > { %v14087_v13 = vadd.f32 %v8853_v43, %v8639_v48  ;;  %v8290_v39 = vpop.f32.mrf.mxu0  ;;  %v8070_v48 = vadd.f32 %v8002_v31, %v13942_v21 }
0x27ab   : > { %11791 = vmatmul.msk.bf16.gmra.mxu1 %vm2091_vm15, %v12168_v4 }
0x27ac   : > { %v8970_v46 = vsel %vm1927_vm1, %v14087_v13, 0.0  ;;  %v8356_v42 = vadd.f32 %v8288_v1, %v8070_v48 }
0x27ad   : > { %8971 = vadd.xlane.f32.xlu1 %v8970_v46 }
0x27af   : > { %v8570_v28 = vpop.f32.mrf.mxu3 }
0x27b0   : > { %v8640_v23 = vadd.f32 %v8570_v28, %v8355_v32 }
0x27b1   : > { %11630 = vmatmul.msk.bf16.gmra.mxu0 %vm2091_vm15, %v12135_v6  ;;  %v8860_v6 = vpop.f32.mrf.mxu1 }
0x27b4   : > { %11709 = vmatmul.msk.bf16.gmra.mxu3 %vm2091_vm15, %v12150_v11 }
0x27b7   : > { %v8573_v27 = vpop.f32.mrf.mxu3 }
0x27b8   : > { %v8641_v11 = vadd.f32 %v8573_v27, %v8356_v42 }
0x27bb   : > { %11792 = vmatmul.msk.bf16.gmra.mxu1 %vm2091_vm15, %v12169_v15 }
0x27bf   : > { %v8575_v43 = vpop.f32.mrf.mxu3 }
0x27c1   : > { %11631 = vmatmul.msk.bf16.gmra.mxu0 %vm2091_vm15, %v12136_v41 }
0x27c4   : > { %11710 = vmatmul.msk.bf16.gmra.mxu3 %vm2091_vm15, %v12151_v61  ;;  %v8007_v61 = vpop.f32.mrf.mxu2 }
0x27c7   : > { %v8578_v30 = vpop.f32.mrf.mxu3 }
0x27d1   : > { %11632 = vmatmul.msk.bf16.gmra.mxu0 %vm2091_vm15, %v12137_v14  ;;  %v14123_v14 = vadd.f32 %v8858_v8, %v8641_v11  ;;  %v8009_v8 = vpop.f32.mrf.mxu2 }
0x27d3   : > { %v8976_v27 = vsel %vm1927_vm1, %v14123_v14, 0.0 }
0x27d4   : > { %11711 = vmatmul.msk.bf16.gmra.mxu3 %vm2091_vm15, %v12152_v25 }
0x27d9   : > { %v8012_v11 = vpop.f32.mrf.mxu2 }
0x27e4   : > { %11712 = vmatmul.msk.bf16.gmra.mxu3 %vm2091_vm15, %v12153_v3 }
0x27f0   : > { %v8954_v45 = vpop.xlane.xlu0 %8953 }
0x27f1   : > { %v9048_v0 = vmul.f32 %v8954_v45, %v12959_v19  ;;  %v8863_v45 = vpop.f32.mrf.mxu1 }
0x27f3   : > { %v14103_v40 = vsub.f32 %v14048_v44, %v9048_v0  ;;  %v14111_v44 = vadd.f32 %v8855_v36, %v8640_v23  ;;  %v8293_v36 = vpop.f32.mrf.mxu0 }
0x27f5   : > { %v9112_v56 = vmul.f32 %v14103_v40, %v14103_v40  ;;  %v8973_v41 = vsel %vm1927_vm1, %v14111_v44, 0.0 }
0x27f7   : > { %v9144_v49 = vsel %vm1927_vm1, %v9112_v56, 0.0 }
0x27f8   : > { %v8957_v55 = vpop.xlane.xlu2 %8956  ;;  %9145 = vadd.xlane.f32.xlu0 %v9144_v49 }
0x27f9   : > { %v9049_v38 = vmul.f32 %v8957_v55, %v12959_v19  ;;  %v8865_v42 = vpop.f32.mrf.mxu1 }
0x27fb   : > { %v14114_v26 = vsub.f32 %v14054_v29, %v9049_v38  ;;  %v8071_v29 = vadd.f32 %v8004_v22, %v13945_v5  ;;  %v8295_v22 = vpop.f32.mrf.mxu0 }
0x27fd   : > { %v9113_v46 = vmul.f32 %v14114_v26, %v14114_v26  ;;  %v8357_v3 = vadd.f32 %v8290_v39, %v8071_v29  ;;  %v8580_v39 = vpop.f32.mrf.mxu3 }
0x27ff   : > { %v9147_v4 = vsel %vm1927_vm1, %v9113_v46, 0.0  ;;  %v8642_v31 = vadd.f32 %v8575_v43, %v8357_v3 }
0x2800   : > { %v8960_v15 = vpop.xlane.xlu1 %8959  ;;  %9148 = vadd.xlane.f32.xlu2 %v9147_v4  ;;  %8974 = vadd.xlane.f32.xlu0 %v8973_v41 }
0x2801   : > { %v9050_v21 = vmul.f32 %v8960_v15, %v12959_v19  ;;  %v14135_v32 = vadd.f32 %v8860_v6, %v8642_v31  ;;  %v8868_v31 = vpop.f32.mrf.mxu1 }
0x2803   : > { %v14126_v25 = vsub.f32 %v14061_v62, %v9050_v21  ;;  %v8072_v62 = vadd.f32 %v8007_v61, %v13952_v37  ;;  %v8979_v43 = vsel %vm1927_vm1, %v14135_v32, 0.0  ;;  %v8298_v61 = vpop.f32.mrf.mxu0 }
0x2805   : > { %v9114_v28 = vmul.f32 %v14126_v25, %v14126_v25  ;;  %v8358_v23 = vadd.f32 %v8293_v36, %v8072_v62  ;;  %v8583_v29 = vpop.f32.mrf.mxu3 }
0x2807   : > { %v9150_v1 = vsel %vm1927_vm1, %v9114_v28, 0.0  ;;  %v8643_v55 = vadd.f32 %v8578_v30, %v8358_v23 }
0x2808   : > { %v8963_v0 = vpop.xlane.xlu0 %8962  ;;  %9151 = vadd.xlane.f32.xlu2 %v9150_v1  ;;  %8977 = vadd.xlane.f32.xlu0 %v8976_v27 }
0x2809   : > { %v9051_v5 = vmul.f32 %v8963_v0, %v12959_v19  ;;  %v14147_v46 = vadd.f32 %v8863_v45, %v8643_v55  ;;  %v8014_v45 = vpop.f32.mrf.mxu2 }
0x280a   : > { %v8075_v23 = vadd.f32 %v8014_v45, %v13965_v12 }
0x280b   : > { %v14138_v56 = vsub.f32 %v14067_v50, %v9051_v5  ;;  %v8073_v50 = vadd.f32 %v8009_v8, %v13955_v34  ;;  %v8982_v36 = vsel %vm1927_vm1, %v14147_v46, 0.0  ;;  %v8300_v62 = vpop.f32.mrf.mxu0 }
0x280c   : > { %v8361_v55 = vadd.f32 %v8300_v62, %v8075_v23 }
0x280d   : > { %v9115_v49 = vmul.f32 %v14138_v56, %v14138_v56  ;;  %v8359_v4 = vadd.f32 %v8295_v22, %v8073_v50 }
0x280f   : > { %v9153_v38 = vsel %vm1927_vm1, %v9115_v49, 0.0  ;;  %v8644_v15 = vadd.f32 %v8580_v39, %v8359_v4 }
0x2810   : > { %v8966_v48 = vpop.xlane.xlu2 %8965  ;;  %9154 = vadd.xlane.f32.xlu1 %v9153_v38  ;;  %8980 = vadd.xlane.f32.xlu2 %v8979_v43  ;;  %v8870_v43 = vpop.f32.mrf.mxu1 }
0x2811   : > { %v9052_v37 = vmul.f32 %v8966_v48, %v12959_v19  ;;  %v14159_v3 = vadd.f32 %v8865_v42, %v8644_v15  ;;  %v8017_v50 = vpop.f32.mrf.mxu2 }
0x2813   : > { %v14150_v6 = vsub.f32 %v14074_v52, %v9052_v37  ;;  %v8074_v52 = vadd.f32 %v8012_v11, %v13962_v16  ;;  %v8985_v8 = vsel %vm1927_vm1, %v14159_v3, 0.0  ;;  %v8303_v12 = vpop.f32.mrf.mxu0  ;;  %v8076_v11 = vadd.f32 %v8017_v50, %v13970_v7 }
0x2815   : > { %v9116_v41 = vmul.f32 %v14150_v6, %v14150_v6  ;;  %v8360_v1 = vadd.f32 %v8298_v61, %v8074_v52 }
0x2817   : > { %v9156_v21 = vsel %vm1927_vm1, %v9116_v41, 0.0  ;;  %v8645_v0 = vadd.f32 %v8583_v29, %v8360_v1  ;;  %v8362_v41 = vadd.f32 %v8303_v12, %v8076_v11 }
0x2818   : > { %v8969_v30 = vpop.xlane.xlu1 %8968  ;;  %9157 = vadd.xlane.f32.xlu1 %v9156_v21  ;;  %8983 = vadd.xlane.f32.xlu2 %v8982_v36  ;;  %v8873_v21 = vpop.f32.mrf.mxu1 }
0x2819   : > { %v9053_v34 = vmul.f32 %v8969_v30, %v12959_v19  ;;  %v14171_v49 = vadd.f32 %v8868_v31, %v8645_v0  ;;  %v12171_v30 = vld [vmem:[%s15008_s5 + $0x8] sm:$0xff]  ;;  %v8019_v7 = vpop.f32.mrf.mxu2 }
0x281a   : > { %9812 = vmatpush.bf16.msra.mxu2 %v12171_v30 }
0x281b   : > { %v14162_v28 = vsub.f32 %v14080_v54, %v9053_v34  ;;  %v8585_v54 = vpop.f32.mrf.mxu3  ;;  %v8988_v42 = vsel %vm1927_vm1, %v14171_v49, 0.0  ;;  %v8305_v31 = vpop.f32.mrf.mxu0 }
0x281c   : > { %v8646_v48 = vadd.f32 %v8585_v54, %v8361_v55 }
0x281d   : > { %v9117_v27 = vmul.f32 %v14162_v28, %v14162_v28 }
0x281f   : > { %v9159_v5 = vsel %vm1927_vm1, %v9117_v27, 0.0  ;;  %v12170_v27 = vld [vmem:[%s15008_s5] sm:$0xff] }
0x2820   : > { %v8972_v22 = vpop.xlane.xlu1 %8971  ;;  %9160 = vadd.xlane.f32.xlu0 %v9159_v5  ;;  %8986 = vadd.xlane.f32.xlu1 %v8985_v8  ;;  %v8875_v8 = vpop.f32.mrf.mxu1 }
0x2821   : > { %v9054_v16 = vmul.f32 %v8972_v22, %v12959_v19  ;;  %9813 = vmatpush.bf16.msra.mxu2 %v12170_v27  ;;  %v8022_v54 = vpop.f32.mrf.mxu2 }
0x2823   : > { %v14174_v39 = vsub.f32 %v14087_v13, %v9054_v16  ;;  %v14182_v13 = vadd.f32 %v8870_v43, %v8646_v48  ;;  %v8588_v4 = vpop.f32.mrf.mxu3  ;;  %v8308_v43 = vpop.f32.mrf.mxu0 }
0x2824   : > { %v8647_v61 = vadd.f32 %v8588_v4, %v8362_v41 }
0x2825   : > { %v9118_v38 = vmul.f32 %v14174_v39, %v14174_v39  ;;  %v8991_v15 = vsel %vm1927_vm1, %v14182_v13, 0.0 }
0x2826   : > { %v14186_v36 = vadd.f32 %v8873_v21, %v8647_v61  ;;  %v8077_v21 = vadd.f32 %v8019_v7, %v13974_v2 }
0x2827   : > { %v9162_v37 = vsel %vm1927_vm1, %v9118_v38, 0.0 }
0x2828   : > { %9163 = vadd.xlane.f32.xlu0 %v9162_v37  ;;  %8989 = vadd.xlane.f32.xlu1 %v8988_v42  ;;  %v8994_v29 = vsel %vm1927_vm1, %v14186_v36, 0.0 }
0x282b   : > { %v8590_v45 = vpop.f32.mrf.mxu3 }
0x2830   : > { %8992 = vadd.xlane.f32.xlu0 %v8991_v15 }
0x2833   : > { %v8593_v42 = vpop.f32.mrf.mxu3 }
0x2838   : > { %8995 = vadd.xlane.f32.xlu0 %v8994_v29  ;;  %v8878_v29 = vpop.f32.mrf.mxu1 }
0x286b   : > { %v9146_v34 = vpop.xlane.xlu0 %9145 }
0x286c   : > { %v9240_v52 = vmul.f32 %v9146_v34, %v12959_v19 }
0x286e   : > { %v9272_v1 = vadd.f32 1e-05, %v9240_v52 }
0x2870   : > { %12406 = vrsqrt.f32 %v9272_v1  ;;  %vm9310_vm13 = vweird.f32 %v9272_v1 }
0x2873   : > { %v9149_v0 = vpop.xlane.xlu2 %9148  ;;  %v8975_v5 = vpop.xlane.xlu0 %8974 }
0x2874   : > { %v9241_v62 = vmul.f32 %v9149_v0, %v12959_v19  ;;  %v9055_v22 = vmul.f32 %v8975_v5, %v12959_v19  ;;  %v8024_v0 = vpop.f32.mrf.mxu2  ;;  %v8363_v5 = vadd.f32 %v8305_v31, %v8077_v21 }
0x2876   : > { %v12407_v16 = vpop.eup %12406  ;;  %v9273_v23 = vadd.f32 1e-05, %v9241_v62  ;;  %v14196_v55 = vsub.f32 %v14111_v44, %v9055_v22  ;;  %v8648_v2 = vadd.f32 %v8590_v45, %v8363_v5  ;;  %v8078_v45 = vadd.f32 %v8022_v54, %v13979_v20  ;;  %v8880_v54 = vpop.f32.mrf.mxu1 }
0x2877   : > { %v9305_v38 = vmul.f32 %v12407_v16, %v9272_v1  ;;  %vm9311_vm15 = vweird.f32 %v12407_v16 }
0x2878   : > { %12408 = vrsqrt.f32 %v9273_v23  ;;  %v9119_v48 = vmul.f32 %v14196_v55, %v14196_v55  ;;  %vm14212_vm14 = vmor %vm9310_vm13, %vm9311_vm15  ;;  %vm9320_vm0 = vweird.f32 %v9273_v23 }
0x2879   : > { %v9306_v37 = vmul.f32 %v12407_v16, %v9305_v38  ;;  %v8310_v38 = vpop.f32.mrf.mxu0 }
0x287a   : > { %v9165_v50 = vsel %vm1927_vm1, %v9119_v48, 0.0 }
0x287b   : > { %v9307_v12 = vmul.f32 0.5, %v9306_v37  ;;  %v9152_v11 = vpop.xlane.xlu2 %9151  ;;  %v8978_v4 = vpop.xlane.xlu0 %8977  ;;  %9166 = vadd.xlane.f32.xlu2 %v9165_v50 }
0x287c   : > { %v9242_v41 = vmul.f32 %v9152_v11, %v12959_v19  ;;  %v9056_v61 = vmul.f32 %v8978_v4, %v12959_v19  ;;  %v8595_v11 = vpop.f32.mrf.mxu3 }
0x287d   : > { %v9308_v44 = vsub.f32 1.5, %v9307_v12 }
0x287e   : > { %v12409_v15 = vpop.eup %12408  ;;  %v14204_v30 = vadd.f32 1e-05, %v9242_v41  ;;  %v14207_v34 = vsub.f32 %v14123_v14, %v9056_v61  ;;  %v14224_v61 = vadd.f32 %v8875_v8, %v8648_v2  ;;  %v8027_v2 = vpop.f32.mrf.mxu2 }
0x287f   : > { %v9309_v52 = vmul.f32 %v12407_v16, %v9308_v44  ;;  %v9315_v27 = vmul.f32 %v12409_v15, %v9273_v23  ;;  %vm9321_vm7 = vweird.f32 %v12409_v15  ;;  %v14227_v44 = vld [vmem:[%s15009_s6] ss:$0 sm:$0xff] }
0x2880   : > { %12410 = vrsqrt.f32 %v14204_v30  ;;  %v9120_v62 = vmul.f32 %v14207_v34, %v14207_v34  ;;  %vm9322_vm2 = vmor %vm9320_vm0, %vm9321_vm7  ;;  %vm9330_vm4 = vweird.f32 %v14204_v30 }
0x2881   : > { %v9316_v22 = vmul.f32 %v12409_v15, %v9315_v27  ;;  %v9313_v48 = vsel %vm14212_vm14, %v12407_v16, %v9309_v52  ;;  %v8364_v27 = vadd.f32 %v8308_v43, %v8078_v45 }
0x2882   : > { %v9168_v14 = vsel %vm1927_vm1, %v9120_v62, 0.0  ;;  %v9624_v16 = vmul.f32 %v9313_v48, %v14103_v40 }
0x2883   : > { %v9317_v31 = vmul.f32 0.5, %v9316_v22  ;;  %v9155_v37 = vpop.xlane.xlu1 %9154  ;;  %v8981_v50 = vpop.xlane.xlu2 %8980  ;;  %9169 = vadd.xlane.f32.xlu2 %v9168_v14  ;;  %v8649_v62 = vadd.f32 %v8593_v42, %v8364_v27  ;;  %v8997_v14 = vsel %vm1927_vm1, %v14224_v61, 0.0 }
0x2884   : > { %v9243_v12 = vmul.f32 %v9155_v37, %v12959_v19  ;;  %v9057_v1 = vmul.f32 %v8981_v50, %v12959_v19  ;;  %v9659_v43 = vmul.f32 %v14227_v44, %v9624_v16 }
0x2885   : > { %v9318_v4 = vsub.f32 1.5, %v9317_v31 }
0x2886   : > { %v14222_v41 = vpop.eup %12410  ;;  %v14230_v21 = vadd.f32 1e-05, %v9243_v12  ;;  %v14233_v52 = vsub.f32 %v14135_v32, %v9057_v1  ;;  %v14242_v32 = vld [vmem:[%s15012_s23] ss:$0 sm:$0xff]  ;;  %v8079_v12 = vadd.f32 %v8024_v0, %v13983_v53  ;;  %v8313_v1 = vpop.f32.mrf.mxu0 }
0x2887   : > { %v9319_v5 = vmul.f32 %v12409_v15, %v9318_v4  ;;  %v9325_v20 = vmul.f32 %v14222_v41, %v14204_v30  ;;  %v9694_v16 = vadd.f32 %v14242_v32, %v9659_v43  ;;  %vm9331_vm3 = vweird.f32 %v14222_v41 }
0x2888   : > { %12412 = vrsqrt.f32 %v14230_v21  ;;  %v9121_v8 = vmul.f32 %v14233_v52, %v14233_v52  ;;  %vm14269_vm5 = vmor %vm9330_vm4, %vm9331_vm3  ;;  %vm9340_vm9 = vweird.f32 %v14230_v21 }
0x2889   : > { %v9323_v40 = vsel %vm9322_vm2, %v12409_v15, %v9319_v5  ;;  %v9326_v22 = vmul.f32 %v14222_v41, %v9325_v20 }
0x288a   : > { %v9625_v23 = vmul.f32 %v9323_v40, %v14114_v26  ;;  %v9171_v7 = vsel %vm1927_vm1, %v9121_v8, 0.0  ;;  %v14253_v26 = vadd.f32 %v8878_v29, %v8649_v62  ;;  %v8365_v8 = vadd.f32 %v8310_v38, %v8079_v12  ;;  %v8598_v40 = vpop.f32.mrf.mxu3 }
0x288b   : > { %v9327_v48 = vmul.f32 0.5, %v9326_v22  ;;  %v9158_v31 = vpop.xlane.xlu1 %9157  ;;  %v8984_v37 = vpop.xlane.xlu2 %8983  ;;  %9172 = vadd.xlane.f32.xlu1 %v9171_v7  ;;  %8998 = vadd.xlane.f32.xlu2 %v8997_v14 }
0x288c   : > { %v9660_v42 = vmul.f32 %v14227_v44, %v9625_v23  ;;  %v9244_v15 = vmul.f32 %v9158_v31, %v12959_v19  ;;  %v9058_v50 = vmul.f32 %v8984_v37, %v12959_v19  ;;  %v8650_v62 = vadd.f32 %v8595_v11, %v8365_v8 }
0x288d   : > { %v9328_v45 = vsub.f32 1.5, %v9327_v48  ;;  %v9000_v7 = vsel %vm1927_vm1, %v14253_v26, 0.0 }
0x288e   : > { %v12413_v4 = vpop.eup %12412  ;;  %v9695_v27 = vadd.f32 %v14242_v32, %v9660_v42  ;;  %v14257_v5 = vadd.f32 1e-05, %v9244_v15  ;;  %v14260_v20 = vsub.f32 %v14147_v46, %v9058_v50  ;;  %v8883_v46 = vpop.f32.mrf.mxu1  ;;  %v14282_v15 = vadd.f32 %v8880_v54, %v8650_v62 }
0x288f   : > { %v9329_v22 = vmul.f32 %v14222_v41, %v9328_v45  ;;  %v9335_v53 = vmul.f32 %v12413_v4, %v14230_v21  ;;  %v8029_v42 = vpop.f32.mrf.mxu2  ;;  %vm9341_vm6 = vweird.f32 %v12413_v4  ;;  %v8080_v45 = vadd.f32 %v8027_v2, %v13988_v18  ;;  %v8315_v8 = vpop.f32.mrf.mxu0 }
0x2890   : > { %v9730_v29 = vpack.c.bf16 %v9695_v27, %v9694_v16  ;;  %12414 = vrsqrt.f32 %v14257_v5  ;;  %v9122_v0 = vmul.f32 %v14260_v20, %v14260_v20  ;;  %vm9342_vm10 = vmor %vm9340_vm9, %vm9341_vm6  ;;  %vm9350_vm12 = vweird.f32 %v14257_v5 }
0x2891   : > { %v9336_v43 = vmul.f32 %v12413_v4, %v9335_v53  ;;  %v9333_v14 = vsel %vm14269_vm5, %v14222_v41, %v9329_v22  ;;  %v8366_v53 = vadd.f32 %v8313_v1, %v8080_v45 }
0x2892   : > { %11801 = vmatmul.msk.bf16.vlgmr.msra.gmra.mxu2 %vm1927_vm1, %v9730_v29  ;;  %v9174_v23 = vsel %vm1927_vm1, %v9122_v0, 0.0  ;;  %v9626_v41 = vmul.f32 %v9333_v14, %v14126_v25  ;;  %v8600_v25 = vpop.f32.mrf.mxu3  ;;  %v8081_v14 = vadd.f32 %v8029_v42, %v13992_v57 }
0x2893   : > { %v9337_v11 = vmul.f32 0.5, %v9336_v43  ;;  %v9161_v48 = vpop.xlane.xlu0 %9160  ;;  %v8987_v30 = vpop.xlane.xlu1 %8986  ;;  %9175 = vadd.xlane.f32.xlu1 %v9174_v23  ;;  %9001 = vadd.xlane.f32.xlu2 %v9000_v7  ;;  %v8651_v0 = vadd.f32 %v8598_v40, %v8366_v53 }
0x2894   : > { %v9245_v31 = vmul.f32 %v9161_v48, %v12959_v19  ;;  %v9059_v37 = vmul.f32 %v8987_v30, %v12959_v19  ;;  %v9661_v1 = vmul.f32 %v14227_v44, %v9626_v41  ;;  %v8367_v45 = vadd.f32 %v8315_v8, %v8081_v14 }
0x2895   : > { %v9338_v50 = vsub.f32 1.5, %v9337_v11 }
0x2896   : > { %v14284_v12 = vpop.eup %12414  ;;  %v14288_v16 = vadd.f32 1e-05, %v9245_v31  ;;  %v14291_v27 = vsub.f32 %v14159_v3, %v9059_v37  ;;  %v9003_v3 = vsel %vm1927_vm1, %v14282_v15, 0.0  ;;  %v8885_v11 = vpop.f32.mrf.mxu1  ;;  %v9696_v31 = vadd.f32 %v14242_v32, %v9661_v1 }
0x2897   : > { %v9339_v22 = vmul.f32 %v12413_v4, %v9338_v50  ;;  %v9345_v54 = vmul.f32 %v14284_v12, %v14257_v5  ;;  %v8032_v50 = vpop.f32.mrf.mxu2  ;;  %vm9351_vm11 = vweird.f32 %v14284_v12 }
0x2898   : > { %12416 = vrsqrt.f32 %v14288_v16  ;;  %v9123_v18 = vmul.f32 %v14291_v27, %v14291_v27  ;;  %vm9352_vm15 = vmor %vm9350_vm12, %vm9351_vm11  ;;  %vm9360_vm14 = vweird.f32 %v14288_v16 }
0x2899   : > { %v9343_v2 = vsel %vm9342_vm10, %v12413_v4, %v9339_v22  ;;  %v9346_v29 = vmul.f32 %v14284_v12, %v9345_v54  ;;  %v8318_v22 = vpop.f32.mrf.mxu0  ;;  %v8652_v54 = vadd.f32 %v8600_v25, %v8367_v45 }
0x289a   : > { %v9627_v21 = vmul.f32 %v9343_v2, %v14138_v56  ;;  %v9177_v62 = vsel %vm1927_vm1, %v9123_v18, 0.0  ;;  %v14310_v56 = vadd.f32 %v8883_v46, %v8651_v0  ;;  %v8603_v18 = vpop.f32.mrf.mxu3 }
0x289b   : > { %v9347_v43 = vmul.f32 0.5, %v9346_v29  ;;  %v14305_v38 = vpop.xlane.xlu0 %9163  ;;  %v8990_v23 = vpop.xlane.xlu1 %8989  ;;  %9178 = vadd.xlane.f32.xlu0 %v9177_v62  ;;  %9004 = vadd.xlane.f32.xlu1 %v9003_v3  ;;  %v14329_v0 = vadd.f32 %v8885_v11, %v8652_v54 }
0x289c   : > { %v9060_v4 = vmul.f32 %v8990_v23, %v12959_v19  ;;  %v9662_v7 = vmul.f32 %v14227_v44, %v9627_v21  ;;  %v9006_v53 = vsel %vm1927_vm1, %v14310_v56, 0.0  ;;  %v8082_v21 = vadd.f32 %v8032_v50, %v13997_v58 }
0x289d   : > { %v9348_v40 = vsub.f32 1.5, %v9347_v43  ;;  %v9009_v11 = vsel %vm1927_vm1, %v14329_v0, 0.0 }
0x289e   : > { %v12417_v48 = vpop.eup %12416  ;;  %v14313_v30 = vsub.f32 %v14171_v49, %v9060_v4  ;;  %v9697_v37 = vadd.f32 %v14242_v32, %v9662_v7  ;;  %v8888_v43 = vpop.f32.mrf.mxu1 }
0x289f   : > { %v9349_v41 = vmul.f32 %v14284_v12, %v9348_v40  ;;  %v9355_v57 = vmul.f32 %v12417_v48, %v14288_v16  ;;  %vm9361_vm13 = vweird.f32 %v12417_v48  ;;  %v8034_v7 = vpop.f32.mrf.mxu2 }
0x28a0   : > { %v9731_v42 = vpack.c.bf16 %v9697_v37, %v9696_v31  ;;  %v9124_v46 = vmul.f32 %v14313_v30, %v14313_v30  ;;  %vm9362_vm7 = vmor %vm9360_vm14, %vm9361_vm13 }
0x28a1   : > { %v9356_v49 = vmul.f32 %v12417_v48, %v9355_v57  ;;  %v9353_v2 = vsel %vm9352_vm15, %v14284_v12, %v9349_v41  ;;  %v8368_v12 = vadd.f32 %v8318_v22, %v8082_v21  ;;  %v8320_v31 = vpop.f32.mrf.mxu0 }
0x28a2   : > { %11802 = vmatmul.msk.bf16.gmra.mxu2 %vm1927_vm1, %v9731_v42  ;;  %v9180_v8 = vsel %vm1927_vm1, %v9124_v46, 0.0  ;;  %v9628_v62 = vmul.f32 %v9353_v2, %v14150_v6  ;;  %v8605_v45 = vpop.f32.mrf.mxu3 }
0x28a3   : > { %v9357_v29 = vmul.f32 0.5, %v9356_v49  ;;  %v8993_v3 = vpop.xlane.xlu0 %8992  ;;  %9181 = vadd.xlane.f32.xlu0 %v9180_v8  ;;  %9007 = vadd.xlane.f32.xlu1 %v9006_v53  ;;  %v8653_v58 = vadd.f32 %v8603_v18, %v8368_v12 }
0x28a4   : > { %v9061_v25 = vmul.f32 %v8993_v3, %v12959_v19  ;;  %v9663_v40 = vmul.f32 %v14227_v44, %v9628_v62 }
0x28a5   : > { %v9358_v5 = vsub.f32 1.5, %v9357_v29  ;;  %v14347_v41 = vadd.f32 %v8888_v43, %v8653_v58 }
0x28a6   : > { %v14334_v1 = vsub.f32 %v14182_v13, %v9061_v25  ;;  %v8890_v49 = vpop.f32.mrf.mxu1 }
0x28a7   : > { %v9359_v23 = vmul.f32 %v12417_v48, %v9358_v5  ;;  %v9012_v53 = vsel %vm1927_vm1, %v14347_v41, 0.0 }
0x28a8   : > { %v9125_v4 = vmul.f32 %v14334_v1, %v14334_v1 }
0x28a9   : > { %v9363_v14 = vsel %vm9362_vm7, %v12417_v48, %v9359_v23  ;;  %v8083_v48 = vadd.f32 %v8034_v7, %v14001_v59  ;;  %v8323_v18 = vpop.f32.mrf.mxu0  ;;  %v9246_v7 = vmul.f32 %v14305_v38, %v12959_v19 }
0x28aa   : > { %v9629_v6 = vmul.f32 %v9363_v14, %v14162_v28  ;;  %v9183_v13 = vsel %vm1927_vm1, %v9125_v4, 0.0  ;;  %v9698_v28 = vadd.f32 %v14242_v32, %v9663_v40  ;;  %v8608_v3 = vpop.f32.mrf.mxu3 }
0x28ab   : > { %v8996_v37 = vpop.xlane.xlu0 %8995  ;;  %9184 = vadd.xlane.f32.xlu2 %v9183_v13  ;;  %9010 = vadd.xlane.f32.xlu0 %v9009_v11  ;;  %v8369_v46 = vadd.f32 %v8320_v31, %v8083_v48  ;;  %v9278_v11 = vadd.f32 1e-05, %v9246_v7 }
0x28ac   : > { %v9062_v16 = vmul.f32 %v8996_v37, %v12959_v19  ;;  %v9664_v50 = vmul.f32 %v14227_v44, %v9629_v6 }
0x28ad   : > { %v8654_v8 = vadd.f32 %v8605_v45, %v8369_v46  ;;  %12418 = vrsqrt.f32 %v9278_v11  ;;  %vm9370_vm2 = vweird.f32 %v9278_v11 }
0x28ae   : > { %v14350_v57 = vsub.f32 %v14186_v36, %v9062_v16  ;;  %v9699_v42 = vadd.f32 %v14242_v32, %v9664_v50  ;;  %v8037_v36 = vpop.f32.mrf.mxu2  ;;  %v8893_v62 = vpop.f32.mrf.mxu1 }
0x28af   : > { %v8084_v2 = vadd.f32 %v8037_v36, %v14006_v10  ;;  %v14361_v29 = vadd.f32 %v8890_v49, %v8654_v8 }
0x28b0   : > { %v9732_v22 = vpack.c.bf16 %v9699_v42, %v9698_v28  ;;  %v9126_v54 = vmul.f32 %v14350_v57, %v14350_v57 }
0x28b1   : > { %v8370_v25 = vadd.f32 %v8323_v18, %v8084_v2  ;;  %v9015_v21 = vsel %vm1927_vm1, %v14361_v29, 0.0 }
0x28b2   : > { %11803 = vmatmul.msk.bf16.gmra.mxu2 %vm1927_vm1, %v9732_v22  ;;  %v9186_v59 = vsel %vm1927_vm1, %v9126_v54, 0.0  ;;  %v8325_v22 = vpop.f32.mrf.mxu0 }
0x28b3   : > { %9187 = vadd.xlane.f32.xlu2 %v9186_v59  ;;  %9013 = vadd.xlane.f32.xlu0 %v9012_v53  ;;  %v8655_v5 = vadd.f32 %v8608_v3, %v8370_v25  ;;  %v12419_v6 = vpop.eup %12418  ;;  %v8610_v59 = vpop.f32.mrf.mxu3 }
0x28b4   : > { %v9365_v13 = vmul.f32 %v12419_v6, %v9278_v11  ;;  %vm9371_vm0 = vweird.f32 %v12419_v6 }
0x28b5   : > { %v14367_v23 = vadd.f32 %v8893_v62, %v8655_v5  ;;  %vm9372_vm3 = vmor %vm9370_vm2, %vm9371_vm0 }
0x28b6   : > { %v14365_v43 = vpop.f32.mrf.mxu2  ;;  %v9366_v40 = vmul.f32 %v12419_v6, %v9365_v13  ;;  %v14390_v25 = vpop.f32.mrf.mxu1 }
0x28b7   : > { %v9018_v12 = vsel %vm1927_vm1, %v14367_v23, 0.0 }
0x28b8   : > { %v9367_v48 = vmul.f32 0.5, %v9366_v40 }
0x28ba   : > { %v9368_v45 = vsub.f32 1.5, %v9367_v48 }
0x28bb   : > { %9016 = vadd.xlane.f32.xlu2 %v9015_v21 }
0x28bc   : > { %v9369_v49 = vmul.f32 %v12419_v6, %v9368_v45 }
0x28be   : > { %v14371_v4 = vpop.f32.mrf.mxu2  ;;  %v9373_v36 = vsel %vm9372_vm3, %v12419_v6, %v9369_v49 }
0x28bf   : > { %v9630_v7 = vmul.f32 %v9373_v36, %v14174_v39 }
0x28c3   : > { %9019 = vadd.xlane.f32.xlu2 %v9018_v12 }
0x28c6   : > { %v14373_v10 = vpop.f32.mrf.mxu2 }
0x28ce   : > { %v14377_v14 = vpop.f32.mrf.mxu2 }
0x28d6   : > { %v14379_v58 = vpop.f32.mrf.mxu2 }
0x28de   : > { %v14381_v37 = vpop.f32.mrf.mxu2 }
0x28e6   : > { %v14385_v46 = vpop.f32.mrf.mxu2 }
0x28ee   : > { %v9167_v31 = vpop.xlane.xlu2 %9166 }
0x28ef   : > { %v9247_v16 = vmul.f32 %v9167_v31, %v12959_v19  ;;  %v14404_v31 = vpop.f32.mrf.mxu2 }
0x28f1   : > { %v9279_v50 = vadd.f32 1e-05, %v9247_v16  ;;  %v8328_v16 = vpop.f32.mrf.mxu0 }
0x28f3   : > { %12420 = vrsqrt.f32 %v9279_v50  ;;  %vm9380_vm5 = vweird.f32 %v9279_v50 }
0x28f6   : > { %v9170_v28 = vpop.xlane.xlu2 %9169 }
0x28f7   : > { %v9248_v38 = vmul.f32 %v9170_v28, %v12959_v19  ;;  %v14410_v28 = vpop.f32.mrf.mxu3 }
0x28f9   : > { %v12421_v42 = vpop.eup %12420  ;;  %v14387_v54 = vadd.f32 1e-05, %v9248_v38  ;;  %v9665_v38 = vmul.f32 %v14227_v44, %v9630_v7 }
0x28fa   : > { %v9375_v8 = vmul.f32 %v12421_v42, %v9279_v50  ;;  %vm9381_vm4 = vweird.f32 %v12421_v42 }
0x28fb   : > { %12422 = vrsqrt.f32 %v14387_v54  ;;  %vm9382_vm6 = vmor %vm9380_vm5, %vm9381_vm4  ;;  %v9700_v7 = vadd.f32 %v14242_v32, %v9665_v38  ;;  %vm9390_vm10 = vweird.f32 %v14387_v54 }
0x28fc   : > { %v9376_v53 = vmul.f32 %v12421_v42, %v9375_v8 }
0x28fe   : > { %v9377_v18 = vmul.f32 0.5, %v9376_v53  ;;  %v9173_v2 = vpop.xlane.xlu1 %9172  ;;  %v8999_v3 = vpop.xlane.xlu2 %8998 }
0x28ff   : > { %v9249_v5 = vmul.f32 %v9173_v2, %v12959_v19  ;;  %v9063_v21 = vmul.f32 %v8999_v3, %v12959_v19  ;;  %v8085_v2 = vadd.f32 %v14365_v43, %v14010_v17 }
0x2900   : > { %v9378_v62 = vsub.f32 1.5, %v9377_v18 }
0x2901   : > { %v14394_v12 = vpop.eup %12422  ;;  %v14397_v13 = vadd.f32 1e-05, %v9249_v5  ;;  %v14400_v11 = vsub.f32 %v14224_v61, %v9063_v21  ;;  %v14425_v5 = vpop.f32.mrf.mxu1 }
0x2902   : > { %v9379_v6 = vmul.f32 %v12421_v42, %v9378_v62  ;;  %v9385_v40 = vmul.f32 %v14394_v12, %v14387_v54  ;;  %vm9391_vm9 = vweird.f32 %v14394_v12 }
0x2903   : > { %12424 = vrsqrt.f32 %v14397_v13  ;;  %v9127_v39 = vmul.f32 %v14400_v11, %v14400_v11  ;;  %vm14447_vm11 = vmor %vm9390_vm10, %vm9391_vm9  ;;  %vm9400_vm15 = vweird.f32 %v14397_v13 }
0x2904   : > { %v9383_v48 = vsel %vm9382_vm6, %v12421_v42, %v9379_v6  ;;  %v9386_v45 = vmul.f32 %v14394_v12, %v9385_v40  ;;  %v8371_v40 = vadd.f32 %v8325_v22, %v8085_v2 }
0x2905   : > { %v9631_v61 = vmul.f32 %v9383_v48, %v14196_v55  ;;  %v9189_v50 = vsel %vm1927_vm1, %v9127_v39, 0.0 }
0x2906   : > { %v9387_v49 = vmul.f32 0.5, %v9386_v45  ;;  %v9176_v8 = vpop.xlane.xlu1 %9175  ;;  %v9002_v53 = vpop.xlane.xlu2 %9001  ;;  %9190 = vadd.xlane.f32.xlu1 %v9189_v50  ;;  %v8656_v50 = vadd.f32 %v8610_v59, %v8371_v40 }
0x2907   : > { %v9250_v36 = vmul.f32 %v9176_v8, %v12959_v19  ;;  %v9064_v18 = vmul.f32 %v9002_v53, %v12959_v19  ;;  %v9666_v42 = vmul.f32 %v14227_v44, %v9631_v61  ;;  %v14445_v45 = vpop.f32.mrf.mxu2  ;;  %v8330_v61 = vpop.f32.mrf.mxu0 }
0x2908   : > { %v9388_v3 = vsub.f32 1.5, %v9387_v49 }
0x2909   : > { %v12425_v55 = vpop.eup %12424  ;;  %v14427_v21 = vadd.f32 1e-05, %v9250_v36  ;;  %v14430_v62 = vsub.f32 %v14253_v26, %v9064_v18  ;;  %v9701_v6 = vadd.f32 %v14242_v32, %v9666_v42  ;;  %v8086_v18 = vadd.f32 %v14371_v4, %v14015_v47  ;;  %v8615_v42 = vpop.f32.mrf.mxu3 }
0x290a   : > { %v9389_v17 = vmul.f32 %v14394_v12, %v9388_v3  ;;  %v9395_v43 = vmul.f32 %v12425_v55, %v14397_v13  ;;  %vm9401_vm12 = vweird.f32 %v12425_v55  ;;  %v8900_v4 = vpop.f32.mrf.mxu1 }
0x290b   : > { %12426 = vrsqrt.f32 %v14427_v21  ;;  %v9733_v39 = vpack.c.bf16 %v9701_v6, %v9700_v7  ;;  %v9128_v48 = vmul.f32 %v14430_v62, %v14430_v62  ;;  %vm9402_vm13 = vmor %vm9400_vm15, %vm9401_vm12  ;;  %vm9410_vm7 = vweird.f32 %v14427_v21 }
0x290c   : > { %v9396_v26 = vmul.f32 %v12425_v55, %v9395_v43  ;;  %v9393_v54 = vsel %vm14447_vm11, %v14394_v12, %v9389_v17  ;;  %v14464_v12 = vadd.f32 %v14390_v25, %v8656_v50  ;;  %v8372_v43 = vadd.f32 %v8328_v16, %v8086_v18 }
0x290d   : > { %11804 = vmatmul.msk.bf16.gmra.mxu2 %vm1927_vm1, %v9733_v39  ;;  %v9192_v22 = vsel %vm1927_vm1, %v9128_v48, 0.0  ;;  %v9632_v7 = vmul.f32 %v9393_v54, %v14207_v34 }
0x290e   : > { %v9397_v49 = vmul.f32 0.5, %v9396_v26  ;;  %v9179_v8 = vpop.xlane.xlu0 %9178  ;;  %v9005_v53 = vpop.xlane.xlu1 %9004  ;;  %9193 = vadd.xlane.f32.xlu1 %v9192_v22  ;;  %v9021_v26 = vsel %vm1927_vm1, %v14464_v12, 0.0 }
0x290f   : > { %v9251_v36 = vmul.f32 %v9179_v8, %v12959_v19  ;;  %v9065_v59 = vmul.f32 %v9005_v53, %v12959_v19  ;;  %v9667_v50 = vmul.f32 %v14227_v44, %v9632_v7  ;;  %v8333_v8 = vpop.f32.mrf.mxu0 }
0x2910   : > { %v9398_v2 = vsub.f32 1.5, %v9397_v49  ;;  %v8087_v49 = vadd.f32 %v14373_v10, %v14019_v63 }
0x2911   : > { %v14461_v3 = vpop.eup %12426  ;;  %v14467_v6 = vadd.f32 1e-05, %v9251_v36  ;;  %v14470_v17 = vsub.f32 %v14282_v15, %v9065_v59  ;;  %v8657_v15 = vadd.f32 %v14410_v28, %v8372_v43  ;;  %v9702_v7 = vadd.f32 %v14242_v32, %v9667_v50 }
0x2912   : > { %v9399_v40 = vmul.f32 %v12425_v55, %v9398_v2  ;;  %v9405_v47 = vmul.f32 %v14461_v3, %v14427_v21  ;;  %vm9411_vm14 = vweird.f32 %v14461_v3 }
0x2913   : > { %12428 = vrsqrt.f32 %v14467_v6  ;;  %v9129_v34 = vmul.f32 %v14470_v17, %v14470_v17  ;;  %v14496_v53 = vadd.f32 %v14425_v5, %v8657_v15  ;;  %vm14512_vm0 = vmor %vm9410_vm7, %vm9411_vm14  ;;  %vm9420_vm3 = vweird.f32 %v14467_v6 }
0x2914   : > { %v9403_v25 = vsel %vm9402_vm13, %v12425_v55, %v9399_v40  ;;  %v9406_v16 = vmul.f32 %v14461_v3, %v9405_v47  ;;  %v8373_v40 = vadd.f32 %v8330_v61, %v8087_v49  ;;  %v8618_v47 = vpop.f32.mrf.mxu3 }
0x2915   : > { %v9633_v13 = vmul.f32 %v9403_v25, %v14233_v52  ;;  %v9815_v39 = vpop.f32.mrf.mxu2  ;;  %v9195_v48 = vsel %vm1927_vm1, %v9129_v34, 0.0  ;;  %v8903_v25 = vpop.f32.mrf.mxu1 }
0x2916   : > { %v9407_v38 = vmul.f32 0.5, %v9406_v16  ;;  %9895 = vst.msk [vmem:[%s14477_s1] sm:$0xff] %vm2867_vm8, %v9815_v39  ;;  %v9182_v22 = vpop.xlane.xlu0 %9181  ;;  %v9008_v54 = vpop.xlane.xlu1 %9007  ;;  %9196 = vadd.xlane.f32.xlu0 %v9195_v48  ;;  %9022 = vadd.xlane.f32.xlu1 %v9021_v26  ;;  %v8658_v5 = vadd.f32 %v8615_v42, %v8373_v40  ;;  %v9024_v39 = vsel %vm1927_vm1, %v14496_v53, 0.0 }
0x2917   : > { %v9252_v28 = vmul.f32 %v9182_v22, %v12959_v19  ;;  %v9066_v55 = vmul.f32 %v9008_v54, %v12959_v19  ;;  %v9668_v52 = vmul.f32 %v14227_v44, %v9633_v13 }
0x2918   : > { %v9408_v36 = vsub.f32 1.5, %v9407_v38  ;;  %v14527_v22 = vadd.f32 %v8900_v4, %v8658_v5 }
0x2919   : > { %v12429_v59 = vpop.eup %12428  ;;  %v14498_v18 = vadd.f32 1e-05, %v9252_v28  ;;  %v14501_v2 = vsub.f32 %v14310_v56, %v9066_v55  ;;  %v9703_v43 = vadd.f32 %v14242_v32, %v9668_v52 }
0x291a   : > { %v9409_v34 = vmul.f32 %v14461_v3, %v9408_v36  ;;  %v9415_v63 = vmul.f32 %v12429_v59, %v14467_v6  ;;  %vm9421_vm2 = vweird.f32 %v12429_v59  ;;  %v8335_v36 = vpop.f32.mrf.mxu0  ;;  %v9027_v40 = vsel %vm1927_vm1, %v14527_v22, 0.0 }
0x291b   : > { %12430 = vrsqrt.f32 %v14498_v18  ;;  %v9734_v10 = vpack.c.bf16 %v9703_v43, %v9702_v7  ;;  %v9130_v56 = vmul.f32 %v14501_v2, %v14501_v2  ;;  %vm9422_vm4 = vmor %vm9420_vm3, %vm9421_vm2  ;;  %vm9430_vm6 = vweird.f32 %v14498_v18 }
0x291c   : > { %v9416_v15 = vmul.f32 %v12429_v59, %v9415_v63  ;;  %v9413_v42 = vsel %vm14512_vm0, %v14461_v3, %v9409_v34  ;;  %v8088_v3 = vadd.f32 %v14377_v14, %v14024_v33 }
0x291d   : > { %v9817_v16 = vpop.f32.mrf.mxu2  ;;  %11805 = vmatmul.msk.bf16.gmra.mxu2 %vm1927_vm1, %v9734_v10  ;;  %v9198_v13 = vsel %vm1927_vm1, %v9130_v56, 0.0  ;;  %v9634_v55 = vmul.f32 %v9413_v42, %v14260_v20  ;;  %v8620_v20 = vpop.f32.mrf.mxu3 }
0x291e   : > { %v9417_v48 = vmul.f32 0.5, %v9416_v15  ;;  %9896 = vst.msk [vmem:[%s14477_s1 + $0x8] sm:$0xff] %vm2867_vm8, %v9817_v16  ;;  %v9185_v21 = vpop.xlane.xlu2 %9184  ;;  %v9011_v26 = vpop.xlane.xlu0 %9010  ;;  %9199 = vadd.xlane.f32.xlu0 %v9198_v13  ;;  %9025 = vadd.xlane.f32.xlu1 %v9024_v39  ;;  %v8374_v43 = vadd.f32 %v8333_v8, %v8088_v3 }
0x291f   : > { %v9253_v50 = vmul.f32 %v9185_v21, %v12959_v19  ;;  %v9067_v38 = vmul.f32 %v9011_v26, %v12959_v19  ;;  %v9669_v8 = vmul.f32 %v14227_v44, %v9634_v55 }
0x2920   : > { %v9418_v54 = vsub.f32 1.5, %v9417_v48  ;;  %v8659_v34 = vadd.f32 %v8618_v47, %v8374_v43  ;;  %v8905_v47 = vpop.f32.mrf.mxu1 }
0x2921   : > { %v14529_v28 = vpop.eup %12430  ;;  %v14534_v52 = vadd.f32 1e-05, %v9253_v50  ;;  %v14537_v49 = vsub.f32 %v14329_v0, %v9067_v38  ;;  %v9704_v48 = vadd.f32 %v14242_v32, %v9669_v8 }
0x2922   : > { %v9419_v7 = vmul.f32 %v12429_v59, %v9418_v54  ;;  %v9425_v4 = vmul.f32 %v14529_v28, %v14498_v18  ;;  %v14559_v39 = vadd.f32 %v8903_v25, %v8659_v34  ;;  %vm9431_vm5 = vweird.f32 %v14529_v28  ;;  %v8338_v38 = vpop.f32.mrf.mxu0 }
0x2923   : > { %12432 = vrsqrt.f32 %v14534_v52  ;;  %v9131_v33 = vmul.f32 %v14537_v49, %v14537_v49  ;;  %vm14572_vm9 = vmor %vm9430_vm6, %vm9431_vm5  ;;  %vm9440_vm11 = vweird.f32 %v14534_v52 }
0x2924   : > { %v9423_v14 = vsel %vm9422_vm4, %v12429_v59, %v9419_v7  ;;  %v9426_v0 = vmul.f32 %v14529_v28, %v9425_v4  ;;  %v9030_v7 = vsel %vm1927_vm1, %v14559_v39, 0.0 }
0x2925   : > { %v9635_v6 = vmul.f32 %v9423_v14, %v14291_v27  ;;  %v9820_v63 = vpop.f32.mrf.mxu2  ;;  %v9201_v10 = vsel %vm1927_vm1, %v9131_v33, 0.0  ;;  %v8089_v27 = vadd.f32 %v14379_v58, %v14028_v9  ;;  %v8623_v4 = vpop.f32.mrf.mxu3 }
0x2926   : > { %v9427_v56 = vmul.f32 0.5, %v9426_v0  ;;  %9897 = vst.msk [vmem:[%s14477_s1 + $0x10] sm:$0xff] %vm2867_vm8, %v9820_v63  ;;  %v14553_v5 = vpop.xlane.xlu2 %9187  ;;  %v9014_v15 = vpop.xlane.xlu0 %9013  ;;  %9202 = vadd.xlane.f32.xlu2 %v9201_v10  ;;  %9028 = vadd.xlane.f32.xlu0 %v9027_v40  ;;  %v8090_v40 = vadd.f32 %v14381_v37, %v14033_v51 }
0x2927   : > { %v9068_v59 = vmul.f32 %v9014_v15, %v12959_v19  ;;  %v9670_v61 = vmul.f32 %v14227_v44, %v9635_v6  ;;  %v8375_v26 = vadd.f32 %v8335_v36, %v8089_v27 }
0x2928   : > { %v9428_v16 = vsub.f32 1.5, %v9427_v56  ;;  %v8908_v6 = vpop.f32.mrf.mxu1  ;;  %v8376_v10 = vadd.f32 %v8338_v38, %v8090_v40 }
0x2929   : > { %v12433_v13 = vpop.eup %12432  ;;  %v14562_v42 = vsub.f32 %v14347_v41, %v9068_v59  ;;  %v9705_v21 = vadd.f32 %v14242_v32, %v9670_v61  ;;  %v8660_v54 = vadd.f32 %v8620_v20, %v8375_v26 }
0x292a   : > { %v9429_v50 = vmul.f32 %v14529_v28, %v9428_v16  ;;  %v9435_v9 = vmul.f32 %v12433_v13, %v14534_v52  ;;  %vm9441_vm10 = vweird.f32 %v12433_v13  ;;  %v8661_v51 = vadd.f32 %v8623_v4, %v8376_v10  ;;  %v8340_v61 = vpop.f32.mrf.mxu0 }
0x292b   : > { %v9735_v58 = vpack.c.bf16 %v9705_v21, %v9704_v48  ;;  %v9132_v25 = vmul.f32 %v14562_v42, %v14562_v42  ;;  %v14586_v14 = vadd.f32 %v8905_v47, %v8660_v54  ;;  %vm9442_vm12 = vmor %vm9440_vm11, %vm9441_vm10  ;;  %v8091_v16 = vadd.f32 %v14385_v46, %v14036_v35 }
0x292c   : > { %v9436_v41 = vmul.f32 %v12433_v13, %v9435_v9  ;;  %v9433_v43 = vsel %vm14572_vm9, %v14529_v28, %v9429_v50  ;;  %v8092_v46 = vadd.f32 %v14404_v31, %v14040_v24 }
0x292d   : > { %v9822_v55 = vpop.f32.mrf.mxu2  ;;  %11806 = vmatmul.msk.bf16.gmra.mxu2 %vm1927_vm1, %v9735_v58  ;;  %v9204_v36 = vsel %vm1927_vm1, %v9132_v25, 0.0  ;;  %v9636_v34 = vmul.f32 %v9433_v43, %v14313_v30  ;;  %v9033_v15 = vsel %vm1927_vm1, %v14586_v14, 0.0  ;;  %v8377_v50 = vadd.f32 %v8340_v61, %v8091_v16 }
0x292e   : > { %v9437_v33 = vmul.f32 0.5, %v9436_v41  ;;  %9898 = vst.msk [vmem:[%s14477_s1 + $0x18] sm:$0xff] %vm2867_vm8, %v9822_v55  ;;  %v9017_v18 = vpop.xlane.xlu2 %9016  ;;  %9205 = vadd.xlane.f32.xlu2 %v9204_v36  ;;  %9031 = vadd.xlane.f32.xlu0 %v9030_v7 }
0x292f   : > { %v9069_v20 = vmul.f32 %v9017_v18, %v12959_v19  ;;  %v9671_v59 = vmul.f32 %v14227_v44, %v9636_v34 }
0x2930   : > { %v9438_v0 = vsub.f32 1.5, %v9437_v33  ;;  %v9254_v33 = vmul.f32 %v14553_v5, %v12959_v19 }
0x2931   : > { %v14592_v28 = vsub.f32 %v14361_v29, %v9069_v20  ;;  %v9706_v21 = vadd.f32 %v14242_v32, %v9671_v59 }
0x2932   : > { %v9439_v63 = vmul.f32 %v12433_v13, %v9438_v0  ;;  %v9286_v24 = vadd.f32 1e-05, %v9254_v33 }
0x2933   : > { %v9133_v8 = vmul.f32 %v14592_v28, %v14592_v28 }
0x2934   : > { %v9443_v56 = vsel %vm9442_vm12, %v12433_v13, %v9439_v63  ;;  %v14608_v13 = vadd.f32 %v8908_v6, %v8661_v51  ;;  %12434 = vrsqrt.f32 %v9286_v24  ;;  %vm9450_vm13 = vweird.f32 %v9286_v24 }
0x2935   : > { %v9637_v30 = vmul.f32 %v9443_v56, %v14334_v1  ;;  %v9825_v37 = vpop.f32.mrf.mxu2  ;;  %v9207_v29 = vsel %vm1927_vm1, %v9133_v8, 0.0  ;;  %v8625_v1 = vpop.f32.mrf.mxu3 }
0x2936   : > { %9899 = vst.msk [vmem:[%s14477_s1 + $0x20] sm:$0xff] %vm2867_vm8, %v9825_v37  ;;  %v9020_v52 = vpop.xlane.xlu2 %9019  ;;  %9208 = vadd.xlane.f32.xlu1 %v9207_v29  ;;  %9034 = vadd.xlane.f32.xlu2 %v9033_v15  ;;  %v8662_v25 = vadd.f32 %v8625_v1, %v8377_v50 }
0x2937   : > { %v9070_v27 = vmul.f32 %v9020_v52, %v12959_v19  ;;  %v9672_v47 = vmul.f32 %v14227_v44, %v9637_v30  ;;  %v8910_v44 = vpop.f32.mrf.mxu1 }
0x2938   : > { %v14625_v54 = vadd.f32 %v8910_v44, %v8662_v25 }
0x2939   : > { %v14611_v48 = vsub.f32 %v14367_v23, %v9070_v27  ;;  %v9707_v26 = vadd.f32 %v14242_v32, %v9672_v47  ;;  %v9036_v23 = vsel %vm1927_vm1, %v14608_v13, 0.0  ;;  %v8343_v32 = vpop.f32.mrf.mxu0 }
0x293a   : > { %v8378_v3 = vadd.f32 %v8343_v32, %v8092_v46  ;;  %v9039_v36 = vsel %vm1927_vm1, %v14625_v54, 0.0  ;;  %v12435_v31 = vpop.eup %12434 }
0x293b   : > { %v9736_v9 = vpack.c.bf16 %v9707_v26, %v9706_v21  ;;  %v9134_v58 = vmul.f32 %v14611_v48, %v14611_v48  ;;  %v9445_v18 = vmul.f32 %v12435_v31, %v9286_v24  ;;  %vm9451_vm15 = vweird.f32 %v12435_v31 }
0x293c   : > { %vm9452_vm14 = vmor %vm9450_vm13, %vm9451_vm15 }
0x293d   : > { %v9827_v38 = vpop.f32.mrf.mxu2  ;;  %11807 = vmatmul.msk.bf16.gmra.mxu2 %vm1927_vm1, %v9736_v9  ;;  %v9210_v35 = vsel %vm1927_vm1, %v9134_v58, 0.0  ;;  %v8628_v41 = vpop.f32.mrf.mxu3  ;;  %v9446_v20 = vmul.f32 %v12435_v31, %v9445_v18  ;;  %v14671_v18 = vld [vmem:[%s15012_s23] ss:$0 sm:$0xff] }
0x293e   : > { %9900 = vst.msk [vmem:[%s14477_s1 + $0x28] sm:$0xff] %vm2867_vm8, %v9827_v38  ;;  %9211 = vadd.xlane.f32.xlu1 %v9210_v35  ;;  %9037 = vadd.xlane.f32.xlu2 %v9036_v23  ;;  %v8663_v55 = vadd.f32 %v8628_v41, %v8378_v3 }
0x293f   : > { %v8913_v7 = vpop.f32.mrf.mxu1  ;;  %v9447_v6 = vmul.f32 0.5, %v9446_v20 }
0x2940   : > { %v14629_v4 = vadd.f32 %v8913_v7, %v8663_v55 }
0x2941   : > { %v9448_v63 = vsub.f32 1.5, %v9447_v6  ;;  %v8345_v7 = vpop.f32.mrf.mxu0 }
0x2942   : > { %v9042_v43 = vsel %vm1927_vm1, %v14629_v4, 0.0 }
0x2943   : > { %v9449_v51 = vmul.f32 %v12435_v31, %v9448_v63 }
0x2945   : > { %v9453_v37 = vsel %vm9452_vm14, %v12435_v31, %v9449_v51 }
0x2946   : > { %9040 = vadd.xlane.f32.xlu1 %v9039_v36  ;;  %v9638_v1 = vmul.f32 %v9453_v37, %v14350_v57  ;;  %v8093_v36 = vadd.f32 %v14445_v45, %v14043_v60 }
0x2948   : > { %v8379_v45 = vadd.f32 %v8345_v7, %v8093_v36 }
0x294e   : > { %9043 = vadd.xlane.f32.xlu1 %v9042_v43 }
0x2979   : > { %v9191_v0 = vpop.xlane.xlu1 %9190 }
0x297a   : > { %v9255_v40 = vmul.f32 %v9191_v0, %v12959_v19 }
0x297c   : > { %v9287_v34 = vadd.f32 1e-05, %v9255_v40  ;;  %v8630_v40 = vpop.f32.mrf.mxu3 }
0x297e   : > { %12436 = vrsqrt.f32 %v9287_v34  ;;  %vm9460_vm0 = vweird.f32 %v9287_v34 }
0x2981   : > { %v9194_v10 = vpop.xlane.xlu1 %9193 }
0x2982   : > { %v9256_v8 = vmul.f32 %v9194_v10, %v12959_v19  ;;  %v8664_v10 = vadd.f32 %v8630_v40, %v8379_v45 }
0x2984   : > { %v12437_v56 = vpop.eup %12436  ;;  %v9288_v15 = vadd.f32 1e-05, %v9256_v8  ;;  %v8915_v8 = vpop.f32.mrf.mxu1 }
0x2985   : > { %v9455_v5 = vmul.f32 %v12437_v56, %v9287_v34  ;;  %vm9461_vm7 = vweird.f32 %v12437_v56 }
0x2986   : > { %12438 = vrsqrt.f32 %v9288_v15  ;;  %vm9462_vm2 = vmor %vm9460_vm0, %vm9461_vm7  ;;  %vm9470_vm4 = vweird.f32 %v9288_v15 }
0x2987   : > { %v9456_v30 = vmul.f32 %v12437_v56, %v9455_v5 }
0x2989   : > { %v9457_v29 = vmul.f32 0.5, %v9456_v30  ;;  %v9197_v59 = vpop.xlane.xlu0 %9196  ;;  %v9023_v61 = vpop.xlane.xlu1 %9022 }
0x298a   : > { %v9257_v52 = vmul.f32 %v9197_v59, %v12959_v19  ;;  %v9071_v27 = vmul.f32 %v9023_v61, %v12959_v19 }
0x298b   : > { %v9458_v47 = vsub.f32 1.5, %v9457_v29 }
0x298c   : > { %v14639_v16 = vpop.eup %12438  ;;  %v14642_v21 = vadd.f32 1e-05, %v9257_v52  ;;  %v14645_v26 = vsub.f32 %v14464_v12, %v9071_v27  ;;  %v14655_v12 = vld [vmem:[%s15009_s6] ss:$0 sm:$0xff] }
0x298d   : > { %v9459_v50 = vmul.f32 %v12437_v56, %v9458_v47  ;;  %v9465_v9 = vmul.f32 %v14639_v16, %v9288_v15  ;;  %v9673_v23 = vmul.f32 %v14655_v12, %v9638_v1  ;;  %vm9471_vm3 = vweird.f32 %v14639_v16 }
0x298e   : > { %12440 = vrsqrt.f32 %v14642_v21  ;;  %v9135_v58 = vmul.f32 %v14645_v26, %v14645_v26  ;;  %vm14681_vm5 = vmor %vm9470_vm4, %vm9471_vm3  ;;  %v14694_v47 = vadd.f32 %v8915_v8, %v8664_v10  ;;  %vm9480_vm9 = vweird.f32 %v14642_v21 }
0x298f   : > { %v9463_v44 = vsel %vm9462_vm2, %v12437_v56, %v9459_v50  ;;  %v9466_v25 = vmul.f32 %v14639_v16, %v9465_v9  ;;  %v9708_v20 = vadd.f32 %v14671_v18, %v9673_v23 }
0x2990   : > { %v9639_v57 = vmul.f32 %v9463_v44, %v14400_v11  ;;  %v9830_v38 = vpop.f32.mrf.mxu2  ;;  %v9213_v35 = vsel %vm1927_vm1, %v9135_v58, 0.0 }
0x2991   : > { %v9467_v32 = vmul.f32 0.5, %v9466_v25  ;;  %9901 = vst.msk [vmem:[%s14477_s1 + $0x30] sm:$0xff] %vm2867_vm8, %v9830_v38  ;;  %v9200_v46 = vpop.xlane.xlu0 %9199  ;;  %v9026_v41 = vpop.xlane.xlu1 %9025  ;;  %9214 = vadd.xlane.f32.xlu0 %v9213_v35 }
0x2992   : > { %v9258_v3 = vmul.f32 %v9200_v46, %v12959_v19  ;;  %v9072_v55 = vmul.f32 %v9026_v41, %v12959_v19  ;;  %v9674_v11 = vmul.f32 %v14655_v12, %v9639_v57 }
0x2993   : > { %v9468_v43 = vsub.f32 1.5, %v9467_v32 }
0x2994   : > { %v12441_v33 = vpop.eup %12440  ;;  %v14665_v24 = vadd.f32 1e-05, %v9258_v3  ;;  %v14668_v31 = vsub.f32 %v14496_v53, %v9072_v55  ;;  %v9709_v0 = vadd.f32 %v14671_v18, %v9674_v11 }
0x2995   : > { %v9469_v34 = vmul.f32 %v14639_v16, %v9468_v43  ;;  %v9475_v60 = vmul.f32 %v12441_v33, %v14642_v21  ;;  %vm9481_vm6 = vweird.f32 %v12441_v33 }
0x2996   : > { %12442 = vrsqrt.f32 %v14665_v24  ;;  %v9737_v6 = vpack.c.bf16 %v9709_v0, %v9708_v20  ;;  %v9136_v53 = vmul.f32 %v14668_v31, %v14668_v31  ;;  %vm9482_vm10 = vmor %vm9480_vm9, %vm9481_vm6  ;;  %vm9490_vm12 = vweird.f32 %v14665_v24 }
0x2997   : > { %v9476_v63 = vmul.f32 %v12441_v33, %v9475_v60  ;;  %v9473_v30 = vsel %vm14681_vm5, %v14639_v16, %v9469_v34 }
0x2998   : > { %v9832_v51 = vpop.f32.mrf.mxu2  ;;  %11808 = vmatmul.msk.bf16.gmra.mxu2 %vm1927_vm1, %v9737_v6  ;;  %v9216_v5 = vsel %vm1927_vm1, %v9136_v53, 0.0  ;;  %v9640_v1 = vmul.f32 %v9473_v30, %v14430_v62 }
0x2999   : > { %v9477_v37 = vmul.f32 0.5, %v9476_v63  ;;  %9902 = vst.msk [vmem:[%s14477_s1 + $0x38] sm:$0xff] %vm2867_vm8, %v9832_v51  ;;  %v9203_v15 = vpop.xlane.xlu2 %9202  ;;  %v9029_v29 = vpop.xlane.xlu0 %9028  ;;  %9217 = vadd.xlane.f32.xlu0 %v9216_v5 }
0x299a   : > { %v9259_v59 = vmul.f32 %v9203_v15, %v12959_v19  ;;  %v9073_v61 = vmul.f32 %v9029_v29, %v12959_v19  ;;  %v9675_v23 = vmul.f32 %v14655_v12, %v9640_v1 }
0x299b   : > { %v9478_v52 = vsub.f32 1.5, %v9477_v37 }
0x299c   : > { %v12443_v27 = vpop.eup %12442  ;;  %v9291_v50 = vadd.f32 1e-05, %v9259_v59  ;;  %v14698_v16 = vsub.f32 %v14527_v22, %v9073_v61  ;;  %v9045_v22 = vsel %vm1927_vm1, %v14694_v47, 0.0  ;;  %v9710_v43 = vadd.f32 %v14671_v18, %v9675_v23 }
0x299d   : > { %v9479_v9 = vmul.f32 %v12441_v33, %v9478_v52  ;;  %v9485_v58 = vmul.f32 %v12443_v27, %v14665_v24  ;;  %vm9491_vm11 = vweird.f32 %v12443_v27 }
0x299e   : > { %12444 = vrsqrt.f32 %v9291_v50  ;;  %v9137_v44 = vmul.f32 %v14698_v16, %v14698_v16  ;;  %vm9492_vm15 = vmor %vm9490_vm12, %vm9491_vm11  ;;  %vm9500_vm14 = vweird.f32 %v9291_v50 }
0x299f   : > { %v9483_v25 = vsel %vm9482_vm10, %v12441_v33, %v9479_v9  ;;  %v9486_v57 = vmul.f32 %v12443_v27, %v9485_v58 }
0x29a0   : > { %v9641_v38 = vmul.f32 %v9483_v25, %v14470_v17  ;;  %v9835_v62 = vpop.f32.mrf.mxu2  ;;  %v9219_v35 = vsel %vm1927_vm1, %v9137_v44, 0.0 }
0x29a1   : > { %v9487_v21 = vmul.f32 0.5, %v9486_v57  ;;  %9903 = vst.msk [vmem:[%s14477_s1 + $0x40] sm:$0xff] %vm2867_vm8, %v9835_v62  ;;  %v9206_v32 = vpop.xlane.xlu2 %9205  ;;  %v9032_v46 = vpop.xlane.xlu0 %9031  ;;  %9220 = vadd.xlane.f32.xlu2 %v9219_v35  ;;  %9046 = vadd.xlane.f32.xlu0 %v9045_v22 }
0x29a2   : > { %v9260_v41 = vmul.f32 %v9206_v32, %v12959_v19  ;;  %v9074_v3 = vmul.f32 %v9032_v46, %v12959_v19  ;;  %v9676_v17 = vmul.f32 %v14655_v12, %v9641_v38 }
0x29a3   : > { %v9488_v55 = vsub.f32 1.5, %v9487_v21 }
0x29a4   : > { %v12445_v11 = vpop.eup %12444  ;;  %v9292_v36 = vadd.f32 1e-05, %v9260_v41  ;;  %v14715_v7 = vsub.f32 %v14559_v39, %v9074_v3  ;;  %v9711_v33 = vadd.f32 %v14671_v18, %v9676_v17 }
0x29a5   : > { %v9489_v20 = vmul.f32 %v12443_v27, %v9488_v55  ;;  %v9495_v0 = vmul.f32 %v12445_v11, %v9291_v50  ;;  %vm9501_vm13 = vweird.f32 %v12445_v11 }
0x29a6   : > { %12446 = vrsqrt.f32 %v9292_v36  ;;  %v9738_v40 = vpack.c.bf16 %v9711_v33, %v9710_v43  ;;  %v9138_v34 = vmul.f32 %v14715_v7, %v14715_v7  ;;  %vm9502_vm7 = vmor %vm9500_vm14, %vm9501_vm13  ;;  %vm9510_vm2 = vweird.f32 %v9292_v36 }
0x29a7   : > { %v9496_v60 = vmul.f32 %v12445_v11, %v9495_v0  ;;  %v9493_v6 = vsel %vm9492_vm15, %v12443_v27, %v9489_v20 }
0x29a8   : > { %v9837_v45 = vpop.f32.mrf.mxu2  ;;  %11809 = vmatmul.msk.bf16.gmra.mxu2 %vm1927_vm1, %v9738_v40  ;;  %v9222_v39 = vsel %vm1927_vm1, %v9138_v34, 0.0  ;;  %v9642_v5 = vmul.f32 %v9493_v6, %v14501_v2 }
0x29a9   : > { %v9497_v53 = vmul.f32 0.5, %v9496_v60  ;;  %9904 = vst.msk [vmem:[%s14477_s1 + $0x48] sm:$0xff] %vm2867_vm8, %v9837_v45  ;;  %v9209_v63 = vpop.xlane.xlu1 %9208  ;;  %v9035_v10 = vpop.xlane.xlu2 %9034  ;;  %9223 = vadd.xlane.f32.xlu2 %v9222_v39 }
0x29aa   : > { %v9261_v8 = vmul.f32 %v9209_v63, %v12959_v19  ;;  %v9075_v56 = vmul.f32 %v9035_v10, %v12959_v19  ;;  %v9677_v9 = vmul.f32 %v14655_v12, %v9642_v5 }
0x29ab   : > { %v9498_v51 = vsub.f32 1.5, %v9497_v53 }
0x29ac   : > { %v12447_v24 = vpop.eup %12446  ;;  %v9293_v30 = vadd.f32 1e-05, %v9261_v8  ;;  %v14730_v37 = vsub.f32 %v14586_v14, %v9075_v56 }
0x29ad   : > { %v9499_v15 = vmul.f32 %v12445_v11, %v9498_v51  ;;  %v9505_v29 = vmul.f32 %v12447_v24, %v9292_v36  ;;  %vm9511_vm0 = vweird.f32 %v12447_v24 }
0x29ae   : > { %12448 = vrsqrt.f32 %v9293_v30  ;;  %v9139_v59 = vmul.f32 %v14730_v37, %v14730_v37  ;;  %vm9512_vm3 = vmor %vm9510_vm2, %vm9511_vm0  ;;  %vm9520_vm5 = vweird.f32 %v9293_v30 }
0x29af   : > { %v9503_v61 = vsel %vm9502_vm7, %v12445_v11, %v9499_v15  ;;  %v9506_v52 = vmul.f32 %v12447_v24, %v9505_v29 }
0x29b0   : > { %v9643_v27 = vmul.f32 %v9503_v61, %v14537_v49  ;;  %v9840_v1 = vpop.f32.mrf.mxu2  ;;  %v9225_v2 = vsel %vm1927_vm1, %v9139_v59, 0.0  ;;  %v9712_v49 = vadd.f32 %v14671_v18, %v9677_v9 }
0x29b1   : > { %v9507_v58 = vmul.f32 0.5, %v9506_v52  ;;  %9905 = vst.msk [vmem:[%s14477_s1 + $0x50] sm:$0xff] %vm2867_vm8, %v9840_v1  ;;  %v9212_v14 = vpop.xlane.xlu1 %9211  ;;  %v9038_v50 = vpop.xlane.xlu2 %9037  ;;  %9226 = vadd.xlane.f32.xlu1 %v9225_v2 }
0x29b2   : > { %v9076_v44 = vmul.f32 %v9038_v50, %v12959_v19  ;;  %v9678_v25 = vmul.f32 %v14655_v12, %v9643_v27 }
0x29b3   : > { %v9508_v57 = vsub.f32 1.5, %v9507_v58 }
0x29b4   : > { %v12449_v38 = vpop.eup %12448  ;;  %v14742_v62 = vsub.f32 %v14608_v13, %v9076_v44  ;;  %v9713_v35 = vadd.f32 %v14671_v18, %v9678_v25 }
0x29b5   : > { %v9509_v22 = vmul.f32 %v12447_v24, %v9508_v57  ;;  %v9515_v23 = vmul.f32 %v12449_v38, %v9293_v30  ;;  %vm9521_vm4 = vweird.f32 %v12449_v38 }
0x29b6   : > { %v9739_v21 = vpack.c.bf16 %v9713_v35, %v9712_v49  ;;  %v9140_v32 = vmul.f32 %v14742_v62, %v14742_v62  ;;  %vm9522_vm6 = vmor %vm9520_vm5, %vm9521_vm4 }
0x29b7   : > { %v9516_v46 = vmul.f32 %v12449_v38, %v9515_v23  ;;  %v9513_v3 = vsel %vm9512_vm3, %v12447_v24, %v9509_v22  ;;  %v9262_v24 = vmul.f32 %v9212_v14, %v12959_v19 }
0x29b8   : > { %v9842_v41 = vpop.f32.mrf.mxu2  ;;  %11810 = vmatmul.msk.bf16.gmra.mxu2 %vm1927_vm1, %v9739_v21  ;;  %v9228_v13 = vsel %vm1927_vm1, %v9140_v32, 0.0  ;;  %v9644_v36 = vmul.f32 %v9513_v3, %v14562_v42 }
0x29b9   : > { %v9517_v17 = vmul.f32 0.5, %v9516_v46  ;;  %9906 = vst.msk [vmem:[%s14477_s1 + $0x58] sm:$0xff] %vm2867_vm8, %v9842_v41  ;;  %v9041_v55 = vpop.xlane.xlu1 %9040  ;;  %9229 = vadd.xlane.f32.xlu0 %v9228_v13 }
0x29ba   : > { %v9077_v11 = vmul.f32 %v9041_v55, %v12959_v19  ;;  %v9679_v39 = vmul.f32 %v14655_v12, %v9644_v36 }
0x29bb   : > { %v9518_v43 = vsub.f32 1.5, %v9517_v17 }
0x29bc   : > { %v14755_v33 = vsub.f32 %v14625_v54, %v9077_v11  ;;  %v9714_v63 = vadd.f32 %v14671_v18, %v9679_v39 }
0x29bd   : > { %v9519_v20 = vmul.f32 %v12449_v38, %v9518_v43 }
0x29be   : > { %v9141_v0 = vmul.f32 %v14755_v33, %v14755_v33 }
0x29bf   : > { %v9523_v40 = vsel %vm9522_vm6, %v12449_v38, %v9519_v20 }
0x29c0   : > { %v9645_v34 = vmul.f32 %v9523_v40, %v14592_v28  ;;  %v9845_v60 = vpop.f32.mrf.mxu2  ;;  %v9231_v45 = vsel %vm1927_vm1, %v9141_v0, 0.0 }
0x29c1   : > { %9907 = vst.msk [vmem:[%s14477_s1 + $0x60] sm:$0xff] %vm2867_vm8, %v9845_v60  ;;  %9232 = vadd.xlane.f32.xlu2 %v9231_v45  ;;  %v9044_v42 = vpop.xlane.xlu1 %9043 }
0x29c2   : > { %v9078_v54 = vmul.f32 %v9044_v42, %v12959_v19  ;;  %v9680_v6 = vmul.f32 %v14655_v12, %v9645_v34 }
0x29c4   : > { %v14767_v53 = vsub.f32 %v14629_v4, %v9078_v54  ;;  %v9715_v28 = vadd.f32 %v14671_v18, %v9680_v6  ;;  %v9294_v4 = vadd.f32 1e-05, %v9262_v24 }
0x29c6   : > { %v9740_v10 = vpack.c.bf16 %v9715_v28, %v9714_v63  ;;  %v9142_v8 = vmul.f32 %v14767_v53, %v14767_v53  ;;  %12450 = vrsqrt.f32 %v9294_v4  ;;  %vm9530_vm10 = vweird.f32 %v9294_v4 }
0x29c8   : > { %v9847_v56 = vpop.f32.mrf.mxu2  ;;  %11811 = vmatmul.msk.bf16.gmra.mxu2 %vm1927_vm1, %v9740_v10  ;;  %v9234_v51 = vsel %vm1927_vm1, %v9142_v8, 0.0 }
0x29c9   : > { %9908 = vst.msk [vmem:[%s14477_s1 + $0x68] sm:$0xff] %vm2867_vm8, %v9847_v56  ;;  %9235 = vadd.xlane.f32.xlu1 %v9234_v51 }
0x29cc   : > { %v12451_v5 = vpop.eup %12450 }
0x29cd   : > { %v9525_v30 = vmul.f32 %v12451_v5, %v9294_v4  ;;  %vm9531_vm9 = vweird.f32 %v12451_v5 }
0x29ce   : > { %vm9532_vm11 = vmor %vm9530_vm10, %vm9531_vm9 }
0x29cf   : > { %v9526_v15 = vmul.f32 %v12451_v5, %v9525_v30 }
0x29d1   : > { %v9527_v52 = vmul.f32 0.5, %v9526_v15 }
0x29d3   : > { %v9528_v27 = vsub.f32 1.5, %v9527_v52 }
0x29d5   : > { %v9529_v50 = vmul.f32 %v12451_v5, %v9528_v27 }
0x29d7   : > { %v9533_v25 = vsel %vm9532_vm11, %v12451_v5, %v9529_v50 }
0x29d8   : > { %v9646_v32 = vmul.f32 %v9533_v25, %v14611_v48 }
0x29da   : > { %v9681_v20 = vmul.f32 %v14655_v12, %v9646_v32 }
0x2a04   : > { %v9215_v29 = vpop.xlane.xlu0 %9214 }
0x2a05   : > { %v9263_v59 = vmul.f32 %v9215_v29, %v12959_v19 }
0x2a07   : > { %v9295_v61 = vadd.f32 1e-05, %v9263_v59 }
0x2a09   : > { %12452 = vrsqrt.f32 %v9295_v61  ;;  %vm9540_vm15 = vweird.f32 %v9295_v61 }
0x2a0c   : > { %v9218_v1 = vpop.xlane.xlu0 %9217 }
0x2a0d   : > { %v9264_v2 = vmul.f32 %v9218_v1, %v12959_v19 }
0x2a0f   : > { %v12453_v9 = vpop.eup %12452  ;;  %v9296_v58 = vadd.f32 1e-05, %v9264_v2 }
0x2a10   : > { %v9535_v14 = vmul.f32 %v12453_v9, %v9295_v61  ;;  %vm9541_vm12 = vweird.f32 %v12453_v9 }
0x2a11   : > { %12454 = vrsqrt.f32 %v9296_v58  ;;  %vm9542_vm13 = vmor %vm9540_vm15, %vm9541_vm12  ;;  %vm9550_vm7 = vweird.f32 %v9296_v58 }
0x2a12   : > { %v9536_v44 = vmul.f32 %v12453_v9, %v9535_v14 }
0x2a14   : > { %v9537_v57 = vmul.f32 0.5, %v9536_v44  ;;  %v9221_v38 = vpop.xlane.xlu2 %9220  ;;  %v9047_v49 = vpop.xlane.xlu0 %9046 }
0x2a15   : > { %v9265_v35 = vmul.f32 %v9221_v38, %v12959_v19  ;;  %v9079_v22 = vmul.f32 %v9047_v49, %v12959_v19 }
0x2a16   : > { %v9538_v23 = vsub.f32 1.5, %v9537_v57 }
0x2a17   : > { %v12455_v21 = vpop.eup %12454  ;;  %v9297_v46 = vadd.f32 1e-05, %v9265_v35  ;;  %v14784_v41 = vsub.f32 %v14694_v47, %v9079_v22 }
0x2a18   : > { %v9539_v13 = vmul.f32 %v12453_v9, %v9538_v23  ;;  %v9545_v3 = vmul.f32 %v12455_v21, %v9296_v58  ;;  %vm9551_vm14 = vweird.f32 %v12455_v21 }
0x2a19   : > { %12456 = vrsqrt.f32 %v9297_v46  ;;  %v9143_v17 = vmul.f32 %v14784_v41, %v14784_v41  ;;  %vm9552_vm0 = vmor %vm9550_vm7, %vm9551_vm14  ;;  %vm9560_vm3 = vweird.f32 %v9297_v46 }
0x2a1a   : > { %v9543_v55 = vsel %vm9542_vm13, %v12453_v9, %v9539_v13  ;;  %v9546_v11 = vmul.f32 %v12455_v21, %v9545_v3 }
0x2a1b   : > { %v9647_v43 = vmul.f32 %v9543_v55, %v14645_v26  ;;  %v9850_v36 = vpop.f32.mrf.mxu2  ;;  %v9237_v48 = vsel %vm1927_vm1, %v9143_v17, 0.0  ;;  %v9716_v26 = vadd.f32 %v14671_v18, %v9681_v20 }
0x2a1c   : > { %v9547_v0 = vmul.f32 0.5, %v9546_v11  ;;  %9909 = vst.msk [vmem:[%s14477_s1 + $0x70] sm:$0xff] %vm2867_vm8, %v9850_v36  ;;  %v9224_v47 = vpop.xlane.xlu2 %9223  ;;  %9238 = vadd.xlane.f32.xlu0 %v9237_v48 }
0x2a1d   : > { %v9266_v40 = vmul.f32 %v9224_v47, %v12959_v19  ;;  %v9682_v34 = vmul.f32 %v14655_v12, %v9647_v43 }
0x2a1e   : > { %v9548_v60 = vsub.f32 1.5, %v9547_v0 }
0x2a1f   : > { %v12457_v45 = vpop.eup %12456  ;;  %v9298_v39 = vadd.f32 1e-05, %v9266_v40  ;;  %v9717_v42 = vadd.f32 %v14671_v18, %v9682_v34 }
0x2a20   : > { %v9549_v54 = vmul.f32 %v12455_v21, %v9548_v60  ;;  %v9555_v6 = vmul.f32 %v12457_v45, %v9297_v46  ;;  %vm9561_vm2 = vweird.f32 %v12457_v45 }
0x2a21   : > { %12458 = vrsqrt.f32 %v9298_v39  ;;  %v9741_v63 = vpack.c.bf16 %v9717_v42, %v9716_v26  ;;  %vm9562_vm4 = vmor %vm9560_vm3, %vm9561_vm2  ;;  %vm9570_vm6 = vweird.f32 %v9298_v39 }
0x2a22   : > { %v9556_v28 = vmul.f32 %v12457_v45, %v9555_v6  ;;  %v9553_v8 = vsel %vm9552_vm0, %v12455_v21, %v9549_v54 }
0x2a23   : > { %v9852_v10 = vpop.f32.mrf.mxu2  ;;  %11812 = vmatmul.msk.bf16.gmra.mxu2 %vm1927_vm1, %v9741_v63  ;;  %v9648_v30 = vmul.f32 %v9553_v8, %v14668_v31 }
0x2a24   : > { %v9557_v56 = vmul.f32 0.5, %v9556_v28  ;;  %9910 = vst.msk [vmem:[%s14477_s1 + $0x78] sm:$0xff] %vm2867_vm8, %v9852_v10  ;;  %v9227_v51 = vpop.xlane.xlu1 %9226 }
0x2a25   : > { %v9267_v24 = vmul.f32 %v9227_v51, %v12959_v19  ;;  %v9683_v2 = vmul.f32 %v14655_v12, %v9648_v30 }
0x2a26   : > { %v9558_v4 = vsub.f32 1.5, %v9557_v56 }
0x2a27   : > { %v12459_v5 = vpop.eup %12458  ;;  %v9299_v15 = vadd.f32 1e-05, %v9267_v24  ;;  %v9718_v57 = vadd.f32 %v14671_v18, %v9683_v2 }
0x2a28   : > { %v9559_v29 = vmul.f32 %v12457_v45, %v9558_v4  ;;  %v9565_v59 = vmul.f32 %v12459_v5, %v9298_v39  ;;  %vm9571_vm5 = vweird.f32 %v12459_v5 }
0x2a29   : > { %12460 = vrsqrt.f32 %v9299_v15  ;;  %vm9572_vm9 = vmor %vm9570_vm6, %vm9571_vm5  ;;  %vm9580_vm11 = vweird.f32 %v9299_v15 }
0x2a2a   : > { %v9563_v61 = vsel %vm9562_vm4, %v12457_v45, %v9559_v29  ;;  %v9566_v52 = vmul.f32 %v12459_v5, %v9565_v59 }
0x2a2b   : > { %v9649_v27 = vmul.f32 %v9563_v61, %v14698_v16  ;;  %v9855_v1 = vpop.f32.mrf.mxu2 }
0x2a2c   : > { %v9567_v9 = vmul.f32 0.5, %v9566_v52  ;;  %9911 = vst.msk [vmem:[%s14477_s1 + $0x80] sm:$0xff] %vm2867_vm8, %v9855_v1  ;;  %v9230_v58 = vpop.xlane.xlu0 %9229 }
0x2a2d   : > { %v9268_v50 = vmul.f32 %v9230_v58, %v12959_v19  ;;  %v9684_v31 = vmul.f32 %v14655_v12, %v9649_v27 }
0x2a2e   : > { %v9568_v14 = vsub.f32 1.5, %v9567_v9 }
0x2a2f   : > { %v12461_v44 = vpop.eup %12460  ;;  %v9300_v25 = vadd.f32 1e-05, %v9268_v50  ;;  %v9719_v38 = vadd.f32 %v14671_v18, %v9684_v31 }
0x2a30   : > { %v9569_v16 = vmul.f32 %v12459_v5, %v9568_v14  ;;  %v9575_v49 = vmul.f32 %v12461_v44, %v9299_v15  ;;  %vm9581_vm10 = vweird.f32 %v12461_v44 }
0x2a31   : > { %12462 = vrsqrt.f32 %v9300_v25  ;;  %v9742_v35 = vpack.c.bf16 %v9719_v38, %v9718_v57  ;;  %vm9582_vm12 = vmor %vm9580_vm11, %vm9581_vm10  ;;  %vm9590_vm13 = vweird.f32 %v9300_v25 }
0x2a32   : > { %v9576_v22 = vmul.f32 %v12461_v44, %v9575_v49  ;;  %v9573_v21 = vsel %vm9572_vm9, %v12459_v5, %v9569_v16 }
0x2a33   : > { %v9857_v23 = vpop.f32.mrf.mxu2  ;;  %11813 = vmatmul.msk.bf16.gmra.mxu2 %vm1927_vm1, %v9742_v35  ;;  %v9650_v55 = vmul.f32 %v9573_v21, %v14715_v7 }
0x2a34   : > { %v9577_v32 = vmul.f32 0.5, %v9576_v22  ;;  %9912 = vst.msk [vmem:[%s14477_s1 + $0x88] sm:$0xff] %vm2867_vm8, %v9857_v23  ;;  %v9233_v46 = vpop.xlane.xlu2 %9232 }
0x2a35   : > { %v9269_v13 = vmul.f32 %v9233_v46, %v12959_v19  ;;  %v9685_v40 = vmul.f32 %v14655_v12, %v9650_v55 }
0x2a36   : > { %v9578_v3 = vsub.f32 1.5, %v9577_v32 }
0x2a37   : > { %v12463_v17 = vpop.eup %12462  ;;  %v9301_v11 = vadd.f32 1e-05, %v9269_v13  ;;  %v9720_v39 = vadd.f32 %v14671_v18, %v9685_v40 }
0x2a38   : > { %v9579_v43 = vmul.f32 %v12461_v44, %v9578_v3  ;;  %v9585_v36 = vmul.f32 %v12463_v17, %v9300_v25  ;;  %vm9591_vm15 = vweird.f32 %v12463_v17 }
0x2a39   : > { %12464 = vrsqrt.f32 %v9301_v11  ;;  %vm9592_vm14 = vmor %vm9590_vm13, %vm9591_vm15  ;;  %vm9600_vm0 = vweird.f32 %v9301_v11 }
0x2a3a   : > { %v9583_v48 = vsel %vm9582_vm12, %v12461_v44, %v9579_v43  ;;  %v9586_v20 = vmul.f32 %v12463_v17, %v9585_v36 }
0x2a3b   : > { %v9651_v0 = vmul.f32 %v9583_v48, %v14730_v37  ;;  %v9860_v47 = vpop.f32.mrf.mxu2 }
0x2a3c   : > { %v9587_v34 = vmul.f32 0.5, %v9586_v20  ;;  %9913 = vst.msk [vmem:[%s14477_s1 + $0x90] sm:$0xff] %vm2867_vm8, %v9860_v47 }
0x2a3d   : > { %v9686_v60 = vmul.f32 %v14655_v12, %v9651_v0 }
0x2a3e   : > { %v9588_v7 = vsub.f32 1.5, %v9587_v34 }
0x2a3f   : > { %v12465_v45 = vpop.eup %12464  ;;  %v9721_v26 = vadd.f32 %v14671_v18, %v9686_v60 }
0x2a40   : > { %v9589_v42 = vmul.f32 %v12463_v17, %v9588_v7  ;;  %v9595_v54 = vmul.f32 %v12465_v45, %v9301_v11  ;;  %vm9601_vm7 = vweird.f32 %v12465_v45 }
0x2a41   : > { %v9743_v6 = vpack.c.bf16 %v9721_v26, %v9720_v39  ;;  %vm9602_vm2 = vmor %vm9600_vm0, %vm9601_vm7 }
0x2a42   : > { %v9596_v37 = vmul.f32 %v12465_v45, %v9595_v54  ;;  %v9593_v28 = vsel %vm9592_vm14, %v12463_v17, %v9589_v42 }
0x2a43   : > { %v9862_v63 = vpop.f32.mrf.mxu2  ;;  %11814 = vmatmul.msk.bf16.gmra.mxu2 %vm1927_vm1, %v9743_v6  ;;  %v9652_v56 = vmul.f32 %v9593_v28, %v14742_v62  ;;  %v9236_v62 = vpop.xlane.xlu1 %9235 }
0x2a44   : > { %v9597_v10 = vmul.f32 0.5, %v9596_v37  ;;  %9914 = vst.msk [vmem:[%s14477_s1 + $0x98] sm:$0xff] %vm2867_vm8, %v9862_v63 }
0x2a45   : > { %v9687_v30 = vmul.f32 %v14655_v12, %v9652_v56 }
0x2a46   : > { %v9598_v8 = vsub.f32 1.5, %v9597_v10 }
0x2a47   : > { %v9722_v29 = vadd.f32 %v14671_v18, %v9687_v30 }
0x2a48   : > { %v9599_v51 = vmul.f32 %v12465_v45, %v9598_v8 }
0x2a4a   : > { %v9603_v24 = vsel %vm9602_vm2, %v12465_v45, %v9599_v51 }
0x2a4b   : > { %v9653_v4 = vmul.f32 %v9603_v24, %v14755_v33  ;;  %v9865_v5 = vpop.f32.mrf.mxu2  ;;  %v9270_v33 = vmul.f32 %v9236_v62, %v12959_v19 }
0x2a4c   : > { %9915 = vst.msk [vmem:[%s14477_s1 + $0xa0] sm:$0xff] %vm2867_vm8, %v9865_v5 }
0x2a4d   : > { %v9688_v15 = vmul.f32 %v14655_v12, %v9653_v4  ;;  %v9302_v27 = vadd.f32 1e-05, %v9270_v33 }
0x2a4f   : > { %v9723_v59 = vadd.f32 %v14671_v18, %v9688_v15  ;;  %12466 = vrsqrt.f32 %v9302_v27  ;;  %vm9610_vm4 = vweird.f32 %v9302_v27 }
0x2a51   : > { %v9744_v61 = vpack.c.bf16 %v9723_v59, %v9722_v29 }
0x2a53   : > { %v9867_v52 = vpop.f32.mrf.mxu2  ;;  %11815 = vmatmul.msk.bf16.gmra.mxu2 %vm1927_vm1, %v9744_v61 }
0x2a54   : > { %9916 = vst.msk [vmem:[%s14477_s1 + $0xa8] sm:$0xff] %vm2867_vm8, %v9867_v52 }
0x2a55   : > { %v12467_v1 = vpop.eup %12466 }
0x2a56   : > { %v9605_v2 = vmul.f32 %v12467_v1, %v9302_v27  ;;  %vm9611_vm3 = vweird.f32 %v12467_v1 }
0x2a57   : > { %vm9612_vm5 = vmor %vm9610_vm4, %vm9611_vm3 }
0x2a58   : > { %v9606_v9 = vmul.f32 %v12467_v1, %v9605_v2 }
0x2a5a   : > { %v9607_v14 = vmul.f32 0.5, %v9606_v9 }
0x2a5c   : > { %v9608_v44 = vsub.f32 1.5, %v9607_v14 }
0x2a5e   : > { %v9609_v57 = vmul.f32 %v12467_v1, %v9608_v44 }
0x2a60   : > { %v9613_v49 = vsel %vm9612_vm5, %v12467_v1, %v9609_v57 }
0x2a61   : > { %v9654_v23 = vmul.f32 %v9613_v49, %v14767_v53 }
0x2a63   : > { %v9689_v13 = vmul.f32 %v14655_v12, %v9654_v23 }
0x2a65   : > { %v9724_v53 = vadd.f32 %v14671_v18, %v9689_v13 }
0x2a8f   : > { %v9239_v58 = vpop.xlane.xlu0 %9238 }
0x2a90   : > { %v9271_v50 = vmul.f32 %v9239_v58, %v12959_v19 }
0x2a92   : > { %v9303_v31 = vadd.f32 1e-05, %v9271_v50 }
0x2a94   : > { %12468 = vrsqrt.f32 %v9303_v31  ;;  %vm9620_vm9 = vweird.f32 %v9303_v31 }
0x2a9a   : > { %v12469_v25 = vpop.eup %12468 }
0x2a9b   : > { %v9615_v38 = vmul.f32 %v12469_v25, %v9303_v31  ;;  %vm9621_vm6 = vweird.f32 %v12469_v25 }
0x2a9c   : > { %vm9622_vm10 = vmor %vm9620_vm9, %vm9621_vm6 }
0x2a9d   : > { %v9616_v16 = vmul.f32 %v12469_v25, %v9615_v38 }
0x2a9f   : > { %v9617_v35 = vmul.f32 0.5, %v9616_v16 }
0x2aa1   : > { %v9618_v22 = vsub.f32 1.5, %v9617_v35 }
0x2aa3   : > { %v9619_v19 = vmul.f32 %v12469_v25, %v9618_v22 }
0x2aa5   : > { %v9623_v21 = vsel %vm9622_vm10, %v12469_v25, %v9619_v19 }
0x2aa6   : > { %v9655_v32 = vmul.f32 %v9623_v21, %v14784_v41  ;;  %v9870_v46 = vpop.f32.mrf.mxu2 }
0x2aa7   : > { %9917 = vst.msk [vmem:[%s14477_s1 + $0xb0] sm:$0xff] %vm2867_vm8, %v9870_v46 }
0x2aa8   : > { %v9690_v3 = vmul.f32 %v14655_v12, %v9655_v32 }
0x2aaa   : > { %v9725_v17 = vadd.f32 %v14671_v18, %v9690_v3 }
0x2aac   : > { %v9745_v55 = vpack.c.bf16 %v9725_v17, %v9724_v53 }
0x2aae   : > { %v9872_v11 = vpop.f32.mrf.mxu2  ;;  %11816 = vmatmul.msk.bf16.gmra.mxu2 %vm1927_vm1, %v9745_v55 }
0x2aaf   : > { %9918 = vst.msk [vmem:[%s14477_s1 + $0xb8] sm:$0xff] %vm2867_vm8, %v9872_v11 }
0x2ab6   : > { %v9875_v41 = vpop.f32.mrf.mxu2 }
0x2ab7   : > { %9919 = vst.msk [vmem:[%s14477_s1 + $0xc0] sm:$0xff] %vm2867_vm8, %v9875_v41 }
0x2abe   : > { %v9877_v43 = vpop.f32.mrf.mxu2 }
0x2abf   : > { %9920 = vst.msk [vmem:[%s14477_s1 + $0xc8] sm:$0xff] %vm2867_vm8, %v9877_v43 }
0x2ac6   : > { %v9880_v12 = vpop.f32.mrf.mxu2 }
0x2ac7   : > { %9921 = vst.msk [vmem:[%s14477_s1 + $0xd0] sm:$0xff] %vm2867_vm8, %v9880_v12 }
0x2ace   : > { %v9882_v36 = vpop.f32.mrf.mxu2 }
0x2acf   : > { %9922 = vst.msk [vmem:[%s14477_s1 + $0xd8] sm:$0xff] %vm2867_vm8, %v9882_v36 }
0x2ad6   : > { %v9885_v18 = vpop.f32.mrf.mxu2 }
0x2ad7   : > { %9923 = vst.msk [vmem:[%s14477_s1 + $0xe0] sm:$0xff] %vm2867_vm8, %v9885_v18 }
0x2ade   : > { %v9887_v48 = vpop.f32.mrf.mxu2 }
0x2adf   : > { %9924 = vst.msk [vmem:[%s14477_s1 + $0xe8] sm:$0xff] %vm2867_vm8, %v9887_v48 }
0x2b31   : > { %v9890_v20 = vpop.f32.mrf.mxu2 }
0x2b32   : > { %9925 = vst.msk [vmem:[%s14477_s1 + $0xf0] sm:$0xff] %vm2867_vm8, %v9890_v20 }
0x2b39   : > { %v9892_v0 = vpop.f32.mrf.mxu2 }
0x2b3a   : > { %9926 = vst.msk [vmem:[%s14477_s1 + $0xf8] sm:$0xff] %vm2867_vm8, %v9892_v0 }
0x2b3b PF: > { %s138_s22 = sadd.s32 1, %s12512_s22  }
0x2b3c   : > { %p135_p2 = scmp.ge.s32.totalorder %s138_s22, 4  }
0x2b3e   :  { %137 = sbr.rel (!%p135_p2) target bundleno = 119 (0x77), region = 396 }
0x2b43   :  { %9949 = vsyncpa [#allocation3], 1 }
0x2b44   :  { %9951 = vsyncpa [#allocation3 + $0x1], 1 }

</bundles_post_ra>
